<compile_context>
chip_gen: v6e
topology: v6e:2x2x1
jax: 0.10.0
libtpu: 0.0.40
codegen_flags: <defaults>
</compile_context>

<pallas_src>
import functools

import jax
import jax.numpy as jnp
from jax.experimental import pallas as pl
from jax.experimental.pallas import tpu as pltpu


# ----------------------------- in-kernel helpers -----------------------------

def _layernorm(x, gamma, beta, eps=1e-5):
    # PyTorch nn.LayerNorm over last dim, biased variance, eps=1e-5. f32 math.
    mean = jnp.mean(x, axis=-1, keepdims=True)
    var = jnp.mean(jnp.square(x - mean), axis=-1, keepdims=True)
    return (x - mean) * jax.lax.rsqrt(var + eps) * gamma + beta


# ------------------- fused transformer stack (all layers) --------------------

def _stack_kernel(n_head, head_size,
                  x_ref, ln1g, ln1b, wqkv, wp, bp,
                  ln2g, ln2b, w1, b1, w2, b2, lnfg, lnfb,
                  o_ref, x_acc, pv_acc):
    layer = pl.program_id(1)
    Bt, T, C = x_acc.shape

    @pl.when(layer == 0)
    def _():
        x_acc[...] = x_ref[...]                    # load residual stream once per batch block

    x = x_acc[...]                                 # (Bt, T, C) f32

    # Causal additive bias built in-kernel (a few VPU ops, no HBM input).
    row = jax.lax.broadcasted_iota(jnp.int32, (T, T), 0)
    col = jax.lax.broadcasted_iota(jnp.int32, (T, T), 1)
    mask = jnp.where(col <= row, jnp.float32(0.0), jnp.float32(-1e30))   # (T, T)

    # --- x = x + proj(concat_h softmax(q_h k_h^T / sqrt(hs)) v_h) ---
    xn = _layernorm(x, ln1g[...], ln1b[...]).astype(jnp.bfloat16)
    xn2d = xn.reshape(Bt * T, C)
    # Fused QKV matmul on folded rows; 1/sqrt(hs) is already baked into Wq.
    qkv = jnp.dot(xn2d, wqkv[...], preferred_element_type=jnp.float32)
    qkv = qkv.astype(jnp.bfloat16).reshape(Bt, T, 3 * C)

    for h in range(n_head):                        # static unroll over heads
        lo = h * head_size
        qh = qkv[:, :, lo:lo + head_size]                       # (Bt, T, hs) bf16
        kh = qkv[:, :, C + lo:C + lo + head_size]
        vh = qkv[:, :, 2 * C + lo:2 * C + lo + head_size]
        s = jnp.einsum('bqd,bkd->bqk', qh, kh,
                       preferred_element_type=jnp.float32)      # (Bt, T, T) f32
        s = s + mask
        s = s - jnp.max(s, axis=-1, keepdims=True)
        p = jnp.exp(s)                                          # f32, unnormalized
        inv_denom = pl.reciprocal(jnp.sum(p, axis=-1, keepdims=True), approx=True)
        pv = jnp.einsum('bqk,bkd->bqd', p.astype(jnp.bfloat16), vh,
                        preferred_element_type=jnp.float32) * inv_denom
        # collect heads into the projection input scratch (no concatenate)
        pv_acc[:, :, lo:lo + head_size] = pv.astype(jnp.bfloat16)

    # One K=C projection matmul with the unsplit Wp (fills the MXU).
    attn = jnp.dot(pv_acc[...].reshape(Bt * T, C), wp[...],
                   preferred_element_type=jnp.float32) + bp[...]
    x = x + attn.reshape(Bt, T, C)
    # TODO(synk): attention / residual / FFN dropout omitted (eval-mode identity).

    # --- x = x + W2 relu(W1 ln2(x) + b1) + b2 ---
    xn2 = _layernorm(x, ln2g[...], ln2b[...]).astype(jnp.bfloat16).reshape(Bt * T, C)
    hdn = jnp.dot(xn2, w1[...], preferred_element_type=jnp.float32) + b1[...]
    hdn = jnp.maximum(hdn, 0.0).astype(jnp.bfloat16)
    ff = jnp.dot(hdn, w2[...], preferred_element_type=jnp.float32) + b2[...]
    x = x + ff.reshape(Bt, T, C)

    x_acc[...] = x

    @pl.when(layer == pl.num_programs(1) - 1)
    def _():
        # Final LayerNorm fused here; emit bf16 so the lm_head input halves HBM traffic.
        o_ref[...] = _layernorm(x, lnfg[...], lnfb[...]).astype(o_ref.dtype)


def transformer_stack(x, stacked, lnf_g, lnf_b, n_head, head_size, b_tile):
    B, T, C = x.shape
    H = 4 * C
    L = stacked[2].shape[0]                        # wqkv is (L, C, 3C)

    def layer_spec(*tail):
        zeros = (0,) * len(tail)
        return pl.BlockSpec((pl.Squeezed(),) + tuple(tail),
                            lambda b, l, _z=zeros: (l,) + _z)

    in_specs = [
        pl.BlockSpec((b_tile, T, C), lambda b, l: (b, 0, 0)),    # x (resident across l)
        layer_spec(1, C), layer_spec(1, C),                      # ln1 gamma/beta
        layer_spec(C, 3 * C),                                    # fused Wqkv (scale folded)
        layer_spec(C, C),                                        # Wp (unsplit)
        layer_spec(1, C),                                        # proj bias
        layer_spec(1, C), layer_spec(1, C),                      # ln2 gamma/beta
        layer_spec(C, H), layer_spec(1, H),                      # ff W1, b1
        layer_spec(H, C), layer_spec(1, C),                      # ff W2, b2
        pl.BlockSpec((1, C), lambda b, l: (0, 0)),               # final LN gamma
        pl.BlockSpec((1, C), lambda b, l: (0, 0)),               # final LN beta
    ]

    kernel = functools.partial(_stack_kernel, n_head, head_size)
    return pl.pallas_call(
        kernel,
        out_shape=jax.ShapeDtypeStruct((B, T, C), jnp.bfloat16),
        grid=(B // b_tile, L),                      # layer axis innermost (carry)
        in_specs=in_specs,
        out_specs=pl.BlockSpec((b_tile, T, C), lambda b, l: (b, 0, 0)),
        scratch_shapes=[pltpu.VMEM((b_tile, T, C), jnp.float32),    # residual carry
                        pltpu.VMEM((b_tile, T, C), jnp.bfloat16)],  # per-head PV collector
        compiler_params=pltpu.CompilerParams(
            dimension_semantics=("parallel", "arbitrary"),
            # Demo config fits easily; raise (v6e: up to ~96 MiB, v7x: stay < ~56 MiB)
            # when scaling B_tile / T / C to the real model.
            vmem_limit_bytes=32 * 1024 * 1024),
    )(x, *stacked, lnf_g, lnf_b)


# -------------------------------- lm_head ------------------------------------

def _head_kernel(x_ref, w_ref, bias_ref, o_ref):
    o_ref[...] = (jnp.dot(x_ref[...], w_ref[...], preferred_element_type=jnp.float32)
                  + bias_ref[...])


def _pick_tile(dim, max_tile, quantum):
    t = (min(dim, max_tile) // quantum) * quantum
    while t >= quantum:
        if dim % t == 0:
            return t
        t -= quantum
    return dim


def lm_head(x2d, w_out, b_out):
    # x2d is already final-layernormed bf16 (B*T, C).
    R, C = x2d.shape
    V = w_out.shape[1]
    tm = _pick_tile(R, 512, 8)        # bigger row tile -> fewer weight re-streams
    tv = _pick_tile(V, 2048, 128)     # vocab tile (keeps (C, tv) blocks small on v7x)

    # Grid order: vocab OUTER, rows INNER -> the (C, tv) weight block stays resident
    # across the inner row sweep; only the small activation rows are re-streamed.
    return pl.pallas_call(
        _head_kernel,
        out_shape=jax.ShapeDtypeStruct((R, V), jnp.float32),
        grid=(V // tv, R // tm),
        in_specs=[pl.BlockSpec((tm, C), lambda v, r: (r, 0)),
                  pl.BlockSpec((C, tv), lambda v, r: (0, v)),
                  pl.BlockSpec((1, tv), lambda v, r: (0, v))],
        out_specs=pl.BlockSpec((tm, tv), lambda v, r: (r, v)),
        compiler_params=pltpu.CompilerParams(
            dimension_semantics=("parallel", "parallel"),
            vmem_limit_bytes=32 * 1024 * 1024),
    )(x2d, w_out, b_out)


# --------------------------------- forward -----------------------------------

def _pick_btile(B, T, target_rows=256):
    # Largest divisor of B whose row count (b_tile * T) is around the MXU row depth.
    bt = max(1, min(B, max(1, target_rows // T)))
    while B % bt != 0:
        bt -= 1
    return bt


@functools.partial(jax.jit, static_argnums=(2, 3))
def transformer_forward(idx, params, n_head, head_size):
    tok_tab, pos_tab, stacked, lnf_g, lnf_b, w_out, b_out = params
    B, T = idx.shape
    C = tok_tab.shape[1]
    # Embedding gathers are glue (plain XLA); the hot path lives in the Pallas kernels.
    x = tok_tab[idx] + pos_tab[:T][None, :, :]                   # (B, T, C) f32
    b_tile = _pick_btile(B, T)
    xn = transformer_stack(x, stacked, lnf_g, lnf_b, n_head, head_size, b_tile)
    logits = lm_head(xn.reshape(B * T, C), w_out, b_out)
    return logits.reshape(B, T, -1), None                        # (logits, loss=None)


# ----------------------------- parameter init --------------------------------

def init_params(key, vocab_size, n_embed, n_head, n_layers, max_block_size=256):
    C, H = n_embed, 4 * n_embed
    hs = C // n_head
    keys = iter(jax.random.split(key, 3 + 6 * n_layers))

    def lin_w(shape, scale=1.0):
        # matches torch.nn.init.normal_(weight, mean=0, std=0.02); stored bf16 for the MXU.
        w = 0.02 * jax.random.normal(next(keys), shape, jnp.float32)
        return (w * scale).astype(jnp.bfloat16)

    tok_tab = 0.02 * jax.random.normal(next(keys), (vocab_size, C), jnp.float32)
    pos_tab = 0.02 * jax.random.normal(next(keys), (max_block_size, C), jnp.float32)

    inv_sqrt_hs = hs ** -0.5
    wqkv, wp, w1, w2 = [], [], [], []
    for _ in range(n_layers):
        wq = lin_w((C, C), scale=inv_sqrt_hs)      # fold 1/sqrt(head_size) into Wq
        wk = lin_w((C, C))
        wv = lin_w((C, C))
        wqkv.append(jnp.concatenate([wq, wk, wv], axis=1))       # (C, 3C) bf16
        wp.append(lin_w((C, C)))                                 # unsplit output projection
        w1.append(lin_w((C, H)))
        w2.append(lin_w((H, C)))

    ones_c = jnp.ones((n_layers, 1, C), jnp.float32)
    zeros_c = jnp.zeros((n_layers, 1, C), jnp.float32)
    stacked = (
        ones_c, zeros_c,                                         # ln1 gamma/beta
        jnp.stack(wqkv),                                         # (L, C, 3C)
        jnp.stack(wp),                                           # (L, C, C)
        zeros_c,                                                 # proj bias
        ones_c, zeros_c,                                         # ln2 gamma/beta
        jnp.stack(w1), jnp.zeros((n_layers, 1, H), jnp.float32),
        jnp.stack(w2), zeros_c,
    )

    lnf_g = jnp.ones((1, C), jnp.float32)
    lnf_b = jnp.zeros((1, C), jnp.float32)
    w_out = lin_w((C, vocab_size))
    b_out = jnp.zeros((1, vocab_size), jnp.float32)
    return (tok_tab, pos_tab, stacked, lnf_g, lnf_b, w_out, b_out)


# ----------------------------------- main -------------------------------------

if __name__ == "__main__":
    # Small, TPU-friendly config consistent with the module structure
    # (original: N_EMBED=384, N_HEAD=6, N_LAYERS=6, BLOCK_SIZE=256).
    VOCAB = 256
    N_EMBED = 128
    N_HEAD = 4
    N_LAYERS = 2
    T = 128         # sequence length
    B = 4           # batch -> b_tile=2 => two "parallel" batch blocks of 256 MXU rows
    head_size = N_EMBED // N_HEAD

    key = jax.random.PRNGKey(0)
    pkey, ikey = jax.random.split(key)
    params = init_params(pkey, VOCAB, N_EMBED, N_HEAD, N_LAYERS)
    idx = jax.random.randint(ikey, (B, T), 0, VOCAB, dtype=jnp.int32)

    logits, loss = transformer_forward(idx, params, N_HEAD, head_size)
    logits = jax.block_until_ready(logits)
    assert logits.shape == (B, T, VOCAB), logits.shape
    assert loss is None
    assert bool(jnp.all(jnp.isfinite(logits)))
    print("KERNEL_OK")
</pallas_src>

<mosaic_0001>
module attributes {stable_mosaic.version = 11 : i64} {
  func.func @_head_kernel(%arg0: i32, %arg1: i32, %arg2: memref<512x128xbf16, #tpu.memory_space<vmem>>, %arg3: memref<128x256xbf16, #tpu.memory_space<vmem>>, %arg4: memref<1x256xf32, #tpu.memory_space<vmem>>, %arg5: memref<512x256xf32, #tpu.memory_space<vmem>>) attributes {dimension_semantics = [#tpu.dimension_semantics<parallel>, #tpu.dimension_semantics<parallel>], iteration_bounds = array<i64: 1, 1>, scalar_prefetch = 0 : i64, scratch_operands = 0 : i64, tpu.core_type = #tpu.core_type<tc>, window_params = [{transform_indices = @transform_0, window_bounds = array<i64: 512, 128>}, {transform_indices = @transform_1, window_bounds = array<i64: 128, 256>}, {transform_indices = @transform_2, window_bounds = array<i64: 1, 256>}, {transform_indices = @transform_3, window_bounds = array<i64: 512, 256>}]} {
    %c0 = arith.constant 0 : index
    %c0_0 = arith.constant 0 : index
    %0 = vector.load %arg2[%c0, %c0_0] : memref<512x128xbf16, #tpu.memory_space<vmem>>, vector<512x128xbf16>
    %c0_1 = arith.constant 0 : index
    %c0_2 = arith.constant 0 : index
    %1 = vector.load %arg3[%c0_1, %c0_2] : memref<128x256xbf16, #tpu.memory_space<vmem>>, vector<128x256xbf16>
    %cst = arith.constant dense<0.000000e+00> : vector<512x256xf32>
    %2 = tpu.matmul %0, %1, %cst {dimension_numbers = #tpu.dot_dimension_numbers<[1], [0], [0], [1], [0, 0, 1, 1], [], []>} : vector<512x128xbf16>, vector<128x256xbf16>, vector<512x256xf32> -> vector<512x256xf32>
    %c0_3 = arith.constant 0 : index
    %c0_4 = arith.constant 0 : index
    %3 = vector.load %arg4[%c0_3, %c0_4] : memref<1x256xf32, #tpu.memory_space<vmem>>, vector<1x256xf32>
    %4 = vector.broadcast %3 : vector<1x256xf32> to vector<512x256xf32>
    %5 = arith.addf %2, %4 : vector<512x256xf32>
    %c0_5 = arith.constant 0 : index
    %c0_6 = arith.constant 0 : index
    %6 = vector.load %arg5[%c0_5, %c0_6] : memref<512x256xf32, #tpu.memory_space<vmem>>, vector<512x256xf32>
    tpu.vector_store %arg5[%c0_5, %c0_6], %5 {strides = array<i32>} : memref<512x256xf32, #tpu.memory_space<vmem>>, vector<512x256xf32>,
    return
  }
  func.func @transform_0(%arg0: i32, %arg1: i32) -> (i32, i32) {
    %c0_i32 = arith.constant 0 : i32
    %c0_i32_0 = arith.constant 0 : i32
    return %arg1, %c0_i32 : i32, i32
  }
  func.func @transform_1(%arg0: i32, %arg1: i32) -> (i32, i32) {
    %c0_i32 = arith.constant 0 : i32
    %c0_i32_0 = arith.constant 0 : i32
    return %c0_i32, %arg0 : i32, i32
  }
  func.func @transform_2(%arg0: i32, %arg1: i32) -> (i32, i32) {
    %c0_i32 = arith.constant 0 : i32
    %c0_i32_0 = arith.constant 0 : i32
    return %c0_i32, %arg0 : i32, i32
  }
  func.func @transform_3(%arg0: i32, %arg1: i32) -> (i32, i32) {
    %c0_i32 = arith.constant 0 : i32
    return %arg1, %arg0 : i32, i32
  }
}

module attributes {stable_mosaic.version = 11 : i64} {
  func.func @_stack_kernel(%arg0: i32, %arg1: i32, %arg2: memref<2x128x128xf32, #tpu.memory_space<vmem>>, %arg3: memref<1x1x128xf32, #tpu.memory_space<vmem>>, %arg4: memref<1x1x128xf32, #tpu.memory_space<vmem>>, %arg5: memref<1x128x384xbf16, #tpu.memory_space<vmem>>, %arg6: memref<1x128x128xbf16, #tpu.memory_space<vmem>>, %arg7: memref<1x1x128xf32, #tpu.memory_space<vmem>>, %arg8: memref<1x1x128xf32, #tpu.memory_space<vmem>>, %arg9: memref<1x1x128xf32, #tpu.memory_space<vmem>>, %arg10: memref<1x128x512xbf16, #tpu.memory_space<vmem>>, %arg11: memref<1x1x512xf32, #tpu.memory_space<vmem>>, %arg12: memref<1x512x128xbf16, #tpu.memory_space<vmem>>, %arg13: memref<1x1x128xf32, #tpu.memory_space<vmem>>, %arg14: memref<1x128xf32, #tpu.memory_space<vmem>>, %arg15: memref<1x128xf32, #tpu.memory_space<vmem>>, %arg16: memref<2x128x128xbf16, #tpu.memory_space<vmem>>, %arg17: memref<2x128x128xf32, #tpu.memory_space<vmem>>, %arg18: memref<2x128x128xbf16, #tpu.memory_space<vmem>>) attributes {dimension_semantics = [#tpu.dimension_semantics<parallel>, #tpu.dimension_semantics<arbitrary>], iteration_bounds = array<i64: 2, 2>, scalar_prefetch = 0 : i64, scratch_operands = 2 : i64, tpu.core_type = #tpu.core_type<tc>, window_params = [{transform_indices = @transform_0, window_bounds = array<i64: 2, 128, 128>}, {transform_indices = @transform_1, window_bounds = array<i64: 1, 1, 128>}, {transform_indices = @transform_2, window_bounds = array<i64: 1, 1, 128>}, {transform_indices = @transform_3, window_bounds = array<i64: 1, 128, 384>}, {transform_indices = @transform_4, window_bounds = array<i64: 1, 128, 128>}, {transform_indices = @transform_5, window_bounds = array<i64: 1, 1, 128>}, {transform_indices = @transform_6, window_bounds = array<i64: 1, 1, 128>}, {transform_indices = @transform_7, window_bounds = array<i64: 1, 1, 128>}, {transform_indices = @transform_8, window_bounds = array<i64: 1, 128, 512>}, {transform_indices = @transform_9, window_bounds = array<i64: 1, 1, 512>}, {transform_indices = @transform_10, window_bounds = array<i64: 1, 512, 128>}, {transform_indices = @transform_11, window_bounds = array<i64: 1, 1, 128>}, {pipeline_mode = #tpu.pipeline_mode<synchronous>, transform_indices = @transform_12, window_bounds = array<i64: 1, 128>}, {pipeline_mode = #tpu.pipeline_mode<synchronous>, transform_indices = @transform_13, window_bounds = array<i64: 1, 128>}, {transform_indices = @transform_14, window_bounds = array<i64: 2, 128, 128>}]} {
    %c0_i32 = arith.constant 0 : i32
    %0 = arith.cmpi eq, %arg1, %c0_i32 : i32
    %1 = arith.extui %0 : i1 to i32
    %c0_i32_0 = arith.constant 0 : i32
    %2 = arith.cmpi ne, %1, %c0_i32_0 : i32
    scf.if %2 {
      %c0_84 = arith.constant 0 : index
      %c0_85 = arith.constant 0 : index
      %c0_86 = arith.constant 0 : index
      %193 = vector.load %arg2[%c0_84, %c0_85, %c0_86] : memref<2x128x128xf32, #tpu.memory_space<vmem>>, vector<2x128x128xf32>
      %c0_87 = arith.constant 0 : index
      %c0_88 = arith.constant 0 : index
      %c0_89 = arith.constant 0 : index
      %194 = vector.load %arg17[%c0_87, %c0_88, %c0_89] : memref<2x128x128xf32, #tpu.memory_space<vmem>>, vector<2x128x128xf32>
      tpu.vector_store %arg17[%c0_87, %c0_88, %c0_89], %193 {strides = array<i32>} : memref<2x128x128xf32, #tpu.memory_space<vmem>>, vector<2x128x128xf32>,
    } else {
    }
    %c0 = arith.constant 0 : index
    %c0_1 = arith.constant 0 : index
    %c0_2 = arith.constant 0 : index
    %3 = vector.load %arg17[%c0, %c0_1, %c0_2] : memref<2x128x128xf32, #tpu.memory_space<vmem>>, vector<2x128x128xf32>
    %4 = tpu.iota {dimensions = array<i32: 0>} : vector<128x128xi32>
    %5 = tpu.iota {dimensions = array<i32: 1>} : vector<128x128xi32>
    %6 = arith.cmpi sle, %5, %4 : vector<128x128xi32>
    %cst = arith.constant 0.000000e+00 : f32
    %cst_3 = arith.constant -1.000000e+30 : f32
    %7 = vector.broadcast %cst : f32 to vector<128x128xf32>
    %8 = vector.broadcast %cst_3 : f32 to vector<128x128xf32>
    %9 = arith.select %6, %7, %8 : vector<128x128xi1>, vector<128x128xf32>
    %c0_4 = arith.constant 0 : index
    %c0_5 = arith.constant 0 : index
    %c0_6 = arith.constant 0 : index
    %10 = vector.load %arg3[%c0_4, %c0_5, %c0_6] : memref<1x1x128xf32, #tpu.memory_space<vmem>>, vector<1x1x128xf32>
    %11 = vector.shape_cast %10 : vector<1x1x128xf32> to vector<1x128xf32>
    %c0_7 = arith.constant 0 : index
    %c0_8 = arith.constant 0 : index
    %c0_9 = arith.constant 0 : index
    %12 = vector.load %arg4[%c0_7, %c0_8, %c0_9] : memref<1x1x128xf32, #tpu.memory_space<vmem>>, vector<1x1x128xf32>
    %13 = vector.shape_cast %12 : vector<1x1x128xf32> to vector<1x128xf32>
    %cst_10 = arith.constant dense<0.000000e+00> : vector<2x128xf32>
    %14 = vector.multi_reduction <add>, %3, %cst_10 [2] : vector<2x128x128xf32> to vector<2x128xf32>
    %15 = vector.shape_cast %14 : vector<2x128xf32> to vector<2x128x1xf32>
    %cst_11 = arith.constant 1.280000e+02 : f32
    %16 = vector.broadcast %cst_11 : f32 to vector<2x128x1xf32>
    %17 = arith.divf %15, %16 : vector<2x128x1xf32>
    %18 = vector.broadcast %17 : vector<2x128x1xf32> to vector<2x128x128xf32>
    %19 = arith.subf %3, %18 : vector<2x128x128xf32>
    %20 = arith.mulf %19, %19 : vector<2x128x128xf32>
    %cst_12 = arith.constant dense<0.000000e+00> : vector<2x128xf32>
    %21 = vector.multi_reduction <add>, %20, %cst_12 [2] : vector<2x128x128xf32> to vector<2x128xf32>
    %22 = vector.shape_cast %21 : vector<2x128xf32> to vector<2x128x1xf32>
    %cst_13 = arith.constant 1.280000e+02 : f32
    %23 = vector.broadcast %cst_13 : f32 to vector<2x128x1xf32>
    %24 = arith.divf %22, %23 : vector<2x128x1xf32>
    %25 = vector.broadcast %17 : vector<2x128x1xf32> to vector<2x128x128xf32>
    %26 = arith.subf %3, %25 : vector<2x128x128xf32>
    %cst_14 = arith.constant 9.99999974E-6 : f32
    %27 = vector.broadcast %cst_14 : f32 to vector<2x128x1xf32>
    %28 = arith.addf %24, %27 : vector<2x128x1xf32>
    %29 = math.rsqrt %28 : vector<2x128x1xf32>
    %30 = vector.broadcast %29 : vector<2x128x1xf32> to vector<2x128x128xf32>
    %31 = arith.mulf %26, %30 : vector<2x128x128xf32>
    %32 = vector.shape_cast %11 : vector<1x128xf32> to vector<1x1x128xf32>
    %33 = vector.broadcast %32 : vector<1x1x128xf32> to vector<2x128x128xf32>
    %34 = arith.mulf %31, %33 : vector<2x128x128xf32>
    %35 = vector.shape_cast %13 : vector<1x128xf32> to vector<1x1x128xf32>
    %36 = vector.broadcast %35 : vector<1x1x128xf32> to vector<2x128x128xf32>
    %37 = arith.addf %34, %36 : vector<2x128x128xf32>
    %38 = arith.truncf %37 : vector<2x128x128xf32> to vector<2x128x128xbf16>
    %39 = vector.shape_cast %38 : vector<2x128x128xbf16> to vector<256x128xbf16>
    %c0_15 = arith.constant 0 : index
    %c0_16 = arith.constant 0 : index
    %c0_17 = arith.constant 0 : index
    %40 = vector.load %arg5[%c0_15, %c0_16, %c0_17] : memref<1x128x384xbf16, #tpu.memory_space<vmem>>, vector<1x128x384xbf16>
    %41 = vector.shape_cast %40 : vector<1x128x384xbf16> to vector<128x384xbf16>
    %cst_18 = arith.constant dense<0.000000e+00> : vector<256x384xf32>
    %42 = tpu.matmul %39, %41, %cst_18 {dimension_numbers = #tpu.dot_dimension_numbers<[1], [0], [0], [1], [0, 0, 1, 1], [], []>} : vector<256x128xbf16>, vector<128x384xbf16>, vector<256x384xf32> -> vector<256x384xf32>
    %43 = arith.truncf %42 : vector<256x384xf32> to vector<256x384xbf16>
    %44 = vector.shape_cast %43 : vector<256x384xbf16> to vector<2x128x384xbf16>
    %45 = vector.extract_strided_slice %44 {offsets = [0, 0, 0], sizes = [2, 128, 32], strides = [1, 1, 1]} : vector<2x128x384xbf16> to vector<2x128x32xbf16>
    %46 = vector.extract_strided_slice %44 {offsets = [0, 0, 128], sizes = [2, 128, 32], strides = [1, 1, 1]} : vector<2x128x384xbf16> to vector<2x128x32xbf16>
    %47 = vector.extract_strided_slice %44 {offsets = [0, 0, 256], sizes = [2, 128, 32], strides = [1, 1, 1]} : vector<2x128x384xbf16> to vector<2x128x32xbf16>
    "tpu.trace_start"() <{level = 10 : i32, message = "bqd,bkd->bqk"}> : () -> ()
    %cst_19 = arith.constant dense<0.000000e+00> : vector<2x128x128xf32>
    %48 = tpu.matmul %45, %46, %cst_19 {dimension_numbers = #tpu.dot_dimension_numbers<[2], [2], [1], [1], [0, 0, 0, 1, 1, 1], [0], [0]>} : vector<2x128x32xbf16>, vector<2x128x32xbf16>, vector<2x128x128xf32> -> vector<2x128x128xf32>
    "tpu.trace_stop"() : () -> ()
    %49 = vector.shape_cast %9 : vector<128x128xf32> to vector<1x128x128xf32>
    %50 = vector.broadcast %49 : vector<1x128x128xf32> to vector<2x128x128xf32>
    %51 = arith.addf %48, %50 : vector<2x128x128xf32>
    %cst_20 = arith.constant dense<0xFF800000> : vector<2x128xf32>
    %52 = vector.multi_reduction <maximumf>, %51, %cst_20 [2] : vector<2x128x128xf32> to vector<2x128xf32>
    %53 = vector.shape_cast %52 : vector<2x128xf32> to vector<2x128x1xf32>
    %54 = vector.broadcast %53 : vector<2x128x1xf32> to vector<2x128x128xf32>
    %55 = arith.subf %51, %54 : vector<2x128x128xf32>
    %56 = math.exp %55 : vector<2x128x128xf32>
    %cst_21 = arith.constant dense<0.000000e+00> : vector<2x128xf32>
    %57 = vector.multi_reduction <add>, %56, %cst_21 [2] : vector<2x128x128xf32> to vector<2x128xf32>
    %58 = vector.shape_cast %57 : vector<2x128xf32> to vector<2x128x1xf32>
    %59 = tpu.reciprocal %58 {approx = true} : vector<2x128x1xf32> -> vector<2x128x1xf32>
    %60 = arith.truncf %56 : vector<2x128x128xf32> to vector<2x128x128xbf16>
    "tpu.trace_start"() <{level = 10 : i32, message = "bqk,bkd->bqd"}> : () -> ()
    %cst_22 = arith.constant dense<0.000000e+00> : vector<2x128x32xf32>
    %61 = tpu.matmul %60, %47, %cst_22 {dimension_numbers = #tpu.dot_dimension_numbers<[2], [1], [1], [2], [0, 0, 0, 1, 1, 2], [0], [0]>} : vector<2x128x128xbf16>, vector<2x128x32xbf16>, vector<2x128x32xf32> -> vector<2x128x32xf32>
    "tpu.trace_stop"() : () -> ()
    %62 = vector.broadcast %59 : vector<2x128x1xf32> to vector<2x128x32xf32>
    %63 = arith.mulf %61, %62 : vector<2x128x32xf32>
    %64 = arith.truncf %63 : vector<2x128x32xf32> to vector<2x128x32xbf16>
    %c0_23 = arith.constant 0 : index
    %c0_24 = arith.constant 0 : index
    %c0_25 = arith.constant 0 : index
    %65 = vector.load %arg18[%c0_23, %c0_24, %c0_25] : memref<2x128x128xbf16, #tpu.memory_space<vmem>>, vector<2x128x32xbf16>
    tpu.vector_store %arg18[%c0_23, %c0_24, %c0_25], %64 {strides = array<i32>} : memref<2x128x128xbf16, #tpu.memory_space<vmem>>, vector<2x128x32xbf16>,
    %66 = vector.extract_strided_slice %44 {offsets = [0, 0, 32], sizes = [2, 128, 32], strides = [1, 1, 1]} : vector<2x128x384xbf16> to vector<2x128x32xbf16>
    %67 = vector.extract_strided_slice %44 {offsets = [0, 0, 160], sizes = [2, 128, 32], strides = [1, 1, 1]} : vector<2x128x384xbf16> to vector<2x128x32xbf16>
    %68 = vector.extract_strided_slice %44 {offsets = [0, 0, 288], sizes = [2, 128, 32], strides = [1, 1, 1]} : vector<2x128x384xbf16> to vector<2x128x32xbf16>
    "tpu.trace_start"() <{level = 10 : i32, message = "bqd,bkd->bqk"}> : () -> ()
    %cst_26 = arith.constant dense<0.000000e+00> : vector<2x128x128xf32>
    %69 = tpu.matmul %66, %67, %cst_26 {dimension_numbers = #tpu.dot_dimension_numbers<[2], [2], [1], [1], [0, 0, 0, 1, 1, 1], [0], [0]>} : vector<2x128x32xbf16>, vector<2x128x32xbf16>, vector<2x128x128xf32> -> vector<2x128x128xf32>
    "tpu.trace_stop"() : () -> ()
    %70 = vector.shape_cast %9 : vector<128x128xf32> to vector<1x128x128xf32>
    %71 = vector.broadcast %70 : vector<1x128x128xf32> to vector<2x128x128xf32>
    %72 = arith.addf %69, %71 : vector<2x128x128xf32>
    %cst_27 = arith.constant dense<0xFF800000> : vector<2x128xf32>
    %73 = vector.multi_reduction <maximumf>, %72, %cst_27 [2] : vector<2x128x128xf32> to vector<2x128xf32>
    %74 = vector.shape_cast %73 : vector<2x128xf32> to vector<2x128x1xf32>
    %75 = vector.broadcast %74 : vector<2x128x1xf32> to vector<2x128x128xf32>
    %76 = arith.subf %72, %75 : vector<2x128x128xf32>
    %77 = math.exp %76 : vector<2x128x128xf32>
    %cst_28 = arith.constant dense<0.000000e+00> : vector<2x128xf32>
    %78 = vector.multi_reduction <add>, %77, %cst_28 [2] : vector<2x128x128xf32> to vector<2x128xf32>
    %79 = vector.shape_cast %78 : vector<2x128xf32> to vector<2x128x1xf32>
    %80 = tpu.reciprocal %79 {approx = true} : vector<2x128x1xf32> -> vector<2x128x1xf32>
    %81 = arith.truncf %77 : vector<2x128x128xf32> to vector<2x128x128xbf16>
    "tpu.trace_start"() <{level = 10 : i32, message = "bqk,bkd->bqd"}> : () -> ()
    %cst_29 = arith.constant dense<0.000000e+00> : vector<2x128x32xf32>
    %82 = tpu.matmul %81, %68, %cst_29 {dimension_numbers = #tpu.dot_dimension_numbers<[2], [1], [1], [2], [0, 0, 0, 1, 1, 2], [0], [0]>} : vector<2x128x128xbf16>, vector<2x128x32xbf16>, vector<2x128x32xf32> -> vector<2x128x32xf32>
    "tpu.trace_stop"() : () -> ()
    %83 = vector.broadcast %80 : vector<2x128x1xf32> to vector<2x128x32xf32>
    %84 = arith.mulf %82, %83 : vector<2x128x32xf32>
    %85 = arith.truncf %84 : vector<2x128x32xf32> to vector<2x128x32xbf16>
    %c0_30 = arith.constant 0 : index
    %c0_31 = arith.constant 0 : index
    %c32 = arith.constant 32 : index
    %86 = vector.load %arg18[%c0_30, %c0_31, %c32] : memref<2x128x128xbf16, #tpu.memory_space<vmem>>, vector<2x128x32xbf16>
    tpu.vector_store %arg18[%c0_30, %c0_31, %c32], %85 {strides = array<i32>} : memref<2x128x128xbf16, #tpu.memory_space<vmem>>, vector<2x128x32xbf16>,
    %87 = vector.extract_strided_slice %44 {offsets = [0, 0, 64], sizes = [2, 128, 32], strides = [1, 1, 1]} : vector<2x128x384xbf16> to vector<2x128x32xbf16>
    %88 = vector.extract_strided_slice %44 {offsets = [0, 0, 192], sizes = [2, 128, 32], strides = [1, 1, 1]} : vector<2x128x384xbf16> to vector<2x128x32xbf16>
    %89 = vector.extract_strided_slice %44 {offsets = [0, 0, 320], sizes = [2, 128, 32], strides = [1, 1, 1]} : vector<2x128x384xbf16> to vector<2x128x32xbf16>
    "tpu.trace_start"() <{level = 10 : i32, message = "bqd,bkd->bqk"}> : () -> ()
    %cst_32 = arith.constant dense<0.000000e+00> : vector<2x128x128xf32>
    %90 = tpu.matmul %87, %88, %cst_32 {dimension_numbers = #tpu.dot_dimension_numbers<[2], [2], [1], [1], [0, 0, 0, 1, 1, 1], [0], [0]>} : vector<2x128x32xbf16>, vector<2x128x32xbf16>, vector<2x128x128xf32> -> vector<2x128x128xf32>
    "tpu.trace_stop"() : () -> ()
    %91 = vector.shape_cast %9 : vector<128x128xf32> to vector<1x128x128xf32>
    %92 = vector.broadcast %91 : vector<1x128x128xf32> to vector<2x128x128xf32>
    %93 = arith.addf %90, %92 : vector<2x128x128xf32>
    %cst_33 = arith.constant dense<0xFF800000> : vector<2x128xf32>
    %94 = vector.multi_reduction <maximumf>, %93, %cst_33 [2] : vector<2x128x128xf32> to vector<2x128xf32>
    %95 = vector.shape_cast %94 : vector<2x128xf32> to vector<2x128x1xf32>
    %96 = vector.broadcast %95 : vector<2x128x1xf32> to vector<2x128x128xf32>
    %97 = arith.subf %93, %96 : vector<2x128x128xf32>
    %98 = math.exp %97 : vector<2x128x128xf32>
    %cst_34 = arith.constant dense<0.000000e+00> : vector<2x128xf32>
    %99 = vector.multi_reduction <add>, %98, %cst_34 [2] : vector<2x128x128xf32> to vector<2x128xf32>
    %100 = vector.shape_cast %99 : vector<2x128xf32> to vector<2x128x1xf32>
    %101 = tpu.reciprocal %100 {approx = true} : vector<2x128x1xf32> -> vector<2x128x1xf32>
    %102 = arith.truncf %98 : vector<2x128x128xf32> to vector<2x128x128xbf16>
    "tpu.trace_start"() <{level = 10 : i32, message = "bqk,bkd->bqd"}> : () -> ()
    %cst_35 = arith.constant dense<0.000000e+00> : vector<2x128x32xf32>
    %103 = tpu.matmul %102, %89, %cst_35 {dimension_numbers = #tpu.dot_dimension_numbers<[2], [1], [1], [2], [0, 0, 0, 1, 1, 2], [0], [0]>} : vector<2x128x128xbf16>, vector<2x128x32xbf16>, vector<2x128x32xf32> -> vector<2x128x32xf32>
    "tpu.trace_stop"() : () -> ()
    %104 = vector.broadcast %101 : vector<2x128x1xf32> to vector<2x128x32xf32>
    %105 = arith.mulf %103, %104 : vector<2x128x32xf32>
    %106 = arith.truncf %105 : vector<2x128x32xf32> to vector<2x128x32xbf16>
    %c0_36 = arith.constant 0 : index
    %c0_37 = arith.constant 0 : index
    %c64 = arith.constant 64 : index
    %107 = vector.load %arg18[%c0_36, %c0_37, %c64] : memref<2x128x128xbf16, #tpu.memory_space<vmem>>, vector<2x128x32xbf16>
    tpu.vector_store %arg18[%c0_36, %c0_37, %c64], %106 {strides = array<i32>} : memref<2x128x128xbf16, #tpu.memory_space<vmem>>, vector<2x128x32xbf16>,
    %108 = vector.extract_strided_slice %44 {offsets = [0, 0, 96], sizes = [2, 128, 32], strides = [1, 1, 1]} : vector<2x128x384xbf16> to vector<2x128x32xbf16>
    %109 = vector.extract_strided_slice %44 {offsets = [0, 0, 224], sizes = [2, 128, 32], strides = [1, 1, 1]} : vector<2x128x384xbf16> to vector<2x128x32xbf16>
    %110 = vector.extract_strided_slice %44 {offsets = [0, 0, 352], sizes = [2, 128, 32], strides = [1, 1, 1]} : vector<2x128x384xbf16> to vector<2x128x32xbf16>
    "tpu.trace_start"() <{level = 10 : i32, message = "bqd,bkd->bqk"}> : () -> ()
    %cst_38 = arith.constant dense<0.000000e+00> : vector<2x128x128xf32>
    %111 = tpu.matmul %108, %109, %cst_38 {dimension_numbers = #tpu.dot_dimension_numbers<[2], [2], [1], [1], [0, 0, 0, 1, 1, 1], [0], [0]>} : vector<2x128x32xbf16>, vector<2x128x32xbf16>, vector<2x128x128xf32> -> vector<2x128x128xf32>
    "tpu.trace_stop"() : () -> ()
    %112 = vector.shape_cast %9 : vector<128x128xf32> to vector<1x128x128xf32>
    %113 = vector.broadcast %112 : vector<1x128x128xf32> to vector<2x128x128xf32>
    %114 = arith.addf %111, %113 : vector<2x128x128xf32>
    %cst_39 = arith.constant dense<0xFF800000> : vector<2x128xf32>
    %115 = vector.multi_reduction <maximumf>, %114, %cst_39 [2] : vector<2x128x128xf32> to vector<2x128xf32>
    %116 = vector.shape_cast %115 : vector<2x128xf32> to vector<2x128x1xf32>
    %117 = vector.broadcast %116 : vector<2x128x1xf32> to vector<2x128x128xf32>
    %118 = arith.subf %114, %117 : vector<2x128x128xf32>
    %119 = math.exp %118 : vector<2x128x128xf32>
    %cst_40 = arith.constant dense<0.000000e+00> : vector<2x128xf32>
    %120 = vector.multi_reduction <add>, %119, %cst_40 [2] : vector<2x128x128xf32> to vector<2x128xf32>
    %121 = vector.shape_cast %120 : vector<2x128xf32> to vector<2x128x1xf32>
    %122 = tpu.reciprocal %121 {approx = true} : vector<2x128x1xf32> -> vector<2x128x1xf32>
    %123 = arith.truncf %119 : vector<2x128x128xf32> to vector<2x128x128xbf16>
    "tpu.trace_start"() <{level = 10 : i32, message = "bqk,bkd->bqd"}> : () -> ()
    %cst_41 = arith.constant dense<0.000000e+00> : vector<2x128x32xf32>
    %124 = tpu.matmul %123, %110, %cst_41 {dimension_numbers = #tpu.dot_dimension_numbers<[2], [1], [1], [2], [0, 0, 0, 1, 1, 2], [0], [0]>} : vector<2x128x128xbf16>, vector<2x128x32xbf16>, vector<2x128x32xf32> -> vector<2x128x32xf32>
    "tpu.trace_stop"() : () -> ()
    %125 = vector.broadcast %122 : vector<2x128x1xf32> to vector<2x128x32xf32>
    %126 = arith.mulf %124, %125 : vector<2x128x32xf32>
    %127 = arith.truncf %126 : vector<2x128x32xf32> to vector<2x128x32xbf16>
    %c0_42 = arith.constant 0 : index
    %c0_43 = arith.constant 0 : index
    %c96 = arith.constant 96 : index
    %128 = vector.load %arg18[%c0_42, %c0_43, %c96] : memref<2x128x128xbf16, #tpu.memory_space<vmem>>, vector<2x128x32xbf16>
    tpu.vector_store %arg18[%c0_42, %c0_43, %c96], %127 {strides = array<i32>} : memref<2x128x128xbf16, #tpu.memory_space<vmem>>, vector<2x128x32xbf16>,
    %c0_44 = arith.constant 0 : index
    %c0_45 = arith.constant 0 : index
    %c0_46 = arith.constant 0 : index
    %129 = vector.load %arg18[%c0_44, %c0_45, %c0_46] : memref<2x128x128xbf16, #tpu.memory_space<vmem>>, vector<2x128x128xbf16>
    %130 = vector.shape_cast %129 : vector<2x128x128xbf16> to vector<256x128xbf16>
    %c0_47 = arith.constant 0 : index
    %c0_48 = arith.constant 0 : index
    %c0_49 = arith.constant 0 : index
    %131 = vector.load %arg6[%c0_47, %c0_48, %c0_49] : memref<1x128x128xbf16, #tpu.memory_space<vmem>>, vector<1x128x128xbf16>
    %132 = vector.shape_cast %131 : vector<1x128x128xbf16> to vector<128x128xbf16>
    %cst_50 = arith.constant dense<0.000000e+00> : vector<256x128xf32>
    %133 = tpu.matmul %130, %132, %cst_50 {dimension_numbers = #tpu.dot_dimension_numbers<[1], [0], [0], [1], [0, 0, 1, 1], [], []>} : vector<256x128xbf16>, vector<128x128xbf16>, vector<256x128xf32> -> vector<256x128xf32>
    %c0_51 = arith.constant 0 : index
    %c0_52 = arith.constant 0 : index
    %c0_53 = arith.constant 0 : index
    %134 = vector.load %arg7[%c0_51, %c0_52, %c0_53] : memref<1x1x128xf32, #tpu.memory_space<vmem>>, vector<1x1x128xf32>
    %135 = vector.shape_cast %134 : vector<1x1x128xf32> to vector<1x128xf32>
    %136 = vector.broadcast %135 : vector<1x128xf32> to vector<256x128xf32>
    %137 = arith.addf %133, %136 : vector<256x128xf32>
    %138 = vector.shape_cast %137 : vector<256x128xf32> to vector<2x128x128xf32>
    %139 = arith.addf %3, %138 : vector<2x128x128xf32>
    %c0_54 = arith.constant 0 : index
    %c0_55 = arith.constant 0 : index
    %c0_56 = arith.constant 0 : index
    %140 = vector.load %arg8[%c0_54, %c0_55, %c0_56] : memref<1x1x128xf32, #tpu.memory_space<vmem>>, vector<1x1x128xf32>
    %141 = vector.shape_cast %140 : vector<1x1x128xf32> to vector<1x128xf32>
    %c0_57 = arith.constant 0 : index
    %c0_58 = arith.constant 0 : index
    %c0_59 = arith.constant 0 : index
    %142 = vector.load %arg9[%c0_57, %c0_58, %c0_59] : memref<1x1x128xf32, #tpu.memory_space<vmem>>, vector<1x1x128xf32>
    %143 = vector.shape_cast %142 : vector<1x1x128xf32> to vector<1x128xf32>
    %cst_60 = arith.constant dense<0.000000e+00> : vector<2x128xf32>
    %144 = vector.multi_reduction <add>, %139, %cst_60 [2] : vector<2x128x128xf32> to vector<2x128xf32>
    %145 = vector.shape_cast %144 : vector<2x128xf32> to vector<2x128x1xf32>
    %cst_61 = arith.constant 1.280000e+02 : f32
    %146 = vector.broadcast %cst_61 : f32 to vector<2x128x1xf32>
    %147 = arith.divf %145, %146 : vector<2x128x1xf32>
    %148 = vector.broadcast %147 : vector<2x128x1xf32> to vector<2x128x128xf32>
    %149 = arith.subf %139, %148 : vector<2x128x128xf32>
    %150 = arith.mulf %149, %149 : vector<2x128x128xf32>
    %cst_62 = arith.constant dense<0.000000e+00> : vector<2x128xf32>
    %151 = vector.multi_reduction <add>, %150, %cst_62 [2] : vector<2x128x128xf32> to vector<2x128xf32>
    %152 = vector.shape_cast %151 : vector<2x128xf32> to vector<2x128x1xf32>
    %cst_63 = arith.constant 1.280000e+02 : f32
    %153 = vector.broadcast %cst_63 : f32 to vector<2x128x1xf32>
    %154 = arith.divf %152, %153 : vector<2x128x1xf32>
    %155 = vector.broadcast %147 : vector<2x128x1xf32> to vector<2x128x128xf32>
    %156 = arith.subf %139, %155 : vector<2x128x128xf32>
    %cst_64 = arith.constant 9.99999974E-6 : f32
    %157 = vector.broadcast %cst_64 : f32 to vector<2x128x1xf32>
    %158 = arith.addf %154, %157 : vector<2x128x1xf32>
    %159 = math.rsqrt %158 : vector<2x128x1xf32>
    %160 = vector.broadcast %159 : vector<2x128x1xf32> to vector<2x128x128xf32>
    %161 = arith.mulf %156, %160 : vector<2x128x128xf32>
    %162 = vector.shape_cast %141 : vector<1x128xf32> to vector<1x1x128xf32>
    %163 = vector.broadcast %162 : vector<1x1x128xf32> to vector<2x128x128xf32>
    %164 = arith.mulf %161, %163 : vector<2x128x128xf32>
    %165 = vector.shape_cast %143 : vector<1x128xf32> to vector<1x1x128xf32>
    %166 = vector.broadcast %165 : vector<1x1x128xf32> to vector<2x128x128xf32>
    %167 = arith.addf %164, %166 : vector<2x128x128xf32>
    %168 = arith.truncf %167 : vector<2x128x128xf32> to vector<2x128x128xbf16>
    %169 = vector.shape_cast %168 : vector<2x128x128xbf16> to vector<256x128xbf16>
    %c0_65 = arith.constant 0 : index
    %c0_66 = arith.constant 0 : index
    %c0_67 = arith.constant 0 : index
    %170 = vector.load %arg10[%c0_65, %c0_66, %c0_67] : memref<1x128x512xbf16, #tpu.memory_space<vmem>>, vector<1x128x512xbf16>
    %171 = vector.shape_cast %170 : vector<1x128x512xbf16> to vector<128x512xbf16>
    %cst_68 = arith.constant dense<0.000000e+00> : vector<256x512xf32>
    %172 = tpu.matmul %169, %171, %cst_68 {dimension_numbers = #tpu.dot_dimension_numbers<[1], [0], [0], [1], [0, 0, 1, 1], [], []>} : vector<256x128xbf16>, vector<128x512xbf16>, vector<256x512xf32> -> vector<256x512xf32>
    %c0_69 = arith.constant 0 : index
    %c0_70 = arith.constant 0 : index
    %c0_71 = arith.constant 0 : index
    %173 = vector.load %arg11[%c0_69, %c0_70, %c0_71] : memref<1x1x512xf32, #tpu.memory_space<vmem>>, vector<1x1x512xf32>
    %174 = vector.shape_cast %173 : vector<1x1x512xf32> to vector<1x512xf32>
    %175 = vector.broadcast %174 : vector<1x512xf32> to vector<256x512xf32>
    %176 = arith.addf %172, %175 : vector<256x512xf32>
    %cst_72 = arith.constant 0.000000e+00 : f32
    %177 = vector.broadcast %cst_72 : f32 to vector<256x512xf32>
    %178 = arith.maximumf %176, %177 : vector<256x512xf32>
    %179 = arith.truncf %178 : vector<256x512xf32> to vector<256x512xbf16>
    %c0_73 = arith.constant 0 : index
    %c0_74 = arith.constant 0 : index
    %c0_75 = arith.constant 0 : index
    %180 = vector.load %arg12[%c0_73, %c0_74, %c0_75] : memref<1x512x128xbf16, #tpu.memory_space<vmem>>, vector<1x512x128xbf16>
    %181 = vector.shape_cast %180 : vector<1x512x128xbf16> to vector<512x128xbf16>
    %cst_76 = arith.constant dense<0.000000e+00> : vector<256x128xf32>
    %182 = tpu.matmul %179, %181, %cst_76 {dimension_numbers = #tpu.dot_dimension_numbers<[1], [0], [0], [1], [0, 0, 1, 1], [], []>} : vector<256x512xbf16>, vector<512x128xbf16>, vector<256x128xf32> -> vector<256x128xf32>
    %c0_77 = arith.constant 0 : index
    %c0_78 = arith.constant 0 : index
    %c0_79 = arith.constant 0 : index
    %183 = vector.load %arg13[%c0_77, %c0_78, %c0_79] : memref<1x1x128xf32, #tpu.memory_space<vmem>>, vector<1x1x128xf32>
    %184 = vector.shape_cast %183 : vector<1x1x128xf32> to vector<1x128xf32>
    %185 = vector.broadcast %184 : vector<1x128xf32> to vector<256x128xf32>
    %186 = arith.addf %182, %185 : vector<256x128xf32>
    %187 = vector.shape_cast %186 : vector<256x128xf32> to vector<2x128x128xf32>
    %188 = arith.addf %139, %187 : vector<2x128x128xf32>
    %c0_80 = arith.constant 0 : index
    %c0_81 = arith.constant 0 : index
    %c0_82 = arith.constant 0 : index
    %189 = vector.load %arg17[%c0_80, %c0_81, %c0_82] : memref<2x128x128xf32, #tpu.memory_space<vmem>>, vector<2x128x128xf32>
    tpu.vector_store %arg17[%c0_80, %c0_81, %c0_82], %188 {strides = array<i32>} : memref<2x128x128xf32, #tpu.memory_space<vmem>>, vector<2x128x128xf32>,
    %c1_i32 = arith.constant 1 : i32
    %190 = arith.cmpi eq, %arg1, %c1_i32 : i32
    %191 = arith.extui %190 : i1 to i32
    %c0_i32_83 = arith.constant 0 : i32
    %192 = arith.cmpi ne, %191, %c0_i32_83 : i32
    scf.if %192 {
      %c0_84 = arith.constant 0 : index
      %c0_85 = arith.constant 0 : index
      %193 = vector.load %arg14[%c0_84, %c0_85] : memref<1x128xf32, #tpu.memory_space<vmem>>, vector<1x128xf32>
      %c0_86 = arith.constant 0 : index
      %c0_87 = arith.constant 0 : index
      %194 = vector.load %arg15[%c0_86, %c0_87] : memref<1x128xf32, #tpu.memory_space<vmem>>, vector<1x128xf32>
      %cst_88 = arith.constant dense<0.000000e+00> : vector<2x128xf32>
      %195 = vector.multi_reduction <add>, %188, %cst_88 [2] : vector<2x128x128xf32> to vector<2x128xf32>
      %196 = vector.shape_cast %195 : vector<2x128xf32> to vector<2x128x1xf32>
      %cst_89 = arith.constant 1.280000e+02 : f32
      %197 = vector.broadcast %cst_89 : f32 to vector<2x128x1xf32>
      %198 = arith.divf %196, %197 : vector<2x128x1xf32>
      %199 = vector.broadcast %198 : vector<2x128x1xf32> to vector<2x128x128xf32>
      %200 = arith.subf %188, %199 : vector<2x128x128xf32>
      %201 = arith.mulf %200, %200 : vector<2x128x128xf32>
      %cst_90 = arith.constant dense<0.000000e+00> : vector<2x128xf32>
      %202 = vector.multi_reduction <add>, %201, %cst_90 [2] : vector<2x128x128xf32> to vector<2x128xf32>
      %203 = vector.shape_cast %202 : vector<2x128xf32> to vector<2x128x1xf32>
      %cst_91 = arith.constant 1.280000e+02 : f32
      %204 = vector.broadcast %cst_91 : f32 to vector<2x128x1xf32>
      %205 = arith.divf %203, %204 : vector<2x128x1xf32>
      %206 = vector.broadcast %198 : vector<2x128x1xf32> to vector<2x128x128xf32>
      %207 = arith.subf %188, %206 : vector<2x128x128xf32>
      %cst_92 = arith.constant 9.99999974E-6 : f32
      %208 = vector.broadcast %cst_92 : f32 to vector<2x128x1xf32>
      %209 = arith.addf %205, %208 : vector<2x128x1xf32>
      %210 = math.rsqrt %209 : vector<2x128x1xf32>
      %211 = vector.broadcast %210 : vector<2x128x1xf32> to vector<2x128x128xf32>
      %212 = arith.mulf %207, %211 : vector<2x128x128xf32>
      %213 = vector.shape_cast %193 : vector<1x128xf32> to vector<1x1x128xf32>
      %214 = vector.broadcast %213 : vector<1x1x128xf32> to vector<2x128x128xf32>
      %215 = arith.mulf %212, %214 : vector<2x128x128xf32>
      %216 = vector.shape_cast %194 : vector<1x128xf32> to vector<1x1x128xf32>
      %217 = vector.broadcast %216 : vector<1x1x128xf32> to vector<2x128x128xf32>
      %218 = arith.addf %215, %217 : vector<2x128x128xf32>
      %219 = arith.truncf %218 : vector<2x128x128xf32> to vector<2x128x128xbf16>
      %c0_93 = arith.constant 0 : index
      %c0_94 = arith.constant 0 : index
      %c0_95 = arith.constant 0 : index
      %220 = vector.load %arg16[%c0_93, %c0_94, %c0_95] : memref<2x128x128xbf16, #tpu.memory_space<vmem>>, vector<2x128x128xbf16>
      tpu.vector_store %arg16[%c0_93, %c0_94, %c0_95], %219 {strides = array<i32>} : memref<2x128x128xbf16, #tpu.memory_space<vmem>>, vector<2x128x128xbf16>,
    } else {
    }
    return
  }
  func.func @transform_0(%arg0: i32, %arg1: i32) -> (i32, i32, i32) {
    %c0_i32 = arith.constant 0 : i32
    %c0_i32_0 = arith.constant 0 : i32
    %c0_i32_1 = arith.constant 0 : i32
    return %arg0, %c0_i32, %c0_i32_0 : i32, i32, i32
  }
  func.func @transform_1(%arg0: i32, %arg1: i32) -> (i32, i32, i32) {
    %c0_i32 = arith.constant 0 : i32
    %c0_i32_0 = arith.constant 0 : i32
    %c0_i32_1 = arith.constant 0 : i32
    return %arg1, %c0_i32, %c0_i32_0 : i32, i32, i32
  }
  func.func @transform_2(%arg0: i32, %arg1: i32) -> (i32, i32, i32) {
    %c0_i32 = arith.constant 0 : i32
    %c0_i32_0 = arith.constant 0 : i32
    %c0_i32_1 = arith.constant 0 : i32
    return %arg1, %c0_i32, %c0_i32_0 : i32, i32, i32
  }
  func.func @transform_3(%arg0: i32, %arg1: i32) -> (i32, i32, i32) {
    %c0_i32 = arith.constant 0 : i32
    %c0_i32_0 = arith.constant 0 : i32
    %c0_i32_1 = arith.constant 0 : i32
    return %arg1, %c0_i32, %c0_i32_0 : i32, i32, i32
  }
  func.func @transform_4(%arg0: i32, %arg1: i32) -> (i32, i32, i32) {
    %c0_i32 = arith.constant 0 : i32
    %c0_i32_0 = arith.constant 0 : i32
    %c0_i32_1 = arith.constant 0 : i32
    return %arg1, %c0_i32, %c0_i32_0 : i32, i32, i32
  }
  func.func @transform_5(%arg0: i32, %arg1: i32) -> (i32, i32, i32) {
    %c0_i32 = arith.constant 0 : i32
    %c0_i32_0 = arith.constant 0 : i32
    %c0_i32_1 = arith.constant 0 : i32
    return %arg1, %c0_i32, %c0_i32_0 : i32, i32, i32
  }
  func.func @transform_6(%arg0: i32, %arg1: i32) -> (i32, i32, i32) {
    %c0_i32 = arith.constant 0 : i32
    %c0_i32_0 = arith.constant 0 : i32
    %c0_i32_1 = arith.constant 0 : i32
    return %arg1, %c0_i32, %c0_i32_0 : i32, i32, i32
  }
  func.func @transform_7(%arg0: i32, %arg1: i32) -> (i32, i32, i32) {
    %c0_i32 = arith.constant 0 : i32
    %c0_i32_0 = arith.constant 0 : i32
    %c0_i32_1 = arith.constant 0 : i32
    return %arg1, %c0_i32, %c0_i32_0 : i32, i32, i32
  }
  func.func @transform_8(%arg0: i32, %arg1: i32) -> (i32, i32, i32) {
    %c0_i32 = arith.constant 0 : i32
    %c0_i32_0 = arith.constant 0 : i32
    %c0_i32_1 = arith.constant 0 : i32
    return %arg1, %c0_i32, %c0_i32_0 : i32, i32, i32
  }
  func.func @transform_9(%arg0: i32, %arg1: i32) -> (i32, i32, i32) {
    %c0_i32 = arith.constant 0 : i32
    %c0_i32_0 = arith.constant 0 : i32
    %c0_i32_1 = arith.constant 0 : i32
    return %arg1, %c0_i32, %c0_i32_0 : i32, i32, i32
  }
  func.func @transform_10(%arg0: i32, %arg1: i32) -> (i32, i32, i32) {
    %c0_i32 = arith.constant 0 : i32
    %c0_i32_0 = arith.constant 0 : i32
    %c0_i32_1 = arith.constant 0 : i32
    return %arg1, %c0_i32, %c0_i32_0 : i32, i32, i32
  }
  func.func @transform_11(%arg0: i32, %arg1: i32) -> (i32, i32, i32) {
    %c0_i32 = arith.constant 0 : i32
    %c0_i32_0 = arith.constant 0 : i32
    %c0_i32_1 = arith.constant 0 : i32
    return %arg1, %c0_i32, %c0_i32_0 : i32, i32, i32
  }
  func.func @transform_12(%arg0: i32, %arg1: i32) -> (i32, i32) {
    %c0_i32 = arith.constant 0 : i32
    %c0_i32_0 = arith.constant 0 : i32
    %c0_i32_1 = arith.constant 0 : i32
    return %c0_i32, %c0_i32_0 : i32, i32
  }
  func.func @transform_13(%arg0: i32, %arg1: i32) -> (i32, i32) {
    %c0_i32 = arith.constant 0 : i32
    %c0_i32_0 = arith.constant 0 : i32
    %c0_i32_1 = arith.constant 0 : i32
    return %c0_i32, %c0_i32_0 : i32, i32
  }
  func.func @transform_14(%arg0: i32, %arg1: i32) -> (i32, i32, i32) {
    %c0_i32 = arith.constant 0 : i32
    %c0_i32_0 = arith.constant 0 : i32
    %c0_i32_1 = arith.constant 0 : i32
    return %arg0, %c0_i32, %c0_i32_0 : i32, i32, i32
  }
}

</mosaic_0001>

<bundles_post_ra>
// kernel: transformer_forward.3
= control target key start
LH: loop header
LB: loop body
LE: loop exit
PB: predicated region body
PF: predicated region fallthrough
CT: control target
= control target key end

     0   :  { %v1023_v2 = vmov 0   ;;  %s1361_s0 = inlined_call_operand.vmem [shape: bf16[512,128], index: 0, kind: input, shape index: {}]   ;;  %s1362_s1 = inlined_call_operand.vmem [shape: bf16[128,256], index: 1, kind: input, shape index: {}]   ;;  %s1363_s2 = inlined_call_operand.vmem [shape: f32[1,256], index: 2, kind: input, shape index: {}]   ;;  %s1364_s3 = inlined_call_operand.hbm [shape: f32[512,256], index: 3, kind: output, shape index: {}]  }
   0x1   :  { %v945_v0 = vld [vmem:[%s1362_s1 + $0x74] ss:$8 sps:$4 sm:$0xff]   ;;  %v947_v1 = vld [vmem:[%s1362_s1 + $0x70] ss:$8 sps:$4 sm:$0xff]   ;;  %412 = vmatprep.mubr.bf16.mxu0 %v1023_v2  ;;  %572 = vmatprep.mubr.bf16.mxu1 %v1023_v2  ;;  %v948_v3 = vld [vmem:[%s1362_s1 + $0x64] ss:$8 sps:$4 sm:$0xff]  }
   0x2   :  { %380 = vmatprep.subr.bf16.mxu0 %v945_v0  ;;  %925 = vmatprep.subr.bf16.mxu1 %v945_v0  ;;  %v950_v4 = vld [vmem:[%s1362_s1 + $0x60] ss:$8 sps:$4 sm:$0xff]   ;;  %v951_v5 = vld [vmem:[%s1362_s1 + $0x54] ss:$8 sps:$4 sm:$0xff]   ;;  %v953_v6 = vld [vmem:[%s1362_s1 + $0x50] ss:$8 sps:$4 sm:$0xff]  }
   0x3   :  { %381 = vmatpush1.bf16.msra.mxu0 %v947_v1  ;;  %933 = vmatpush1.bf16.msra.mxu1 %v947_v1  ;;  %v954_v7 = vld [vmem:[%s1362_s1 + $0x44] ss:$8 sps:$4 sm:$0xff]   ;;  %v956_v8 = vld [vmem:[%s1362_s1 + $0x40] ss:$8 sps:$4 sm:$0xff]   ;;  %v957_v9 = vld [vmem:[%s1362_s1 + $0x34] ss:$8 sps:$4 sm:$0xff]  }
   0x4   :  { %382 = vmatprep.subr.bf16.mxu0 %v948_v3  ;;  %926 = vmatprep.subr.bf16.mxu1 %v948_v3  ;;  %v959_v10 = vld [vmem:[%s1362_s1 + $0x30] ss:$8 sps:$4 sm:$0xff]   ;;  %v960_v11 = vld [vmem:[%s1362_s1 + $0x24] ss:$8 sps:$4 sm:$0xff]   ;;  %v962_v12 = vld [vmem:[%s1362_s1 + $0x20] ss:$8 sps:$4 sm:$0xff]  }
   0x5   :  { %v963_v13 = vld [vmem:[%s1362_s1 + $0x14] ss:$8 sps:$4 sm:$0xff]   ;;  %v965_v14 = vld [vmem:[%s1362_s1 + $0x10] ss:$8 sps:$4 sm:$0xff]   ;;  %v966_v15 = vld [vmem:[%s1362_s1 + $0x4] ss:$8 sps:$4 sm:$0xff]  }
   0x6   :  { %v968_v16 = vld [vmem:[%s1362_s1] ss:$8 sps:$4 sm:$0xff]  }
   0x7   :  { %383 = vmatpush1.bf16.msra.mxu0 %v950_v4  ;;  %934 = vmatpush1.bf16.msra.mxu1 %v950_v4  ;;  %v969_v17 = vld [vmem:[%s1361_s0] sm:$0xff]   ;;  %v971_v19 = vld [vmem:[%s1361_s0 + $0x8] sm:$0xff]  }
   0x8   :  { %384 = vmatprep.subr.bf16.mxu0 %v951_v5  ;;  %927 = vmatprep.subr.bf16.mxu1 %v951_v5  ;;  %v970_v18 = vld [vmem:[%s1361_s0 + $0x80] sm:$0xff]   ;;  %v972_v20 = vld [vmem:[%s1361_s0 + $0x88] sm:$0xff]  }
   0xb   :  { %385 = vmatpush1.bf16.msra.mxu0 %v953_v6  ;;  %935 = vmatpush1.bf16.msra.mxu1 %v953_v6 }
   0xc   :  { %386 = vmatprep.subr.bf16.mxu0 %v954_v7  ;;  %928 = vmatprep.subr.bf16.mxu1 %v954_v7 }
   0xf   :  { %387 = vmatpush1.bf16.msra.mxu0 %v956_v8  ;;  %936 = vmatpush1.bf16.msra.mxu1 %v956_v8 }
  0x10   :  { %388 = vmatprep.subr.bf16.mxu0 %v957_v9  ;;  %929 = vmatprep.subr.bf16.mxu1 %v957_v9 }
  0x13   :  { %389 = vmatpush1.bf16.msra.mxu0 %v959_v10  ;;  %937 = vmatpush1.bf16.msra.mxu1 %v959_v10 }
  0x14   :  { %390 = vmatprep.subr.bf16.mxu0 %v960_v11  ;;  %930 = vmatprep.subr.bf16.mxu1 %v960_v11 }
  0x17   :  { %391 = vmatpush1.bf16.msra.mxu0 %v962_v12  ;;  %938 = vmatpush1.bf16.msra.mxu1 %v962_v12 }
  0x18   :  { %392 = vmatprep.subr.bf16.mxu0 %v963_v13  ;;  %931 = vmatprep.subr.bf16.mxu1 %v963_v13 }
  0x1b   :  { %393 = vmatpush1.bf16.msra.mxu0 %v965_v14  ;;  %939 = vmatpush1.bf16.msra.mxu1 %v965_v14 }
  0x1c   :  { %394 = vmatprep.subr.bf16.mxu0 %v966_v15  ;;  %932 = vmatprep.subr.bf16.mxu1 %v966_v15 }
  0x1f   :  { %395 = vmatpush1.bf16.msra.mxu0 %v968_v16  ;;  %940 = vmatpush1.bf16.msra.mxu1 %v968_v16 }
  0x22   :  { %413 = vmatmul.mubr.bf16.vlgmr.msra.gmra.mxu0 %v969_v17  ;;  %573 = vmatmul.mubr.bf16.vlgmr.msra.gmra.mxu1 %v970_v18 }
  0x23   :  { %422 = vmatprep.mubr.bf16.mxu0 %v1023_v2  ;;  %582 = vmatprep.mubr.bf16.mxu1 %v1023_v2 }
  0x2a   :  { %423 = vmatmul.mubr.bf16.gmra.mxu0 %v971_v19  ;;  %583 = vmatmul.mubr.bf16.gmra.mxu1 %v972_v20 }
  0x2b   :  { %432 = vmatprep.mubr.bf16.mxu0 %v1023_v2  ;;  %592 = vmatprep.mubr.bf16.mxu1 %v1023_v2 }
  0x2c   :  { %8 = vsyncpa [#allocation3], 0  ;;  %v973_v21 = vld [vmem:[%s1361_s0 + $0x10] sm:$0xff]   ;;  %v975_v23 = vld [vmem:[%s1361_s0 + $0x18] sm:$0xff]   ;;  %v98_v49 = vlaneseq }
  0x2d   :  { %v974_v22 = vld [vmem:[%s1361_s0 + $0x90] sm:$0xff]   ;;  %v976_v24 = vld [vmem:[%s1361_s0 + $0x98] sm:$0xff]   ;;  %v977_v25 = vld [vmem:[%s1361_s0 + $0x20] sm:$0xff]  }
  0x2e   :  { %v978_v26 = vld [vmem:[%s1361_s0 + $0xa0] sm:$0xff]   ;;  %v979_v27 = vld [vmem:[%s1361_s0 + $0x28] sm:$0xff]   ;;  %v981_v29 = vld [vmem:[%s1361_s0 + $0x30] sm:$0xff]   ;;  %v99_v50 = vshrl.u32 %v98_v49, 7 }
  0x2f   :  { %v980_v28 = vld [vmem:[%s1361_s0 + $0xa8] sm:$0xff]   ;;  %v982_v30 = vld [vmem:[%s1361_s0 + $0xb0] sm:$0xff]   ;;  %v983_v31 = vld [vmem:[%s1361_s0 + $0x38] sm:$0xff]  }
  0x30   :  { %v984_v32 = vld [vmem:[%s1361_s0 + $0xb8] sm:$0xff]   ;;  %v985_v33 = vld [vmem:[%s1361_s0 + $0x40] sm:$0xff]   ;;  %v987_v35 = vld [vmem:[%s1361_s0 + $0x48] sm:$0xff]   ;;  %v100_v51 = vsub.s32 0, %v99_v50  ;;  %v104_v53 = vsub.s32 1, %v99_v50 }
  0x31   :  { %v986_v34 = vld [vmem:[%s1361_s0 + $0xc0] sm:$0xff]   ;;  %v988_v36 = vld [vmem:[%s1361_s0 + $0xc8] sm:$0xff]   ;;  %v989_v37 = vld [vmem:[%s1361_s0 + $0x50] sm:$0xff]  }
  0x32   :  { %433 = vmatmul.mubr.bf16.gmra.mxu0 %v973_v21  ;;  %593 = vmatmul.mubr.bf16.gmra.mxu1 %v974_v22  ;;  %v990_v38 = vld [vmem:[%s1361_s0 + $0xd0] sm:$0xff]   ;;  %v991_v39 = vld [vmem:[%s1361_s0 + $0x58] sm:$0xff]   ;;  %v993_v41 = vld [vmem:[%s1361_s0 + $0x60] sm:$0xff]  }
  0x33   :  { %442 = vmatprep.mubr.bf16.mxu0 %v1023_v2  ;;  %602 = vmatprep.mubr.bf16.mxu1 %v1023_v2  ;;  %v992_v40 = vld [vmem:[%s1361_s0 + $0xd8] sm:$0xff]   ;;  %v994_v42 = vld [vmem:[%s1361_s0 + $0xe0] sm:$0xff]   ;;  %v995_v43 = vld [vmem:[%s1361_s0 + $0x68] sm:$0xff]  }
  0x34   :  { %v996_v44 = vld [vmem:[%s1361_s0 + $0xe8] sm:$0xff]   ;;  %v997_v45 = vld [vmem:[%s1361_s0 + $0x70] sm:$0xff]   ;;  %v999_v47 = vld [vmem:[%s1361_s0 + $0x78] sm:$0xff]  }
  0x35   :  { %v998_v46 = vld [vmem:[%s1361_s0 + $0xf0] sm:$0xff]   ;;  %v1000_v48 = vld [vmem:[%s1361_s0 + $0xf8] sm:$0xff]   ;;  %v96_v52 = vld [vmem:[%s1363_s2] sm:$0x3]  ;;  %s1024_s0 = smov [#allocation2]  }
  0x36   :  { %v1226_v54 = vrot.slane %v96_v52, %v100_v51  ;;  %v1228_v55 = vrot.slane %v96_v52, %v104_v53  ;;  %s866_s2 = sshll.u32 %s1024_s0, 4  ;;  %s867_s2 = int_to_ptr.vmem [resolvable:$true] %s866_s2 }
  0x37   :  { %s1001_s26 = scalar_lea.vmem %s867_s2, 16384  ;;  %p1006_p1 = scmp.lt.s32.totalorder %s867_s2, %s867_s2 }
  0x38   :  { %p1002_p0 = scmp.ne.s32.totalorder %s867_s2, %s1001_s26  ;;  %p1007_p2 = scmp.lt.s32.totalorder %s1001_s26, %s1001_s26 }
  0x3a   :  { %443 = vmatmul.mubr.bf16.gmra.mxu0 %v975_v23  ;;  %603 = vmatmul.mubr.bf16.gmra.mxu1 %v976_v24  ;;  %p1008_p3 = por %p1007_p2, %p1006_p1 }
  0x3b   :  { %452 = vmatprep.mubr.bf16.mxu0 %v1023_v2  ;;  %612 = vmatprep.mubr.bf16.mxu1 %v1023_v2 }
  0x3c   :  { %p1009_p4 = pnand %p1008_p3, %p1002_p0 }
  0x42   :  { %453 = vmatmul.mubr.bf16.gmra.mxu0 %v977_v25  ;;  %613 = vmatmul.mubr.bf16.gmra.mxu1 %v978_v26 }
  0x43   :  { %462 = vmatprep.mubr.bf16.mxu0 %v1023_v2  ;;  %622 = vmatprep.mubr.bf16.mxu1 %v1023_v2 }
  0x4a   :  { %463 = vmatmul.mubr.bf16.gmra.mxu0 %v979_v27  ;;  %623 = vmatmul.mubr.bf16.gmra.mxu1 %v980_v28 }
  0x4b   :  { %472 = vmatprep.mubr.bf16.mxu0 %v1023_v2  ;;  %632 = vmatprep.mubr.bf16.mxu1 %v1023_v2 }
  0x52   :  { %473 = vmatmul.mubr.bf16.gmra.mxu0 %v981_v29  ;;  %633 = vmatmul.mubr.bf16.gmra.mxu1 %v982_v30 }
  0x53   :  { %482 = vmatprep.mubr.bf16.mxu0 %v1023_v2  ;;  %642 = vmatprep.mubr.bf16.mxu1 %v1023_v2 }
  0x5a   :  { %483 = vmatmul.mubr.bf16.gmra.mxu0 %v983_v31  ;;  %643 = vmatmul.mubr.bf16.gmra.mxu1 %v984_v32 }
  0x5b   :  { %492 = vmatprep.mubr.bf16.mxu0 %v1023_v2  ;;  %652 = vmatprep.mubr.bf16.mxu1 %v1023_v2 }
  0x62   :  { %493 = vmatmul.mubr.bf16.gmra.mxu0 %v985_v33  ;;  %653 = vmatmul.mubr.bf16.gmra.mxu1 %v986_v34 }
  0x63   :  { %502 = vmatprep.mubr.bf16.mxu0 %v1023_v2  ;;  %662 = vmatprep.mubr.bf16.mxu1 %v1023_v2 }
  0x6a   :  { %503 = vmatmul.mubr.bf16.gmra.mxu0 %v987_v35  ;;  %663 = vmatmul.mubr.bf16.gmra.mxu1 %v988_v36 }
  0x6b   :  { %512 = vmatprep.mubr.bf16.mxu0 %v1023_v2  ;;  %672 = vmatprep.mubr.bf16.mxu1 %v1023_v2 }
  0x72   :  { %513 = vmatmul.mubr.bf16.gmra.mxu0 %v989_v37  ;;  %673 = vmatmul.mubr.bf16.gmra.mxu1 %v990_v38 }
  0x73   :  { %522 = vmatprep.mubr.bf16.mxu0 %v1023_v2  ;;  %682 = vmatprep.mubr.bf16.mxu1 %v1023_v2 }
  0x7a   :  { %523 = vmatmul.mubr.bf16.gmra.mxu0 %v991_v39  ;;  %683 = vmatmul.mubr.bf16.gmra.mxu1 %v992_v40 }
  0x7b   :  { %532 = vmatprep.mubr.bf16.mxu0 %v1023_v2  ;;  %692 = vmatprep.mubr.bf16.mxu1 %v1023_v2 }
  0x82   :  { %533 = vmatmul.mubr.bf16.gmra.mxu0 %v993_v41  ;;  %693 = vmatmul.mubr.bf16.gmra.mxu1 %v994_v42 }
  0x83   :  { %542 = vmatprep.mubr.bf16.mxu0 %v1023_v2  ;;  %702 = vmatprep.mubr.bf16.mxu1 %v1023_v2 }
  0x8a   :  { %543 = vmatmul.mubr.bf16.gmra.mxu0 %v995_v43  ;;  %703 = vmatmul.mubr.bf16.gmra.mxu1 %v996_v44 }
  0x8b   :  { %552 = vmatprep.mubr.bf16.mxu0 %v1023_v2  ;;  %712 = vmatprep.mubr.bf16.mxu1 %v1023_v2 }
  0x92   :  { %553 = vmatmul.mubr.bf16.gmra.mxu0 %v997_v45  ;;  %713 = vmatmul.mubr.bf16.gmra.mxu1 %v998_v46 }
  0x93   :  { %562 = vmatprep.mubr.bf16.mxu0 %v1023_v2  ;;  %722 = vmatprep.mubr.bf16.mxu1 %v1023_v2 }
  0x9a   :  { %563 = vmatmul.mubr.bf16.gmra.mxu0 %v999_v47  ;;  %723 = vmatmul.mubr.bf16.gmra.mxu1 %v1000_v48 }
  0xe2   :  { %v414_v56 = vpop.f32.mrf.mxu0  ;;  %v574_v57 = vpop.f32.mrf.mxu1 }
  0xe3   :  { %v415_v58 = vadd.f32 %v414_v56, %v1226_v54  ;;  %v575_v59 = vadd.f32 %v574_v57, %v1226_v54 }
  0xe4   :  { %v416_v60 = vpop.f32.mrf.mxu0  ;;  %v576_v61 = vpop.f32.mrf.mxu1 }
  0xe5   :  { %733 = vst [vmem:[#allocation2] sm:$0xff] %v415_v58  ;;  %797 = vst [vmem:[#allocation2 + $0x200] sm:$0xff] %v575_v59  ;;  %v417_v62 = vadd.f32 %v416_v60, %v1228_v55  ;;  %v577_v63 = vadd.f32 %v576_v61, %v1228_v55 }
  0xe6   :  { %v418_v0 = vpop.f32.mrf.mxu0  ;;  %v578_v1 = vpop.f32.mrf.mxu1 }
  0xe7   :  { %734 = vst [vmem:[#allocation2 + $0x8] sm:$0xff] %v417_v62  ;;  %798 = vst [vmem:[#allocation2 + $0x208] sm:$0xff] %v577_v63  ;;  %v419_v2 = vadd.f32 %v418_v0, %v1226_v54  ;;  %v579_v3 = vadd.f32 %v578_v1, %v1226_v54 }
  0xe8   :  { %v420_v4 = vpop.f32.mrf.mxu0  ;;  %v580_v5 = vpop.f32.mrf.mxu1 }
  0xe9   :  { %735 = vst [vmem:[#allocation2 + $0x10] sm:$0xff] %v419_v2  ;;  %799 = vst [vmem:[#allocation2 + $0x210] sm:$0xff] %v579_v3  ;;  %v421_v6 = vadd.f32 %v420_v4, %v1228_v55  ;;  %v581_v7 = vadd.f32 %v580_v5, %v1228_v55 }
  0xea   :  { %v424_v8 = vpop.f32.mrf.mxu0  ;;  %v584_v9 = vpop.f32.mrf.mxu1 }
  0xeb   :  { %736 = vst [vmem:[#allocation2 + $0x18] sm:$0xff] %v421_v6  ;;  %800 = vst [vmem:[#allocation2 + $0x218] sm:$0xff] %v581_v7  ;;  %v425_v10 = vadd.f32 %v424_v8, %v1226_v54  ;;  %v585_v11 = vadd.f32 %v584_v9, %v1226_v54 }
  0xec   :  { %v426_v12 = vpop.f32.mrf.mxu0  ;;  %v586_v13 = vpop.f32.mrf.mxu1 }
  0xed   :  { %737 = vst [vmem:[#allocation2 + $0x20] sm:$0xff] %v425_v10  ;;  %801 = vst [vmem:[#allocation2 + $0x220] sm:$0xff] %v585_v11  ;;  %v427_v14 = vadd.f32 %v426_v12, %v1228_v55  ;;  %v587_v15 = vadd.f32 %v586_v13, %v1228_v55 }
  0xee   :  { %v428_v16 = vpop.f32.mrf.mxu0  ;;  %v588_v17 = vpop.f32.mrf.mxu1 }
  0xef   :  { %738 = vst [vmem:[#allocation2 + $0x28] sm:$0xff] %v427_v14  ;;  %802 = vst [vmem:[#allocation2 + $0x228] sm:$0xff] %v587_v15  ;;  %v429_v18 = vadd.f32 %v428_v16, %v1226_v54  ;;  %v589_v19 = vadd.f32 %v588_v17, %v1226_v54 }
  0xf0   :  { %v430_v20 = vpop.f32.mrf.mxu0  ;;  %v590_v21 = vpop.f32.mrf.mxu1 }
  0xf1   :  { %739 = vst [vmem:[#allocation2 + $0x30] sm:$0xff] %v429_v18  ;;  %803 = vst [vmem:[#allocation2 + $0x230] sm:$0xff] %v589_v19  ;;  %v431_v22 = vadd.f32 %v430_v20, %v1228_v55  ;;  %v591_v23 = vadd.f32 %v590_v21, %v1228_v55 }
  0xf2   :  { %v434_v24 = vpop.f32.mrf.mxu0  ;;  %v594_v25 = vpop.f32.mrf.mxu1 }
  0xf3   :  { %740 = vst [vmem:[#allocation2 + $0x38] sm:$0xff] %v431_v22  ;;  %804 = vst [vmem:[#allocation2 + $0x238] sm:$0xff] %v591_v23  ;;  %v435_v26 = vadd.f32 %v434_v24, %v1226_v54  ;;  %v595_v27 = vadd.f32 %v594_v25, %v1226_v54 }
  0xf4   :  { %v436_v28 = vpop.f32.mrf.mxu0  ;;  %v596_v29 = vpop.f32.mrf.mxu1 }
  0xf5   :  { %741 = vst [vmem:[#allocation2 + $0x40] sm:$0xff] %v435_v26  ;;  %805 = vst [vmem:[#allocation2 + $0x240] sm:$0xff] %v595_v27  ;;  %v437_v30 = vadd.f32 %v436_v28, %v1228_v55  ;;  %v597_v31 = vadd.f32 %v596_v29, %v1228_v55 }
  0xf6   :  { %v438_v32 = vpop.f32.mrf.mxu0  ;;  %v598_v33 = vpop.f32.mrf.mxu1 }
  0xf7   :  { %742 = vst [vmem:[#allocation2 + $0x48] sm:$0xff] %v437_v30  ;;  %806 = vst [vmem:[#allocation2 + $0x248] sm:$0xff] %v597_v31  ;;  %v439_v34 = vadd.f32 %v438_v32, %v1226_v54  ;;  %v599_v35 = vadd.f32 %v598_v33, %v1226_v54 }
  0xf8   :  { %v440_v36 = vpop.f32.mrf.mxu0  ;;  %v600_v37 = vpop.f32.mrf.mxu1 }
  0xf9   :  { %743 = vst [vmem:[#allocation2 + $0x50] sm:$0xff] %v439_v34  ;;  %807 = vst [vmem:[#allocation2 + $0x250] sm:$0xff] %v599_v35  ;;  %v441_v38 = vadd.f32 %v440_v36, %v1228_v55  ;;  %v601_v39 = vadd.f32 %v600_v37, %v1228_v55 }
  0xfa   :  { %v444_v40 = vpop.f32.mrf.mxu0  ;;  %v604_v41 = vpop.f32.mrf.mxu1 }
  0xfb   :  { %744 = vst [vmem:[#allocation2 + $0x58] sm:$0xff] %v441_v38  ;;  %808 = vst [vmem:[#allocation2 + $0x258] sm:$0xff] %v601_v39  ;;  %v445_v42 = vadd.f32 %v444_v40, %v1226_v54  ;;  %v605_v43 = vadd.f32 %v604_v41, %v1226_v54 }
  0xfc   :  { %v446_v44 = vpop.f32.mrf.mxu0  ;;  %v606_v45 = vpop.f32.mrf.mxu1 }
  0xfd   :  { %745 = vst [vmem:[#allocation2 + $0x60] sm:$0xff] %v445_v42  ;;  %809 = vst [vmem:[#allocation2 + $0x260] sm:$0xff] %v605_v43  ;;  %v447_v46 = vadd.f32 %v446_v44, %v1228_v55  ;;  %v607_v47 = vadd.f32 %v606_v45, %v1228_v55 }
  0xfe   :  { %v448_v48 = vpop.f32.mrf.mxu0  ;;  %v608_v49 = vpop.f32.mrf.mxu1 }
  0xff   :  { %746 = vst [vmem:[#allocation2 + $0x68] sm:$0xff] %v447_v46  ;;  %810 = vst [vmem:[#allocation2 + $0x268] sm:$0xff] %v607_v47  ;;  %v449_v50 = vadd.f32 %v448_v48, %v1226_v54  ;;  %v609_v51 = vadd.f32 %v608_v49, %v1226_v54 }
 0x100   :  { %v450_v52 = vpop.f32.mrf.mxu0  ;;  %v610_v53 = vpop.f32.mrf.mxu1 }
 0x101   :  { %747 = vst [vmem:[#allocation2 + $0x70] sm:$0xff] %v449_v50  ;;  %811 = vst [vmem:[#allocation2 + $0x270] sm:$0xff] %v609_v51  ;;  %v451_v56 = vadd.f32 %v450_v52, %v1228_v55  ;;  %v611_v57 = vadd.f32 %v610_v53, %v1228_v55 }
 0x102   :  { %v454_v58 = vpop.f32.mrf.mxu0  ;;  %v614_v59 = vpop.f32.mrf.mxu1 }
 0x103   :  { %748 = vst [vmem:[#allocation2 + $0x78] sm:$0xff] %v451_v56  ;;  %812 = vst [vmem:[#allocation2 + $0x278] sm:$0xff] %v611_v57  ;;  %v455_v60 = vadd.f32 %v454_v58, %v1226_v54  ;;  %v615_v61 = vadd.f32 %v614_v59, %v1226_v54 }
 0x104   :  { %v456_v62 = vpop.f32.mrf.mxu0  ;;  %v616_v63 = vpop.f32.mrf.mxu1 }
 0x105   :  { %749 = vst [vmem:[#allocation2 + $0x80] sm:$0xff] %v455_v60  ;;  %813 = vst [vmem:[#allocation2 + $0x280] sm:$0xff] %v615_v61  ;;  %v457_v0 = vadd.f32 %v456_v62, %v1228_v55  ;;  %v617_v1 = vadd.f32 %v616_v63, %v1228_v55 }
 0x106   :  { %v458_v2 = vpop.f32.mrf.mxu0  ;;  %v618_v3 = vpop.f32.mrf.mxu1 }
 0x107   :  { %750 = vst [vmem:[#allocation2 + $0x88] sm:$0xff] %v457_v0  ;;  %814 = vst [vmem:[#allocation2 + $0x288] sm:$0xff] %v617_v1  ;;  %v459_v4 = vadd.f32 %v458_v2, %v1226_v54  ;;  %v619_v5 = vadd.f32 %v618_v3, %v1226_v54 }
 0x108   :  { %v460_v6 = vpop.f32.mrf.mxu0  ;;  %v620_v7 = vpop.f32.mrf.mxu1 }
 0x109   :  { %751 = vst [vmem:[#allocation2 + $0x90] sm:$0xff] %v459_v4  ;;  %815 = vst [vmem:[#allocation2 + $0x290] sm:$0xff] %v619_v5  ;;  %v461_v8 = vadd.f32 %v460_v6, %v1228_v55  ;;  %v621_v9 = vadd.f32 %v620_v7, %v1228_v55 }
 0x10a   :  { %v464_v10 = vpop.f32.mrf.mxu0  ;;  %v624_v11 = vpop.f32.mrf.mxu1 }
 0x10b   :  { %752 = vst [vmem:[#allocation2 + $0x98] sm:$0xff] %v461_v8  ;;  %816 = vst [vmem:[#allocation2 + $0x298] sm:$0xff] %v621_v9  ;;  %v465_v12 = vadd.f32 %v464_v10, %v1226_v54  ;;  %v625_v13 = vadd.f32 %v624_v11, %v1226_v54 }
 0x10c   :  { %v466_v14 = vpop.f32.mrf.mxu0  ;;  %v626_v15 = vpop.f32.mrf.mxu1 }
 0x10d   :  { %753 = vst [vmem:[#allocation2 + $0xa0] sm:$0xff] %v465_v12  ;;  %817 = vst [vmem:[#allocation2 + $0x2a0] sm:$0xff] %v625_v13  ;;  %v467_v16 = vadd.f32 %v466_v14, %v1228_v55  ;;  %v627_v17 = vadd.f32 %v626_v15, %v1228_v55 }
 0x10e   :  { %v468_v18 = vpop.f32.mrf.mxu0  ;;  %v628_v19 = vpop.f32.mrf.mxu1 }
 0x10f   :  { %754 = vst [vmem:[#allocation2 + $0xa8] sm:$0xff] %v467_v16  ;;  %818 = vst [vmem:[#allocation2 + $0x2a8] sm:$0xff] %v627_v17  ;;  %v469_v20 = vadd.f32 %v468_v18, %v1226_v54  ;;  %v629_v21 = vadd.f32 %v628_v19, %v1226_v54 }
 0x110   :  { %v470_v22 = vpop.f32.mrf.mxu0  ;;  %v630_v23 = vpop.f32.mrf.mxu1 }
 0x111   :  { %755 = vst [vmem:[#allocation2 + $0xb0] sm:$0xff] %v469_v20  ;;  %819 = vst [vmem:[#allocation2 + $0x2b0] sm:$0xff] %v629_v21  ;;  %v471_v24 = vadd.f32 %v470_v22, %v1228_v55  ;;  %v631_v25 = vadd.f32 %v630_v23, %v1228_v55 }
 0x112   :  { %v474_v26 = vpop.f32.mrf.mxu0  ;;  %v634_v27 = vpop.f32.mrf.mxu1 }
 0x113   :  { %756 = vst [vmem:[#allocation2 + $0xb8] sm:$0xff] %v471_v24  ;;  %820 = vst [vmem:[#allocation2 + $0x2b8] sm:$0xff] %v631_v25  ;;  %v475_v28 = vadd.f32 %v474_v26, %v1226_v54  ;;  %v635_v29 = vadd.f32 %v634_v27, %v1226_v54 }
 0x114   :  { %v476_v30 = vpop.f32.mrf.mxu0  ;;  %v636_v31 = vpop.f32.mrf.mxu1 }
 0x115   :  { %757 = vst [vmem:[#allocation2 + $0xc0] sm:$0xff] %v475_v28  ;;  %821 = vst [vmem:[#allocation2 + $0x2c0] sm:$0xff] %v635_v29  ;;  %v477_v32 = vadd.f32 %v476_v30, %v1228_v55  ;;  %v637_v33 = vadd.f32 %v636_v31, %v1228_v55 }
 0x116   :  { %v478_v34 = vpop.f32.mrf.mxu0  ;;  %v638_v35 = vpop.f32.mrf.mxu1 }
 0x117   :  { %758 = vst [vmem:[#allocation2 + $0xc8] sm:$0xff] %v477_v32  ;;  %822 = vst [vmem:[#allocation2 + $0x2c8] sm:$0xff] %v637_v33  ;;  %v479_v36 = vadd.f32 %v478_v34, %v1226_v54  ;;  %v639_v37 = vadd.f32 %v638_v35, %v1226_v54 }
 0x118   :  { %v480_v38 = vpop.f32.mrf.mxu0  ;;  %v640_v39 = vpop.f32.mrf.mxu1 }
 0x119   :  { %759 = vst [vmem:[#allocation2 + $0xd0] sm:$0xff] %v479_v36  ;;  %823 = vst [vmem:[#allocation2 + $0x2d0] sm:$0xff] %v639_v37  ;;  %v481_v40 = vadd.f32 %v480_v38, %v1228_v55  ;;  %v641_v41 = vadd.f32 %v640_v39, %v1228_v55 }
 0x11a   :  { %v484_v42 = vpop.f32.mrf.mxu0  ;;  %v644_v43 = vpop.f32.mrf.mxu1 }
 0x11b   :  { %760 = vst [vmem:[#allocation2 + $0xd8] sm:$0xff] %v481_v40  ;;  %824 = vst [vmem:[#allocation2 + $0x2d8] sm:$0xff] %v641_v41  ;;  %v485_v44 = vadd.f32 %v484_v42, %v1226_v54  ;;  %v645_v45 = vadd.f32 %v644_v43, %v1226_v54 }
 0x11c   :  { %v486_v46 = vpop.f32.mrf.mxu0  ;;  %v646_v47 = vpop.f32.mrf.mxu1 }
 0x11d   :  { %761 = vst [vmem:[#allocation2 + $0xe0] sm:$0xff] %v485_v44  ;;  %825 = vst [vmem:[#allocation2 + $0x2e0] sm:$0xff] %v645_v45  ;;  %v487_v48 = vadd.f32 %v486_v46, %v1228_v55  ;;  %v647_v49 = vadd.f32 %v646_v47, %v1228_v55 }
 0x11e   :  { %v488_v50 = vpop.f32.mrf.mxu0  ;;  %v648_v51 = vpop.f32.mrf.mxu1 }
 0x11f   :  { %762 = vst [vmem:[#allocation2 + $0xe8] sm:$0xff] %v487_v48  ;;  %826 = vst [vmem:[#allocation2 + $0x2e8] sm:$0xff] %v647_v49  ;;  %v489_v52 = vadd.f32 %v488_v50, %v1226_v54  ;;  %v649_v53 = vadd.f32 %v648_v51, %v1226_v54 }
 0x120   :  { %v490_v56 = vpop.f32.mrf.mxu0  ;;  %v650_v57 = vpop.f32.mrf.mxu1 }
 0x121   :  { %763 = vst [vmem:[#allocation2 + $0xf0] sm:$0xff] %v489_v52  ;;  %827 = vst [vmem:[#allocation2 + $0x2f0] sm:$0xff] %v649_v53  ;;  %v491_v58 = vadd.f32 %v490_v56, %v1228_v55  ;;  %v651_v59 = vadd.f32 %v650_v57, %v1228_v55 }
 0x122   :  { %v494_v60 = vpop.f32.mrf.mxu0  ;;  %v654_v61 = vpop.f32.mrf.mxu1 }
 0x123   :  { %764 = vst [vmem:[#allocation2 + $0xf8] sm:$0xff] %v491_v58  ;;  %828 = vst [vmem:[#allocation2 + $0x2f8] sm:$0xff] %v651_v59  ;;  %v495_v62 = vadd.f32 %v494_v60, %v1226_v54  ;;  %v655_v63 = vadd.f32 %v654_v61, %v1226_v54 }
 0x124   :  { %v496_v0 = vpop.f32.mrf.mxu0  ;;  %v656_v1 = vpop.f32.mrf.mxu1 }
 0x125   :  { %765 = vst [vmem:[#allocation2 + $0x100] sm:$0xff] %v495_v62  ;;  %829 = vst [vmem:[#allocation2 + $0x300] sm:$0xff] %v655_v63  ;;  %v497_v2 = vadd.f32 %v496_v0, %v1228_v55  ;;  %v657_v3 = vadd.f32 %v656_v1, %v1228_v55 }
 0x126   :  { %v498_v4 = vpop.f32.mrf.mxu0  ;;  %v658_v5 = vpop.f32.mrf.mxu1 }
 0x127   :  { %766 = vst [vmem:[#allocation2 + $0x108] sm:$0xff] %v497_v2  ;;  %830 = vst [vmem:[#allocation2 + $0x308] sm:$0xff] %v657_v3  ;;  %v499_v6 = vadd.f32 %v498_v4, %v1226_v54  ;;  %v659_v7 = vadd.f32 %v658_v5, %v1226_v54 }
 0x128   :  { %v500_v8 = vpop.f32.mrf.mxu0  ;;  %v660_v9 = vpop.f32.mrf.mxu1 }
 0x129   :  { %767 = vst [vmem:[#allocation2 + $0x110] sm:$0xff] %v499_v6  ;;  %831 = vst [vmem:[#allocation2 + $0x310] sm:$0xff] %v659_v7  ;;  %v501_v10 = vadd.f32 %v500_v8, %v1228_v55  ;;  %v661_v11 = vadd.f32 %v660_v9, %v1228_v55 }
 0x12a   :  { %v504_v12 = vpop.f32.mrf.mxu0  ;;  %v664_v13 = vpop.f32.mrf.mxu1 }
 0x12b   :  { %768 = vst [vmem:[#allocation2 + $0x118] sm:$0xff] %v501_v10  ;;  %832 = vst [vmem:[#allocation2 + $0x318] sm:$0xff] %v661_v11  ;;  %v505_v14 = vadd.f32 %v504_v12, %v1226_v54  ;;  %v665_v15 = vadd.f32 %v664_v13, %v1226_v54 }
 0x12c   :  { %v506_v16 = vpop.f32.mrf.mxu0  ;;  %v666_v17 = vpop.f32.mrf.mxu1 }
 0x12d   :  { %769 = vst [vmem:[#allocation2 + $0x120] sm:$0xff] %v505_v14  ;;  %833 = vst [vmem:[#allocation2 + $0x320] sm:$0xff] %v665_v15  ;;  %v507_v18 = vadd.f32 %v506_v16, %v1228_v55  ;;  %v667_v19 = vadd.f32 %v666_v17, %v1228_v55 }
 0x12e   :  { %v508_v20 = vpop.f32.mrf.mxu0  ;;  %v668_v21 = vpop.f32.mrf.mxu1 }
 0x12f   :  { %770 = vst [vmem:[#allocation2 + $0x128] sm:$0xff] %v507_v18  ;;  %834 = vst [vmem:[#allocation2 + $0x328] sm:$0xff] %v667_v19  ;;  %v509_v22 = vadd.f32 %v508_v20, %v1226_v54  ;;  %v669_v23 = vadd.f32 %v668_v21, %v1226_v54 }
 0x130   :  { %v510_v24 = vpop.f32.mrf.mxu0  ;;  %v670_v25 = vpop.f32.mrf.mxu1 }
 0x131   :  { %771 = vst [vmem:[#allocation2 + $0x130] sm:$0xff] %v509_v22  ;;  %835 = vst [vmem:[#allocation2 + $0x330] sm:$0xff] %v669_v23  ;;  %v511_v26 = vadd.f32 %v510_v24, %v1228_v55  ;;  %v671_v27 = vadd.f32 %v670_v25, %v1228_v55 }
 0x132   :  { %v514_v28 = vpop.f32.mrf.mxu0  ;;  %v674_v29 = vpop.f32.mrf.mxu1 }
 0x133   :  { %772 = vst [vmem:[#allocation2 + $0x138] sm:$0xff] %v511_v26  ;;  %836 = vst [vmem:[#allocation2 + $0x338] sm:$0xff] %v671_v27  ;;  %v515_v30 = vadd.f32 %v514_v28, %v1226_v54  ;;  %v675_v31 = vadd.f32 %v674_v29, %v1226_v54 }
 0x134   :  { %v516_v32 = vpop.f32.mrf.mxu0  ;;  %v676_v33 = vpop.f32.mrf.mxu1 }
 0x135   :  { %773 = vst [vmem:[#allocation2 + $0x140] sm:$0xff] %v515_v30  ;;  %837 = vst [vmem:[#allocation2 + $0x340] sm:$0xff] %v675_v31  ;;  %v517_v34 = vadd.f32 %v516_v32, %v1228_v55  ;;  %v677_v35 = vadd.f32 %v676_v33, %v1228_v55 }
 0x136   :  { %v518_v36 = vpop.f32.mrf.mxu0  ;;  %v678_v37 = vpop.f32.mrf.mxu1 }
 0x137   :  { %774 = vst [vmem:[#allocation2 + $0x148] sm:$0xff] %v517_v34  ;;  %838 = vst [vmem:[#allocation2 + $0x348] sm:$0xff] %v677_v35  ;;  %v519_v38 = vadd.f32 %v518_v36, %v1226_v54  ;;  %v679_v39 = vadd.f32 %v678_v37, %v1226_v54 }
 0x138   :  { %v520_v40 = vpop.f32.mrf.mxu0  ;;  %v680_v41 = vpop.f32.mrf.mxu1 }
 0x139   :  { %775 = vst [vmem:[#allocation2 + $0x150] sm:$0xff] %v519_v38  ;;  %839 = vst [vmem:[#allocation2 + $0x350] sm:$0xff] %v679_v39  ;;  %v521_v42 = vadd.f32 %v520_v40, %v1228_v55  ;;  %v681_v43 = vadd.f32 %v680_v41, %v1228_v55 }
 0x13a   :  { %v524_v44 = vpop.f32.mrf.mxu0  ;;  %v684_v45 = vpop.f32.mrf.mxu1 }
 0x13b   :  { %776 = vst [vmem:[#allocation2 + $0x158] sm:$0xff] %v521_v42  ;;  %840 = vst [vmem:[#allocation2 + $0x358] sm:$0xff] %v681_v43  ;;  %v525_v46 = vadd.f32 %v524_v44, %v1226_v54  ;;  %v685_v47 = vadd.f32 %v684_v45, %v1226_v54 }
 0x13c   :  { %v526_v48 = vpop.f32.mrf.mxu0  ;;  %v686_v49 = vpop.f32.mrf.mxu1 }
 0x13d   :  { %777 = vst [vmem:[#allocation2 + $0x160] sm:$0xff] %v525_v46  ;;  %841 = vst [vmem:[#allocation2 + $0x360] sm:$0xff] %v685_v47  ;;  %v527_v50 = vadd.f32 %v526_v48, %v1228_v55  ;;  %v687_v51 = vadd.f32 %v686_v49, %v1228_v55 }
 0x13e   :  { %v528_v52 = vpop.f32.mrf.mxu0  ;;  %v688_v53 = vpop.f32.mrf.mxu1 }
 0x13f   :  { %778 = vst [vmem:[#allocation2 + $0x168] sm:$0xff] %v527_v50  ;;  %842 = vst [vmem:[#allocation2 + $0x368] sm:$0xff] %v687_v51  ;;  %v529_v56 = vadd.f32 %v528_v52, %v1226_v54  ;;  %v689_v57 = vadd.f32 %v688_v53, %v1226_v54 }
 0x140   :  { %v530_v58 = vpop.f32.mrf.mxu0  ;;  %v690_v59 = vpop.f32.mrf.mxu1 }
 0x141   :  { %779 = vst [vmem:[#allocation2 + $0x170] sm:$0xff] %v529_v56  ;;  %843 = vst [vmem:[#allocation2 + $0x370] sm:$0xff] %v689_v57  ;;  %v531_v60 = vadd.f32 %v530_v58, %v1228_v55  ;;  %v691_v61 = vadd.f32 %v690_v59, %v1228_v55 }
 0x142   :  { %v534_v62 = vpop.f32.mrf.mxu0  ;;  %v694_v63 = vpop.f32.mrf.mxu1 }
 0x143   :  { %780 = vst [vmem:[#allocation2 + $0x178] sm:$0xff] %v531_v60  ;;  %844 = vst [vmem:[#allocation2 + $0x378] sm:$0xff] %v691_v61  ;;  %v535_v0 = vadd.f32 %v534_v62, %v1226_v54  ;;  %v695_v1 = vadd.f32 %v694_v63, %v1226_v54 }
 0x144   :  { %v536_v2 = vpop.f32.mrf.mxu0  ;;  %v696_v3 = vpop.f32.mrf.mxu1 }
 0x145   :  { %781 = vst [vmem:[#allocation2 + $0x180] sm:$0xff] %v535_v0  ;;  %845 = vst [vmem:[#allocation2 + $0x380] sm:$0xff] %v695_v1  ;;  %v537_v4 = vadd.f32 %v536_v2, %v1228_v55  ;;  %v697_v5 = vadd.f32 %v696_v3, %v1228_v55 }
 0x146   :  { %v538_v6 = vpop.f32.mrf.mxu0  ;;  %v698_v7 = vpop.f32.mrf.mxu1 }
 0x147   :  { %782 = vst [vmem:[#allocation2 + $0x188] sm:$0xff] %v537_v4  ;;  %846 = vst [vmem:[#allocation2 + $0x388] sm:$0xff] %v697_v5  ;;  %v539_v8 = vadd.f32 %v538_v6, %v1226_v54  ;;  %v699_v9 = vadd.f32 %v698_v7, %v1226_v54 }
 0x148   :  { %v540_v10 = vpop.f32.mrf.mxu0  ;;  %v700_v11 = vpop.f32.mrf.mxu1 }
 0x149   :  { %783 = vst [vmem:[#allocation2 + $0x190] sm:$0xff] %v539_v8  ;;  %847 = vst [vmem:[#allocation2 + $0x390] sm:$0xff] %v699_v9  ;;  %v541_v12 = vadd.f32 %v540_v10, %v1228_v55  ;;  %v701_v13 = vadd.f32 %v700_v11, %v1228_v55 }
 0x14a   :  { %v544_v14 = vpop.f32.mrf.mxu0  ;;  %v704_v15 = vpop.f32.mrf.mxu1 }
 0x14b   :  { %784 = vst [vmem:[#allocation2 + $0x198] sm:$0xff] %v541_v12  ;;  %848 = vst [vmem:[#allocation2 + $0x398] sm:$0xff] %v701_v13  ;;  %v545_v16 = vadd.f32 %v544_v14, %v1226_v54  ;;  %v705_v17 = vadd.f32 %v704_v15, %v1226_v54 }
 0x14c   :  { %v546_v18 = vpop.f32.mrf.mxu0  ;;  %v706_v19 = vpop.f32.mrf.mxu1 }
 0x14d   :  { %785 = vst [vmem:[#allocation2 + $0x1a0] sm:$0xff] %v545_v16  ;;  %849 = vst [vmem:[#allocation2 + $0x3a0] sm:$0xff] %v705_v17  ;;  %v547_v20 = vadd.f32 %v546_v18, %v1228_v55  ;;  %v707_v21 = vadd.f32 %v706_v19, %v1228_v55 }
 0x14e   :  { %v548_v22 = vpop.f32.mrf.mxu0  ;;  %v708_v23 = vpop.f32.mrf.mxu1 }
 0x14f   :  { %786 = vst [vmem:[#allocation2 + $0x1a8] sm:$0xff] %v547_v20  ;;  %850 = vst [vmem:[#allocation2 + $0x3a8] sm:$0xff] %v707_v21  ;;  %v549_v24 = vadd.f32 %v548_v22, %v1226_v54  ;;  %v709_v25 = vadd.f32 %v708_v23, %v1226_v54 }
 0x150   :  { %v550_v26 = vpop.f32.mrf.mxu0  ;;  %v710_v27 = vpop.f32.mrf.mxu1 }
 0x151   :  { %787 = vst [vmem:[#allocation2 + $0x1b0] sm:$0xff] %v549_v24  ;;  %851 = vst [vmem:[#allocation2 + $0x3b0] sm:$0xff] %v709_v25  ;;  %v551_v28 = vadd.f32 %v550_v26, %v1228_v55  ;;  %v711_v29 = vadd.f32 %v710_v27, %v1228_v55 }
 0x152   :  { %v554_v30 = vpop.f32.mrf.mxu0  ;;  %v714_v31 = vpop.f32.mrf.mxu1 }
 0x153   :  { %788 = vst [vmem:[#allocation2 + $0x1b8] sm:$0xff] %v551_v28  ;;  %852 = vst [vmem:[#allocation2 + $0x3b8] sm:$0xff] %v711_v29  ;;  %v555_v32 = vadd.f32 %v554_v30, %v1226_v54  ;;  %v715_v33 = vadd.f32 %v714_v31, %v1226_v54 }
 0x154   :  { %v556_v34 = vpop.f32.mrf.mxu0  ;;  %v716_v35 = vpop.f32.mrf.mxu1 }
 0x155   :  { %789 = vst [vmem:[#allocation2 + $0x1c0] sm:$0xff] %v555_v32  ;;  %853 = vst [vmem:[#allocation2 + $0x3c0] sm:$0xff] %v715_v33  ;;  %v557_v36 = vadd.f32 %v556_v34, %v1228_v55  ;;  %v717_v37 = vadd.f32 %v716_v35, %v1228_v55 }
 0x156   :  { %v558_v38 = vpop.f32.mrf.mxu0  ;;  %v718_v39 = vpop.f32.mrf.mxu1 }
 0x157   :  { %790 = vst [vmem:[#allocation2 + $0x1c8] sm:$0xff] %v557_v36  ;;  %854 = vst [vmem:[#allocation2 + $0x3c8] sm:$0xff] %v717_v37  ;;  %v559_v40 = vadd.f32 %v558_v38, %v1226_v54  ;;  %v719_v41 = vadd.f32 %v718_v39, %v1226_v54 }
 0x158   :  { %v560_v42 = vpop.f32.mrf.mxu0  ;;  %v720_v43 = vpop.f32.mrf.mxu1 }
 0x159   :  { %791 = vst [vmem:[#allocation2 + $0x1d0] sm:$0xff] %v559_v40  ;;  %855 = vst [vmem:[#allocation2 + $0x3d0] sm:$0xff] %v719_v41  ;;  %v561_v44 = vadd.f32 %v560_v42, %v1228_v55  ;;  %v721_v45 = vadd.f32 %v720_v43, %v1228_v55 }
 0x15a   :  { %v564_v46 = vpop.f32.mrf.mxu0  ;;  %v724_v47 = vpop.f32.mrf.mxu1 }
 0x15b   :  { %792 = vst [vmem:[#allocation2 + $0x1d8] sm:$0xff] %v561_v44  ;;  %856 = vst [vmem:[#allocation2 + $0x3d8] sm:$0xff] %v721_v45  ;;  %v565_v48 = vadd.f32 %v564_v46, %v1226_v54  ;;  %v725_v49 = vadd.f32 %v724_v47, %v1226_v54 }
 0x15c   :  { %v566_v50 = vpop.f32.mrf.mxu0  ;;  %v726_v51 = vpop.f32.mrf.mxu1 }
 0x15d   :  { %793 = vst [vmem:[#allocation2 + $0x1e0] sm:$0xff] %v565_v48  ;;  %857 = vst [vmem:[#allocation2 + $0x3e0] sm:$0xff] %v725_v49  ;;  %v567_v52 = vadd.f32 %v566_v50, %v1228_v55  ;;  %v727_v53 = vadd.f32 %v726_v51, %v1228_v55 }
 0x15e   :  { %v568_v56 = vpop.f32.mrf.mxu0  ;;  %v728_v57 = vpop.f32.mrf.mxu1 }
 0x15f   :  { %794 = vst [vmem:[#allocation2 + $0x1e8] sm:$0xff] %v567_v52  ;;  %858 = vst [vmem:[#allocation2 + $0x3e8] sm:$0xff] %v727_v53  ;;  %v569_v58 = vadd.f32 %v568_v56, %v1226_v54  ;;  %v729_v59 = vadd.f32 %v728_v57, %v1226_v54 }
 0x160   :  { %v570_v60 = vpop.f32.mrf.mxu0  ;;  %v730_v61 = vpop.f32.mrf.mxu1 }
 0x161   :  { %795 = vst [vmem:[#allocation2 + $0x1f0] sm:$0xff] %v569_v58  ;;  %859 = vst [vmem:[#allocation2 + $0x3f0] sm:$0xff] %v729_v59  ;;  %v571_v62 = vadd.f32 %v570_v60, %v1228_v55  ;;  %v731_v63 = vadd.f32 %v730_v61, %v1228_v55 }
 0x163   :  { %796 = vst [vmem:[#allocation2 + $0x1f8] sm:$0xff] %v571_v62  ;;  %860 = vst [vmem:[#allocation2 + $0x3f8] sm:$0xff] %v731_v63 }
 0x164   :  { %1012 = shalt.err (!%p1009_p4)
}
 0x165   :  { %s1025_s27 = smov 256   ;;  %s1026_s28 = smov 16  }
 0x166   :  { %872 = dma.vmem_to_hbm [thread:$0]  %s867_s2, 16384, %s1364_s3, [#allocation3], %s1025_s27, %s1025_s27, %s1026_s28  }
 0x167   :  { %1021 = dma.done.wait [#allocation3], 16384  }
 0x168   :  { %1022 = vsyncadd [#allocation3], 4294950912 }
 0x169   :  { %876 = vsyncpa [#allocation3], 1 }

// kernel: transformer_forward.2
= control target key start
LH: loop header
LB: loop body
LE: loop exit
PB: predicated region body
PF: predicated region fallthrough
CT: control target
= control target key end

     0   :  { %s12141_s29 = smov 0   ;;  %s12143_s30 = smov 0   ;;  %s16948_s0 = inlined_call_operand.vmem [shape: f32[4,128,128], index: 0, kind: input, shape index: {}]   ;;  %s16949_s1 = inlined_call_operand.vmem [shape: f32[2,1,128], index: 1, kind: input, shape index: {}]   ;;  %s16950_s2 = inlined_call_operand.vmem [shape: f32[2,1,128], index: 2, kind: input, shape index: {}]   ;;  %s16951_s3 = inlined_call_operand.vmem [shape: bf16[2,128,384], index: 3, kind: input, shape index: {}]   ;;  %s16952_s4 = inlined_call_operand.vmem [shape: bf16[2,128,128], index: 4, kind: input, shape index: {}]   ;;  %s16953_s5 = inlined_call_operand.vmem [shape: f32[2,1,128], index: 5, kind: input, shape index: {}]   ;;  %s16954_s6 = inlined_call_operand.vmem [shape: f32[2,1,128], index: 6, kind: input, shape index: {}]   ;;  %s16955_s7 = inlined_call_operand.vmem [shape: f32[2,1,128], index: 7, kind: input, shape index: {}]   ;;  %s16956_s8 = inlined_call_operand.vmem [shape: bf16[2,128,512], index: 8, kind: input, shape index: {}]   ;;  %s16957_s9 = inlined_call_operand.vmem [shape: f32[2,1,512], index: 9, kind: input, shape index: {}]   ;;  %s16958_s10 = inlined_call_operand.vmem [shape: bf16[2,512,128], index: 10, kind: input, shape index: {}]   ;;  %s16959_s11 = inlined_call_operand.vmem [shape: f32[2,1,128], index: 11, kind: input, shape index: {}]   ;;  %s16960_s12 = inlined_call_operand.vmem [shape: f32[1,128], index: 12, kind: input, shape index: {}]   ;;  %s16961_s13 = inlined_call_operand.vmem [shape: f32[1,128], index: 13, kind: input, shape index: {}]   ;;  %s16962_s14 = inlined_call_operand.vmem [shape: bf16[4,128,128], index: 14, kind: output, shape index: {}]  }
   0x1   :  { %17164 = sst [smem:[#allocation151_spill]] %s16948_s0  ;;  %s12145_s15 = smov 0  }
   0x2   :  { %17165 = sst [smem:[#allocation152_spill]] %s16949_s1  ;;  %s12147_s16 = smov 0  }
   0x3   :  { %17166 = sst [smem:[#allocation153_spill]] %s16950_s2  ;;  %s12149_s17 = smov 0  }
   0x4   :  { %17167 = sst [smem:[#allocation154_spill]] %s16951_s3 }
   0x5   :  { %17168 = sst [smem:[#allocation155_spill]] %s16960_s12 }
   0x6   :  { %17169 = sst [smem:[#allocation156_spill]] %s16961_s13 }
   0x7 LB: > { %17170 = sst [smem:[#allocation4_spill]] %s12051_s15  ;;  %s33_s18 = sadd.s32 1, %s12051_s15  ;;  %s12059_s17 = sphi %s12149_s17, %s24_s17   ;;  %s12055_s16 = sphi %s12147_s16, %s17816_s16   ;;  %s12051_s15 = sphi %s12145_s15, %s17815_s15   ;;  %s12047_s30 = sphi %s12143_s30, %s17814_s30   ;;  %s12043_s29 = sphi %s12141_s29, %s17813_s29  }
   0x8   : > { %17171 = sst [smem:[#allocation5_spill]] %s12055_s16  ;;  %s36_s19 = sadd.s32 1, %s12055_s16 }
   0x9   : > { %17172 = sst [smem:[#allocation6_spill]] %s12059_s17  ;;  %p34_p0 = scmp.ge.s32.totalorder %s33_s18, 2 }
   0xa   : > { %p9264_p1 = scmp.ge.s32.totalorder %s12059_s17, 1  ;;  %p523_p2 = scmp.lt.s32.totalorder %s12059_s17, 5 }
   0xb   : > { %s17818_s18 = smov (%p34_p0, %s33_s18), 0  ;;  %s17820_s19 = smov (!%p34_p0, %s36_s19), %s12055_s16 }
   0xc   : > { %17173 = sst [smem:[#allocation7_spill]] %s17818_s18  ;;  %p524_p3 = pnand %p9264_p1, %p523_p2 }
   0xd   : > { %p38_p4 = scmp.ge.s32.totalorder %s17820_s19, 2 }
   0xe   : > { %527 = sbr.rel (%p524_p3) target bundleno = 4613 (0x1205), region = 76 }
   0xf   : > { %s17822_s19 = smov (%p38_p4, %s17820_s19), 0 }
  0x10   : > { %17174 = sst [smem:[#allocation8_spill]] %s17822_s19 }
  0x13   : > { %s9265_s20 = sshll.u32 %s12047_s30, 1  ;;  %p620_p5 = scmp.lt.s32.totalorder %s12043_s29, 1 }
  0x14   : > { %p614_p6 = scmp.lt.s32.totalorder %s9265_s20, 3  ;;  %s17177_s0 = sld [smem:[#allocation151_spill]] }
  0x15   : > { %s12175_s21 = scalar_select %p620_p5, %s12043_s29, 1 }
  0x16   : > { %s17824_s20 = smov (!%p614_p6, %s9265_s20), 3  ;;  %s17178_s3 = sld [smem:[#allocation154_spill]] }
  0x17   : > { %s9627_s28 = sshll.u32 %s17824_s20, 7  ;;  %s11103_s30 = smul.u32 192, %s12175_s21 }
  0x18   : > { %s9628_s15 = sshll.u32 %s12175_s21, 6  ;;  %s9629_s13 = sshll.u32 %s12175_s21, 8 }
  0x19   : > { %s12200_s24 = scalar_lea.vmem %s16952_s4, %s9628_s15  ;;  %s9273_s15 = sshll.u32 %s12175_s21, 2 }
  0x1a   : > { %s12189_s16 = scalar_lea.vmem %s17177_s0, %s9627_s28  ;;  %s12224_s25 = scalar_lea.vmem %s16957_s9, %s9273_s15 }
  0x1b   : > { %s12229_s1 = scalar_lea.vmem %s16958_s10, %s9629_s13  ;;  %s661_s28 = scalar_lea.vmem %s16959_s11, %s12175_s21 }
  0x1c   : > { %s12195_s12 = scalar_lea.vmem %s17178_s3, %s11103_s30  ;;  %s12218_s3 = scalar_lea.vmem %s16956_s8, %s9629_s13 }
  0x1d   : > { %s9631_s0 = sshll.u32 %s17824_s20, 6  ;;  %p9279_p7 = scmp.ne.s32.totalorder %s12043_s29, 0 }
  0x1e   : > { %s12238_s30 = scalar_lea.vmem %s16962_s14, %s9631_s0 }
  0x1f   : > { %673 = sbr.rel (%p9279_p7) target bundleno = 53 (0x35), region = 80 }
  0x24   : > { %v674_v0 = vld [vmem:[%s12189_s16] sm:$0xff]  ;;  %v675_v1 = vld [vmem:[%s12189_s16 + $0x8] sm:$0xff]  ;;  %v676_v2 = vld [vmem:[%s12189_s16 + $0x10] sm:$0xff] }
  0x25   : > { %706 = vst [vmem:[#allocation2 + $0xb0] sm:$0xff] %v674_v0  ;;  %707 = vst [vmem:[#allocation2] sm:$0xff] %v675_v1  ;;  %v677_v3 = vld [vmem:[%s12189_s16 + $0x18] sm:$0xff]  ;;  %v678_v4 = vld [vmem:[%s12189_s16 + $0x20] sm:$0xff] }
  0x26   : > { %708 = vst [vmem:[#allocation2 + $0xd8] sm:$0xff] %v676_v2  ;;  %v679_v5 = vld [vmem:[%s12189_s16 + $0x28] sm:$0xff]  ;;  %709 = vst [vmem:[#allocation2 + $0x18] sm:$0xff] %v677_v3  ;;  %v680_v6 = vld [vmem:[%s12189_s16 + $0x30] sm:$0xff] }
  0x27   : > { %710 = vst [vmem:[#allocation2 + $0x50] sm:$0xff] %v678_v4  ;;  %711 = vst [vmem:[#allocation2 + $0x68] sm:$0xff] %v679_v5  ;;  %v681_v7 = vld [vmem:[%s12189_s16 + $0x38] sm:$0xff]  ;;  %v682_v8 = vld [vmem:[%s12189_s16 + $0x40] sm:$0xff] }
  0x28   : > { %712 = vst [vmem:[#allocation2 + $0x30] sm:$0xff] %v680_v6  ;;  %713 = vst [vmem:[#allocation2 + $0x48] sm:$0xff] %v681_v7  ;;  %v683_v9 = vld [vmem:[%s12189_s16 + $0x48] sm:$0xff]  ;;  %v684_v10 = vld [vmem:[%s12189_s16 + $0x50] sm:$0xff] }
  0x29   : > { %714 = vst [vmem:[#allocation2 + $0x80] sm:$0xff] %v682_v8  ;;  %v685_v11 = vld [vmem:[%s12189_s16 + $0x58] sm:$0xff]  ;;  %715 = vst [vmem:[#allocation2 + $0x88] sm:$0xff] %v683_v9  ;;  %v686_v12 = vld [vmem:[%s12189_s16 + $0x60] sm:$0xff] }
  0x2a   : > { %716 = vst [vmem:[#allocation2 + $0xe8] sm:$0xff] %v684_v10  ;;  %717 = vst [vmem:[#allocation2 + $0xb8] sm:$0xff] %v685_v11  ;;  %v687_v13 = vld [vmem:[%s12189_s16 + $0x68] sm:$0xff]  ;;  %v688_v14 = vld [vmem:[%s12189_s16 + $0x70] sm:$0xff] }
  0x2b   : > { %718 = vst [vmem:[#allocation2 + $0x60] sm:$0xff] %v686_v12  ;;  %719 = vst [vmem:[#allocation2 + $0xf0] sm:$0xff] %v687_v13  ;;  %v689_v15 = vld [vmem:[%s12189_s16 + $0x78] sm:$0xff]  ;;  %v690_v16 = vld [vmem:[%s12189_s16 + $0x80] sm:$0xff] }
  0x2c   : > { %720 = vst [vmem:[#allocation2 + $0x8] sm:$0xff] %v688_v14  ;;  %v691_v17 = vld [vmem:[%s12189_s16 + $0x88] sm:$0xff]  ;;  %721 = vst [vmem:[#allocation2 + $0x78] sm:$0xff] %v689_v15  ;;  %v692_v18 = vld [vmem:[%s12189_s16 + $0x90] sm:$0xff] }
  0x2d   : > { %722 = vst [vmem:[#allocation2 + $0x38] sm:$0xff] %v690_v16  ;;  %723 = vst [vmem:[#allocation2 + $0x58] sm:$0xff] %v691_v17  ;;  %v693_v19 = vld [vmem:[%s12189_s16 + $0x98] sm:$0xff]  ;;  %v694_v20 = vld [vmem:[%s12189_s16 + $0xa0] sm:$0xff] }
  0x2e   : > { %724 = vst [vmem:[#allocation2 + $0x40] sm:$0xff] %v692_v18  ;;  %725 = vst [vmem:[#allocation2 + $0xc8] sm:$0xff] %v693_v19  ;;  %v695_v21 = vld [vmem:[%s12189_s16 + $0xa8] sm:$0xff]  ;;  %v696_v22 = vld [vmem:[%s12189_s16 + $0xb0] sm:$0xff] }
  0x2f   : > { %726 = vst [vmem:[#allocation2 + $0xe0] sm:$0xff] %v694_v20  ;;  %v697_v23 = vld [vmem:[%s12189_s16 + $0xb8] sm:$0xff]  ;;  %727 = vst [vmem:[#allocation2 + $0x90] sm:$0xff] %v695_v21  ;;  %v698_v24 = vld [vmem:[%s12189_s16 + $0xc0] sm:$0xff] }
  0x30   : > { %728 = vst [vmem:[#allocation2 + $0x70] sm:$0xff] %v696_v22  ;;  %729 = vst [vmem:[#allocation2 + $0xc0] sm:$0xff] %v697_v23  ;;  %v699_v25 = vld [vmem:[%s12189_s16 + $0xc8] sm:$0xff]  ;;  %v700_v26 = vld [vmem:[%s12189_s16 + $0xd0] sm:$0xff] }
  0x31   : > { %730 = vst [vmem:[#allocation2 + $0xa8] sm:$0xff] %v698_v24  ;;  %731 = vst [vmem:[#allocation2 + $0xd0] sm:$0xff] %v699_v25  ;;  %v701_v27 = vld [vmem:[%s12189_s16 + $0xd8] sm:$0xff]  ;;  %v702_v28 = vld [vmem:[%s12189_s16 + $0xe0] sm:$0xff] }
  0x32   : > { %732 = vst [vmem:[#allocation2 + $0x10] sm:$0xff] %v700_v26  ;;  %v703_v29 = vld [vmem:[%s12189_s16 + $0xe8] sm:$0xff]  ;;  %733 = vst [vmem:[#allocation2 + $0x28] sm:$0xff] %v701_v27  ;;  %v704_v30 = vld [vmem:[%s12189_s16 + $0xf0] sm:$0xff] }
  0x33   : > { %734 = vst [vmem:[#allocation2 + $0xa0] sm:$0xff] %v702_v28  ;;  %735 = vst [vmem:[#allocation2 + $0xf8] sm:$0xff] %v703_v29  ;;  %v705_v31 = vld [vmem:[%s12189_s16 + $0xf8] sm:$0xff] }
  0x34   : > { %736 = vst [vmem:[#allocation2 + $0x20] sm:$0xff] %v704_v30  ;;  %737 = vst [vmem:[#allocation2 + $0x98] sm:$0xff] %v705_v31 }
  0x35 PF: > { %v738_v32 = vld [vmem:[#allocation2 + $0xb0] sm:$0xff]  ;;  %v740_v33 = vld [vmem:[#allocation2 + $0xd8] sm:$0xff]  ;;  %v739_v34 = vld [vmem:[#allocation2] sm:$0xff]  ;;  %s17179_s20 = sld [smem:[#allocation152_spill]]  ;;  %vm1830_vm0 = vcmask 261120   ;;  %s12063_s23 = smov 64  }
  0x36   : > { %823 = vadd.xlane.f32.xlu0 %v738_v32  ;;  %827 = vadd.xlane.f32.xlu1 %v740_v33  ;;  %v741_v35 = vld [vmem:[#allocation2 + $0x18] sm:$0xff]  ;;  %v12273_v36 = vld [vmem:[#allocation2 + $0x50] sm:$0xff]  ;;  %v12275_v37 = vld [vmem:[#allocation2 + $0x68] sm:$0xff]  ;;  %s17181_s15 = sld [smem:[#allocation153_spill]]  ;;  %s12065_s26 = smov 32  }
  0x37   : > { %v12277_v38 = vld [vmem:[#allocation2 + $0x30] sm:$0xff]  ;;  %v12279_v39 = vld [vmem:[#allocation2 + $0x48] sm:$0xff]  ;;  %v12283_v40 = vld [vmem:[#allocation2 + $0x80] sm:$0xff]  ;;  %s17779_s19 = scalar_lea.vmem %s16953_s5, %s12175_s21  ;;  %s17797_s0 = scalar_lea.vmem %s16954_s6, %s12175_s21 }
  0x38   : > { %v12285_v41 = vld [vmem:[#allocation2 + $0x88] sm:$0xff]  ;;  %v12293_v43 = vld [vmem:[#allocation2 + $0xb8] sm:$0xff]  ;;  %v12295_v44 = vld [vmem:[#allocation2 + $0x60] sm:$0xff]  ;;  %p9590_p8 = scmp.ne.s32.totalorder %s12043_s29, 1 }
  0x39   : > { %v12289_v42 = vld [vmem:[#allocation2 + $0xe8] sm:$0xff]  ;;  %v12297_v45 = vld [vmem:[#allocation2 + $0xf0] sm:$0xff]  ;;  %v12305_v47 = vld [vmem:[#allocation2 + $0x78] sm:$0xff] }
  0x3a   : > { %825 = vadd.xlane.f32.xlu0 %v739_v34  ;;  %829 = vadd.xlane.f32.xlu1 %v741_v35  ;;  %v12301_v46 = vld [vmem:[#allocation2 + $0x8] sm:$0xff]  ;;  %v12311_v49 = vld [vmem:[#allocation2 + $0xd0] sm:$0xff]  ;;  %v12331_v2 = vld [vmem:[#allocation2 + $0xa0] sm:$0xff] }
  0x3b   : > { %v12307_v48 = vld [vmem:[#allocation2 + $0xa8] sm:$0xff]  ;;  %v12313_v50 = vld [vmem:[#allocation2 + $0x10] sm:$0xff]  ;;  %v12340_v8 = vld [vmem:[#allocation2 + $0xf8] sm:$0xff]  ;;  %s17180_s27 = scalar_lea.vmem %s17179_s20, %s12175_s21 }
  0x3c   : > { %v12315_v51 = vld [vmem:[#allocation2 + $0x28] sm:$0xff]  ;;  %v12348_v13 = vld [vmem:[#allocation2 + $0x20] sm:$0xff]  ;;  %v11154_v16 = vld [vmem:[%s12195_s12 + $0x90] ss:$12 sps:$4 sm:$0xff]   ;;  %s17182_s22 = scalar_lea.vmem %s17181_s15, %s12175_s21  ;;  %s17811_s15 = sld [smem:[#allocation156_spill]] (!%p9590_p8) }
  0x3d   : > { %v11149_v52 = vld [vmem:[%s12195_s12 + $0xac] ss:$12 sps:$4 sm:$0xff]   ;;  %v11151_v53 = vld [vmem:[%s12195_s12 + $0xa8] ss:$12 sps:$4 sm:$0xff]   ;;  %v11158_v29 = vld [vmem:[%s12195_s12 + $0x64] ss:$12 sps:$4 sm:$0xff]  }
  0x3e   : > { %831 = vadd.xlane.f32.xlu0 %v12273_v36  ;;  %833 = vadd.xlane.f32.xlu1 %v12275_v37  ;;  %v11152_v15 = vld [vmem:[%s12195_s12 + $0x94] ss:$12 sps:$4 sm:$0xff]   ;;  %v12358_v20 = vld [vmem:[#allocation2 + $0x98] sm:$0xff] }
  0x3f   : > { %1428 = vmatprep.subr.bf16.mxu0 %v11149_v52  ;;  %11023 = vmatprep.subr.bf16.mxu1 %v11149_v52  ;;  %v11155_v22 = vld [vmem:[%s12195_s12 + $0x7c] ss:$12 sps:$4 sm:$0xff]   ;;  %v11157_v23 = vld [vmem:[%s12195_s12 + $0x78] ss:$12 sps:$4 sm:$0xff]   ;;  %v11160_v30 = vld [vmem:[%s12195_s12 + $0x60] ss:$12 sps:$4 sm:$0xff]  }
  0x40   : > { %1429 = vmatpush1.bf16.msra.mxu0 %v11151_v53  ;;  %11031 = vmatpush1.bf16.msra.mxu1 %v11151_v53  ;;  %v12368_v27 = vld [vmem:[#allocation2 + $0x38] sm:$0xff] }
  0x41   : > { %1430 = vmatprep.subr.bf16.mxu0 %v11152_v15  ;;  %11024 = vmatprep.subr.bf16.mxu1 %v11152_v15 }
  0x42   : > { %835 = vadd.xlane.f32.xlu0 %v12277_v38  ;;  %837 = vadd.xlane.f32.xlu1 %v12279_v39 }
  0x44   : > { %1431 = vmatpush1.bf16.msra.mxu0 %v11154_v16  ;;  %11032 = vmatpush1.bf16.msra.mxu1 %v11154_v16 }
  0x45   : > { %1432 = vmatprep.subr.bf16.mxu0 %v11155_v22  ;;  %11025 = vmatprep.subr.bf16.mxu1 %v11155_v22 }
  0x46   : > { %839 = vadd.xlane.f32.xlu0 %v12283_v40  ;;  %841 = vadd.xlane.f32.xlu1 %v12285_v41 }
  0x48   : > { %1433 = vmatpush1.bf16.msra.mxu0 %v11157_v23  ;;  %11033 = vmatpush1.bf16.msra.mxu1 %v11157_v23  ;;  %v16966_v23 = vmov 0  }
  0x49   : > { %1434 = vmatprep.subr.bf16.mxu0 %v11158_v29  ;;  %11026 = vmatprep.subr.bf16.mxu1 %v11158_v29 }
  0x4a   : > { %843 = vadd.xlane.f32.xlu0 %v12289_v42  ;;  %845 = vadd.xlane.f32.xlu1 %v12293_v43 }
  0x4b   : > { %1460 = vmatprep.mubr.bf16.mxu0 %v16966_v23  ;;  %1580 = vmatprep.mubr.bf16.mxu1 %v16966_v23 }
  0x4c   : > { %1435 = vmatpush1.bf16.msra.mxu0 %v11160_v30  ;;  %11034 = vmatpush1.bf16.msra.mxu1 %v11160_v30 }
  0x4e   : > { %847 = vadd.xlane.f32.xlu0 %v12295_v44  ;;  %849 = vadd.xlane.f32.xlu1 %v12297_v45 }
  0x52   : > { %851 = vadd.xlane.f32.xlu0 %v12301_v46  ;;  %853 = vadd.xlane.f32.xlu1 %v12305_v47 }
  0x56   : > { %871 = vadd.xlane.f32.xlu0 %v12307_v48  ;;  %873 = vadd.xlane.f32.xlu1 %v12311_v49 }
  0x5a   : > { %875 = vadd.xlane.f32.xlu0 %v12313_v50  ;;  %877 = vadd.xlane.f32.xlu1 %v12315_v51 }
  0xbf   : > { %v824_v54 = vpop.xlane.xlu0 %823  ;;  %v828_v55 = vpop.xlane.xlu1 %827 }
  0xc0   : > { %v888_v56 = vmul.f32 0.0078125, %v824_v54  ;;  %v890_v58 = vmul.f32 0.0078125, %v828_v55  ;;  %v12388_v54 = vld [vmem:[#allocation2 + $0x40] sm:$0xff] }
  0xc1   : > { %v11164_v55 = vld [vmem:[%s12195_s12 + $0x34] ss:$12 sps:$4 sm:$0xff]  }
  0xc2   : > { %v12323_v57 = vsub.f32 %v738_v32, %v888_v56  ;;  %v12329_v1 = vsub.f32 %v740_v33, %v890_v58 }
  0xc3   : > { %v826_v59 = vpop.xlane.xlu0 %825  ;;  %v830_v60 = vpop.xlane.xlu1 %829 }
  0xc4   : > { %v889_v61 = vmul.f32 0.0078125, %v826_v59  ;;  %v952_v62 = vmul.f32 %v12323_v57, %v12323_v57  ;;  %v891_v0 = vmul.f32 0.0078125, %v830_v60  ;;  %v954_v5 = vmul.f32 %v12329_v1, %v12329_v1  ;;  %v11166_v59 = vld [vmem:[%s12195_s12 + $0x30] ss:$12 sps:$4 sm:$0xff]  }
  0xc6   : > { %984 = vadd.xlane.f32.xlu0 %v952_v62  ;;  %v12327_v63 = vsub.f32 %v739_v34, %v889_v61  ;;  %v12338_v7 = vsub.f32 %v741_v35, %v891_v0  ;;  %v12378_v34 = vld [vmem:[#allocation2 + $0x58] sm:$0xff]  ;;  %v12398_v62 = vld [vmem:[#allocation2 + $0xc8] sm:$0xff] }
  0xc7   : > { %v832_v3 = vpop.xlane.xlu0 %831  ;;  %v834_v9 = vpop.xlane.xlu1 %833  ;;  %v11167_v0 = vld [vmem:[%s12195_s12 + $0x1c] ss:$12 sps:$4 sm:$0xff]  }
  0xc8   : > { %v953_v4 = vmul.f32 %v12327_v63, %v12327_v63  ;;  %v892_v6 = vmul.f32 0.0078125, %v832_v3  ;;  %v955_v10 = vmul.f32 %v12338_v7, %v12338_v7  ;;  %v893_v11 = vmul.f32 0.0078125, %v834_v9  ;;  %v12408_v9 = vld [vmem:[#allocation2 + $0xe0] sm:$0xff] }
  0xca   : > { %879 = vadd.xlane.f32.xlu0 %v12331_v2  ;;  %986 = vadd.xlane.f32.xlu1 %v953_v4  ;;  %v12346_v12 = vsub.f32 %v12273_v36, %v892_v6  ;;  %v12356_v19 = vsub.f32 %v12275_v37, %v893_v11  ;;  %v11161_v36 = vld [vmem:[%s12195_s12 + $0x4c] ss:$12 sps:$4 sm:$0xff]   ;;  %v11170_v11 = vld [vmem:[%s12195_s12 + $0x4] ss:$12 sps:$4 sm:$0xff]  }
  0xcb   : > { %v836_v14 = vpop.xlane.xlu0 %835  ;;  %v838_v21 = vpop.xlane.xlu1 %837  ;;  %1436 = vmatprep.subr.bf16.mxu0 %v11161_v36  ;;  %11027 = vmatprep.subr.bf16.mxu1 %v11161_v36  ;;  %v11169_v4 = vld [vmem:[%s12195_s12 + $0x18] ss:$12 sps:$4 sm:$0xff]  }
  0xcc   : > { %v956_v17 = vmul.f32 %v12346_v12, %v12346_v12  ;;  %v894_v18 = vmul.f32 0.0078125, %v836_v14  ;;  %v957_v24 = vmul.f32 %v12356_v19, %v12356_v19  ;;  %v895_v25 = vmul.f32 0.0078125, %v838_v21  ;;  %v11172_v14 = vld [vmem:[%s12195_s12] ss:$12 sps:$4 sm:$0xff]  }
  0xce   : > { %988 = vadd.xlane.f32.xlu0 %v954_v5  ;;  %881 = vadd.xlane.f32.xlu1 %v12340_v8  ;;  %v12366_v26 = vsub.f32 %v12277_v38, %v894_v18  ;;  %v12376_v33 = vsub.f32 %v12279_v39, %v895_v25  ;;  %v11163_v38 = vld [vmem:[%s12195_s12 + $0x48] ss:$12 sps:$4 sm:$0xff]  }
  0xcf   : > { %v840_v28 = vpop.xlane.xlu0 %839  ;;  %v842_v35 = vpop.xlane.xlu1 %841  ;;  %1437 = vmatpush1.bf16.msra.mxu0 %v11163_v38  ;;  %11035 = vmatpush1.bf16.msra.mxu1 %v11163_v38 }
  0xd0   : > { %v958_v31 = vmul.f32 %v12366_v26, %v12366_v26  ;;  %v896_v32 = vmul.f32 0.0078125, %v840_v28  ;;  %v959_v52 = vmul.f32 %v12376_v33, %v12376_v33  ;;  %v897_v39 = vmul.f32 0.0078125, %v842_v35  ;;  %1438 = vmatprep.subr.bf16.mxu0 %v11164_v55  ;;  %11028 = vmatprep.subr.bf16.mxu1 %v11164_v55  ;;  %v12428_v28 = vld [vmem:[#allocation2 + $0x70] sm:$0xff] }
  0xd2   : > { %883 = vadd.xlane.f32.xlu0 %v12348_v13  ;;  %990 = vadd.xlane.f32.xlu1 %v955_v10  ;;  %v12386_v53 = vsub.f32 %v12283_v40, %v896_v32  ;;  %v12396_v61 = vsub.f32 %v12285_v41, %v897_v39 }
  0xd3   : > { %v844_v37 = vpop.xlane.xlu0 %843  ;;  %v846_v56 = vpop.xlane.xlu1 %845  ;;  %1439 = vmatpush1.bf16.msra.mxu0 %v11166_v59  ;;  %11036 = vmatpush1.bf16.msra.mxu1 %v11166_v59 }
  0xd4   : > { %v960_v60 = vmul.f32 %v12386_v53, %v12386_v53  ;;  %v898_v40 = vmul.f32 0.0078125, %v844_v37  ;;  %v961_v5 = vmul.f32 %v12396_v61, %v12396_v61  ;;  %v899_v6 = vmul.f32 0.0078125, %v846_v56  ;;  %1440 = vmatprep.subr.bf16.mxu0 %v11167_v0  ;;  %11029 = vmatprep.subr.bf16.mxu1 %v11167_v0  ;;  %v12439_v37 = vld [vmem:[#allocation2 + $0xc0] sm:$0xff] }
  0xd6   : > { %885 = vadd.xlane.f32.xlu1 %v12358_v20  ;;  %992 = vadd.xlane.f32.xlu0 %v956_v17  ;;  %v12406_v41 = vsub.f32 %v12289_v42, %v898_v40  ;;  %v12416_v17 = vsub.f32 %v12293_v43, %v899_v6  ;;  %v12418_v42 = vld [vmem:[#allocation2 + $0x90] sm:$0xff] }
  0xd7   : > { %v848_v58 = vpop.xlane.xlu0 %847  ;;  %v850_v3 = vpop.xlane.xlu1 %849  ;;  %1441 = vmatpush1.bf16.msra.mxu0 %v11169_v4  ;;  %11037 = vmatpush1.bf16.msra.mxu1 %v11169_v4 }
  0xd8   : > { %v962_v15 = vmul.f32 %v12406_v41, %v12406_v41  ;;  %v900_v16 = vmul.f32 0.0078125, %v848_v58  ;;  %1442 = vmatprep.subr.bf16.mxu0 %v11170_v11  ;;  %11030 = vmatprep.subr.bf16.mxu1 %v11170_v11  ;;  %v901_v21 = vmul.f32 0.0078125, %v850_v3  ;;  %v963_v43 = vmul.f32 %v12416_v17, %v12416_v17 }
  0xda   : > { %994 = vadd.xlane.f32.xlu1 %v957_v24  ;;  %855 = vadd.xlane.f32.xlu0 %v12368_v27  ;;  %v12426_v25 = vsub.f32 %v12295_v44, %v900_v16  ;;  %v12431_v30 = vsub.f32 %v12297_v45, %v901_v21 }
  0xdb   : > { %v852_v10 = vpop.xlane.xlu0 %851  ;;  %v854_v18 = vpop.xlane.xlu1 %853  ;;  %1443 = vmatpush1.bf16.msra.mxu0 %v11172_v14  ;;  %11038 = vmatpush1.bf16.msra.mxu1 %v11172_v14 }
  0xdc   : > { %v902_v24 = vmul.f32 0.0078125, %v852_v10  ;;  %v903_v29 = vmul.f32 0.0078125, %v854_v18  ;;  %v964_v32 = vmul.f32 %v12426_v25, %v12426_v25  ;;  %v965_v38 = vmul.f32 %v12431_v30, %v12431_v30 }
  0xde   : > { %857 = vadd.xlane.f32.xlu1 %v12378_v34  ;;  %996 = vadd.xlane.f32.xlu0 %v958_v31  ;;  %v12437_v36 = vsub.f32 %v12301_v46, %v902_v24  ;;  %v12444_v45 = vsub.f32 %v12305_v47, %v903_v29 }
  0xdf   : > { %v872_v22 = vpop.xlane.xlu0 %871  ;;  %v874_v31 = vpop.xlane.xlu1 %873 }
  0xe0   : > { %v912_v35 = vmul.f32 0.0078125, %v872_v22  ;;  %v913_v39 = vmul.f32 0.0078125, %v874_v31  ;;  %v967_v58 = vmul.f32 %v12444_v45, %v12444_v45 }
  0xe2   : > { %998 = vadd.xlane.f32.xlu1 %v959_v52  ;;  %859 = vadd.xlane.f32.xlu0 %v12388_v54  ;;  %v966_v52 = vmul.f32 %v12437_v36, %v12437_v36  ;;  %v12450_v46 = vsub.f32 %v12307_v48, %v912_v35 }
  0xe3   : > { %v876_v44 = vpop.xlane.xlu0 %875  ;;  %v878_v56 = vpop.xlane.xlu1 %877 }
  0xe4   : > { %v914_v55 = vmul.f32 0.0078125, %v876_v44  ;;  %v976_v47 = vmul.f32 %v12450_v46, %v12450_v46  ;;  %v915_v59 = vmul.f32 0.0078125, %v878_v56 }
  0xe6   : > { %861 = vadd.xlane.f32.xlu1 %v12398_v62  ;;  %1000 = vadd.xlane.f32.xlu0 %v960_v60  ;;  %v12457_v60 = vsub.f32 %v12311_v49, %v913_v39  ;;  %v12460_v40 = vsub.f32 %v12313_v50, %v914_v55  ;;  %v12467_v3 = vsub.f32 %v12315_v51, %v915_v59 }
  0xe8   : > { %v977_v48 = vmul.f32 %v12457_v60, %v12457_v60  ;;  %v978_v0 = vmul.f32 %v12460_v40, %v12460_v40  ;;  %v979_v49 = vmul.f32 %v12467_v3, %v12467_v3 }
  0xea   : > { %1002 = vadd.xlane.f32.xlu1 %v961_v5  ;;  %863 = vadd.xlane.f32.xlu0 %v12408_v9 }
  0xee   : > { %865 = vadd.xlane.f32.xlu1 %v12418_v42  ;;  %1004 = vadd.xlane.f32.xlu0 %v962_v15 }
  0xf2   : > { %1006 = vadd.xlane.f32.xlu1 %v963_v43  ;;  %867 = vadd.xlane.f32.xlu0 %v12428_v28 }
  0xf6   : > { %869 = vadd.xlane.f32.xlu1 %v12439_v37  ;;  %1008 = vadd.xlane.f32.xlu0 %v964_v32 }
  0xfa   : > { %1010 = vadd.xlane.f32.xlu1 %v965_v38  ;;  %1012 = vadd.xlane.f32.xlu0 %v966_v52 }
  0xfe   : > { %1014 = vadd.xlane.f32.xlu1 %v967_v58  ;;  %1032 = vadd.xlane.f32.xlu0 %v976_v47 }
 0x102   : > { %1034 = vadd.xlane.f32.xlu1 %v977_v48  ;;  %1036 = vadd.xlane.f32.xlu0 %v978_v0 }
 0x106   : > { %1038 = vadd.xlane.f32.xlu1 %v979_v49 }
 0x14f   : > { %v985_v4 = vpop.xlane.xlu0 %984 }
 0x150   : > { %v1048_v50 = vmul.f32 0.0078125, %v985_v4 }
 0x152   : > { %v1080_v5 = vadd.f32 1e-05, %v1048_v50 }
 0x153   : > { %v987_v6 = vpop.xlane.xlu1 %986  ;;  %v880_v10 = vpop.xlane.xlu0 %879 }
 0x154   : > { %11285 = vrsqrt.f32 %v1080_v5  ;;  %v1049_v11 = vmul.f32 0.0078125, %v987_v6  ;;  %v916_v14 = vmul.f32 0.0078125, %v880_v10  ;;  %v12497_v6 = vld [vmem:[%s17180_s27] ss:$0 sm:$0xff]  ;;  %s17798_s27 = scalar_lea.vmem %s16955_s7, %s12175_s21 }
 0x156   : > { %v1081_v15 = vadd.f32 1e-05, %v1049_v11  ;;  %v12472_v16 = vsub.f32 %v12331_v2, %v916_v14 }
 0x157   : > { %v882_v51 = vpop.xlane.xlu1 %881  ;;  %v989_v18 = vpop.xlane.xlu0 %988 }
 0x158   : > { %11287 = vrsqrt.f32 %v1081_v15  ;;  %v917_v21 = vmul.f32 0.0078125, %v882_v51  ;;  %v1050_v22 = vmul.f32 0.0078125, %v989_v18  ;;  %v980_v43 = vmul.f32 %v12472_v16, %v12472_v16 }
 0x15a   : > { %v1082_v24 = vadd.f32 1e-05, %v1050_v22  ;;  %1040 = vadd.xlane.f32.xlu0 %v980_v43  ;;  %v12477_v29 = vsub.f32 %v12340_v8, %v917_v21  ;;  %v12511_v43 = vld [vmem:[%s17182_s22] ss:$0 sm:$0xff] }
 0x15b   : > { %v991_v31 = vpop.xlane.xlu1 %990  ;;  %v884_v32 = vpop.xlane.xlu0 %883 }
 0x15c   : > { %11289 = vrsqrt.f32 %v1082_v24  ;;  %v1051_v35 = vmul.f32 0.0078125, %v991_v31  ;;  %v918_v44 = vmul.f32 0.0078125, %v884_v32  ;;  %v981_v2 = vmul.f32 %v12477_v29, %v12477_v29 }
 0x15e   : > { %v1083_v38 = vadd.f32 1e-05, %v1051_v35  ;;  %1042 = vadd.xlane.f32.xlu1 %v981_v2  ;;  %v12482_v52 = vsub.f32 %v12348_v13, %v918_v44 }
 0x15f   : > { %v886_v39 = vpop.xlane.xlu1 %885  ;;  %v993_v55 = vpop.xlane.xlu0 %992 }
 0x160   : > { %11291 = vrsqrt.f32 %v1083_v38  ;;  %v919_v56 = vmul.f32 0.0078125, %v886_v39  ;;  %v1052_v8 = vmul.f32 0.0078125, %v993_v55  ;;  %v982_v58 = vmul.f32 %v12482_v52, %v12482_v52 }
 0x161   : > { %v11286_v47 = vpop.eup %11285 }
 0x162   : > { %v1084_v59 = vadd.f32 1e-05, %v1052_v8  ;;  %1044 = vadd.xlane.f32.xlu0 %v982_v58  ;;  %v12487_v48 = vsub.f32 %v12358_v20, %v919_v56  ;;  %v1144_v13 = vmul.f32 %v11286_v47, %v12323_v57 }
 0x163   : > { %v995_v0 = vpop.xlane.xlu1 %994  ;;  %v856_v49 = vpop.xlane.xlu0 %855 }
 0x164   : > { %11293 = vrsqrt.f32 %v1084_v59  ;;  %v1053_v4 = vmul.f32 0.0078125, %v995_v0  ;;  %v904_v50 = vmul.f32 0.0078125, %v856_v49  ;;  %v983_v5 = vmul.f32 %v12487_v48, %v12487_v48 }
 0x165   : > { %v11288_v10 = vpop.eup %11287  ;;  %v1182_v51 = vmul.f32 %v12497_v6, %v1144_v13 }
 0x166   : > { %v1085_v20 = vadd.f32 1e-05, %v1053_v4  ;;  %1046 = vadd.xlane.f32.xlu1 %v983_v5  ;;  %v12500_v11 = vsub.f32 %v12368_v27, %v904_v50  ;;  %v1145_v57 = vmul.f32 %v11288_v10, %v12327_v63  ;;  %v12535_v10 = vld [vmem:[%s12195_s12 + $0xb0] ss:$12 sps:$4 sm:$0xff]  }
 0x167   : > { %v858_v14 = vpop.xlane.xlu1 %857  ;;  %v997_v15 = vpop.xlane.xlu0 %996  ;;  %v1220_v44 = vadd.f32 %v12511_v43, %v1182_v51  ;;  %10415 = vmatprep.subr.bf16.mxu1 %v12535_v10 }
 0x168   : > { %11295 = vrsqrt.f32 %v1085_v20  ;;  %v905_v18 = vmul.f32 0.0078125, %v858_v14  ;;  %v1054_v21 = vmul.f32 0.0078125, %v997_v15  ;;  %v968_v22 = vmul.f32 %v12500_v11, %v12500_v11 }
 0x169   : > { %v11290_v27 = vpop.eup %11289  ;;  %v1183_v24 = vmul.f32 %v12497_v6, %v1145_v57 }
 0x16a   : > { %v1086_v63 = vadd.f32 1e-05, %v1054_v21  ;;  %1016 = vadd.xlane.f32.xlu0 %v968_v22  ;;  %v12515_v31 = vsub.f32 %v12378_v34, %v905_v18  ;;  %v1146_v38 = vmul.f32 %v11290_v27, %v12329_v1 }
 0x16b   : > { %v999_v32 = vpop.xlane.xlu1 %998  ;;  %v860_v35 = vpop.xlane.xlu0 %859  ;;  %v1221_v2 = vadd.f32 %v12511_v43, %v1183_v24 }
 0x16c   : > { %11297 = vrsqrt.f32 %v1086_v63  ;;  %v1055_v39 = vmul.f32 0.0078125, %v999_v32  ;;  %v906_v55 = vmul.f32 0.0078125, %v860_v35  ;;  %v969_v56 = vmul.f32 %v12515_v31, %v12515_v31 }
 0x16d   : > { %v11292_v8 = vpop.eup %11291  ;;  %v12522_v58 = vpack.c.bf16 %v1221_v2, %v1220_v44  ;;  %v1184_v49 = vmul.f32 %v12497_v6, %v1146_v38 }
 0x16e   : > { %v1087_v34 = vadd.f32 1e-05, %v1055_v39  ;;  %1018 = vadd.xlane.f32.xlu1 %v969_v56  ;;  %v12525_v47 = vsub.f32 %v12388_v54, %v906_v55  ;;  %v1147_v59 = vmul.f32 %v11292_v8, %v12338_v7 }
 0x16f   : > { %1461 = vmatmul.mubr.bf16.vlgmr.msra.gmra.mxu0 %v12522_v58  ;;  %v862_v1 = vpop.xlane.xlu1 %861  ;;  %v1001_v0 = vpop.xlane.xlu0 %1000  ;;  %v1222_v15 = vadd.f32 %v12511_v43, %v1184_v49 }
 0x170   : > { %11299 = vrsqrt.f32 %v1087_v34  ;;  %v907_v13 = vmul.f32 0.0078125, %v862_v1  ;;  %v1056_v4 = vmul.f32 0.0078125, %v1001_v0  ;;  %v970_v50 = vmul.f32 %v12525_v47, %v12525_v47  ;;  %1470 = vmatprep.mubr.bf16.mxu0 %v16966_v23 }
 0x171   : > { %v11294_v5 = vpop.eup %11293  ;;  %v1185_v54 = vmul.f32 %v12497_v6, %v1147_v59 }
 0x172   : > { %v1088_v7 = vadd.f32 1e-05, %v1056_v4  ;;  %1020 = vadd.xlane.f32.xlu0 %v970_v50  ;;  %v12538_v20 = vsub.f32 %v12398_v62, %v907_v13  ;;  %v1148_v18 = vmul.f32 %v11294_v5, %v12346_v12 }
 0x173   : > { %v1003_v57 = vpop.xlane.xlu1 %1002  ;;  %v864_v14 = vpop.xlane.xlu0 %863  ;;  %v1223_v51 = vadd.f32 %v12511_v43, %v1185_v54 }
 0x174   : > { %11301 = vrsqrt.f32 %v1088_v7  ;;  %v1057_v21 = vmul.f32 0.0078125, %v1003_v57  ;;  %v908_v22 = vmul.f32 0.0078125, %v864_v14  ;;  %v971_v27 = vmul.f32 %v12538_v20, %v12538_v20 }
 0x175   : > { %v11296_v24 = vpop.eup %11295  ;;  %v12546_v63 = vpack.c.bf16 %v1223_v51, %v1222_v15  ;;  %v1186_v2 = vmul.f32 %v12497_v6, %v1148_v18 }
 0x176   : > { %v1089_v62 = vadd.f32 1e-05, %v1057_v21  ;;  %1022 = vadd.xlane.f32.xlu1 %v971_v27  ;;  %v12549_v32 = vsub.f32 %v12408_v9, %v908_v22  ;;  %v1149_v35 = vmul.f32 %v11296_v24, %v12356_v19 }
 0x177   : > { %1471 = vmatmul.mubr.bf16.gmra.mxu0 %v12546_v63  ;;  %v866_v12 = vpop.xlane.xlu1 %865  ;;  %v1005_v44 = vpop.xlane.xlu0 %1004  ;;  %v1224_v1 = vadd.f32 %v12511_v43, %v1186_v2 }
 0x178   : > { %11303 = vrsqrt.f32 %v1089_v62  ;;  %v909_v38 = vmul.f32 0.0078125, %v866_v12  ;;  %v1058_v39 = vmul.f32 0.0078125, %v1005_v44  ;;  %v972_v55 = vmul.f32 %v12549_v32, %v12549_v32  ;;  %1480 = vmatprep.mubr.bf16.mxu0 %v16966_v23 }
 0x179   : > { %v11298_v56 = vpop.eup %11297  ;;  %v1187_v9 = vmul.f32 %v12497_v6, %v1149_v35 }
 0x17a   : > { %v1090_v8 = vadd.f32 1e-05, %v1058_v39  ;;  %1024 = vadd.xlane.f32.xlu0 %v972_v55  ;;  %v12559_v19 = vsub.f32 %v12418_v42, %v909_v38  ;;  %v1150_v49 = vmul.f32 %v11298_v56, %v12366_v26 }
 0x17b   : > { %v1007_v34 = vpop.xlane.xlu1 %1006  ;;  %v868_v59 = vpop.xlane.xlu0 %867  ;;  %v1225_v0 = vadd.f32 %v12511_v43, %v1187_v9 }
 0x17c   : > { %11305 = vrsqrt.f32 %v1090_v8  ;;  %v1059_v13 = vmul.f32 0.0078125, %v1007_v34  ;;  %v910_v4 = vmul.f32 0.0078125, %v868_v59  ;;  %v973_v50 = vmul.f32 %v12559_v19, %v12559_v19 }
 0x17d   : > { %v11300_v5 = vpop.eup %11299  ;;  %v12566_v54 = vpack.c.bf16 %v1225_v0, %v1224_v1  ;;  %v1188_v15 = vmul.f32 %v12497_v6, %v1150_v49 }
 0x17e   : > { %v1091_v7 = vadd.f32 1e-05, %v1059_v13  ;;  %1026 = vadd.xlane.f32.xlu1 %v973_v50  ;;  %v12569_v42 = vsub.f32 %v12428_v28, %v910_v4  ;;  %v1151_v57 = vmul.f32 %v11300_v5, %v12376_v33 }
 0x17f   : > { %1481 = vmatmul.mubr.bf16.gmra.mxu0 %v12566_v54  ;;  %v870_v14 = vpop.xlane.xlu1 %869  ;;  %v1009_v26 = vpop.xlane.xlu0 %1008  ;;  %v1226_v12 = vadd.f32 %v12511_v43, %v1188_v15 }
 0x180   : > { %11307 = vrsqrt.f32 %v1091_v7  ;;  %v911_v51 = vmul.f32 0.0078125, %v870_v14  ;;  %v1060_v18 = vmul.f32 0.0078125, %v1009_v26  ;;  %v974_v21 = vmul.f32 %v12569_v42, %v12569_v42  ;;  %1490 = vmatprep.mubr.bf16.mxu0 %v16966_v23 }
 0x181   : > { %v11302_v22 = vpop.eup %11301  ;;  %v1189_v28 = vmul.f32 %v12497_v6, %v1151_v57 }
 0x182   : > { %v1092_v27 = vadd.f32 1e-05, %v1060_v18  ;;  %1028 = vadd.xlane.f32.xlu0 %v974_v21  ;;  %v12579_v33 = vsub.f32 %v12439_v37, %v911_v51  ;;  %v1152_v24 = vmul.f32 %v11302_v22, %v12386_v53 }
 0x183   : > { %v1011_v62 = vpop.xlane.xlu1 %1010  ;;  %v1013_v35 = vpop.xlane.xlu0 %1012  ;;  %v1227_v44 = vadd.f32 %v12511_v43, %v1189_v28 }
 0x184   : > { %11309 = vrsqrt.f32 %v1092_v27  ;;  %v1061_v2 = vmul.f32 0.0078125, %v1011_v62  ;;  %v1062_v38 = vmul.f32 0.0078125, %v1013_v35  ;;  %v975_v39 = vmul.f32 %v12579_v33, %v12579_v33 }
 0x185   : > { %v11304_v55 = vpop.eup %11303  ;;  %v12586_v56 = vpack.c.bf16 %v1227_v44, %v1226_v12  ;;  %v1190_v37 = vmul.f32 %v12497_v6, %v1152_v24 }
 0x186   : > { %v1093_v9 = vadd.f32 1e-05, %v1061_v2  ;;  %1030 = vadd.xlane.f32.xlu1 %v975_v39  ;;  %v1153_v53 = vmul.f32 %v11304_v55, %v12396_v61  ;;  %v1094_v8 = vadd.f32 1e-05, %v1062_v38 }
 0x187   : > { %1491 = vmatmul.mubr.bf16.gmra.mxu0 %v12586_v56  ;;  %v1015_v34 = vpop.xlane.xlu1 %1014  ;;  %v1033_v59 = vpop.xlane.xlu0 %1032  ;;  %v1228_v4 = vadd.f32 %v12511_v43, %v1190_v37 }
 0x188   : > { %11311 = vrsqrt.f32 %v1093_v9  ;;  %v1063_v1 = vmul.f32 0.0078125, %v1015_v34  ;;  %v1072_v0 = vmul.f32 0.0078125, %v1033_v59  ;;  %1500 = vmatprep.mubr.bf16.mxu0 %v16966_v23  ;;  %v1191_v49 = vmul.f32 %v12497_v6, %v1153_v53 }
 0x189   : > { %v11306_v13 = vpop.eup %11305  ;;  %11313 = vrsqrt.f32 %v1094_v8 }
 0x18a   : > { %v1095_v50 = vadd.f32 1e-05, %v1063_v1  ;;  %v1104_v5 = vadd.f32 1e-05, %v1072_v0  ;;  %v1229_v7 = vadd.f32 %v12511_v43, %v1191_v49  ;;  %v1154_v61 = vmul.f32 %v11306_v13, %v12406_v41 }
 0x18b   : > { %v1035_v57 = vpop.xlane.xlu1 %1034  ;;  %v1037_v14 = vpop.xlane.xlu0 %1036 }
 0x18c   : > { %11315 = vrsqrt.f32 %v1095_v50  ;;  %v1073_v26 = vmul.f32 0.0078125, %v1035_v57  ;;  %v1074_v15 = vmul.f32 0.0078125, %v1037_v14  ;;  %v12596_v51 = vpack.c.bf16 %v1229_v7, %v1228_v4 }
 0x18d   : > { %v11308_v18 = vpop.eup %11307  ;;  %11317 = vrsqrt.f32 %v1104_v5  ;;  %v1192_v21 = vmul.f32 %v12497_v6, %v1154_v61 }
 0x18e   : > { %v1105_v22 = vadd.f32 1e-05, %v1073_v26  ;;  %v1106_v28 = vadd.f32 1e-05, %v1074_v15  ;;  %v1155_v27 = vmul.f32 %v11308_v18, %v12416_v17 }
 0x18f   : > { %1501 = vmatmul.mubr.bf16.gmra.mxu0 %v12596_v51  ;;  %v1039_v24 = vpop.xlane.xlu1 %1038  ;;  %v1230_v12 = vadd.f32 %v12511_v43, %v1192_v21 }
 0x190   : > { %11319 = vrsqrt.f32 %v1105_v22  ;;  %v1075_v41 = vmul.f32 0.0078125, %v1039_v24  ;;  %1510 = vmatprep.mubr.bf16.mxu0 %v16966_v23  ;;  %v1193_v62 = vmul.f32 %v12497_v6, %v1155_v27 }
 0x191   : > { %v11310_v35 = vpop.eup %11309  ;;  %11321 = vrsqrt.f32 %v1106_v28  ;;  %v11174_v28 = vld [vmem:[%s12195_s12 + $0x98] ss:$12 sps:$4 sm:$0xff]  }
 0x192   : > { %v1107_v44 = vadd.f32 1e-05, %v1075_v41  ;;  %v1231_v2 = vadd.f32 %v12511_v43, %v1193_v62  ;;  %v1156_v38 = vmul.f32 %v11310_v35, %v12426_v25  ;;  %v11176_v62 = vld [vmem:[%s12195_s12 + $0x68] ss:$12 sps:$4 sm:$0xff]   ;;  %v11178_v35 = vld [vmem:[%s12195_s12 + $0x38] ss:$12 sps:$4 sm:$0xff]  }
 0x194   : > { %11323 = vrsqrt.f32 %v1107_v44  ;;  %v12606_v17 = vpack.c.bf16 %v1231_v2, %v1230_v12  ;;  %v1194_v37 = vmul.f32 %v12497_v6, %v1156_v38  ;;  %v11179_v12 = vld [vmem:[%s12195_s12 + $0x20] ss:$12 sps:$4 sm:$0xff]   ;;  %v11180_v44 = vld [vmem:[%s12195_s12 + $0x8] ss:$12 sps:$4 sm:$0xff]  }
 0x195   : > { %v11312_v39 = vpop.eup %11311 }
 0x196   : > { %v1157_v55 = vmul.f32 %v11312_v39, %v12431_v30  ;;  %v11314_v9 = vpop.eup %11313  ;;  %v1232_v59 = vadd.f32 %v12511_v43, %v1194_v37 }
 0x197   : > { %1511 = vmatmul.mubr.bf16.gmra.mxu0 %v12606_v17  ;;  %v1158_v0 = vmul.f32 %v11314_v9, %v12437_v36 }
 0x198   : > { %1520 = vmatprep.mubr.bf16.mxu0 %v16966_v23  ;;  %v1195_v53 = vmul.f32 %v12497_v6, %v1157_v55 }
 0x199   : > { %v11316_v8 = vpop.eup %11315  ;;  %v1196_v61 = vmul.f32 %v12497_v6, %v1158_v0 }
 0x19a   : > { %v11318_v34 = vpop.eup %11317  ;;  %v1233_v25 = vadd.f32 %v12511_v43, %v1195_v53  ;;  %v1159_v1 = vmul.f32 %v11316_v8, %v12444_v45 }
 0x19b   : > { %v1168_v30 = vmul.f32 %v11318_v34, %v12450_v46  ;;  %v1234_v15 = vadd.f32 %v12511_v43, %v1196_v61 }
 0x19c   : > { %v12618_v49 = vpack.c.bf16 %v1233_v25, %v1232_v59  ;;  %v1197_v4 = vmul.f32 %v12497_v6, %v1159_v1 }
 0x19d   : > { %v11320_v13 = vpop.eup %11319  ;;  %v1206_v5 = vmul.f32 %v12497_v6, %v1168_v30 }
 0x19e   : > { %v1169_v50 = vmul.f32 %v11320_v13, %v12457_v60  ;;  %v11322_v7 = vpop.eup %11321  ;;  %v1235_v46 = vadd.f32 %v12511_v43, %v1197_v4 }
 0x19f   : > { %1521 = vmatmul.mubr.bf16.gmra.mxu0 %v12618_v49  ;;  %v1244_v57 = vadd.f32 %v12511_v43, %v1206_v5  ;;  %v1170_v60 = vmul.f32 %v11322_v7, %v12460_v40 }
 0x1a0   : > { %1530 = vmatprep.mubr.bf16.mxu0 %v16966_v23  ;;  %v1207_v36 = vmul.f32 %v12497_v6, %v1169_v50  ;;  %v12636_v22 = vpack.c.bf16 %v1235_v46, %v1234_v15 }
 0x1a1   : > { %v11324_v45 = vpop.eup %11323  ;;  %v1208_v27 = vmul.f32 %v12497_v6, %v1170_v60 }
 0x1a2   : > { %v1245_v14 = vadd.f32 %v12511_v43, %v1207_v36  ;;  %v1171_v26 = vmul.f32 %v11324_v45, %v12467_v3  ;;  %v11175_v3 = vld [vmem:[%s12195_s12 + $0x80] ss:$12 sps:$4 sm:$0xff]  }
 0x1a3   : > { %v1246_v24 = vadd.f32 %v12511_v43, %v1208_v27 }
 0x1a4   : > { %v12633_v18 = vpack.c.bf16 %v1245_v14, %v1244_v57  ;;  %v1209_v21 = vmul.f32 %v12497_v6, %v1171_v26 }
 0x1a6   : > { %1581 = vmatmul.mubr.bf16.vlgmr.msra.gmra.mxu1 %v12633_v18  ;;  %v1247_v40 = vadd.f32 %v12511_v43, %v1209_v21 }
 0x1a7   : > { %1531 = vmatmul.mubr.bf16.gmra.mxu0 %v12636_v22  ;;  %1590 = vmatprep.mubr.bf16.mxu1 %v16966_v23 }
 0x1a8   : > { %10416 = vmatpush3.bf16.msra.mxu1 %v12535_v10  ;;  %1540 = vmatprep.mubr.bf16.mxu0 %v16966_v23  ;;  %v12648_v41 = vpack.c.bf16 %v1247_v40, %v1246_v24  ;;  %v11177_v10 = vld [vmem:[%s12195_s12 + $0x50] ss:$12 sps:$4 sm:$0xff]   ;;  %s12062_s12 = smov 96  }
 0x1a9   : > { %10417 = vmatprep.subr.bf16.mxu1 %v11174_v28 }
 0x1ac   : > { %10418 = vmatpush3.bf16.msra.mxu1 %v11174_v28 }
 0x1ad   : > { %10419 = vmatprep.subr.bf16.mxu1 %v11175_v3 }
 0x1ae   : > { %1591 = vmatmul.mubr.bf16.gmra.mxu1 %v12648_v41 }
 0x1af   : > { %1600 = vmatprep.mubr.bf16.mxu1 %v16966_v23 }
 0x1b0   : > { %10420 = vmatpush3.bf16.msra.mxu1 %v11175_v3 }
 0x1b1   : > { %10421 = vmatprep.subr.bf16.mxu1 %v11176_v62 }
 0x1b4   : > { %10422 = vmatpush3.bf16.msra.mxu1 %v11176_v62 }
 0x1b5   : > { %10423 = vmatprep.subr.bf16.mxu1 %v11177_v10 }
 0x1b8   : > { %10424 = vmatpush3.bf16.msra.mxu1 %v11177_v10 }
 0x1b9   : > { %10425 = vmatprep.subr.bf16.mxu1 %v11178_v35 }
 0x1bc   : > { %10426 = vmatpush3.bf16.msra.mxu1 %v11178_v35 }
 0x1bd   : > { %10427 = vmatprep.subr.bf16.mxu1 %v11179_v12 }
 0x1c0   : > { %10428 = vmatpush3.bf16.msra.mxu1 %v11179_v12 }
 0x1c1   : > { %10429 = vmatprep.subr.bf16.mxu1 %v11180_v44 }
 0x1c4   : > { %10430 = vmatpush3.bf16.msra.mxu1 %v11180_v44 }
 0x1e3   : > { %v1041_v2 = vpop.xlane.xlu0 %1040 }
 0x1e4   : > { %v1076_v38 = vmul.f32 0.0078125, %v1041_v2 }
 0x1e6   : > { %v1108_v39 = vadd.f32 1e-05, %v1076_v38 }
 0x1e7   : > { %v1043_v55 = vpop.xlane.xlu1 %1042 }
 0x1e8   : > { %11325 = vrsqrt.f32 %v1108_v39  ;;  %v1077_v37 = vmul.f32 0.0078125, %v1043_v55 }
 0x1ea   : > { %v1109_v9 = vadd.f32 1e-05, %v1077_v37 }
 0x1eb   : > { %v1045_v53 = vpop.xlane.xlu0 %1044 }
 0x1ec   : > { %11327 = vrsqrt.f32 %v1109_v9  ;;  %v1078_v8 = vmul.f32 0.0078125, %v1045_v53 }
 0x1ee   : > { %v1110_v34 = vadd.f32 1e-05, %v1078_v8 }
 0x1ef   : > { %v1047_v59 = vpop.xlane.xlu1 %1046 }
 0x1f0   : > { %11329 = vrsqrt.f32 %v1110_v34  ;;  %v1079_v25 = vmul.f32 0.0078125, %v1047_v59 }
 0x1f2   : > { %v1111_v1 = vadd.f32 1e-05, %v1079_v25 }
 0x1f3   : > { %v1017_v0 = vpop.xlane.xlu0 %1016 }
 0x1f4   : > { %11331 = vrsqrt.f32 %v1111_v1  ;;  %v1064_v30 = vmul.f32 0.0078125, %v1017_v0 }
 0x1f5   : > { %v11326_v13 = vpop.eup %11325 }
 0x1f6   : > { %v1096_v4 = vadd.f32 1e-05, %v1064_v30  ;;  %v1172_v50 = vmul.f32 %v11326_v13, %v12472_v16 }
 0x1f7   : > { %v1019_v5 = vpop.xlane.xlu1 %1018 }
 0x1f8   : > { %11333 = vrsqrt.f32 %v1096_v4  ;;  %v1065_v7 = vmul.f32 0.0078125, %v1019_v5  ;;  %v1210_v46 = vmul.f32 %v12497_v6, %v1172_v50 }
 0x1f9   : > { %v11328_v61 = vpop.eup %11327 }
 0x1fa   : > { %v1097_v36 = vadd.f32 1e-05, %v1065_v7  ;;  %v1173_v45 = vmul.f32 %v11328_v61, %v12477_v29  ;;  %v1248_v21 = vadd.f32 %v12511_v43, %v1210_v46 }
 0x1fb   : > { %v1021_v57 = vpop.xlane.xlu0 %1020 }
 0x1fc   : > { %11335 = vrsqrt.f32 %v1097_v36  ;;  %v1066_v14 = vmul.f32 0.0078125, %v1021_v57  ;;  %v1211_v60 = vmul.f32 %v12497_v6, %v1173_v45 }
 0x1fd   : > { %v11330_v26 = vpop.eup %11329 }
 0x1fe   : > { %v1098_v15 = vadd.f32 1e-05, %v1066_v14  ;;  %v1249_v16 = vadd.f32 %v12511_v43, %v1211_v60  ;;  %v1174_v28 = vmul.f32 %v11330_v26, %v12482_v52 }
 0x1ff   : > { %v1023_v27 = vpop.xlane.xlu1 %1022 }
 0x200   : > { %11337 = vrsqrt.f32 %v1098_v15  ;;  %v1067_v40 = vmul.f32 0.0078125, %v1023_v27  ;;  %v12664_v3 = vpack.c.bf16 %v1249_v16, %v1248_v21  ;;  %v1212_v10 = vmul.f32 %v12497_v6, %v1174_v28 }
 0x201   : > { %v11332_v29 = vpop.eup %11331 }
 0x202   : > { %v1099_v24 = vadd.f32 1e-05, %v1067_v40  ;;  %1601 = vmatmul.mubr.bf16.gmra.mxu1 %v12664_v3  ;;  %v1175_v62 = vmul.f32 %v11332_v29, %v12487_v48  ;;  %v1250_v38 = vadd.f32 %v12511_v43, %v1212_v10 }
 0x203   : > { %v1025_v35 = vpop.xlane.xlu0 %1024  ;;  %1610 = vmatprep.mubr.bf16.mxu1 %v16966_v23 }
 0x204   : > { %11339 = vrsqrt.f32 %v1099_v24  ;;  %v1068_v12 = vmul.f32 0.0078125, %v1025_v35  ;;  %v1213_v52 = vmul.f32 %v12497_v6, %v1175_v62 }
 0x205   : > { %v11334_v44 = vpop.eup %11333 }
 0x206   : > { %v1100_v2 = vadd.f32 1e-05, %v1068_v12  ;;  %v1251_v39 = vadd.f32 %v12511_v43, %v1213_v52  ;;  %v1160_v55 = vmul.f32 %v11334_v44, %v12500_v11 }
 0x207   : > { %v1027_v37 = vpop.xlane.xlu1 %1026 }
 0x208   : > { %11341 = vrsqrt.f32 %v1100_v2  ;;  %v1069_v48 = vmul.f32 0.0078125, %v1027_v37  ;;  %v12674_v9 = vpack.c.bf16 %v1251_v39, %v1250_v38  ;;  %v1198_v59 = vmul.f32 %v12497_v6, %v1160_v55 }
 0x209   : > { %v11336_v53 = vpop.eup %11335 }
 0x20a   : > { %v1101_v8 = vadd.f32 1e-05, %v1069_v48  ;;  %1611 = vmatmul.mubr.bf16.gmra.mxu1 %v12674_v9  ;;  %v1161_v34 = vmul.f32 %v11336_v53, %v12515_v31  ;;  %v1236_v13 = vadd.f32 %v12511_v43, %v1198_v59 }
 0x20b   : > { %10431 = vmatprep.mubr.bf16.mxu1 %v12522_v58  ;;  %v1029_v25 = vpop.xlane.xlu0 %1028 }
 0x20c   : > { %11343 = vrsqrt.f32 %v1101_v8  ;;  %v1070_v1 = vmul.f32 0.0078125, %v1029_v25  ;;  %v1199_v11 = vmul.f32 %v12497_v6, %v1161_v34 }
 0x20d   : > { %v11338_v0 = vpop.eup %11337 }
 0x20e   : > { %v1102_v30 = vadd.f32 1e-05, %v1070_v1  ;;  %v1237_v4 = vadd.f32 %v12511_v43, %v1199_v11  ;;  %v1162_v50 = vmul.f32 %v11338_v0, %v12525_v47 }
 0x20f   : > { %v1031_v5 = vpop.xlane.xlu1 %1030 }
 0x210   : > { %11345 = vrsqrt.f32 %v1102_v30  ;;  %v1071_v31 = vmul.f32 0.0078125, %v1031_v5  ;;  %v1260_v7 = vpack.c.bf16 %v1237_v4, %v1236_v13  ;;  %v1200_v45 = vmul.f32 %v12497_v6, %v1162_v50 }
 0x211   : > { %v11340_v61 = vpop.eup %11339 }
 0x212   : > { %v1103_v36 = vadd.f32 1e-05, %v1071_v31  ;;  %1541 = vmatmul.mubr.bf16.gmra.mxu0 %v1260_v7  ;;  %10432 = vmatmul.mubr.bf16.vlgmr.msra.gmra.mxu1 %v12546_v63  ;;  %v1163_v58 = vmul.f32 %v11340_v61, %v12538_v20  ;;  %v1238_v57 = vadd.f32 %v12511_v43, %v1200_v45 }
 0x213   : > { %10435 = vmatprep.mubr.bf16.mxu1 %v12566_v54  ;;  %1550 = vmatprep.mubr.bf16.mxu0 %v16966_v23 }
 0x214   : > { %11347 = vrsqrt.f32 %v1103_v36  ;;  %v1201_v47 = vmul.f32 %v12497_v6, %v1163_v58 }
 0x215   : > { %v11342_v46 = vpop.eup %11341 }
 0x216   : > { %v1239_v14 = vadd.f32 %v12511_v43, %v1201_v47  ;;  %v1164_v60 = vmul.f32 %v11342_v46, %v12549_v32 }
 0x218   : > { %v1261_v26 = vpack.c.bf16 %v1239_v14, %v1238_v57  ;;  %v1202_v54 = vmul.f32 %v12497_v6, %v1164_v60 }
 0x219   : > { %v11344_v63 = vpop.eup %11343 }
 0x21a   : > { %1551 = vmatmul.mubr.bf16.gmra.mxu0 %v1261_v26  ;;  %10436 = vmatmul.mubr.bf16.gmra.mxu1 %v12586_v56  ;;  %v1165_v20 = vmul.f32 %v11344_v63, %v12559_v19  ;;  %v1240_v16 = vadd.f32 %v12511_v43, %v1202_v54 }
 0x21b   : > { %10439 = vmatprep.mubr.bf16.mxu1 %v12596_v51  ;;  %1560 = vmatprep.mubr.bf16.mxu0 %v16966_v23 }
 0x21c   : > { %v1203_v15 = vmul.f32 %v12497_v6, %v1165_v20 }
 0x21d   : > { %v11346_v21 = vpop.eup %11345 }
 0x21e   : > { %v1241_v32 = vadd.f32 %v12511_v43, %v1203_v15  ;;  %v1166_v28 = vmul.f32 %v11346_v21, %v12569_v42 }
 0x220   : > { %v1262_v27 = vpack.c.bf16 %v1241_v32, %v1240_v16  ;;  %v1204_v56 = vmul.f32 %v12497_v6, %v1166_v28 }
 0x221   : > { %v11348_v40 = vpop.eup %11347 }
 0x222   : > { %1561 = vmatmul.mubr.bf16.gmra.mxu0 %v1262_v27  ;;  %10440 = vmatmul.mubr.bf16.gmra.mxu1 %v12606_v17  ;;  %v1167_v19 = vmul.f32 %v11348_v40, %v12579_v33  ;;  %v1242_v29 = vadd.f32 %v12511_v43, %v1204_v56 }
 0x223   : > { %10443 = vmatprep.mubr.bf16.mxu1 %v12618_v49  ;;  %1570 = vmatprep.mubr.bf16.mxu0 %v16966_v23 }
 0x224   : > { %v1205_v51 = vmul.f32 %v12497_v6, %v1167_v19 }
 0x226   : > { %v1243_v24 = vadd.f32 %v12511_v43, %v1205_v51 }
 0x228   : > { %v1263_v42 = vpack.c.bf16 %v1243_v24, %v1242_v29 }
 0x22a   : > { %1571 = vmatmul.mubr.bf16.gmra.mxu0 %v1263_v42  ;;  %10444 = vmatmul.mubr.bf16.gmra.mxu1 %v12636_v22 }
 0x22b   : > { %10447 = vmatprep.mubr.bf16.mxu1 %v1260_v7 }
 0x22f   : > { %v1462_v17 = vpop.f32.mrf.mxu0 }
 0x231   : > { %v12711_v62 = vpop.f32.mrf.mxu0 }
 0x232   : > { %10448 = vmatmul.mubr.bf16.gmra.mxu1 %v1261_v26 }
 0x233   : > { %v1466_v33 = vpop.f32.mrf.mxu0  ;;  %10451 = vmatprep.mubr.bf16.mxu1 %v1262_v27 }
 0x234   : > { %v12713_v49 = vpack.c.bf16 %v1466_v33, %v1462_v17 }
 0x235   : > { %v12715_v10 = vpop.f32.mrf.mxu0 }
 0x236   : > { %2788 = vrot.lane.b32.xlu1 %v12713_v49, %s12062_s12  ;;  %v12771_v21 = vpack.c.bf16 %v12715_v10, %v12711_v62 }
 0x237   : > { %v1472_v6 = vpop.f32.mrf.mxu0 }
 0x239   : > { %v12719_v43 = vpop.f32.mrf.mxu0 }
 0x23a   : > { %10452 = vmatmul.mubr.bf16.gmra.mxu1 %v1263_v42 }
 0x23b   : > { %v1476_v22 = vpop.f32.mrf.mxu0  ;;  %10455 = vmatprep.mubr.bf16.mxu1 %v12633_v18 }
 0x23c   : > { %v12773_v16 = vpack.c.bf16 %v1476_v22, %v1472_v6  ;;  %v1856_v6 = vsel %vm1830_vm0, %v12771_v21, 0 }
 0x23d   : > { %v12722_v35 = vpop.f32.mrf.mxu0 }
 0x23e   : > { %v12818_v42 = vpack.c.bf16 %v12722_v35, %v12719_v43 }
 0x23f   : > { %v1482_v12 = vpop.f32.mrf.mxu0 }
 0x240   : > { %v1859_v10 = vsel %vm1830_vm0, %v12818_v42, 0 }
 0x241   : > { %v12724_v52 = vpop.f32.mrf.mxu0 }
 0x242   : > { %10456 = vmatmul.mubr.bf16.gmra.mxu1 %v12648_v41 }
 0x243   : > { %v1486_v44 = vpop.f32.mrf.mxu0  ;;  %10459 = vmatprep.mubr.bf16.mxu1 %v12664_v3 }
 0x244   : > { %v12728_v2 = vpack.c.bf16 %v1486_v44, %v1482_v12 }
 0x245   : > { %v12730_v38 = vpop.f32.mrf.mxu0 }
 0x246   : > { %v12824_v17 = vpack.c.bf16 %v12730_v38, %v12724_v52 }
 0x247   : > { %v1492_v39 = vpop.f32.mrf.mxu0 }
 0x248   : > { %v1862_v33 = vsel %vm1830_vm0, %v12824_v17, 0 }
 0x249   : > { %v12732_v55 = vpop.f32.mrf.mxu0 }
 0x24a   : > { %10460 = vmatmul.mubr.bf16.gmra.mxu1 %v12674_v9 }
 0x24b   : > { %v1496_v18 = vpop.f32.mrf.mxu0  ;;  %10479 = vmatprep.mubr.msk.bf16.mxu1 %vm1830_vm0, %v12713_v49 }
 0x24c   : > { %v12737_v37 = vpack.c.bf16 %v1496_v18, %v1492_v39 }
 0x24d   : > { %v1498_v41 = vpop.f32.mrf.mxu0 }
 0x24e   : > { %v12808_v29 = vpack.c.bf16 %v1498_v41, %v12732_v55 }
 0x24f   : > { %v1502_v48 = vpop.f32.mrf.mxu0 }
 0x250   : > { %v1865_v62 = vsel %vm1830_vm0, %v12808_v29, 0 }
 0x251   : > { %v1504_v53 = vpop.f32.mrf.mxu0 }
 0x253   : > { %v1506_v3 = vpop.f32.mrf.mxu0 }
 0x254   : > { %v12739_v8 = vpack.c.bf16 %v1506_v3, %v1502_v48 }
 0x255   : > { %v1508_v34 = vpop.f32.mrf.mxu0 }
 0x256   : > { %17183 = vst [vmem:[#allocation9_spill] sm:$0xff] %v12739_v8  ;;  %v12791_v19 = vpack.c.bf16 %v1508_v34, %v1504_v53 }
 0x257   : > { %v1512_v59 = vpop.f32.mrf.mxu0 }
 0x258   : > { %v1868_v24 = vsel %vm1830_vm0, %v12791_v19, 0 }
 0x259   : > { %v1514_v25 = vpop.f32.mrf.mxu0 }
 0x25b   : > { %v1516_v1 = vpop.f32.mrf.mxu0 }
 0x25c   : > { %v12741_v11 = vpack.c.bf16 %v1516_v1, %v1512_v59 }
 0x25d   : > { %v1518_v9 = vpop.f32.mrf.mxu0 }
 0x25e   : > { %17184 = vst [vmem:[#allocation10_spill] sm:$0xff] %v12741_v11  ;;  %v12775_v32 = vpack.c.bf16 %v1518_v9, %v1514_v25 }
 0x25f   : > { %v1522_v0 = vpop.f32.mrf.mxu0 }
 0x260   : > { %v1871_v51 = vsel %vm1830_vm0, %v12775_v32, 0 }
 0x261   : > { %v1524_v30 = vpop.f32.mrf.mxu0 }
 0x263   : > { %v1526_v13 = vpop.f32.mrf.mxu0 }
 0x264   : > { %v12743_v4 = vpack.c.bf16 %v1526_v13, %v1522_v0 }
 0x265   : > { %v1528_v50 = vpop.f32.mrf.mxu0 }
 0x266   : > { %17185 = vst [vmem:[#allocation11_spill] sm:$0xff] %v12743_v4  ;;  %v1582_v5 = vpop.f32.mrf.mxu1  ;;  %v12753_v26 = vpack.c.bf16 %v1528_v50, %v1524_v30 }
 0x267   : > { %v1532_v31 = vpop.f32.mrf.mxu0 }
 0x268   : > { %v1584_v7 = vpop.f32.mrf.mxu1  ;;  %v1874_v28 = vsel %vm1830_vm0, %v12753_v26, 0 }
 0x269   : > { %v1534_v61 = vpop.f32.mrf.mxu0 }
 0x26a   : > { %v1586_v36 = vpop.f32.mrf.mxu1 }
 0x26b   : > { %v1536_v58 = vpop.f32.mrf.mxu0  ;;  %v12745_v45 = vpack.c.bf16 %v1586_v36, %v1582_v5 }
 0x26c   : > { %v12747_v47 = vpack.c.bf16 %v1536_v58, %v1532_v31  ;;  %v1588_v46 = vpop.f32.mrf.mxu1 }
 0x26d   : > { %17186 = vst [vmem:[#allocation12_spill] sm:$0xff] %v12745_v45  ;;  %v1538_v57 = vpop.f32.mrf.mxu0  ;;  %2989 = vrot.lane.b32.xlu0 %v12745_v45, %s12062_s12  ;;  %v12785_v27 = vpack.c.bf16 %v1588_v46, %v1584_v7 }
 0x26e   : > { %v12751_v14 = vpack.c.bf16 %v1538_v57, %v1534_v61  ;;  %v1592_v60 = vpop.f32.mrf.mxu1 }
 0x26f   : > { %17188 = vst [vmem:[#allocation14_spill] sm:$0xff] %v12785_v27 }
 0x270   : > { %11039 = vmatprep.subr.msk.bf16.mxu1 %vm1830_vm0, %v12751_v14  ;;  %v1594_v63 = vpop.f32.mrf.mxu1  ;;  %v1877_v20 = vsel %vm1830_vm0, %v12751_v14, 0 }
 0x271   : > { %10464 = vmatpush3.bf16.xpose.msra.mxu1 %v1877_v20  ;;  %3953 = vrot.lane.b32.xlu0 %v12713_v49, %s12063_s23 }
 0x272   : > { %11040 = vmatprep.subr.msk.bf16.mxu1 %vm1830_vm0, %v12753_v26  ;;  %v1596_v54 = vpop.f32.mrf.mxu1 }
 0x273   : > { %v12763_v15 = vpack.c.bf16 %v1596_v54, %v1592_v60 }
 0x274   : > { %v1598_v40 = vpop.f32.mrf.mxu1 }
 0x275   : > { %17187 = vst [vmem:[#allocation13_spill] sm:$0xff] %v12763_v15  ;;  %4138 = vrot.lane.b32.xlu0 %v12745_v45, %s12063_s23  ;;  %2991 = vrot.lane.b32.xlu1 %v12763_v15, %s12062_s12  ;;  %v12793_v56 = vpack.c.bf16 %v1598_v40, %v1594_v63 }
 0x277   : > { %v2016_v54 = vsel %vm1830_vm0, %v12793_v56, 0 }
 0x279   : > { %10466 = vmatpush3.bf16.xpose.msra.mxu1 %v1874_v28  ;;  %2812 = vrot.lane.b32.xlu0 %v12771_v21, %s12062_s12 }
 0x27a   : > { %3955 = vrot.lane.b32.xlu1 %v12773_v16, %s12063_s23  ;;  %11041 = vmatprep.subr.msk.bf16.mxu1 %vm1830_vm0, %v12775_v32 }
 0x27d   : > { %3013 = vrot.lane.b32.xlu0 %v12785_v27, %s12062_s12 }
 0x27e   : > { %4140 = vrot.lane.b32.xlu1 %v12763_v15, %s12063_s23 }
 0x281   : > { %10468 = vmatpush3.bf16.xpose.msra.mxu1 %v1871_v51  ;;  %3969 = vrot.lane.b32.xlu0 %v12771_v21, %s12063_s23 }
 0x282   : > { %3015 = vrot.lane.b32.xlu1 %v12793_v56, %s12062_s12  ;;  %11042 = vmatprep.subr.msk.bf16.mxu1 %vm1830_vm0, %v12791_v19 }
 0x285   : > { %4154 = vrot.lane.b32.xlu0 %v12785_v27, %s12063_s23 }
 0x286   : > { %4156 = vrot.lane.b32.xlu1 %v12793_v56, %s12063_s23 }
 0x289   : > { %10470 = vmatpush3.bf16.xpose.msra.mxu1 %v1868_v24  ;;  %2790 = vrot.lane.b32.xlu0 %v12773_v16, %s12062_s12 }
 0x28a   : > { %11043 = vmatprep.subr.msk.bf16.mxu1 %vm1830_vm0, %v12808_v29 }
 0x28d   : > { %2814 = vrot.lane.b32.xlu0 %v12818_v42, %s12062_s12 }
 0x291   : > { %10472 = vmatpush3.bf16.xpose.msra.mxu1 %v1865_v62  ;;  %3971 = vrot.lane.b32.xlu0 %v12818_v42, %s12063_s23 }
 0x292   : > { %11044 = vmatprep.subr.msk.bf16.mxu1 %vm1830_vm0, %v12824_v17 }
 0x295   : > { %2792 = vrot.lane.b32.xlu0 %v12728_v2, %s12062_s12 }
 0x299   : > { %10474 = vmatpush3.bf16.xpose.msra.mxu1 %v1862_v33 }
 0x29a   : > { %11045 = vmatprep.subr.msk.bf16.mxu1 %vm1830_vm0, %v12818_v42 }
 0x2a1   : > { %10476 = vmatpush3.bf16.xpose.msra.mxu1 %v1859_v10 }
 0x2a2   : > { %11046 = vmatprep.subr.msk.bf16.mxu1 %vm1830_vm0, %v12771_v21 }
 0x2a9   : > { %10478 = vmatpush3.bf16.xpose.msra.mxu1 %v1856_v6 }
 0x2b0   : > { %10480 = vmatmul.mubr.msk.bf16.vlgmr.msra.gmra.mxu1 %vm1830_vm0, %v12773_v16 }
 0x2b1   : > { %10483 = vmatprep.mubr.msk.bf16.mxu1 %vm1830_vm0, %v12728_v2 }
 0x2b8   : > { %10484 = vmatmul.mubr.msk.bf16.gmra.mxu1 %vm1830_vm0, %v12737_v37 }
 0x2b9   : > { %10487 = vmatprep.mubr.msk.bf16.mxu1 %vm1830_vm0, %v12739_v8 }
 0x2c0   : > { %10488 = vmatmul.mubr.msk.bf16.gmra.mxu1 %vm1830_vm0, %v12741_v11 }
 0x2c1   : > { %10491 = vmatprep.mubr.msk.bf16.mxu1 %vm1830_vm0, %v12743_v4 }
 0x2c2   : > { %v1602_v43 = vpop.f32.mrf.mxu1 }
 0x2c4   : > { %v1604_v22 = vpop.f32.mrf.mxu1 }
 0x2c6   : > { %v1606_v35 = vpop.f32.mrf.mxu1 }
 0x2c7   : > { %v12856_v12 = vpack.c.bf16 %v1606_v35, %v1602_v43  ;;  %v2013_v43 = vsel %vm1830_vm0, %v12785_v27, 0 }
 0x2c8   : > { %10492 = vmatmul.mubr.msk.bf16.gmra.mxu1 %vm1830_vm0, %v12747_v47  ;;  %v1608_v52 = vpop.f32.mrf.mxu1 }
 0x2c9   : > { %17189 = vst [vmem:[#allocation15_spill] sm:$0xff] %v12856_v12  ;;  %2993 = vrot.lane.b32.xlu0 %v12856_v12, %s12062_s12  ;;  %v12878_v34 = vpack.c.bf16 %v1608_v52, %v1604_v22  ;;  %v770_v22 = vlaneseq }
 0x2ca   : > { %v1612_v44 = vpop.f32.mrf.mxu1 }
 0x2cb   : > { %v2019_v31 = vsel %vm1830_vm0, %v12878_v34, 0 }
 0x2cc   : > { %v1614_v38 = vpop.f32.mrf.mxu1 }
 0x2cd   : > { %3957 = vrot.lane.b32.xlu0 %v12728_v2, %s12063_s23 }
 0x2ce   : > { %v1616_v39 = vpop.f32.mrf.mxu1 }
 0x2cf   : > { %v12864_v55 = vpack.c.bf16 %v1616_v39, %v1612_v44  ;;  %v12954_v39 = vshrl.u32 %v770_v22, 7 }
 0x2d0   : > { %v1618_v18 = vpop.f32.mrf.mxu1 }
 0x2d1   : > { %17190 = vst [vmem:[#allocation16_spill] sm:$0xff] %v12864_v55  ;;  %v12866_v41 = vpack.c.bf16 %v1618_v18, %v1614_v38  ;;  %4142 = vrot.lane.b32.xlu0 %v12856_v12, %s12063_s23  ;;  %2995 = vrot.lane.b32.xlu1 %v12864_v55, %s12062_s12  ;;  %17192 = vst [vmem:[#allocation18_spill] sm:$0xff] %v12954_v39  ;;  %v779_v23 = vadd.s32 64, %v12954_v39 }
 0x2d2   : > { %v1542_v48 = vpop.f32.mrf.mxu0  ;;  %v12872_v53 = vpop.f32.mrf.mxu1 }
 0x2d3   : > { %11047 = vmatprep.subr.msk.bf16.mxu0 %vm1830_vm0, %v12866_v41  ;;  %v2022_v3 = vsel %vm1830_vm0, %v12866_v41, 0 }
 0x2d4   : > { %v12880_v59 = vpop.f32.mrf.mxu0  ;;  %v1655_v25 = vpop.f32.mrf.mxu1  ;;  %10496 = vmatpush3.bf16.xpose.msra.mxu0 %v2022_v3 }
 0x2d5   : > { %2816 = vrot.lane.b32.xlu0 %v12824_v17, %s12062_s12  ;;  %4144 = vrot.lane.b32.xlu1 %v12864_v55, %s12063_s23 }
 0x2d6   : > { %11048 = vmatprep.subr.msk.bf16.mxu0 %vm1830_vm0, %v12878_v34  ;;  %v1546_v1 = vpop.f32.mrf.mxu0  ;;  %v12888_v9 = vpop.f32.mrf.mxu1 }
 0x2d7   : > { %v12890_v0 = vpack.c.bf16 %v1546_v1, %v1542_v48 }
 0x2d8   : > { %v12892_v30 = vpop.f32.mrf.mxu0  ;;  %v1658_v13 = vpop.f32.mrf.mxu1 }
 0x2d9   : > { %3017 = vrot.lane.b32.xlu0 %v12878_v34, %s12062_s12  ;;  %2818 = vrot.lane.b32.xlu1 %v12808_v29, %s12062_s12  ;;  %v12918_v46 = vpack.c.bf16 %v1658_v13, %v1655_v25  ;;  %v12964_v13 = vand.u32 127, %v770_v22 }
 0x2da   : > { %10511 = vmatprep.mubr.msk.bf16.mxu0 %vm1830_vm0, %v12890_v0  ;;  %v12900_v50 = vpop.f32.mrf.mxu0  ;;  %v12902_v5 = vpop.f32.mrf.mxu1 }
 0x2db   : > { %17191 = vst [vmem:[#allocation17_spill] sm:$0xff] %v12918_v46  ;;  %vm797_vm8 = vcmp.le.s32.totalorder %v12964_v13, %v779_v23  ;;  %v780_v23 = vadd.s32 72, %v12954_v39 }
 0x2dc   : > { %v12906_v7 = vpop.f32.mrf.mxu0  ;;  %v1671_v61 = vpop.f32.mrf.mxu1  ;;  %10498 = vmatpush3.bf16.xpose.msra.mxu0 %v2019_v31  ;;  %v774_v31 = vadd.s32 24, %v12954_v39 }
 0x2dd   : > { %3973 = vrot.lane.b32.xlu0 %v12824_v17, %s12063_s23  ;;  %3975 = vrot.lane.b32.xlu1 %v12808_v29, %s12063_s23  ;;  %vm798_vm10 = vcmp.le.s32.totalorder %v12964_v13, %v780_v23 }
 0x2de   : > { %11049 = vmatprep.subr.msk.bf16.mxu0 %vm1830_vm0, %v12793_v56  ;;  %v12914_v36 = vpop.f32.mrf.mxu0  ;;  %v12916_v58 = vpop.f32.mrf.mxu1  ;;  %vm792_vm1 = vcmp.le.s32.totalorder %v12964_v13, %v774_v31  ;;  %v778_v31 = vadd.s32 56, %v12954_v39 }
 0x2e0   : > { %v12920_v57 = vpop.f32.mrf.mxu0  ;;  %v1674_v60 = vpop.f32.mrf.mxu1  ;;  %vm796_vm5 = vcmp.le.s32.totalorder %v12964_v13, %v778_v31 }
 0x2e1   : > { %4158 = vrot.lane.b32.xlu0 %v12878_v34, %s12063_s23  ;;  %3446 = vrot.lane.b32.xlu1 %v12918_v46, %s12062_s12  ;;  %v12956_v18 = vpack.c.bf16 %v1674_v60, %v1671_v61 }
 0x2e2   : > { %v12926_v63 = vpop.f32.mrf.mxu0  ;;  %v10441_v20 = vpop.f32.mrf.mxu1 }
 0x2e3   : > { %17193 = vst [vmem:[#allocation19_spill] sm:$0xff] %v12956_v18 }
 0x2e4   : > { %v1564_v28 = vpop.f32.mrf.mxu0  ;;  %v12930_v40 = vpop.f32.mrf.mxu1  ;;  %10500 = vmatpush3.bf16.xpose.msra.mxu0 %v2016_v54 }
 0x2e5   : > { %2794 = vrot.lane.b32.xlu0 %v12737_v37, %s12062_s12  ;;  %11050 = vmatprep.subr.msk.bf16.mxu0 %vm1830_vm0, %v12785_v27 }
 0x2e6   : > { %4579 = vrot.lane.b32.xlu1 %v12918_v46, %s12063_s23  ;;  %v12938_v51 = vpop.f32.mrf.mxu0  ;;  %v10442_v24 = vpop.f32.mrf.mxu1 }
 0x2e8   : > { %v1568_v62 = vpop.f32.mrf.mxu0  ;;  %v1690_v33 = vpop.f32.mrf.mxu1 }
 0x2e9   : > { %3959 = vrot.lane.b32.xlu0 %v12737_v37, %s12063_s23  ;;  %v12967_v54 = vpack.c.bf16 %v1568_v62, %v1564_v28  ;;  %v772_v28 = vadd.s32 8, %v12954_v39  ;;  %v16979_v62 = vmov -1e+30  }
 0x2ea   : > { %2798 = vrot.lane.b32.xlu1 %v12741_v11, %s12062_s12  ;;  %v12944_v10 = vpop.f32.mrf.mxu0  ;;  %v10445_v6 = vpop.f32.mrf.mxu1 }
 0x2eb   : > { %vm790_vm2 = vcmp.le.s32.totalorder %v12964_v13, %v772_v28 }
 0x2ec   : > { %v1574_v35 = vpop.f32.mrf.mxu0  ;;  %10502 = vmatpush3.bf16.xpose.msra.mxu0 %v2013_v43  ;;  %v1703_v52 = vpop.f32.mrf.mxu1 }
 0x2ed   : > { %3019 = vrot.lane.b32.xlu0 %v12866_v41, %s12062_s12 }
 0x2ee   : > { %3963 = vrot.lane.b32.xlu1 %v12741_v11, %s12063_s23  ;;  %v12952_v44 = vpop.f32.mrf.mxu0  ;;  %v10446_v38 = vpop.f32.mrf.mxu1 }
 0x2ef   : > { %v12958_v48 = vpack.c.bf16 %v10446_v38, %v10445_v6  ;;  %v12983_v6 = vsel %vm792_vm1, 0.0, %v16979_v62  ;;  %v12998_v38 = vsel %vm790_vm2, 0.0, %v16979_v62  ;;  %vm789_vm1 = vcmp.le.s32.totalorder %v12964_v13, %v12954_v39 }
 0x2f0   : > { %v1578_v3 = vpop.f32.mrf.mxu0  ;;  %v1706_v1 = vpop.f32.mrf.mxu1  ;;  %17196 = vst [vmem:[#allocation22_spill] sm:$0xff] %v12983_v6  ;;  %17198 = vst [vmem:[#allocation24_spill] sm:$0xff] %v12998_v38  ;;  %vm2747_vm2 = vcmask 257024  }
 0x2f1   : > { %17194 = vst [vmem:[#allocation20_spill] sm:$0xff] %v12958_v48  ;;  %v12960_v25 = vpack.c.bf16 %v1578_v3, %v1574_v35  ;;  %4160 = vrot.lane.b32.xlu0 %v12866_v41, %s12063_s23  ;;  %v12969_v43 = vpack.c.bf16 %v1706_v1, %v1703_v52  ;;  %10527 = vmatprep.subr.bf16.mxu1 %v12958_v48  ;;  %v777_v35 = vadd.s32 48, %v12954_v39 }
 0x2f2   : > { %3450 = vrot.lane.b32.xlu1 %v12956_v18, %s12062_s12  ;;  %v10449_v61 = vpop.f32.mrf.mxu1  ;;  %10528 = vmatpush3.bf16.msra.mxu1 %v12958_v48  ;;  %v12993_v52 = vpack.c.bf16 %v10442_v24, %v10441_v20 }
 0x2f3   : > { %17195 = vst [vmem:[#allocation21_spill] sm:$0xff] %v12969_v43  ;;  %11051 = vmatprep.subr.msk.bf16.mxu0 %vm1830_vm0, %v12960_v25  ;;  %v2010_v60 = vsel %vm1830_vm0, %v12960_v25, 0  ;;  %10529 = vmatprep.subr.bf16.mxu1 %v12969_v43  ;;  %vm795_vm3 = vcmp.le.s32.totalorder %v12964_v13, %v777_v35  ;;  %v13027_v35 = vpop.permute.xlu0 %2989 }
 0x2f4   : > { %10504 = vmatpush3.bf16.xpose.msra.mxu0 %v2010_v60  ;;  %v12985_v22 = vpop.f32.mrf.mxu1  ;;  %17197 = vst [vmem:[#allocation23_spill] sm:$0xff] %v12993_v52  ;;  %v13007_v20 = vsel %vm795_vm3, 0.0, %v16979_v62  ;;  %v13017_v60 = vpack.c.bf16 %v12888_v9, %v12872_v53  ;;  %17203 = vst [vmem:[#allocation29_spill] sm:$0xff] %v13027_v35  ;;  %v2007_v53 = vsel %vm1830_vm0, %v12967_v54, 0  ;;  %v776_v9 = vadd.s32 40, %v12954_v39 }
 0x2f5   : > { %5100 = vrot.lane.b32.xlu0 %v12808_v29, %s12065_s26  ;;  %11052 = vmatprep.subr.msk.bf16.mxu0 %vm1830_vm0, %v12967_v54  ;;  %v775_v29 = vadd.s32 32, %v12954_v39  ;;  %17199 = vst [vmem:[#allocation25_spill] sm:$0xff] %v13007_v20  ;;  %vm3920_vm3 = vcmask 519424  }
 0x2f6   : > { %3979 = vrot.lane.b32.xlu1 %v12775_v32, %s12063_s23  ;;  %v10450_v3 = vpop.f32.mrf.mxu1  ;;  %10530 = vmatpush3.bf16.msra.mxu1 %v12969_v43  ;;  %17200 = vst [vmem:[#allocation26_spill] sm:$0xff] %v13017_v60  ;;  %vm794_vm6 = vcmp.le.s32.totalorder %v12964_v13, %v776_v9 }
 0x2f7   : > { %v13003_v1 = vpack.c.bf16 %v10450_v3, %v10449_v61  ;;  %10531 = vmatprep.subr.bf16.mxu1 %v12993_v52  ;;  %vm793_vm4 = vcmp.le.s32.totalorder %v12964_v13, %v775_v29  ;;  %v13020_v61 = vpack.c.bf16 %v1690_v33, %v12930_v40  ;;  %v13031_v3 = vpack.c.bf16 %v12920_v57, %v12906_v7 }
 0x2f8   : > { %v13009_v24 = vpop.f32.mrf.mxu1  ;;  %v13025_v28 = vsel %vm793_vm4, 0.0, %v16979_v62  ;;  %v13040_v40 = vsel %vm796_vm5, 0.0, %v16979_v62  ;;  %v781_v7 = vadd.s32 80, %v12954_v39  ;;  %v13052_v57 = vpack.c.bf16 %v12916_v58, %v12902_v5  ;;  %v13068_v58 = vpop.permute.xlu0 %3953 }
 0x2f9   : > { %2796 = vrot.lane.b32.xlu0 %v12739_v8, %s12062_s12  ;;  %17201 = vst [vmem:[#allocation27_spill] sm:$0xff] %v13020_v61  ;;  %17202 = vst [vmem:[#allocation28_spill] sm:$0xff] %v13025_v28  ;;  %v13057_v31 = vsel %vm794_vm6, 0.0, %v16979_v62  ;;  %v2004_v11 = vsel %vm1830_vm0, %v13031_v3, 0  ;;  %vm5045_vm4 = vcmask 781824  }
 0x2fa   : > { %4583 = vrot.lane.b32.xlu1 %v12956_v18, %s12063_s23  ;;  %v10453_v29 = vpop.f32.mrf.mxu1  ;;  %10532 = vmatpush3.bf16.msra.mxu1 %v12993_v52  ;;  %17204 = vst [vmem:[#allocation30_spill] sm:$0xff] %v13040_v40  ;;  %17205 = vst [vmem:[#allocation31_spill] sm:$0xff] %v13052_v57  ;;  %vm799_vm7 = vcmp.le.s32.totalorder %v12964_v13, %v781_v7  ;;  %v782_v7 = vadd.s32 88, %v12954_v39 }
 0x2fb   : > { %10533 = vmatprep.subr.bf16.mxu1 %v13020_v61  ;;  %17206 = vst [vmem:[#allocation32_spill] sm:$0xff] %v13057_v31  ;;  %v13066_v5 = vsel %vm799_vm7, 0.0, %v16979_v62  ;;  %17208 = vst [vmem:[#allocation34_spill] sm:$0xff] %v13068_v58 }
 0x2fc   : > { %10506 = vmatpush3.bf16.xpose.msra.mxu0 %v2007_v53  ;;  %v13042_v33 = vpop.f32.mrf.mxu1  ;;  %17207 = vst [vmem:[#allocation33_spill] sm:$0xff] %v13066_v5  ;;  %vm800_vm9 = vcmp.le.s32.totalorder %v12964_v13, %v782_v7 }
 0x2fd   : > { %3448 = vrot.lane.b32.xlu0 %v13017_v60, %s12062_s12  ;;  %11053 = vmatprep.subr.msk.bf16.mxu0 %vm1830_vm0, %v13031_v3 }
 0x2fe   : > { %5104 = vrot.lane.b32.xlu1 %v12775_v32, %s12065_s26  ;;  %v10454_v53 = vpop.f32.mrf.mxu1  ;;  %10534 = vmatpush3.bf16.msra.mxu1 %v13020_v61 }
 0x2ff   : > { %v13062_v9 = vpack.c.bf16 %v10454_v53, %v10453_v29  ;;  %10535 = vmatprep.subr.bf16.mxu1 %v13052_v57  ;;  %v13079_v29 = vsel %vm797_vm8, 0.0, %v16979_v62  ;;  %v13083_v53 = vpack.c.bf16 %v12892_v30, %v12880_v59  ;;  %v785_v59 = vadd.s32 112, %v12954_v39  ;;  %v13107_v30 = vpop.permute.xlu0 %4138 }
 0x300   : > { %v13070_v35 = vpop.f32.mrf.mxu1  ;;  %17209 = vst [vmem:[#allocation35_spill] sm:$0xff] %v13079_v29  ;;  %17212 = vst [vmem:[#allocation38_spill] sm:$0xff] %v13107_v30  ;;  %v786_v30 = vadd.s32 120, %v12954_v39 }
 0x301   : > { %3961 = vrot.lane.b32.xlu0 %v12739_v8, %s12063_s23  ;;  %v13092_v8 = vsel %vm800_vm9, 0.0, %v16979_v62  ;;  %vm803_vm11 = vcmp.le.s32.totalorder %v12964_v13, %v785_v59 }
 0x302   : > { %2800 = vrot.lane.b32.xlu1 %v12743_v4, %s12062_s12  ;;  %v10457_v58 = vpop.f32.mrf.mxu1  ;;  %10536 = vmatpush3.bf16.msra.mxu1 %v13052_v57  ;;  %17210 = vst [vmem:[#allocation36_spill] sm:$0xff] %v13092_v8  ;;  %v783_v8 = vadd.s32 96, %v12954_v39  ;;  %v13116_v23 = vsel %vm803_vm11, 0.0, %v16979_v62  ;;  %vm804_vm13 = vcmp.le.s32.totalorder %v12964_v13, %v786_v30 }
 0x303   : > { %10537 = vmatprep.subr.bf16.mxu1 %v12956_v18  ;;  %17213 = vst [vmem:[#allocation39_spill] sm:$0xff] %v13116_v23  ;;  %v13136_v23 = vpop.permute.xlu0 %2812 }
 0x304   : > { %10508 = vmatpush3.bf16.xpose.msra.mxu0 %v2004_v11  ;;  %v13094_v27 = vpop.f32.mrf.mxu1  ;;  %v13105_v11 = vsel %vm798_vm10, 0.0, %v16979_v62  ;;  %vm801_vm12 = vcmp.le.s32.totalorder %v12964_v13, %v783_v8  ;;  %v13134_v8 = vsel %vm804_vm13, 0.0, %v16979_v62 }
 0x305   : > { %4581 = vrot.lane.b32.xlu0 %v13017_v60, %s12063_s23  ;;  %11054 = vmatprep.subr.msk.bf16.mxu0 %vm1830_vm0, %v13083_v53  ;;  %17211 = vst [vmem:[#allocation37_spill] sm:$0xff] %v13105_v11  ;;  %v13125_v59 = vsel %vm801_vm12, 0.0, %v16979_v62  ;;  %17215 = vst [vmem:[#allocation41_spill] sm:$0xff] %v13134_v8  ;;  %v13153_v8 = vpack.c.bf16 %v12914_v36, %v12900_v50  ;;  %v13188_v36 = vpack.c.bf16 %v13009_v24, %v12985_v22 }
 0x306   : > { %3965 = vrot.lane.b32.xlu1 %v12743_v4, %s12063_s23  ;;  %v10458_v7 = vpop.f32.mrf.mxu1  ;;  %10538 = vmatpush3.bf16.msra.mxu1 %v12956_v18  ;;  %17214 = vst [vmem:[#allocation40_spill] sm:$0xff] %v13125_v59  ;;  %v784_v18 = vadd.s32 104, %v12954_v39 }
 0x307   : > { %v13112_v5 = vpack.c.bf16 %v10458_v7, %v10457_v58  ;;  %10539 = vmatprep.subr.bf16.mxu1 %v13017_v60  ;;  %v2001_v7 = vsel %vm1830_vm0, %v13083_v53, 0  ;;  %17221 = vst [vmem:[#allocation47_spill] sm:$0xff] %v13188_v36 }
 0x308   : > { %v1754_v4 = vpop.f32.mrf.mxu1  ;;  %vm802_vm14 = vcmp.le.s32.totalorder %v12964_v13, %v784_v18  ;;  %v13159_v18 = vpack.c.bf16 %v12938_v51, %v12926_v63 }
 0x309   : > { %2820 = vrot.lane.b32.xlu0 %v12791_v19, %s12062_s12  ;;  %v13146_v30 = vsel %vm802_vm14, 0.0, %v16979_v62  ;;  %v13164_v62 = vpop.permute.xlu0 %3013 }
 0x30a   : > { %2824 = vrot.lane.b32.xlu1 %v12753_v26, %s12062_s12  ;;  %v10461_v58 = vpop.f32.mrf.mxu1  ;;  %10540 = vmatpush3.bf16.msra.mxu1 %v13017_v60  ;;  %17216 = vst [vmem:[#allocation42_spill] sm:$0xff] %v13146_v30  ;;  %17217 = vst [vmem:[#allocation43_spill] sm:$0xff] %v13159_v18 }
 0x30b   : > { %10541 = vmatprep.subr.bf16.mxu1 %v12918_v46  ;;  %17218 = vst [vmem:[#allocation44_spill] sm:$0xff] %v13164_v62 }
 0x30c   : > { %10510 = vmatpush3.bf16.xpose.msra.mxu0 %v2001_v7  ;;  %v13138_v11 = vpop.f32.mrf.mxu1 }
 0x30d   : > { %3977 = vrot.lane.b32.xlu0 %v12791_v19, %s12063_s23  ;;  %v13178_v50 = vpop.permute.xlu0 %3969 }
 0x30e   : > { %3981 = vrot.lane.b32.xlu1 %v12753_v26, %s12063_s23  ;;  %v10462_v60 = vpop.f32.mrf.mxu1  ;;  %10542 = vmatpush3.bf16.msra.mxu1 %v12918_v46  ;;  %17220 = vst [vmem:[#allocation46_spill] sm:$0xff] %v13178_v50 }
 0x30f   : > { %v13149_v7 = vpack.c.bf16 %v10462_v60, %v10461_v58 }
 0x311   : > { %5102 = vrot.lane.b32.xlu0 %v12791_v19, %s12065_s26  ;;  %10559 = vmatprep.subr.bf16.mxu1 %v13149_v7  ;;  %v13176_v19 = vpack.c.bf16 %v12952_v44, %v12944_v10  ;;  %v13196_v63 = vpop.permute.xlu0 %4154  ;;  %v13226_v44 = vpack.c.bf16 %v1754_v4, %v13094_v27 }
 0x312   : > { %3458 = vrot.lane.b32.xlu1 %v12969_v43, %s12062_s12  ;;  %17222 = vst [vmem:[#allocation48_spill] sm:$0xff] %v13196_v63 }
 0x313   : > { %10512 = vmatmul.mubr.msk.bf16.vlgmr.msra.gmra.mxu0 %vm1830_vm0, %v13153_v8  ;;  %17219 = vst [vmem:[#allocation45_spill] sm:$0xff] %v13176_v19 }
 0x314   : > { %10515 = vmatprep.mubr.msk.bf16.mxu0 %vm1830_vm0, %v13159_v18 }
 0x315   : > { %3452 = vrot.lane.b32.xlu0 %v13052_v57, %s12062_s12  ;;  %v13206_v51 = vpop.permute.xlu0 %2790 }
 0x316   : > { %4591 = vrot.lane.b32.xlu1 %v12969_v43, %s12063_s23 }
 0x319   : > { %4585 = vrot.lane.b32.xlu0 %v13052_v57, %s12063_s23  ;;  %v13216_v10 = vpop.permute.xlu0 %2814 }
 0x31a   : > { %3005 = vrot.lane.b32.xlu1 %v13083_v53, %s12062_s12 }
 0x31b   : > { %10516 = vmatmul.mubr.msk.bf16.gmra.mxu0 %vm1830_vm0, %v13176_v19 }
 0x31c   : > { %10519 = vmatprep.mubr.msk.bf16.mxu0 %vm1830_vm0, %v12745_v45 }
 0x31d   : > { %2822 = vrot.lane.b32.xlu0 %v12775_v32, %s12062_s12  ;;  %v2789_v32 = vpop.permute.xlu1 %2788  ;;  %v13228_v22 = vpop.permute.xlu0 %3971 }
 0x31e   : > { %3575 = vrot.lane.b32.xlu1 %v13188_v36, %s12062_s12  ;;  %17223 = vst [vmem:[#allocation49_spill] sm:$0xff] %v13228_v22 }
 0x321   : > { %3456 = vrot.lane.b32.xlu0 %v12993_v52, %s12062_s12  ;;  %v13238_v24 = vpop.permute.xlu0 %2792  ;;  %v13264_v58 = vpop.permute.xlu1 %2991 }
 0x322   : > { %4146 = vrot.lane.b32.xlu1 %v13083_v53, %s12063_s23  ;;  %17227 = vst [vmem:[#allocation53_spill] sm:$0xff] %v13264_v58 }
 0x323   : > { %10520 = vmatmul.mubr.msk.bf16.gmra.mxu0 %vm1830_vm0, %v12763_v15 }
 0x324   : > { %10523 = vmatprep.mubr.msk.bf16.mxu0 %vm1830_vm0, %v12856_v12 }
 0x325   : > { %4589 = vrot.lane.b32.xlu0 %v12993_v52, %s12063_s23 }
 0x326   : > { %2983 = vrot.lane.b32.xlu1 %v13153_v8, %s12062_s12 }
 0x329   : > { %3454 = vrot.lane.b32.xlu0 %v13020_v61, %s12062_s12 }
 0x32a   : > { %4132 = vrot.lane.b32.xlu1 %v13153_v8, %s12063_s23 }
 0x32b   : > { %10524 = vmatmul.mubr.msk.bf16.gmra.mxu0 %vm1830_vm0, %v12864_v55 }
 0x32c   : > { %10607 = vmatprep.mubr.msk.bf16.mxu0 %vm1830_vm0, %v2789_v32 }
 0x32d   : > { %4587 = vrot.lane.b32.xlu0 %v13020_v61, %s12063_s23 }
 0x32e   : > { %3009 = vrot.lane.b32.xlu1 %v12967_v54, %s12062_s12 }
 0x331   : > { %5106 = vrot.lane.b32.xlu0 %v12753_v26, %s12065_s26 }
 0x332   : > { %3583 = vrot.lane.b32.xlu1 %v13226_v44, %s12062_s12 }
 0x335   : > { %2802 = vrot.lane.b32.xlu0 %v12747_v47, %s12062_s12 }
 0x336   : > { %4150 = vrot.lane.b32.xlu1 %v12967_v54, %s12063_s23 }
 0x339   : > { %3460 = vrot.lane.b32.xlu0 %v12958_v48, %s12062_s12 }
 0x33a   : > { %2987 = vrot.lane.b32.xlu1 %v13176_v19, %s12062_s12 }
 0x33b   : > { %v13244_v4 = vpop.permute.xlu0 %2993 }
 0x33c   : > { %17224 = vst [vmem:[#allocation50_spill] sm:$0xff] %v13244_v4 }
 0x33d   : > { %3967 = vrot.lane.b32.xlu0 %v12747_v47, %s12063_s23 }
 0x33e   : > { %3589 = vrot.lane.b32.xlu1 %v13149_v7, %s12062_s12 }
 0x33f   : > { %v13250_v26 = vpop.permute.xlu0 %3957 }
 0x340   : > { %17225 = vst [vmem:[#allocation51_spill] sm:$0xff] %v13250_v26 }
 0x341   : > { %4593 = vrot.lane.b32.xlu0 %v12958_v48, %s12063_s23 }
 0x342   : > { %4136 = vrot.lane.b32.xlu1 %v13176_v19, %s12063_s23 }
 0x343   : > { %v13256_v27 = vpop.permute.xlu0 %4142 }
 0x344   : > { %17226 = vst [vmem:[#allocation52_spill] sm:$0xff] %v13256_v27  ;;  %v13276_v27 = vpop.permute.xlu1 %3955 }
 0x345   : > { %2826 = vrot.lane.b32.xlu0 %v12751_v14, %s12062_s12  ;;  %17229 = vst [vmem:[#allocation55_spill] sm:$0xff] %v13276_v27 }
 0x346   : > { %4714 = vrot.lane.b32.xlu1 %v13149_v7, %s12063_s23 }
 0x347   : > { %v13262_v60 = vpop.permute.xlu0 %2816 }
 0x348   : > { %v13286_v50 = vpop.permute.xlu1 %4140 }
 0x349   : > { %3983 = vrot.lane.b32.xlu0 %v12751_v14, %s12063_s23  ;;  %17232 = vst [vmem:[#allocation58_spill] sm:$0xff] %v13286_v50 }
 0x34a   : > { %3011 = vrot.lane.b32.xlu1 %v12960_v25, %s12062_s12 }
 0x34b   : > { %v13270_v32 = vpop.permute.xlu0 %3017 }
 0x34c   : > { %17228 = vst [vmem:[#allocation54_spill] sm:$0xff] %v13270_v32  ;;  %v13298_v27 = vpop.permute.xlu1 %3015 }
 0x34d   : > { %5108 = vrot.lane.b32.xlu0 %v12751_v14, %s12065_s26  ;;  %17233 = vst [vmem:[#allocation59_spill] sm:$0xff] %v13298_v27  ;;  %v17247_v27 = vmov -1e+30  }
 0x34e   : > { %4152 = vrot.lane.b32.xlu1 %v12960_v25, %s12063_s23 }
 0x34f   : > { %v13278_v63 = vpop.permute.xlu0 %3973 }
 0x350   : > { %17230 = vst [vmem:[#allocation56_spill] sm:$0xff] %v13278_v63 }
 0x351   : > { %2981 = vrot.lane.b32.xlu0 %v12890_v0, %s12062_s12 }
 0x352   : > { %4710 = vrot.lane.b32.xlu1 %v13112_v5, %s12063_s23 }
 0x353   : > { %v13284_v26 = vpop.permute.xlu0 %4158 }
 0x354   : > { %17231 = vst [vmem:[#allocation57_spill] sm:$0xff] %v13284_v26  ;;  %v13316_v26 = vpack.c.bf16 %v13070_v35, %v13042_v33 }
 0x355   : > { %3577 = vrot.lane.b32.xlu0 %v13003_v1, %s12062_s12 }
 0x356   : > { %5096 = vrot.lane.b32.xlu1 %v12818_v42, %s12065_s26  ;;  %v13308_v42 = vpop.permute.xlu1 %4156 }
 0x357   : > { %v13292_v14 = vpop.permute.xlu0 %2794  ;;  %17236 = vst [vmem:[#allocation62_spill] sm:$0xff] %v13308_v42 }
 0x359   : > { %4130 = vrot.lane.b32.xlu0 %v12890_v0, %s12063_s23 }
 0x35a   : > { %4702 = vrot.lane.b32.xlu1 %v13003_v1, %s12063_s23  ;;  %v13320_v63 = vpop.permute.xlu1 %2995 }
 0x35b   : > { %v13300_v22 = vpop.permute.xlu0 %3959  ;;  %17238 = vst [vmem:[#allocation64_spill] sm:$0xff] %v13320_v63 }
 0x35c   : > { %17234 = vst [vmem:[#allocation60_spill] sm:$0xff] %v13300_v22 }
 0x35d   : > { %3581 = vrot.lane.b32.xlu0 %v13062_v9, %s12062_s12 }
 0x35e   : > { %4700 = vrot.lane.b32.xlu1 %v13188_v36, %s12063_s23 }
 0x35f   : > { %v13306_v50 = vpop.permute.xlu0 %3019 }
 0x360   : > { %17235 = vst [vmem:[#allocation61_spill] sm:$0xff] %v13306_v50 }
 0x361   : > { %3007 = vrot.lane.b32.xlu0 %v13031_v3, %s12062_s12 }
 0x362   : > { %5080 = vrot.lane.b32.xlu1 %v12773_v16, %s12065_s26  ;;  %v13332_v16 = vpop.permute.xlu1 %4144 }
 0x363   : > { %v13318_v22 = vpop.permute.xlu0 %4160  ;;  %17240 = vst [vmem:[#allocation66_spill] sm:$0xff] %v13332_v16 }
 0x364   : > { %17237 = vst [vmem:[#allocation63_spill] sm:$0xff] %v13318_v22 }
 0x365   : > { %3579 = vrot.lane.b32.xlu0 %v13316_v26, %s12062_s12 }
 0x366   : > { %5082 = vrot.lane.b32.xlu1 %v12728_v2, %s12065_s26  ;;  %v13340_v22 = vpop.permute.xlu1 %2818 }
 0x367   : > { %v13326_v42 = vpop.permute.xlu0 %5100  ;;  %v2862_v48 = vsel %vm1830_vm0, %v13340_v22, 0 }
 0x368   : > { %17239 = vst [vmem:[#allocation65_spill] sm:$0xff] %v13326_v42  ;;  %v1770_v42 = vpop.f32.mrf.mxu1 }
 0x369   : > { %4148 = vrot.lane.b32.xlu0 %v13031_v3, %s12063_s23 }
 0x36a   : > { %5281 = vrot.lane.b32.xlu1 %v12793_v56, %s12065_s26  ;;  %v13349_v56 = vpack.c.bf16 %v1770_v42, %v13138_v11  ;;  %v13351_v16 = vpop.permute.xlu1 %3975  ;;  %v773_v11 = vadd.s32 16, %v12954_v39 }
 0x36b   : > { %v13334_v35 = vpop.permute.xlu0 %2796  ;;  %17242 = vst [vmem:[#allocation68_spill] sm:$0xff] %v13351_v16 }
 0x36c   : > { %vm791_vm15 = vcmp.le.s32.totalorder %v12964_v13, %v773_v11 }
 0x36d   : > { %2985 = vrot.lane.b32.xlu0 %v13159_v18, %s12062_s12 }
 0x36e   : > { %v13357_v58 = vpop.permute.xlu1 %3446 }
 0x36f   : > { %v13338_v33 = vpop.permute.xlu0 %3448 }
 0x370   : > { %v10481_v43 = vpop.f32.mrf.mxu1 }
 0x371   : > { %3585 = vrot.lane.b32.xlu0 %v13112_v5, %s12062_s12 }
 0x372   : > { %v13366_v42 = vpop.permute.xlu1 %4579 }
 0x373   : > { %v13344_v2 = vpop.permute.xlu0 %3961  ;;  %17245 = vst [vmem:[#allocation71_spill] sm:$0xff] %v13366_v42 }
 0x374   : > { %17241 = vst [vmem:[#allocation67_spill] sm:$0xff] %v13344_v2 }
 0x375   : > { %4134 = vrot.lane.b32.xlu0 %v13159_v18, %s12063_s23 }
 0x376   : > { %v13375_v62 = vpop.permute.xlu1 %2798 }
 0x377   : > { %v13353_v63 = vpop.permute.xlu0 %4581 }
 0x378   : > { %17243 = vst [vmem:[#allocation69_spill] sm:$0xff] %v13353_v63 }
 0x379   : > { %3587 = vrot.lane.b32.xlu0 %v13349_v56, %s12062_s12 }
 0x37a   : > { %v13390_v11 = vpop.permute.xlu1 %3963 }
 0x37b   : > { %v2821_v4 = vpop.permute.xlu0 %2820  ;;  %17250 = vst [vmem:[#allocation75_spill] sm:$0xff] %v13390_v11 }
 0x37d   : > { %4712 = vrot.lane.b32.xlu0 %v13349_v56, %s12063_s23 }
 0x37e   : > { %v13396_v12 = vpop.permute.xlu1 %3450 }
 0x37f   : > { %v13361_v2 = vpop.permute.xlu0 %3977 }
 0x380   : > { %17244 = vst [vmem:[#allocation70_spill] sm:$0xff] %v13361_v2  ;;  %v13378_v2 = vsel %vm791_vm15, 0.0, %v17247_v27 }
 0x381   : > { %5098 = vrot.lane.b32.xlu0 %v12824_v17, %s12065_s26  ;;  %17248 = vst [vmem:[#allocation73_spill] sm:$0xff] %v13378_v2 }
 0x383   : > { %v13368_v16 = vpop.permute.xlu0 %5102 }
 0x384   : > { %17246 = vst [vmem:[#allocation72_spill] sm:$0xff] %v13368_v16  ;;  %v13385_v16 = vadd.f32 %v10481_v43, %v13378_v2 }
 0x385   : > { %4708 = vrot.lane.b32.xlu0 %v13226_v44, %s12063_s23 }
 0x387   : > { %v13373_v63 = vpop.permute.xlu0 %3452 }
 0x389   : > { %4706 = vrot.lane.b32.xlu0 %v13062_v9, %s12063_s23 }
 0x38b   : > { %v13382_v17 = vpop.permute.xlu0 %4585 }
 0x38c   : > { %17249 = vst [vmem:[#allocation74_spill] sm:$0xff] %v13382_v17  ;;  %v13404_v17 = vpop.permute.xlu1 %3979 }
 0x38d   : > { %4704 = vrot.lane.b32.xlu0 %v13316_v26, %s12063_s23  ;;  %17252 = vst [vmem:[#allocation77_spill] sm:$0xff] %v13404_v17 }
 0x38e   : > { %2125 = vmax.xlane.f32.xlu1 %v13385_v16 }
 0x38f   : > { %v2823_v42 = vpop.permute.xlu0 %2822 }
 0x390   : > { %v13412_v11 = vpop.permute.xlu1 %4583 }
 0x391   : > { %5094 = vrot.lane.b32.xlu0 %v12771_v21, %s12065_s26  ;;  %17254 = vst [vmem:[#allocation79_spill] sm:$0xff] %v13412_v11 }
 0x393   : > { %v13394_v32 = vpop.permute.xlu0 %3456 }
 0x395   : > { %5078 = vrot.lane.b32.xlu0 %v12713_v49, %s12065_s26 }
 0x397   : > { %v13400_v43 = vpop.permute.xlu0 %4589 }
 0x398   : > { %17251 = vst [vmem:[#allocation76_spill] sm:$0xff] %v13400_v43  ;;  %v13418_v43 = vpop.permute.xlu1 %5104 }
 0x399   : > { %5285 = vrot.lane.b32.xlu0 %v12866_v41, %s12065_s26  ;;  %17256 = vst [vmem:[#allocation81_spill] sm:$0xff] %v13418_v43 }
 0x39b   : > { %v13406_v45 = vpop.permute.xlu0 %3454 }
 0x39c   : > { %v13424_v17 = vpop.permute.xlu1 %2800 }
 0x39d   : > { %5283 = vrot.lane.b32.xlu0 %v12878_v34, %s12065_s26 }
 0x39f   : > { %v13410_v21 = vpop.permute.xlu0 %4587 }
 0x3a0   : > { %17253 = vst [vmem:[#allocation78_spill] sm:$0xff] %v13410_v21  ;;  %v13428_v34 = vpop.permute.xlu1 %3965 }
 0x3a1   : > { %5084 = vrot.lane.b32.xlu0 %v12737_v37, %s12065_s26  ;;  %17258 = vst [vmem:[#allocation83_spill] sm:$0xff] %v13428_v34 }
 0x3a3   : > { %v13416_v49 = vpop.permute.xlu0 %5106 }
 0x3a4   : > { %17255 = vst [vmem:[#allocation80_spill] sm:$0xff] %v13416_v49  ;;  %v2825_v43 = vpop.permute.xlu1 %2824  ;;  %v13438_v49 = vsel %vm789_vm1, 0.0, %v17247_v27 }
 0x3a5   : > { %17260 = vst [vmem:[#allocation85_spill] sm:$0xff] %v13438_v49 }
 0x3a7   : > { %v13420_v18 = vpop.permute.xlu0 %2802 }
 0x3a8   : > { %v13448_v27 = vpop.permute.xlu1 %3981 }
 0x3a9   : > { %17261 = vst [vmem:[#allocation86_spill] sm:$0xff] %v13448_v27 }
 0x3ab   : > { %v13422_v41 = vpop.permute.xlu0 %3460 }
 0x3af   : > { %v13426_v46 = vpop.permute.xlu0 %3967 }
 0x3b0   : > { %17257 = vst [vmem:[#allocation82_spill] sm:$0xff] %v13426_v46  ;;  %v1913_v46 = vpop.f32.mrf.mxu1 }
 0x3b1   : > { %v13441_v34 = vadd.f32 %v1913_v46, %v13438_v49  ;;  %v2865_v46 = vsel %vm1830_vm0, %v2821_v4, 0 }
 0x3b2   : > { %v10482_v13 = vpop.f32.mrf.mxu1 }
 0x3b3   : > { %v13430_v21 = vpop.permute.xlu0 %4593 }
 0x3b4   : > { %17259 = vst [vmem:[#allocation84_spill] sm:$0xff] %v13430_v21  ;;  %v2871_v21 = vsel %vm1830_vm0, %v2825_v43, 0 }
 0x3b7   : > { %v2827_v11 = vpop.permute.xlu0 %2826 }
 0x3b8   : > { %11055 = vmatprep.subr.msk.bf16.mxu0 %vm1830_vm0, %v2827_v11  ;;  %v2874_v37 = vsel %vm1830_vm0, %v2827_v11, 0  ;;  %v2868_v11 = vsel %vm1830_vm0, %v2823_v42, 0 }
 0x3b9   : > { %10592 = vmatpush3.bf16.xpose.msra.mxu0 %v2874_v37  ;;  %v1916_v37 = vpop.f32.mrf.mxu1 }
 0x3ba   : > { %11056 = vmatprep.subr.msk.bf16.mxu0 %vm1830_vm0, %v2825_v43  ;;  %v13453_v43 = vpop.permute.xlu1 %3458 }
 0x3bb   : > { %v10485_v39 = vpop.f32.mrf.mxu1 }
 0x3bd   : > { %v1929_v57 = vpop.f32.mrf.mxu1 }
 0x3be   : > { %v13469_v55 = vpop.permute.xlu1 %4591 }
 0x3bf   : > { %v10486_v52 = vpop.f32.mrf.mxu1  ;;  %17266 = vst [vmem:[#allocation91_spill] sm:$0xff] %v13469_v55 }
 0x3c0   : > { %2121 = vmax.xlane.f32.xlu0 %v13441_v34 }
 0x3c1   : > { %10594 = vmatpush3.bf16.xpose.msra.mxu0 %v2871_v21  ;;  %v1932_v15 = vpop.f32.mrf.mxu1 }
 0x3c2   : > { %11057 = vmatprep.subr.msk.bf16.mxu0 %vm1830_vm0, %v2823_v42 }
 0x3c3   : > { %v10489_v19 = vpop.f32.mrf.mxu1 }
 0x3c9   : > { %10596 = vmatpush3.bf16.xpose.msra.mxu0 %v2868_v11  ;;  %v13459_v11 = vpop.permute.xlu0 %3983 }
 0x3ca   : > { %11058 = vmatprep.subr.msk.bf16.mxu0 %vm1830_vm0, %v2821_v4  ;;  %17263 = vst [vmem:[#allocation88_spill] sm:$0xff] %v13459_v11 }
 0x3d1   : > { %10598 = vmatpush3.bf16.xpose.msra.mxu0 %v2865_v46 }
 0x3d2   : > { %11059 = vmatprep.subr.msk.bf16.mxu0 %vm1830_vm0, %v13340_v22  ;;  %v13481_v22 = vpop.permute.xlu0 %5108 }
 0x3d3   : > { %v10513_v21 = vpop.f32.mrf.mxu0  ;;  %17267 = vst [vmem:[#allocation92_spill] sm:$0xff] %v13481_v22 }
 0x3d4   : > { %v13456_v61 = vadd.f32 %v10513_v21, %v13378_v2 }
 0x3d5   : > { %v2058_v42 = vpop.f32.mrf.mxu0 }
 0x3d6   : > { %17262 = vst [vmem:[#allocation87_spill] sm:$0xff] %v13456_v61  ;;  %2157 = vmax.xlane.f32.xlu1 %v13456_v61  ;;  %v13462_v4 = vadd.f32 %v2058_v42, %v13438_v49  ;;  %v13476_v42 = vadd.f32 %v10482_v13, %v12983_v6  ;;  %v13497_v22 = vpop.permute.xlu0 %2981 }
 0x3d7   : > { %v10514_v27 = vpop.f32.mrf.mxu0  ;;  %17270 = vst [vmem:[#allocation95_spill] sm:$0xff] %v13497_v22  ;;  %v13512_v22 = vadd.f32 %v1929_v57, %v13025_v28  ;;  %v13532_v57 = vadd.f32 %v10486_v52, %v13040_v40  ;;  %v2853_v52 = vsel %vm1830_vm0, %v13136_v23, 0 }
 0x3d8   : > { %17264 = vst [vmem:[#allocation89_spill] sm:$0xff] %v13462_v4  ;;  %v13465_v46 = vadd.f32 %v10514_v27, %v12983_v6  ;;  %v13479_v27 = vadd.f32 %v10485_v39, %v13007_v20  ;;  %v2859_v39 = vsel %vm1830_vm0, %v13262_v60, 0 }
 0x3d9   : > { %v2061_v21 = vpop.f32.mrf.mxu0  ;;  %10600 = vmatpush3.bf16.xpose.msra.mxu0 %v2862_v48  ;;  %v13485_v48 = vpop.permute.xlu1 %3005 }
 0x3da   : > { %17265 = vst [vmem:[#allocation90_spill] sm:$0xff] %v13465_v46  ;;  %2153 = vmax.xlane.f32.xlu1 %v13462_v4  ;;  %2159 = vmax.xlane.f32.xlu0 %v13465_v46  ;;  %17268 = vst [vmem:[#allocation93_spill] sm:$0xff] %v13485_v48  ;;  %v13488_v4 = vadd.f32 %v1916_v37, %v12998_v38  ;;  %v1945_v48 = vpop.f32.mrf.mxu1  ;;  %v13502_v49 = vadd.f32 %v2061_v21, %v12998_v38  ;;  %v2856_v21 = vsel %vm1830_vm0, %v13216_v10, 0 }
 0x3db   : > { %11060 = vmatprep.subr.msk.bf16.mxu0 %vm1830_vm0, %v13262_v60  ;;  %v10517_v61 = vpop.f32.mrf.mxu0 }
 0x3dc   : > { %v13491_v13 = vadd.f32 %v10517_v61, %v13007_v20  ;;  %17271 = vst [vmem:[#allocation96_spill] sm:$0xff] %v13502_v49 }
 0x3dd   : > { %v2074_v55 = vpop.f32.mrf.mxu0  ;;  %v13507_v60 = vpop.permute.xlu1 %3575 }
 0x3de   : > { %2127 = vmax.xlane.f32.xlu1 %v13476_v42  ;;  %2133 = vmax.xlane.f32.xlu0 %v13479_v27  ;;  %17269 = vst [vmem:[#allocation94_spill] sm:$0xff] %v13491_v13  ;;  %v13505_v61 = vadd.f32 %v2074_v55, %v13025_v28  ;;  %17273 = vst [vmem:[#allocation98_spill] sm:$0xff] %v13507_v60  ;;  %v13521_v55 = vpop.permute.xlu0 %3577 }
 0x3df   : > { %v10518_v46 = vpop.f32.mrf.mxu0  ;;  %17275 = vst [vmem:[#allocation100_spill] sm:$0xff] %v13521_v55 }
 0x3e0   : > { %17272 = vst [vmem:[#allocation97_spill] sm:$0xff] %v13505_v61  ;;  %v13517_v20 = vadd.f32 %v10518_v46, %v13040_v40  ;;  %v13535_v46 = vadd.f32 %v1945_v48, %v13079_v29 }
 0x3e1   : > { %v2077_v6 = vpop.f32.mrf.mxu0  ;;  %10602 = vmatpush3.bf16.xpose.msra.mxu0 %v2859_v39  ;;  %v13527_v60 = vpop.permute.xlu1 %4146 }
 0x3e2   : > { %2123 = vmax.xlane.f32.xlu1 %v13488_v4  ;;  %2165 = vmax.xlane.f32.xlu0 %v13491_v13  ;;  %v13514_v13 = vpop.f32.mrf.mxu1  ;;  %17274 = vst [vmem:[#allocation99_spill] sm:$0xff] %v13517_v20  ;;  %17276 = vst [vmem:[#allocation101_spill] sm:$0xff] %v13527_v60  ;;  %v17278_v60 = vld [vmem:[#allocation37_spill] sm:$0xff] }
 0x3e3   : > { %11061 = vmatprep.subr.msk.bf16.mxu0 %vm1830_vm0, %v13216_v10  ;;  %v10521_v37 = vpop.f32.mrf.mxu0 }
 0x3e4   : > { %v1948_v10 = vpop.f32.mrf.mxu1 }
 0x3e5   : > { %v2090_v39 = vpop.f32.mrf.mxu0  ;;  %v13549_v48 = vpop.permute.xlu1 %2983 }
 0x3e6   : > { %2155 = vmax.xlane.f32.xlu1 %v13502_v49  ;;  %2161 = vmax.xlane.f32.xlu0 %v13505_v61  ;;  %v13545_v61 = vadd.f32 %v1948_v10, %v17278_v60  ;;  %v10493_v49 = vpop.f32.mrf.mxu1  ;;  %17279 = vst [vmem:[#allocation103_spill] sm:$0xff] %v13549_v48  ;;  %v17280_v10 = vld [vmem:[#allocation39_spill] sm:$0xff]  ;;  %v17283_v48 = vld [vmem:[#allocation33_spill] sm:$0xff] }
 0x3e7   : > { %v13523_v38 = vpop.f32.mrf.mxu0  ;;  %v13567_v50 = vadd.f32 %v10489_v19, %v17283_v48  ;;  %v17284_v19 = vld [vmem:[#allocation41_spill] sm:$0xff] }
 0x3e9   : > { %10604 = vmatpush3.bf16.xpose.msra.mxu0 %v2856_v21  ;;  %v2093_v55 = vpop.f32.mrf.mxu0  ;;  %v13539_v21 = vpop.permute.xlu0 %4130 }
 0x3ea   : > { %2129 = vmax.xlane.f32.xlu1 %v13512_v22  ;;  %2167 = vmax.xlane.f32.xlu0 %v13517_v20  ;;  %17277 = vst [vmem:[#allocation102_spill] sm:$0xff] %v13539_v21  ;;  %v13542_v20 = vadd.f32 %v1932_v15, %v13057_v31  ;;  %v1961_v21 = vpop.f32.mrf.mxu1  ;;  %v13555_v15 = vadd.f32 %v2077_v6, %v13057_v31 }
 0x3eb   : > { %11062 = vmatprep.subr.msk.bf16.mxu0 %vm1830_vm0, %v13136_v23  ;;  %v10525_v40 = vpop.f32.mrf.mxu0 }
 0x3ec   : > { %v13558_v28 = vadd.f32 %v10525_v40, %v17280_v10  ;;  %v10494_v6 = vpop.f32.mrf.mxu1 }
 0x3ed   : > { %v13560_v2 = vpop.permute.xlu0 %3581  ;;  %v2106_v23 = vpop.f32.mrf.mxu0 }
 0x3ee   : > { %2135 = vmax.xlane.f32.xlu1 %v13532_v57  ;;  %2137 = vmax.xlane.f32.xlu0 %v13535_v46  ;;  %17281 = vst [vmem:[#allocation104_spill] sm:$0xff] %v13560_v2  ;;  %v13570_v36 = vadd.f32 %v2106_v23, %v13125_v59  ;;  %v13583_v23 = vadd.f32 %v10494_v6, %v17284_v19 }
 0x3ef   : > { %v10526_v2 = vpop.f32.mrf.mxu0 }
 0x3f1   : > { %10606 = vmatpush3.bf16.xpose.msra.mxu0 %v2853_v52  ;;  %v13564_v52 = vpop.permute.xlu1 %4132  ;;  %v13579_v40 = vpop.permute.xlu0 %3007 }
 0x3f2   : > { %2131 = vmax.xlane.f32.xlu1 %v13542_v20  ;;  %2139 = vmax.xlane.f32.xlu0 %v13545_v61  ;;  %17282 = vst [vmem:[#allocation105_spill] sm:$0xff] %v13564_v52  ;;  %v13586_v52 = vadd.f32 %v10521_v37, %v17283_v48 }
 0x3f3   : > { %10655 = vmatprep.subr.bf16.mxu0 %v13422_v41 }
 0x3f5   : > { %v13602_v37 = vpop.permute.xlu0 %3579 }
 0x3f6   : > { %2163 = vmax.xlane.f32.xlu1 %v13555_v15  ;;  %2181 = vmax.xlane.f32.xlu0 %v13558_v28  ;;  %17285 = vst [vmem:[#allocation106_spill] sm:$0xff] %v13602_v37 }
 0x3f8   : > { %10608 = vmatmul.mubr.msk.bf16.vlgmr.msra.gmra.mxu0 %vm1830_vm0, %v13206_v51  ;;  %v13588_v51 = vpop.permute.xlu1 %3009 }
 0x3f9   : > { %10611 = vmatprep.mubr.msk.bf16.mxu0 %vm1830_vm0, %v13238_v24  ;;  %10656 = vmatpush3.bf16.msra.mxu0 %v13422_v41  ;;  %v13595_v24 = vadd.f32 %v2090_v39, %v13079_v29  ;;  %v13598_v41 = vadd.f32 %v10526_v2, %v17284_v19  ;;  %v17287_v2 = vld [vmem:[#allocation36_spill] sm:$0xff] }
 0x3fa   : > { %2141 = vmax.xlane.f32.xlu1 %v13567_v50  ;;  %2177 = vmax.xlane.f32.xlu0 %v13570_v36  ;;  %v13614_v39 = vadd.f32 %v13514_v13, %v17287_v2 }
 0x3fb   : > { %10657 = vmatprep.subr.bf16.mxu0 %v13453_v43 }
 0x3fd   : > { %10658 = vmatpush3.bf16.msra.mxu0 %v13453_v43  ;;  %v13609_v43 = vpop.permute.xlu1 %3583 }
 0x3fe   : > { %2173 = vmax.xlane.f32.xlu1 %v13586_v52  ;;  %2151 = vmax.xlane.f32.xlu0 %v13583_v23  ;;  %17286 = vst [vmem:[#allocation107_spill] sm:$0xff] %v13609_v43 }
 0x3ff   : > { %10659 = vmatprep.subr.bf16.mxu0 %v13394_v32 }
 0x400   : > { %10612 = vmatmul.mubr.msk.bf16.gmra.mxu0 %vm1830_vm0, %v13292_v14  ;;  %v13619_v14 = vpop.permute.xlu0 %4148 }
 0x401   : > { %10615 = vmatprep.mubr.msk.bf16.mxu0 %vm1830_vm0, %v13334_v35  ;;  %10660 = vmatpush3.bf16.msra.mxu0 %v13394_v32  ;;  %17288 = vst [vmem:[#allocation108_spill] sm:$0xff] %v13619_v14  ;;  %v13623_v32 = vadd.f32 %v13523_v38, %v17287_v2  ;;  %v13627_v35 = vpop.permute.xlu1 %4150  ;;  %v13645_v38 = vadd.f32 %v10493_v49, %v17280_v10 }
 0x402   : > { %2169 = vmax.xlane.f32.xlu1 %v13595_v24  ;;  %2183 = vmax.xlane.f32.xlu0 %v13598_v41  ;;  %17289 = vst [vmem:[#allocation109_spill] sm:$0xff] %v13627_v35 }
 0x403   : > { %10661 = vmatprep.subr.bf16.mxu0 %v13406_v45 }
 0x404   : > { %v13637_v13 = vpop.permute.xlu0 %2985 }
 0x405   : > { %10662 = vmatpush3.bf16.msra.mxu0 %v13406_v45  ;;  %v13635_v45 = vadd.f32 %v2093_v55, %v17278_v60  ;;  %17290 = vst [vmem:[#allocation110_spill] sm:$0xff] %v13637_v13 }
 0x406   : > { %2143 = vmax.xlane.f32.xlu1 %v13614_v39  ;;  %10663 = vmatprep.subr.bf16.mxu0 %v13373_v63 }
 0x408   : > { %10616 = vmatmul.mubr.msk.bf16.gmra.mxu0 %vm1830_vm0, %v13375_v62  ;;  %v13642_v62 = vpop.permute.xlu1 %2987 }
 0x409   : > { %10619 = vmatprep.mubr.msk.bf16.mxu0 %vm1830_vm0, %v13424_v17  ;;  %10664 = vmatpush3.bf16.msra.mxu0 %v13373_v63  ;;  %17291 = vst [vmem:[#allocation111_spill] sm:$0xff] %v13642_v62  ;;  %v13652_v63 = vpop.permute.xlu0 %3585 }
 0x40a   : > { %2175 = vmax.xlane.f32.xlu1 %v13623_v32  ;;  %10665 = vmatprep.subr.bf16.mxu0 %v13396_v12  ;;  %17292 = vst [vmem:[#allocation112_spill] sm:$0xff] %v13652_v63 }
 0x40c   : > { %v13657_v17 = vpop.permute.xlu1 %3589 }
 0x40d   : > { %10666 = vmatpush3.bf16.msra.mxu0 %v13396_v12  ;;  %v13655_v12 = vadd.f32 %v1961_v21, %v13125_v59  ;;  %17293 = vst [vmem:[#allocation113_spill] sm:$0xff] %v13657_v17  ;;  %v17298_v21 = vld [vmem:[#allocation11_spill] sm:$0xff] }
 0x40e   : > { %2171 = vmax.xlane.f32.xlu1 %v13635_v45  ;;  %10667 = vmatprep.subr.bf16.mxu0 %v13338_v33 }
 0x410   : > { %10620 = vmatmul.mubr.msk.bf16.gmra.mxu0 %vm1830_vm0, %v13420_v18  ;;  %v17294_v18 = vld [vmem:[#allocation14_spill] sm:$0xff]  ;;  %v13667_v49 = vpop.permute.xlu1 %4136 }
 0x411   : > { %10668 = vmatpush3.bf16.msra.mxu0 %v13338_v33  ;;  %v13665_v33 = vpop.permute.xlu0 %4134  ;;  %17296 = vst [vmem:[#allocation114_spill] sm:$0xff] %v13667_v49  ;;  %v17303_v49 = vld [vmem:[#allocation10_spill] sm:$0xff] }
 0x412   : > { %2149 = vmax.xlane.f32.xlu1 %v13645_v38  ;;  %10669 = vmatprep.subr.bf16.mxu0 %v13357_v58  ;;  %17295 = vst [vmem:[#allocation14_spill] sm:$0xff] %v13665_v33  ;;  %v17301_v33 = vld [vmem:[#allocation9_spill] sm:$0xff] }
 0x415   : > { %10670 = vmatpush3.bf16.msra.mxu0 %v13357_v58  ;;  %v13671_v55 = vpop.permute.xlu0 %3587  ;;  %v13675_v58 = vpop.permute.xlu1 %4714 }
 0x416   : > { %2145 = vmax.xlane.f32.xlu1 %v13655_v12  ;;  %11071 = vmatprep.subr.msk.bf16.mxu0 %vm1830_vm0, %v13459_v11  ;;  %17297 = vst [vmem:[#allocation115_spill] sm:$0xff] %v13671_v55  ;;  %17299 = vst [vmem:[#allocation11_spill] sm:$0xff] %v13675_v58 }
 0x418   : > { %5279 = vrot.lane.b32.xlu0 %v17294_v18, %s12065_s26 }
 0x419   : > { %v13679_v6 = vpop.permute.xlu0 %4712  ;;  %v13681_v18 = vpop.permute.xlu1 %3011 }
 0x41a   : > { %17300 = vst [vmem:[#allocation116_spill] sm:$0xff] %v13679_v6 }
 0x41c   : > { %5277 = vrot.lane.b32.xlu0 %v12960_v25, %s12065_s26 }
 0x41d   : > { %v13687_v25 = vpop.permute.xlu0 %5098 }
 0x41e   : > { %17302 = vst [vmem:[#allocation9_spill] sm:$0xff] %v13687_v25 }
 0x420   : > { %5090 = vrot.lane.b32.xlu0 %v17298_v21, %s12065_s26  ;;  %v13691_v21 = vpop.permute.xlu1 %4152 }
 0x421   : > { %17304 = vst [vmem:[#allocation10_spill] sm:$0xff] %v13691_v21 }
 0x424   : > { %5273 = vrot.lane.b32.xlu0 %v13031_v3, %s12065_s26  ;;  %v13695_v3 = vpop.permute.xlu0 %4708  ;;  %v13697_v6 = vpop.permute.xlu1 %4710 }
 0x425   : > { %17305 = vst [vmem:[#allocation117_spill] sm:$0xff] %v13695_v3  ;;  %17306 = vst [vmem:[#allocation118_spill] sm:$0xff] %v13697_v6 }
 0x427   : > { %5086 = vrot.lane.b32.xlu1 %v17301_v33, %s12065_s26 }
 0x428   : > { %5255 = vrot.lane.b32.xlu0 %v12890_v0, %s12065_s26  ;;  %v13701_v33 = vpop.permute.xlu0 %4706  ;;  %v13705_v0 = vpop.permute.xlu1 %5096 }
 0x429   : > { %17307 = vst [vmem:[#allocation119_spill] sm:$0xff] %v13701_v33  ;;  %17308 = vst [vmem:[#allocation120_spill] sm:$0xff] %v13705_v0 }
 0x42b   : > { %5088 = vrot.lane.b32.xlu1 %v17303_v49, %s12065_s26 }
 0x42c   : > { %v13709_v49 = vpop.permute.xlu0 %4704 }
 0x42d   : > { %17309 = vst [vmem:[#allocation121_spill] sm:$0xff] %v13709_v49 }
 0x42f   : > { %5275 = vrot.lane.b32.xlu1 %v12967_v54, %s12065_s26  ;;  %v13711_v54 = vpop.permute.xlu1 %4702 }
 0x430   : > { %17310 = vst [vmem:[#allocation122_spill] sm:$0xff] %v13711_v54  ;;  %v13713_v25 = vpop.permute.xlu0 %5094 }
 0x431   : > { %17311 = vst [vmem:[#allocation123_spill] sm:$0xff] %v13713_v25 }
 0x433   : > { %5092 = vrot.lane.b32.xlu1 %v12747_v47, %s12065_s26  ;;  %v13715_v3 = vpop.permute.xlu1 %4700 }
 0x434   : > { %17312 = vst [vmem:[#allocation124_spill] sm:$0xff] %v13715_v3  ;;  %v13717_v6 = vpop.permute.xlu0 %5078  ;;  %v2109_v3 = vpop.f32.mrf.mxu0 }
 0x435   : > { %17313 = vst [vmem:[#allocation125_spill] sm:$0xff] %v13717_v6 }
 0x437   : > { %5271 = vrot.lane.b32.xlu1 %v13083_v53, %s12065_s26  ;;  %v13719_v47 = vpop.permute.xlu1 %5080 }
 0x438   : > { %17314 = vst [vmem:[#allocation126_spill] sm:$0xff] %v13719_v47  ;;  %v13721_v33 = vpop.permute.xlu0 %5285  ;;  %v13738_v47 = vadd.f32 %v2109_v3, %v13146_v30 }
 0x439   : > { %17315 = vst [vmem:[#allocation127_spill] sm:$0xff] %v13721_v33 }
 0x43b   : > { %5257 = vrot.lane.b32.xlu1 %v13153_v8, %s12065_s26  ;;  %v13723_v53 = vpop.permute.xlu1 %5082  ;;  %v1964_v8 = vpop.f32.mrf.mxu1 }
 0x43c   : > { %17316 = vst [vmem:[#allocation128_spill] sm:$0xff] %v13723_v53  ;;  %v13725_v0 = vpop.permute.xlu0 %5283  ;;  %v13732_v25 = vadd.f32 %v1964_v8, %v13146_v30 }
 0x43d   : > { %17317 = vst [vmem:[#allocation129_spill] sm:$0xff] %v13725_v0 }
 0x43f   : > { %v13727_v58 = vpop.permute.xlu1 %5281 }
 0x440   : > { %17318 = vst [vmem:[#allocation130_spill] sm:$0xff] %v13727_v58  ;;  %v13729_v49 = vpop.permute.xlu0 %5084 }
 0x441   : > { %17319 = vst [vmem:[#allocation131_spill] sm:$0xff] %v13729_v49 }
 0x443   : > { %v2126_v54 = vpop.xlane.xlu1 %2125 }
 0x444   : > { %v2187_v35 = vsub.f32 %v13385_v16, %v2126_v54 }
 0x446   : > { %v2221_v62 = vmul.f32 1.442695, %v2187_v35 }
 0x449   : > { %v2122_v14 = vpop.xlane.xlu0 %2121 }
 0x44a   : > { %v2185_v49 = vsub.f32 %v13441_v34, %v2122_v14 }
 0x44c   : > { %v2217_v21 = vmul.f32 1.442695, %v2185_v49 }
 0x44e   : > { %11349 = vpow2.f32 %v2217_v21 }
 0x45b   : > { %v13761_v21 = vpop.eup %11349 }
 0x45c   : > { %17320 = vst [vmem:[#allocation132_spill] sm:$0xff] %v13761_v21 }
 0x45f   : > { %v13734_v6 = vpop.xlane.xlu1 %2157  ;;  %2147 = vmax.xlane.f32.xlu1 %v13732_v25 }
 0x463   : > { %2179 = vmax.xlane.f32.xlu1 %v13738_v47  ;;  %v13741_v0 = vpop.xlane.xlu1 %2153  ;;  %v13743_v58 = vpop.xlane.xlu0 %2159 }
 0x467   : > { %v2128_v53 = vpop.xlane.xlu1 %2127  ;;  %v2134_v8 = vpop.xlane.xlu0 %2133 }
 0x468   : > { %v2188_v33 = vsub.f32 %v13476_v42, %v2128_v53  ;;  %v2191_v16 = vsub.f32 %v13479_v27, %v2134_v8 }
 0x46a   : > { %v2223_v11 = vmul.f32 1.442695, %v2188_v33 }
 0x46b   : > { %v2124_v37 = vpop.xlane.xlu1 %2123  ;;  %v13748_v43 = vpop.xlane.xlu0 %2165 }
 0x46c   : > { %v2186_v3 = vsub.f32 %v13488_v4, %v2124_v37  ;;  %11351 = vpow2.f32 %v2223_v11  ;;  %v2229_v4 = vmul.f32 1.442695, %v2191_v16 }
 0x46e   : > { %v2219_v63 = vmul.f32 1.442695, %v2186_v3 }
 0x46f   : > { %v13751_v55 = vpop.xlane.xlu1 %2155  ;;  %v13753_v34 = vpop.xlane.xlu0 %2161 }
 0x470   : > { %11353 = vpow2.f32 %v2219_v63 }
 0x471   : > { %11355 = vpow2.f32 %v2221_v62 }
 0x472   : > { %11357 = vpow2.f32 %v2229_v4 }
 0x473   : > { %v2130_v42 = vpop.xlane.xlu1 %2129  ;;  %v13755_v14 = vpop.xlane.xlu0 %2167 }
 0x474   : > { %v2189_v33 = vsub.f32 %v13512_v22, %v2130_v42 }
 0x476   : > { %v2225_v35 = vmul.f32 1.442695, %v2189_v33 }
 0x477   : > { %v2136_v49 = vpop.xlane.xlu1 %2135  ;;  %v2138_v54 = vpop.xlane.xlu0 %2137 }
 0x478   : > { %v2192_v37 = vsub.f32 %v13532_v57, %v2136_v49  ;;  %v2193_v11 = vsub.f32 %v13535_v46, %v2138_v54  ;;  %11359 = vpow2.f32 %v2225_v35 }
 0x479   : > { %v13763_v3 = vpop.eup %11351 }
 0x47a   : > { %v2231_v53 = vmul.f32 1.442695, %v2192_v37  ;;  %v2233_v57 = vmul.f32 1.442695, %v2193_v11 }
 0x47b   : > { %v2132_v63 = vpop.xlane.xlu1 %2131  ;;  %v2140_v62 = vpop.xlane.xlu0 %2139 }
 0x47c   : > { %v2190_v27 = vsub.f32 %v13542_v20, %v2132_v63  ;;  %v2194_v22 = vsub.f32 %v13545_v61, %v2140_v62  ;;  %11361 = vpow2.f32 %v2231_v53 }
 0x47d   : > { %v13767_v8 = vpop.eup %11353 }
 0x47e   : > { %v13769_v42 = vpop.eup %11355  ;;  %v2227_v16 = vmul.f32 1.442695, %v2190_v27  ;;  %v2235_v46 = vmul.f32 1.442695, %v2194_v22  ;;  %v2377_v33 = vpack.c.bf16 %v13767_v8, %v13761_v21  ;;  %v17335_v21 = vld [vmem:[#allocation22_spill] sm:$0xff] }
 0x47f   : > { %17321 = vst [vmem:[#allocation133_spill] sm:$0xff] %v13769_v42  ;;  %v13773_v49 = vpop.xlane.xlu1 %2163  ;;  %v2378_v54 = vpack.c.bf16 %v13763_v3, %v13769_v42  ;;  %v13783_v4 = vpop.eup %11357 }
 0x480   : > { %11363 = vpow2.f32 %v2227_v16  ;;  %10543 = vmatprep.mubr.bf16.mxu1 %v2377_v33  ;;  %17322 = vst [vmem:[#allocation134_spill] sm:$0xff] %v13783_v4 }
 0x481   : > { %11365 = vpow2.f32 %v2235_v46  ;;  %10544 = vmatmul.mubr.bf16.vlgmr.msra.gmra.mxu1 %v2378_v54 }
 0x482   : > { %11367 = vpow2.f32 %v2233_v57  ;;  %10560 = vmatpush3.bf16.msra.mxu1 %v13149_v7 }
 0x483   : > { %10561 = vmatprep.subr.bf16.mxu1 %v13349_v56  ;;  %v2142_v20 = vpop.xlane.xlu1 %2141 }
 0x484   : > { %v2195_v35 = vsub.f32 %v13567_v50, %v2142_v20  ;;  %v17328_v20 = vld [vmem:[#allocation61_spill] sm:$0xff] }
 0x485   : > { %v13785_v37 = vpop.eup %11359 }
 0x486   : > { %10562 = vmatpush3.bf16.msra.mxu1 %v13349_v56  ;;  %17323 = vst [vmem:[#allocation135_spill] sm:$0xff] %v13785_v37  ;;  %v2237_v57 = vmul.f32 1.442695, %v2195_v35 }
 0x487   : > { %10563 = vmatprep.subr.bf16.mxu1 %v13112_v5  ;;  %v13781_v61 = vpop.xlane.xlu1 %2173 }
 0x488   : > { %11369 = vpow2.f32 %v2237_v57 }
 0x489   : > { %v13792_v53 = vpop.eup %11361 }
 0x48a   : > { %10564 = vmatpush3.bf16.msra.mxu1 %v13112_v5  ;;  %17324 = vst [vmem:[#allocation136_spill] sm:$0xff] %v13792_v53  ;;  %v2380_v16 = vpack.c.bf16 %v13792_v53, %v13783_v4  ;;  %v17333_v4 = vld [vmem:[#allocation85_spill] sm:$0xff] }
 0x48b   : > { %10565 = vmatprep.subr.bf16.mxu1 %v13226_v44  ;;  %v13790_v11 = vpop.xlane.xlu1 %2169 }
 0x48d   : > { %v13794_v63 = vpop.eup %11363 }
 0x48e   : > { %v13796_v62 = vpop.eup %11365  ;;  %10566 = vmatpush3.bf16.msra.mxu1 %v13226_v44  ;;  %v2379_v27 = vpack.c.bf16 %v13794_v63, %v13785_v37 }
 0x48f   : > { %17325 = vst [vmem:[#allocation137_spill] sm:$0xff] %v13796_v62  ;;  %v13801_v22 = vpop.eup %11367  ;;  %10567 = vmatprep.subr.bf16.mxu1 %v13062_v9  ;;  %v2144_v50 = vpop.xlane.xlu1 %2143 }
 0x490   : > { %17326 = vst [vmem:[#allocation138_spill] sm:$0xff] %v13801_v22  ;;  %v2196_v46 = vsub.f32 %v13614_v39, %v2144_v50  ;;  %10547 = vmatprep.mubr.bf16.mxu1 %v2379_v27  ;;  %v2381_v33 = vpack.c.bf16 %v13796_v62, %v13801_v22  ;;  %v17327_v39 = vld [vmem:[#allocation47_spill] sm:$0xff] }
 0x491   : > { %10548 = vmatmul.mubr.bf16.gmra.mxu1 %v2380_v16 }
 0x492   : > { %v2239_v54 = vmul.f32 1.442695, %v2196_v46  ;;  %10568 = vmatpush3.bf16.msra.mxu1 %v13062_v9  ;;  %10551 = vmatprep.mubr.bf16.mxu1 %v2381_v33  ;;  %v17331_v33 = vld [vmem:[#allocation73_spill] sm:$0xff] }
 0x493   : > { %10569 = vmatprep.subr.bf16.mxu1 %v13316_v26  ;;  %v13824_v50 = vpop.xlane.xlu1 %2175 }
 0x494   : > { %11371 = vpow2.f32 %v2239_v54 }
 0x495   : > { %v13818_v35 = vpop.eup %11369 }
 0x496   : > { %10570 = vmatpush3.bf16.msra.mxu1 %v13316_v26  ;;  %17329 = vst [vmem:[#allocation61_spill] sm:$0xff] %v13818_v35 }
 0x497   : > { %10571 = vmatprep.subr.bf16.mxu1 %v13003_v1  ;;  %v13826_v16 = vpop.xlane.xlu1 %2171 }
 0x49a   : > { %10572 = vmatpush3.bf16.msra.mxu1 %v13003_v1 }
 0x49b   : > { %10573 = vmatprep.subr.bf16.mxu1 %v17327_v39  ;;  %v13831_v62 = vpop.xlane.xlu1 %2149 }
 0x49e   : > { %10574 = vmatpush3.bf16.msra.mxu1 %v17327_v39  ;;  %v17338_v39 = vld [vmem:[#allocation25_spill] sm:$0xff] }
 0x49f   : > { %11063 = vmatprep.subr.msk.bf16.mxu1 %vm1830_vm0, %v17328_v20 }
 0x4a1   : > { %v13820_v27 = vpop.eup %11371 }
 0x4a2   : > { %17330 = vst [vmem:[#allocation139_spill] sm:$0xff] %v13820_v27  ;;  %v2382_v57 = vpack.c.bf16 %v13820_v27, %v13818_v35  ;;  %v2146_v27 = vpop.xlane.xlu1 %2145 }
 0x4a4   : > { %10552 = vmatmul.mubr.bf16.gmra.mxu1 %v2382_v57 }
 0x4b8   : > { %v10609_v46 = vpop.f32.mrf.mxu0 }
 0x4b9   : > { %v13829_v54 = vadd.f32 %v10609_v46, %v17331_v33  ;;  %v17337_v33 = vld [vmem:[#allocation24_spill] sm:$0xff] }
 0x4ba   : > { %v2910_v22 = vpop.f32.mrf.mxu0 }
 0x4bb   : > { %17332 = vst [vmem:[#allocation140_spill] sm:$0xff] %v13829_v54  ;;  %v13834_v37 = vadd.f32 %v2910_v22, %v17333_v4  ;;  %3170 = vmax.xlane.f32.xlu1 %v13829_v54  ;;  %v17340_v54 = vld [vmem:[#allocation30_spill] sm:$0xff] }
 0x4bc   : > { %v10610_v42 = vpop.f32.mrf.mxu0 }
 0x4bd   : > { %17334 = vst [vmem:[#allocation141_spill] sm:$0xff] %v13834_v37  ;;  %v13838_v35 = vadd.f32 %v10610_v42, %v17335_v21  ;;  %3166 = vmax.xlane.f32.xlu0 %v13834_v37  ;;  %v17339_v21 = vld [vmem:[#allocation28_spill] sm:$0xff] }
 0x4be   : > { %v2913_v57 = vpop.f32.mrf.mxu0 }
 0x4bf   : > { %17336 = vst [vmem:[#allocation142_spill] sm:$0xff] %v13838_v35  ;;  %3172 = vmax.xlane.f32.xlu1 %v13838_v35  ;;  %v13843_v13 = vadd.f32 %v2913_v57, %v17337_v33  ;;  %v13856_v35 = vpop.permute.xlu1 %5086  ;;  %v13879_v33 = vpop.xlane.xlu0 %2181 }
 0x4c0   : > { %v10613_v46 = vpop.f32.mrf.mxu0  ;;  %17341 = vst [vmem:[#allocation143_spill] sm:$0xff] %v13856_v35 }
 0x4c1   : > { %v13846_v53 = vadd.f32 %v10613_v46, %v17338_v39 }
 0x4c2   : > { %v2926_v22 = vpop.f32.mrf.mxu0 }
 0x4c3   : > { %3168 = vmax.xlane.f32.xlu1 %v13843_v13  ;;  %3178 = vmax.xlane.f32.xlu0 %v13846_v53  ;;  %v13851_v4 = vadd.f32 %v2926_v22, %v17339_v21  ;;  %v13864_v39 = vpop.permute.xlu1 %5088 }
 0x4c4   : > { %v10614_v42 = vpop.f32.mrf.mxu0  ;;  %17342 = vst [vmem:[#allocation144_spill] sm:$0xff] %v13864_v39  ;;  %v17347_v39 = vld [vmem:[#allocation45_spill] sm:$0xff] }
 0x4c5   : > { %v13854_v37 = vadd.f32 %v10614_v42, %v17340_v54 }
 0x4c6   : > { %v2929_v17 = vpop.f32.mrf.mxu0 }
 0x4c7   : > { %3174 = vmax.xlane.f32.xlu1 %v13851_v4  ;;  %3180 = vmax.xlane.f32.xlu0 %v13854_v37  ;;  %v13861_v57 = vadd.f32 %v2929_v17, %v13057_v31  ;;  %v13873_v54 = vpop.permute.xlu1 %5275 }
 0x4c8   : > { %v10617_v46 = vpop.f32.mrf.mxu0  ;;  %17344 = vst [vmem:[#allocation146_spill] sm:$0xff] %v13873_v54 }
 0x4c9   : > { %v13867_v22 = vadd.f32 %v10617_v46, %v17283_v48 }
 0x4ca   : > { %v2942_v42 = vpop.f32.mrf.mxu0 }
 0x4cb   : > { %3176 = vmax.xlane.f32.xlu0 %v13861_v57  ;;  %17343 = vst [vmem:[#allocation145_spill] sm:$0xff] %v13867_v22  ;;  %v13871_v35 = vadd.f32 %v2942_v42, %v13079_v29  ;;  %v13882_v46 = vpop.permute.xlu1 %5092  ;;  %v17349_v29 = vld [vmem:[#allocation13_spill] sm:$0xff] }
 0x4cc   : > { %v10618_v21 = vpop.f32.mrf.mxu0  ;;  %17346 = vst [vmem:[#allocation148_spill] sm:$0xff] %v13882_v46 }
 0x4cd   : > { %v13877_v17 = vadd.f32 %v10618_v21, %v17287_v2  ;;  %v13892_v21 = vpop.xlane.xlu0 %2177 }
 0x4ce   : > { %v2945_v31 = vpop.f32.mrf.mxu0 }
 0x4cf   : > { %3186 = vmax.xlane.f32.xlu0 %v13867_v22  ;;  %17345 = vst [vmem:[#allocation147_spill] sm:$0xff] %v13877_v17  ;;  %v13887_v42 = vadd.f32 %v2945_v31, %v17278_v60  ;;  %v13897_v48 = vpop.permute.xlu1 %5271  ;;  %v17353_v60 = vld [vmem:[#allocation96_spill] sm:$0xff] }
 0x4d0   : > { %v10621_v54 = vpop.f32.mrf.mxu0  ;;  %17351 = vst [vmem:[#allocation149_spill] sm:$0xff] %v13897_v48  ;;  %v2197_v48 = vsub.f32 %v13655_v12, %v2146_v27  ;;  %v17357_v12 = vld [vmem:[#allocation23_spill] sm:$0xff] }
 0x4d1   : > { %17348 = vst [vmem:[#allocation45_spill] sm:$0xff] %v13887_v42  ;;  %v13895_v2 = vadd.f32 %v10621_v54, %v17280_v10  ;;  %v2152_v22 = vpop.xlane.xlu0 %2151  ;;  %v2199_v54 = vsub.f32 %v13645_v38, %v13831_v62 }
 0x4d2   : > { %v2958_v46 = vpop.f32.mrf.mxu0  ;;  %v2241_v38 = vmul.f32 1.442695, %v2197_v48  ;;  %v2206_v48 = vsub.f32 %v13555_v15, %v13773_v49  ;;  %v17364_v49 = vld [vmem:[#allocation26_spill] sm:$0xff] }
 0x4d3   : > { %3182 = vmax.xlane.f32.xlu0 %v13871_v35  ;;  %17350 = vst [vmem:[#allocation13_spill] sm:$0xff] %v13895_v2  ;;  %v13903_v31 = vadd.f32 %v2958_v46, %v13125_v59  ;;  %v13911_v10 = vpop.permute.xlu1 %5257 }
 0x4d7   : > { %3188 = vmax.xlane.f32.xlu0 %v13877_v17  ;;  %v2245_v17 = vmul.f32 1.442695, %v2199_v54  ;;  %v17360_v54 = vld [vmem:[#allocation87_spill] sm:$0xff] }
 0x4d8   : > { %5261 = vrot.lane.b32.xlu1 %v17347_v39, %s12065_s26  ;;  %v17352_v39 = vld [vmem:[#allocation16_spill] sm:$0xff] }
 0x4d9   : > { %17354 = vst [vmem:[#allocation16_spill] sm:$0xff] %v13911_v10 }
 0x4db   : > { %3184 = vmax.xlane.f32.xlu0 %v13887_v42  ;;  %v2202_v42 = vsub.f32 %v17353_v60, %v13751_v55  ;;  %v2200_v60 = vsub.f32 %v13583_v23, %v2152_v22  ;;  %v17356_v55 = vld [vmem:[#allocation89_spill] sm:$0xff]  ;;  %v17358_v23 = vld [vmem:[#allocation90_spill] sm:$0xff] }
 0x4dc   : > { %5265 = vrot.lane.b32.xlu1 %v17349_v29, %s12065_s26  ;;  %v10622_v29 = vpop.f32.mrf.mxu0  ;;  %v2201_v59 = vsub.f32 %v17356_v55, %v13741_v0  ;;  %v2204_v22 = vsub.f32 %v17358_v23, %v13743_v58  ;;  %v17359_v0 = vld [vmem:[#allocation27_spill] sm:$0xff]  ;;  %v2203_v55 = vsub.f32 %v17360_v54, %v13734_v6  ;;  %v2259_v58 = vmul.f32 1.442695, %v2206_v48 }
 0x4dd   : > { %v13916_v46 = vadd.f32 %v10622_v29, %v17284_v19  ;;  %v2210_v6 = vsub.f32 %v13635_v45, %v13826_v16 }
 0x4de   : > { %v2249_v29 = vmul.f32 1.442695, %v2201_v59  ;;  %v17361_v59 = vld [vmem:[#allocation97_spill] sm:$0xff] }
 0x4df   : > { %3194 = vmax.xlane.f32.xlu0 %v13895_v2  ;;  %v17355_v2 = vld [vmem:[#allocation20_spill] sm:$0xff] }
 0x4e0   : > { %5269 = vrot.lane.b32.xlu1 %v17352_v39, %s12065_s26  ;;  %v2251_v39 = vmul.f32 1.442695, %v2202_v42 }
 0x4e2   : > { %11373 = vpow2.f32 %v2251_v39  ;;  %v17362_v39 = vld [vmem:[#allocation31_spill] sm:$0xff] }
 0x4e3   : > { %3190 = vmax.xlane.f32.xlu0 %v13903_v31  ;;  %11375 = vpow2.f32 %v2245_v17  ;;  %v2255_v17 = vmul.f32 1.442695, %v2204_v22  ;;  %v2267_v22 = vmul.f32 1.442695, %v2210_v6  ;;  %v2215_v6 = vsub.f32 %v13558_v28, %v13879_v33 }
 0x4e4   : > { %5718 = vrot.lane.b32.xlu1 %v17355_v2, %s12065_s26  ;;  %v2247_v2 = vmul.f32 1.442695, %v2200_v60  ;;  %11377 = vpow2.f32 %v2241_v38  ;;  %v2253_v60 = vmul.f32 1.442695, %v2203_v55 }
 0x4e5   : > { %v2277_v28 = vmul.f32 1.442695, %v2215_v6  ;;  %v3049_v6 = vsel %vm1830_vm0, %v13579_v40, 0 }
 0x4e7   : > { %3196 = vmax.xlane.f32.xlu0 %v13916_v46 }
 0x4e8   : > { %v2148_v62 = vpop.xlane.xlu1 %2147  ;;  %5714 = vrot.lane.b32.xlu1 %v17357_v12, %s12065_s26 }
 0x4e9   : > { %v2198_v27 = vsub.f32 %v13732_v25, %v2148_v62  ;;  %v2205_v25 = vsub.f32 %v17361_v59, %v13753_v34  ;;  %v17363_v62 = vld [vmem:[#allocation99_spill] sm:$0xff]  ;;  %v17365_v34 = vld [vmem:[#allocation94_spill] sm:$0xff] }
 0x4ea   : > { %v2208_v15 = vsub.f32 %v17363_v62, %v13755_v14  ;;  %v2207_v12 = vsub.f32 %v17365_v34, %v13748_v43  ;;  %v3067_v34 = vsel %vm1830_vm0, %v17328_v20, 0 }
 0x4eb   : > { %v2243_v42 = vmul.f32 1.442695, %v2198_v27  ;;  %v2257_v38 = vmul.f32 1.442695, %v2205_v25  ;;  %v17373_v25 = vld [vmem:[#allocation43_spill] sm:$0xff] }
 0x4ec   : > { %5712 = vrot.lane.b32.xlu1 %v17359_v0, %s12065_s26  ;;  %v2263_v14 = vmul.f32 1.442695, %v2208_v15  ;;  %v2261_v16 = vmul.f32 1.442695, %v2207_v12  ;;  %v2180_v0 = vpop.xlane.xlu1 %2179  ;;  %v17379_v15 = vld [vmem:[#allocation15_spill] sm:$0xff]  ;;  %v17380_v12 = vld [vmem:[#allocation54_spill] sm:$0xff] }
 0x4ed   : > { %11379 = vpow2.f32 %v2243_v42  ;;  %v17368_v42 = vld [vmem:[#allocation17_spill] sm:$0xff]  ;;  %v2214_v59 = vsub.f32 %v13738_v47, %v2180_v0 }
 0x4ee   : > { %11381 = vpow2.f32 %v2247_v2  ;;  %v2209_v2 = vsub.f32 %v13595_v24, %v13790_v11  ;;  %v2212_v11 = vsub.f32 %v13623_v32, %v13824_v50  ;;  %v2211_v32 = vsub.f32 %v13586_v52, %v13781_v61 }
 0x4ef   : > { %11383 = vpow2.f32 %v2249_v29  ;;  %v13945_v27 = vpop.eup %11373 }
 0x4f0   : > { %5710 = vrot.lane.b32.xlu1 %v17362_v39, %s12065_s26  ;;  %11385 = vpow2.f32 %v2255_v17  ;;  %17366 = vst [vmem:[#allocation96_spill] sm:$0xff] %v13945_v27  ;;  %v13949_v29 = vpop.eup %11375  ;;  %v2265_v48 = vmul.f32 1.442695, %v2209_v2  ;;  %v2271_v50 = vmul.f32 1.442695, %v2212_v11  ;;  %v2184_v39 = vpop.xlane.xlu0 %2183 }
 0x4f1   : > { %11387 = vpow2.f32 %v2259_v58  ;;  %17367 = vst [vmem:[#allocation20_spill] sm:$0xff] %v13949_v29  ;;  %v13953_v23 = vpop.eup %11377  ;;  %v2275_v58 = vmul.f32 1.442695, %v2214_v59  ;;  %v2269_v52 = vmul.f32 1.442695, %v2211_v32 }
 0x4f2   : > { %11389 = vpow2.f32 %v2253_v60  ;;  %17369 = vst [vmem:[#allocation89_spill] sm:$0xff] %v13953_v23  ;;  %v17375_v60 = vld [vmem:[#allocation12_spill] sm:$0xff] }
 0x4f3   : > { %11391 = vpow2.f32 %v2257_v38 }
 0x4f4   : > { %5706 = vrot.lane.b32.xlu1 %v17364_v49, %s12065_s26  ;;  %11393 = vpow2.f32 %v2263_v14  ;;  %v17382_v14 = vld [vmem:[#allocation21_spill] sm:$0xff] }
 0x4f5   : > { %11395 = vpow2.f32 %v2267_v22 }
 0x4f6   : > { %11397 = vpow2.f32 %v2261_v16  ;;  %v17386_v16 = vld [vmem:[#allocation19_spill] sm:$0xff] }
 0x4f7   : > { %11399 = vpow2.f32 %v2265_v48  ;;  %v3064_v48 = vsel %vm1830_vm0, %v17380_v12, 0 }
 0x4f8   : > { %5704 = vrot.lane.b32.xlu1 %v17368_v42, %s12065_s26  ;;  %11401 = vpow2.f32 %v2271_v50 }
 0x4f9   : > { %11403 = vpow2.f32 %v2275_v58 }
 0x4fa   : > { %v13955_v45 = vpop.eup %11379  ;;  %11405 = vpow2.f32 %v2269_v52  ;;  %v17395_v52 = vld [vmem:[#allocation95_spill] sm:$0xff] }
 0x4fb   : > { %17370 = vst [vmem:[#allocation23_spill] sm:$0xff] %v13955_v45  ;;  %v13957_v43 = vpop.eup %11381  ;;  %v2383_v54 = vpack.c.bf16 %v13955_v45, %v13953_v23 }
 0x4fc   : > { %17371 = vst [vmem:[#allocation90_spill] sm:$0xff] %v13957_v43  ;;  %v13961_v24 = vpop.eup %11383  ;;  %5839 = vrot.lane.b32.xlu1 %v13149_v7, %s12065_s26  ;;  %v2384_v55 = vpack.c.bf16 %v13957_v43, %v13949_v29  ;;  %v2213_v7 = vsub.f32 %v13570_v36, %v13892_v21  ;;  %v2216_v21 = vsub.f32 %v13598_v41, %v2184_v39  ;;  %v17502_v29 = vld [vmem:[#allocation36_spill] sm:$0xff] }
 0x4fd   : > { %17372 = vst [vmem:[#allocation27_spill] sm:$0xff] %v13961_v24  ;;  %5259 = vrot.lane.b32.xlu0 %v17373_v25, %s12065_s26  ;;  %10555 = vmatprep.mubr.bf16.mxu1 %v2383_v54  ;;  %v2385_v17 = vpack.c.bf16 %v13945_v27, %v13961_v24  ;;  %v13980_v47 = vpop.eup %11385  ;;  %v17387_v54 = vld [vmem:[#allocation59_spill] sm:$0xff]  ;;  %v17496_v27 = vld [vmem:[#allocation28_spill] sm:$0xff] }
 0x4fe   : > { %10556 = vmatmul.mubr.bf16.gmra.mxu1 %v2384_v55  ;;  %17374 = vst [vmem:[#allocation87_spill] sm:$0xff] %v13980_v47  ;;  %v13984_v38 = vpop.eup %11387  ;;  %v2273_v62 = vmul.f32 1.442695, %v2213_v7  ;;  %v2279_v41 = vmul.f32 1.442695, %v2216_v21  ;;  %v3061_v7 = vsel %vm1830_vm0, %v17387_v54, 0 }
 0x4ff   : > { %10575 = vmatprep.mubr.bf16.mxu1 %v2385_v17  ;;  %17376 = vst [vmem:[#allocation97_spill] sm:$0xff] %v13984_v38  ;;  %v13986_v61 = vpop.eup %11389  ;;  %v3055_v21 = vsel %vm1830_vm0, %v13681_v18, 0  ;;  %v17498_v24 = vld [vmem:[#allocation32_spill] sm:$0xff] }
 0x500   : > { %5835 = vrot.lane.b32.xlu1 %v13112_v5, %s12065_s26  ;;  %17377 = vst [vmem:[#allocation31_spill] sm:$0xff] %v13986_v61  ;;  %v13988_v36 = vpop.eup %11391  ;;  %v2386_v5 = vpack.c.bf16 %v13980_v47, %v13986_v61  ;;  %11407 = vpow2.f32 %v2273_v62  ;;  %v17491_v61 = vld [vmem:[#allocation73_spill] sm:$0xff] }
 0x501   : > { %5263 = vrot.lane.b32.xlu0 %v17375_v60, %s12065_s26  ;;  %17378 = vst [vmem:[#allocation99_spill] sm:$0xff] %v13988_v36  ;;  %v2387_v49 = vpack.c.bf16 %v13984_v38, %v13988_v36  ;;  %v14003_v2 = vpop.eup %11393  ;;  %11409 = vpow2.f32 %v2279_v41  ;;  %v2961_v60 = vpop.f32.mrf.mxu0  ;;  %v17463_v38 = vld [vmem:[#allocation60_spill] sm:$0xff] }
 0x502   : > { %17381 = vst [vmem:[#allocation26_spill] sm:$0xff] %v14003_v2  ;;  %v14007_v42 = vpop.eup %11395  ;;  %11411 = vpow2.f32 %v2277_v28  ;;  %v14056_v62 = vadd.f32 %v2961_v60, %v13146_v30 }
 0x503   : > { %17383 = vst [vmem:[#allocation94_spill] sm:$0xff] %v14007_v42  ;;  %v14009_v33 = vpop.eup %11397 }
 0x504   : > { %17384 = vst [vmem:[#allocation17_spill] sm:$0xff] %v14009_v33  ;;  %v14011_v22 = vpop.eup %11399  ;;  %v2388_v20 = vpack.c.bf16 %v14003_v2, %v14009_v33  ;;  %v17454_v33 = vld [vmem:[#allocation137_spill] sm:$0xff] }
 0x505   : > { %5267 = vrot.lane.b32.xlu0 %v17379_v15, %s12065_s26  ;;  %17385 = vst [vmem:[#allocation43_spill] sm:$0xff] %v14011_v22  ;;  %v2389_v0 = vpack.c.bf16 %v14007_v42, %v14011_v22  ;;  %v14023_v11 = vpop.eup %11401  ;;  %v3052_v15 = vsel %vm1830_vm0, %v13588_v51, 0 }
 0x506   : > { %10576 = vmatmul.mubr.bf16.vlgmr.msra.gmra.mxu1 %v2386_v5  ;;  %17388 = vst [vmem:[#allocation12_spill] sm:$0xff] %v14023_v11  ;;  %v14027_v55 = vpop.eup %11403  ;;  %v14063_v5 = vpop.permute.xlu0 %5279 }
 0x507   : > { %10624 = vmatpush3.bf16.xpose.msra.mxu1 %v3067_v34  ;;  %10579 = vmatprep.mubr.bf16.mxu1 %v2387_v49  ;;  %17389 = vst [vmem:[#allocation15_spill] sm:$0xff] %v14027_v55  ;;  %v14029_v59 = vpop.eup %11405  ;;  %v17398_v34 = vld [vmem:[#allocation93_spill] sm:$0xff] }
 0x508   : > { %11064 = vmatprep.subr.msk.bf16.mxu1 %vm1830_vm0, %v17380_v12  ;;  %17390 = vst [vmem:[#allocation54_spill] sm:$0xff] %v14029_v59  ;;  %v2390_v17 = vpack.c.bf16 %v14023_v11, %v14029_v59  ;;  %v17404_v12 = vld [vmem:[#allocation103_spill] sm:$0xff] }
 0x509   : > { %5716 = vrot.lane.b32.xlu0 %v17382_v14, %s12065_s26  ;;  %v17405_v14 = vld [vmem:[#allocation110_spill] sm:$0xff] }
 0x50a   : > { %v14067_v49 = vpop.permute.xlu0 %5277 }
 0x50b   : > { %17397 = vst [vmem:[#allocation95_spill] sm:$0xff] %v14067_v49 }
 0x50d   : > { %5708 = vrot.lane.b32.xlu0 %v17386_v16, %s12065_s26  ;;  %v14031_v25 = vpop.eup %11407 }
 0x50e   : > { %10580 = vmatmul.mubr.bf16.gmra.mxu1 %v2388_v20  ;;  %17391 = vst [vmem:[#allocation21_spill] sm:$0xff] %v14031_v25  ;;  %v2391_v32 = vpack.c.bf16 %v14027_v55, %v14031_v25  ;;  %v14043_v50 = vpop.eup %11409  ;;  %v17407_v20 = vld [vmem:[#allocation115_spill] sm:$0xff] }
 0x50f   : > { %10626 = vmatpush3.bf16.xpose.msra.mxu1 %v3064_v48  ;;  %10583 = vmatprep.mubr.bf16.mxu1 %v2389_v0  ;;  %17393 = vst [vmem:[#allocation19_spill] sm:$0xff] %v14043_v50  ;;  %v14045_v39 = vpop.eup %11411  ;;  %v17408_v0 = vld [vmem:[#allocation142_spill] sm:$0xff] }
 0x510   : > { %11065 = vmatprep.subr.msk.bf16.mxu1 %vm1830_vm0, %v17387_v54  ;;  %17394 = vst [vmem:[#allocation59_spill] sm:$0xff] %v14045_v39  ;;  %v2392_v58 = vpack.c.bf16 %v14043_v50, %v14045_v39  ;;  %v17409_v54 = vld [vmem:[#allocation140_spill] sm:$0xff] }
 0x511   : > { %5837 = vrot.lane.b32.xlu0 %v13349_v56, %s12065_s26  ;;  %v17392_v56 = vld [vmem:[#allocation44_spill] sm:$0xff] }
 0x512   : > { %17396 = vst [vmem:[#allocation44_spill] sm:$0xff] %v14063_v5 }
 0x515   : > { %5829 = vrot.lane.b32.xlu0 %v13316_v26, %s12065_s26  ;;  %v3058_v26 = vsel %vm1830_vm0, %v17392_v56, 0 }
 0x516   : > { %10584 = vmatmul.mubr.bf16.gmra.mxu1 %v2390_v17 }
 0x517   : > { %10628 = vmatpush3.bf16.xpose.msra.mxu1 %v3061_v7  ;;  %10587 = vmatprep.mubr.bf16.mxu1 %v2391_v32 }
 0x518   : > { %11066 = vmatprep.subr.msk.bf16.mxu1 %vm1830_vm0, %v17392_v56  ;;  %v17410_v56 = vld [vmem:[#allocation112_spill] sm:$0xff] }
 0x51e   : > { %10588 = vmatmul.mubr.bf16.gmra.mxu1 %v2392_v58 }
 0x51f   : > { %10630 = vmatpush3.bf16.xpose.msra.mxu1 %v3058_v26  ;;  %10639 = vmatprep.mubr.msk.bf16.mxu1 %vm1830_vm0, %v17395_v52 }
 0x520   : > { %11067 = vmatprep.subr.msk.bf16.mxu1 %vm1830_vm0, %v13681_v18  ;;  %v14074_v18 = vpop.permute.xlu0 %5090 }
 0x524   : > { %3192 = vmax.xlane.f32.xlu1 %v14056_v62 }
 0x527   : > { %10632 = vmatpush3.bf16.xpose.msra.mxu1 %v3055_v21  ;;  %v17411_v21 = vld [vmem:[#allocation111_spill] sm:$0xff] }
 0x528   : > { %11068 = vmatprep.subr.msk.bf16.mxu1 %vm1830_vm0, %v13588_v51  ;;  %v14083_v51 = vpop.permute.xlu0 %5273 }
 0x529   : > { %17399 = vst [vmem:[#allocation93_spill] sm:$0xff] %v14083_v51 }
 0x52c   : > { %v14094_v41 = vpop.permute.xlu0 %5255 }
 0x52f   : > { %10634 = vmatpush3.bf16.xpose.msra.mxu1 %v3052_v15 }
 0x530   : > { %11069 = vmatprep.subr.msk.bf16.mxu1 %vm1830_vm0, %v13579_v40  ;;  %v17400_v40 = vld [vmem:[#allocation113_spill] sm:$0xff] }
 0x531   : > { %17403 = vst [vmem:[#allocation113_spill] sm:$0xff] %v14094_v41 }
 0x534   : > { %2283 = vadd.xlane.f32.xlu0 %v13767_v8  ;;  %v17401_v8 = vld [vmem:[#allocation136_spill] sm:$0xff] }
 0x535   : > { %5833 = vrot.lane.b32.xlu1 %v13226_v44, %s12065_s26  ;;  %v3046_v44 = vsel %vm1830_vm0, %v17398_v34, 0 }
 0x537   : > { %10636 = vmatpush3.bf16.xpose.msra.mxu1 %v3049_v6  ;;  %v17412_v6 = vld [vmem:[#allocation29_spill] sm:$0xff] }
 0x538   : > { %11070 = vmatprep.subr.msk.bf16.mxu1 %vm1830_vm0, %v17398_v34  ;;  %2287 = vadd.xlane.f32.xlu0 %v13763_v3  ;;  %v17402_v3 = vld [vmem:[#allocation47_spill] sm:$0xff] }
 0x539   : > { %5831 = vrot.lane.b32.xlu1 %v13062_v9, %s12065_s26  ;;  %v17413_v34 = vld [vmem:[#allocation107_spill] sm:$0xff] }
 0x53c   : > { %2291 = vadd.xlane.f32.xlu0 %v13794_v63 }
 0x53d   : > { %5827 = vrot.lane.b32.xlu1 %v13003_v1, %s12065_s26  ;;  %v17406_v1 = vld [vmem:[#allocation141_spill] sm:$0xff] }
 0x53f   : > { %10638 = vmatpush3.bf16.xpose.msra.mxu1 %v3046_v44 }
 0x540   : > { %10687 = vmatprep.subr.bf16.mxu1 %v17400_v40  ;;  %2295 = vadd.xlane.f32.xlu0 %v17401_v8 }
 0x541   : > { %5825 = vrot.lane.b32.xlu1 %v17402_v3, %s12065_s26 }
 0x544   : > { %v3171_v9 = vpop.xlane.xlu1 %3170 }
 0x545   : > { %v3232_v17 = vsub.f32 %v17409_v54, %v3171_v9 }
 0x546   : > { %10640 = vmatmul.mubr.msk.bf16.vlgmr.msra.gmra.mxu1 %vm1830_vm0, %v17404_v12  ;;  %v3167_v63 = vpop.xlane.xlu0 %3166 }
 0x547   : > { %10643 = vmatprep.mubr.msk.bf16.mxu1 %vm1830_vm0, %v17405_v14  ;;  %10688 = vmatpush3.bf16.msra.mxu1 %v17400_v40  ;;  %v3230_v28 = vsub.f32 %v17406_v1, %v3167_v63  ;;  %v3266_v52 = vmul.f32 1.442695, %v3232_v17  ;;  %v17414_v63 = vld [vmem:[#allocation104_spill] sm:$0xff] }
 0x548   : > { %10689 = vmatprep.subr.bf16.mxu1 %v17407_v20  ;;  %v3173_v16 = vpop.xlane.xlu1 %3172 }
 0x549   : > { %v3233_v48 = vsub.f32 %v17408_v0, %v3173_v16  ;;  %v3262_v7 = vmul.f32 1.442695, %v3230_v28  ;;  %v17415_v28 = vld [vmem:[#allocation53_spill] sm:$0xff]  ;;  %v17416_v16 = vld [vmem:[#allocation50_spill] sm:$0xff] }
 0x54b   : > { %v3268_v32 = vmul.f32 1.442695, %v3233_v48  ;;  %10690 = vmatpush3.bf16.msra.mxu1 %v17407_v20 }
 0x54c   : > { %10691 = vmatprep.subr.bf16.mxu1 %v17410_v56  ;;  %v3169_v58 = vpop.xlane.xlu1 %3168  ;;  %v3179_v26 = vpop.xlane.xlu0 %3178 }
 0x54d   : > { %11413 = vpow2.f32 %v3268_v32  ;;  %v3231_v60 = vsub.f32 %v13843_v13, %v3169_v58  ;;  %v3236_v3 = vsub.f32 %v13846_v53, %v3179_v26  ;;  %v17419_v32 = vld [vmem:[#allocation64_spill] sm:$0xff]  ;;  %v17420_v58 = vld [vmem:[#allocation98_spill] sm:$0xff] }
 0x54e   : > { %10644 = vmatmul.mubr.msk.bf16.gmra.mxu1 %vm1830_vm0, %v17411_v21  ;;  %11415 = vpow2.f32 %v3262_v7  ;;  %v17421_v21 = vld [vmem:[#allocation147_spill] sm:$0xff] }
 0x54f   : > { %v3264_v15 = vmul.f32 1.442695, %v3231_v60  ;;  %10647 = vmatprep.mubr.msk.bf16.mxu1 %vm1830_vm0, %v17412_v6  ;;  %10692 = vmatpush3.bf16.msra.mxu1 %v17410_v56  ;;  %v3274_v20 = vmul.f32 1.442695, %v3236_v3  ;;  %v17422_v6 = vld [vmem:[#allocation88_spill] sm:$0xff]  ;;  %v17424_v3 = vld [vmem:[#allocation86_spill] sm:$0xff] }
 0x550   : > { %10693 = vmatprep.subr.bf16.mxu1 %v17413_v34  ;;  %v3175_v44 = vpop.xlane.xlu1 %3174  ;;  %v3181_v40 = vpop.xlane.xlu0 %3180 }
 0x551   : > { %11417 = vpow2.f32 %v3264_v15  ;;  %v3234_v8 = vsub.f32 %v13851_v4, %v3175_v44  ;;  %v3237_v13 = vsub.f32 %v13854_v37, %v3181_v40  ;;  %v17417_v37 = vld [vmem:[#allocation106_spill] sm:$0xff]  ;;  %v17423_v40 = vld [vmem:[#allocation145_spill] sm:$0xff] }
 0x552   : > { %11419 = vpow2.f32 %v3266_v52 }
 0x553   : > { %v3276_v9 = vmul.f32 1.442695, %v3237_v13  ;;  %10694 = vmatpush3.bf16.msra.mxu1 %v17413_v34  ;;  %v3270_v12 = vmul.f32 1.442695, %v3234_v8  ;;  %v4031_v34 = vsel %vm1830_vm0, %v17422_v6, 0 }
 0x554   : > { %10695 = vmatprep.subr.bf16.mxu1 %v17414_v63  ;;  %v3177_v14 = vpop.xlane.xlu0 %3176 }
 0x555   : > { %v3235_v1 = vsub.f32 %v13861_v57, %v3177_v14  ;;  %11421 = vpow2.f32 %v3276_v9  ;;  %v17418_v57 = vld [vmem:[#allocation100_spill] sm:$0xff]  ;;  %v17425_v9 = vld [vmem:[#allocation63_spill] sm:$0xff] }
 0x556   : > { %10648 = vmatmul.mubr.msk.bf16.gmra.mxu1 %vm1830_vm0, %v17415_v28  ;;  %11423 = vpow2.f32 %v3270_v12  ;;  %v17426_v14 = vld [vmem:[#allocation132_spill] sm:$0xff]  ;;  %v17427_v28 = vld [vmem:[#allocation45_spill] sm:$0xff] }
 0x557   : > { %v3272_v4 = vmul.f32 1.442695, %v3235_v1  ;;  %10651 = vmatprep.mubr.msk.bf16.mxu1 %vm1830_vm0, %v17416_v16  ;;  %10696 = vmatpush3.bf16.msra.mxu1 %v17414_v63 }
 0x558   : > { %10697 = vmatprep.subr.bf16.mxu1 %v17417_v37  ;;  %v3187_v53 = vpop.xlane.xlu0 %3186 }
 0x559   : > { %11425 = vpow2.f32 %v3272_v4  ;;  %v3240_v8 = vsub.f32 %v17423_v40, %v3187_v53  ;;  %v17434_v40 = vld [vmem:[#allocation70_spill] sm:$0xff] }
 0x55a   : > { %v11414_v0 = vpop.eup %11413  ;;  %11427 = vpow2.f32 %v3274_v20 }
 0x55b   : > { %10698 = vmatpush3.bf16.msra.mxu1 %v17417_v37  ;;  %3332 = vadd.xlane.f32.xlu0 %v11414_v0  ;;  %v14128_v54 = vpop.eup %11415  ;;  %v3282_v4 = vmul.f32 1.442695, %v3240_v8  ;;  %v17435_v8 = vld [vmem:[#allocation138_spill] sm:$0xff] }
 0x55c   : > { %10699 = vmatprep.subr.bf16.mxu1 %v17418_v57  ;;  %v3183_v48 = vpop.xlane.xlu0 %3182 }
 0x55d   : > { %v3238_v52 = vsub.f32 %v13871_v35, %v3183_v48 }
 0x55e   : > { %v11418_v17 = vpop.eup %11417  ;;  %10652 = vmatmul.mubr.msk.bf16.gmra.mxu1 %vm1830_vm0, %v17419_v32  ;;  %v14156_v32 = vpop.permute.xlu1 %5261 }
 0x55f   : > { %v14132_v7 = vpop.eup %11419  ;;  %10700 = vmatpush3.bf16.msra.mxu1 %v17418_v57  ;;  %3328 = vadd.xlane.f32.xlu0 %v11418_v17  ;;  %v3422_v56 = vpack.c.bf16 %v11418_v17, %v14128_v54  ;;  %v3278_v12 = vmul.f32 1.442695, %v3238_v52  ;;  %v17428_v57 = vld [vmem:[#allocation133_spill] sm:$0xff]  ;;  %v4028_v17 = vsel %vm1830_vm0, %v17424_v3, 0  ;;  %17429 = vst [vmem:[#allocation136_spill] sm:$0xff] %v14156_v32  ;;  %v17432_v52 = vld [vmem:[#allocation134_spill] sm:$0xff] }
 0x560   : > { %10701 = vmatprep.subr.bf16.mxu1 %v17420_v58  ;;  %v3189_v26 = vpop.xlane.xlu0 %3188  ;;  %v3423_v60 = vpack.c.bf16 %v11414_v0, %v14132_v7 }
 0x561   : > { %v3241_v15 = vsub.f32 %v17421_v21, %v3189_v26  ;;  %10671 = vmatprep.mubr.bf16.mxu0 %v3422_v56  ;;  %v17430_v56 = vld [vmem:[#allocation77_spill] sm:$0xff]  ;;  %v17431_v26 = vld [vmem:[#allocation135_spill] sm:$0xff] }
 0x562   : > { %10672 = vmatmul.mubr.bf16.vlgmr.msra.gmra.mxu0 %v3423_v60  ;;  %v11422_v44 = vpop.eup %11421  ;;  %v14163_v6 = vpop.permute.xlu1 %5265 }
 0x563   : > { %v3284_v13 = vmul.f32 1.442695, %v3241_v15  ;;  %10702 = vmatpush3.bf16.msra.mxu1 %v17420_v58  ;;  %10720 = vmatpush3.bf16.xpose.msra.mxu0 %v4031_v34  ;;  %v14148_v35 = vpop.eup %11423  ;;  %17433 = vst [vmem:[#allocation47_spill] sm:$0xff] %v14163_v6  ;;  %v4025_v34 = vsel %vm1830_vm0, %v17430_v56, 0 }
 0x564   : > { %11072 = vmatprep.subr.msk.bf16.mxu0 %vm1830_vm0, %v17424_v3  ;;  %11079 = vmatprep.subr.msk.bf16.mxu1 %vm1830_vm0, %v17425_v9  ;;  %v3185_v63 = vpop.xlane.xlu0 %3184 }
 0x565   : > { %11429 = vpow2.f32 %v3284_v13  ;;  %3340 = vadd.xlane.f32.xlu0 %v11422_v44  ;;  %2281 = vadd.xlane.f32.xlu1 %v17426_v14  ;;  %v3239_v20 = vsub.f32 %v17427_v28, %v3185_v63 }
 0x566   : > { %v11426_v1 = vpop.eup %11425  ;;  %11431 = vpow2.f32 %v3278_v12 }
 0x567   : > { %v3424_v16 = vpack.c.bf16 %v11426_v1, %v14148_v35  ;;  %v11428_v37 = vpop.eup %11427  ;;  %v3280_v53 = vmul.f32 1.442695, %v3239_v20  ;;  %v4022_v20 = vsel %vm1830_vm0, %v17434_v40, 0 }
 0x568   : > { %v3195_v0 = vpop.xlane.xlu0 %3194  ;;  %v3425_v48 = vpack.c.bf16 %v11422_v44, %v11428_v37 }
 0x569   : > { %3336 = vadd.xlane.f32.xlu0 %v11426_v1  ;;  %2285 = vadd.xlane.f32.xlu1 %v17428_v57  ;;  %11433 = vpow2.f32 %v3280_v53  ;;  %v17437_v1 = vld [vmem:[#allocation13_spill] sm:$0xff] }
 0x56a   : > { %10675 = vmatprep.mubr.bf16.mxu0 %v3424_v16  ;;  %11435 = vpow2.f32 %v3282_v4  ;;  %v3244_v28 = vsub.f32 %v17437_v1, %v3195_v0  ;;  %v17438_v4 = vld [vmem:[#allocation68_spill] sm:$0xff] }
 0x56b   : > { %10676 = vmatmul.mubr.bf16.gmra.mxu0 %v3425_v48  ;;  %v4019_v48 = vsel %vm1830_vm0, %v17438_v4, 0 }
 0x56c   : > { %10722 = vmatpush3.bf16.xpose.msra.mxu0 %v4028_v17  ;;  %v3191_v58 = vpop.xlane.xlu0 %3190  ;;  %v3290_v53 = vmul.f32 1.442695, %v3244_v28 }
 0x56d   : > { %11073 = vmatprep.subr.msk.bf16.mxu0 %vm1830_vm0, %v17430_v56  ;;  %2289 = vadd.xlane.f32.xlu1 %v17431_v26  ;;  %v3242_v57 = vsub.f32 %v13903_v31, %v3191_v58  ;;  %v17439_v56 = vld [vmem:[#allocation56_spill] sm:$0xff] }
 0x56f   : > { %v3286_v0 = vmul.f32 1.442695, %v3242_v57 }
 0x570   : > { %v3197_v60 = vpop.xlane.xlu0 %3196 }
 0x571   : > { %2293 = vadd.xlane.f32.xlu1 %v17432_v52  ;;  %v3245_v15 = vsub.f32 %v13916_v46, %v3197_v60  ;;  %v14170_v46 = vpop.permute.xlu1 %5269  ;;  %v14202_v52 = vpop.f32.mrf.mxu1 }
 0x572   : > { %v11430_v21 = vpop.eup %11429  ;;  %17436 = vst [vmem:[#allocation103_spill] sm:$0xff] %v14170_v46 }
 0x573   : > { %3348 = vadd.xlane.f32.xlu0 %v11430_v21  ;;  %v3292_v44 = vmul.f32 1.442695, %v3245_v15  ;;  %v11432_v13 = vpop.eup %11431  ;;  %v17442_v15 = vld [vmem:[#allocation46_spill] sm:$0xff] }
 0x574   : > { %10724 = vmatpush3.bf16.xpose.msra.mxu0 %v4025_v34 }
 0x575   : > { %11074 = vmatprep.subr.msk.bf16.mxu0 %vm1830_vm0, %v17434_v40  ;;  %2297 = vadd.xlane.f32.xlu1 %v17435_v8  ;;  %11437 = vpow2.f32 %v3292_v44  ;;  %v14179_v16 = vpop.permute.xlu1 %5718  ;;  %v14210_v44 = vpop.f32.mrf.mxu1  ;;  %v4010_v8 = vsel %vm1830_vm0, %v17442_v15, 0 }
 0x576   : > { %v11434_v3 = vpop.eup %11433  ;;  %11439 = vpow2.f32 %v3290_v53 }
 0x577   : > { %v11436_v12 = vpop.eup %11435  ;;  %3344 = vadd.xlane.f32.xlu0 %v11434_v3  ;;  %v3426_v63 = vpack.c.bf16 %v11434_v3, %v11432_v13  ;;  %11441 = vpow2.f32 %v3286_v0 }
 0x578   : > { %v3427_v14 = vpack.c.bf16 %v11430_v21, %v11436_v12  ;;  %v14204_v21 = vpop.permute.xlu0 %5259 }
 0x579   : > { %3330 = vadd.xlane.f32.xlu1 %v14132_v7  ;;  %10679 = vmatprep.mubr.bf16.mxu0 %v3426_v63  ;;  %v14187_v17 = vpop.permute.xlu1 %5714  ;;  %17441 = vst [vmem:[#allocation110_spill] sm:$0xff] %v14204_v21 }
 0x57a   : > { %10680 = vmatmul.mubr.bf16.gmra.mxu0 %v3427_v14 }
 0x57c   : > { %10726 = vmatpush3.bf16.xpose.msra.mxu0 %v4022_v20  ;;  %v14212_v40 = vpop.permute.xlu0 %5263 }
 0x57d   : > { %11075 = vmatprep.subr.msk.bf16.mxu0 %vm1830_vm0, %v17438_v4  ;;  %3326 = vadd.xlane.f32.xlu1 %v14128_v54  ;;  %v14192_v31 = vpop.permute.xlu1 %5712  ;;  %v4016_v54 = vsel %vm1830_vm0, %v17439_v56, 0  ;;  %17443 = vst [vmem:[#allocation141_spill] sm:$0xff] %v14212_v40 }
 0x580   : > { %v14219_v14 = vpop.permute.xlu0 %5267 }
 0x581   : > { %3338 = vadd.xlane.f32.xlu1 %v11428_v37  ;;  %v17440_v37 = vld [vmem:[#allocation49_spill] sm:$0xff]  ;;  %v14198_v26 = vpop.permute.xlu1 %5710  ;;  %17445 = vst [vmem:[#allocation115_spill] sm:$0xff] %v14219_v14  ;;  %v17503_v14 = vld [vmem:[#allocation40_spill] sm:$0xff] }
 0x582   : > { %v14182_v7 = vpop.eup %11437  ;;  %v4013_v60 = vsel %vm1830_vm0, %v17440_v37, 0 }
 0x583   : > { %3356 = vadd.xlane.f32.xlu0 %v14182_v7  ;;  %v11440_v58 = vpop.eup %11439 }
 0x584   : > { %10728 = vmatpush3.bf16.xpose.msra.mxu0 %v4019_v48  ;;  %v14227_v4 = vpop.permute.xlu0 %5716 }
 0x585   : > { %11076 = vmatprep.subr.msk.bf16.mxu0 %vm1830_vm0, %v17439_v56  ;;  %3334 = vadd.xlane.f32.xlu1 %v14148_v35  ;;  %v11442_v35 = vpop.eup %11441  ;;  %v14208_v34 = vpop.permute.xlu1 %5706 }
 0x588   : > { %v14233_v0 = vpop.permute.xlu0 %5708 }
 0x589   : > { %3346 = vadd.xlane.f32.xlu1 %v11436_v12  ;;  %v14216_v3 = vpop.permute.xlu1 %5704  ;;  %v17444_v12 = vld [vmem:[#allocation84_spill] sm:$0xff] }
 0x58c   : > { %10730 = vmatpush3.bf16.xpose.msra.mxu0 %v4016_v54 }
 0x58d   : > { %11077 = vmatprep.subr.msk.bf16.mxu0 %vm1830_vm0, %v17440_v37  ;;  %3342 = vadd.xlane.f32.xlu1 %v11432_v13  ;;  %v10546_v13 = vpop.f32.mrf.mxu1  ;;  %v14223_v28 = vpop.permute.xlu1 %5839 }
 0x58e   : > { %17446 = vst [vmem:[#allocation142_spill] sm:$0xff] %v14223_v28 }
 0x58f   : > { %v2430_v63 = vpop.f32.mrf.mxu1 }
 0x591   : > { %3354 = vadd.xlane.f32.xlu1 %v11440_v58  ;;  %v14221_v1 = vpop.f32.mrf.mxu1  ;;  %v14229_v53 = vpop.permute.xlu1 %5835 }
 0x592   : > { %17447 = vst [vmem:[#allocation140_spill] sm:$0xff] %v14229_v53 }
 0x593   : > { %v14225_v20 = vpop.f32.mrf.mxu1 }
 0x594   : > { %10732 = vmatpush3.bf16.xpose.msra.mxu0 %v4013_v60 }
 0x595   : > { %11078 = vmatprep.subr.msk.bf16.mxu0 %vm1830_vm0, %v17442_v15  ;;  %3350 = vadd.xlane.f32.xlu1 %v11442_v35  ;;  %v14231_v57 = vpop.f32.mrf.mxu1  ;;  %v14238_v15 = vpop.permute.xlu0 %5837 }
 0x596   : > { %17448 = vst [vmem:[#allocation112_spill] sm:$0xff] %v14238_v15 }
 0x597   : > { %v2446_v56 = vpop.f32.mrf.mxu1 }
 0x599   : > { %v14236_v37 = vpop.f32.mrf.mxu1  ;;  %v14244_v50 = vpop.permute.xlu0 %5829 }
 0x59a   : > { %17449 = vst [vmem:[#allocation111_spill] sm:$0xff] %v14244_v50 }
 0x59c   : > { %10734 = vmatpush3.bf16.xpose.msra.mxu0 %v4010_v8  ;;  %v14240_v8 = vpop.f32.mrf.mxu1 }
 0x59d   : > { %10783 = vmatprep.subr.bf16.mxu0 %v17444_v12 }
 0x59e   : > { %v14242_v39 = vpop.f32.mrf.mxu1 }
 0x5a0   : > { %v14246_v25 = vpop.f32.mrf.mxu1 }
 0x5ad   : > { %v3193_v48 = vpop.xlane.xlu1 %3192 }
 0x5ae   : > { %v3243_v54 = vsub.f32 %v14056_v62, %v3193_v48 }
 0x5b0   : > { %v3288_v60 = vmul.f32 1.442695, %v3243_v54 }
 0x5b2   : > { %11443 = vpow2.f32 %v3288_v60  ;;  %v3429_v60 = vpack.c.bf16 %v14182_v7, %v11440_v58  ;;  %v17457_v7 = vld [vmem:[#allocation55_spill] sm:$0xff] }
 0x5bd   : > { %v2284_v55 = vpop.xlane.xlu0 %2283 }
 0x5be   : > { %11445 = vrcp.f32 %v2284_v55  ;;  %v14248_v59 = vpop.f32.mrf.mxu1  ;;  %v17455_v55 = vld [vmem:[#allocation34_spill] sm:$0xff] }
 0x5bf   : > { %17450 = vst [vmem:[#allocation29_spill] sm:$0xff] %v14248_v59  ;;  %v11444_v11 = vpop.eup %11443 }
 0x5c0   : > { %v14250_v62 = vpop.f32.mrf.mxu1  ;;  %3352 = vadd.xlane.f32.xlu0 %v11444_v11  ;;  %v3428_v48 = vpack.c.bf16 %v11444_v11, %v11442_v35 }
 0x5c1   : > { %17451 = vst [vmem:[#allocation107_spill] sm:$0xff] %v14250_v62  ;;  %v2288_v54 = vpop.xlane.xlu0 %2287  ;;  %v17500_v62 = vld [vmem:[#allocation35_spill] sm:$0xff] }
 0x5c2   : > { %11447 = vrcp.f32 %v2288_v54  ;;  %v14253_v22 = vpop.f32.mrf.mxu1  ;;  %10683 = vmatprep.mubr.bf16.mxu0 %v3428_v48  ;;  %v17459_v48 = vld [vmem:[#allocation51_spill] sm:$0xff] }
 0x5c3   : > { %17452 = vst [vmem:[#allocation104_spill] sm:$0xff] %v14253_v22  ;;  %10684 = vmatmul.mubr.bf16.gmra.mxu0 %v3429_v60  ;;  %v17460_v54 = vld [vmem:[#allocation91_spill] sm:$0xff] }
 0x5c4   : > { %v14255_v42 = vpop.f32.mrf.mxu1  ;;  %2299 = vadd.xlane.f32.xlu0 %v17454_v33  ;;  %10735 = vmatprep.mubr.msk.bf16.mxu0 %vm1830_vm0, %v17455_v55 }
 0x5c5   : > { %17453 = vst [vmem:[#allocation53_spill] sm:$0xff] %v14255_v42  ;;  %v2292_v2 = vpop.xlane.xlu0 %2291 }
 0x5c6   : > { %11449 = vrcp.f32 %v2292_v2  ;;  %v14260_v36 = vpop.f32.mrf.mxu1 }
 0x5c7   : > { %17456 = vst [vmem:[#allocation50_spill] sm:$0xff] %v14260_v36 }
 0x5c8   : > { %v14264_v58 = vpop.f32.mrf.mxu1 }
 0x5c9   : > { %v2296_v11 = vpop.xlane.xlu0 %2295  ;;  %17458 = vst [vmem:[#allocation106_spill] sm:$0xff] %v14264_v58 }
 0x5ca   : > { %11451 = vrcp.f32 %v2296_v11  ;;  %v14270_v55 = vpop.f32.mrf.mxu1 }
 0x5cb   : > { %v11446_v35 = vpop.eup %11445  ;;  %10736 = vmatmul.mubr.msk.bf16.vlgmr.msra.gmra.mxu0 %vm1830_vm0, %v17457_v7  ;;  %17461 = vst [vmem:[#allocation100_spill] sm:$0xff] %v14270_v55  ;;  %v17462_v7 = vld [vmem:[#allocation76_spill] sm:$0xff] }
 0x5cc   : > { %10784 = vmatpush3.bf16.msra.mxu0 %v17444_v12  ;;  %10739 = vmatprep.mubr.msk.bf16.mxu0 %vm1830_vm0, %v17459_v48  ;;  %v2588_v33 = vmul.f32 %v11446_v35, %v2430_v63  ;;  %v14277_v63 = vpop.f32.mrf.mxu1  ;;  %v17465_v35 = vld [vmem:[#allocation67_spill] sm:$0xff] }
 0x5cd   : > { %10785 = vmatprep.subr.bf16.mxu0 %v17460_v54  ;;  %17464 = vst [vmem:[#allocation64_spill] sm:$0xff] %v14277_v63 }
 0x5ce   : > { %v9633_v2 = vpack.c.bf16 %v2588_v33, %v2588_v33  ;;  %v17466_v33 = vld [vmem:[#allocation78_spill] sm:$0xff] }
 0x5cf   : > { %v11448_v60 = vpop.eup %11447 }
 0x5d0   : > { %10786 = vmatpush3.bf16.msra.mxu0 %v17460_v54  ;;  %2749 = vst.msk [vmem:[#allocation3 + $0x4] sm:$0xf] %vm2747_vm2, %v9633_v2  ;;  %v2590_v11 = vmul.f32 %v11448_v60, %v10546_v13  ;;  %v14284_v2 = vpop.permute.xlu1 %5833  ;;  %v14286_v60 = vpop.f32.mrf.mxu1 }
 0x5d1   : > { %10787 = vmatprep.subr.bf16.mxu0 %v17462_v7  ;;  %17467 = vst [vmem:[#allocation98_spill] sm:$0xff] %v14284_v2  ;;  %17468 = vst [vmem:[#allocation147_spill] sm:$0xff] %v14286_v60 }
 0x5d2   : > { %v9635_v36 = vpack.c.bf16 %v2590_v11, %v2590_v11  ;;  %v17469_v11 = vld [vmem:[#allocation74_spill] sm:$0xff] }
 0x5d3   : > { %v11450_v12 = vpop.eup %11449  ;;  %10740 = vmatmul.mubr.msk.bf16.gmra.mxu0 %vm1830_vm0, %v17463_v38 }
 0x5d4   : > { %10788 = vmatpush3.bf16.msra.mxu0 %v17462_v7  ;;  %10743 = vmatprep.mubr.msk.bf16.mxu0 %vm1830_vm0, %v17465_v35  ;;  %2751 = vst.msk [vmem:[#allocation3 + $0xc] sm:$0xf] %vm2747_vm2, %v9635_v36  ;;  %v2592_v48 = vmul.f32 %v11450_v12, %v2446_v56  ;;  %v17470_v35 = vld [vmem:[#allocation75_spill] sm:$0xff]  ;;  %v14294_v36 = vpop.f32.mrf.mxu1 }
 0x5d5   : > { %10789 = vmatprep.subr.bf16.mxu0 %v17466_v33  ;;  %17471 = vst [vmem:[#allocation88_spill] sm:$0xff] %v14294_v36  ;;  %v17472_v56 = vld [vmem:[#allocation83_spill] sm:$0xff] }
 0x5d6   : > { %v9637_v13 = vpack.c.bf16 %v2592_v48, %v2592_v48  ;;  %v17473_v12 = vld [vmem:[#allocation79_spill] sm:$0xff]  ;;  %v14301_v48 = vpop.permute.xlu1 %5831 }
 0x5d7   : > { %v11452_v54 = vpop.eup %11451  ;;  %17474 = vst [vmem:[#allocation145_spill] sm:$0xff] %v14301_v48 }
 0x5d8   : > { %10790 = vmatpush3.bf16.msra.mxu0 %v17466_v33  ;;  %2753 = vst.msk [vmem:[#allocation3 + $0x14] sm:$0xf] %vm2747_vm2, %v9637_v13  ;;  %v2594_v38 = vmul.f32 %v11452_v54, %v14231_v57  ;;  %v14303_v57 = vpop.f32.mrf.mxu1  ;;  %v17476_v33 = vld [vmem:[#allocation69_spill] sm:$0xff]  ;;  %v17477_v13 = vld [vmem:[#allocation82_spill] sm:$0xff] }
 0x5d9   : > { %10791 = vmatprep.subr.bf16.mxu0 %v17469_v11  ;;  %17475 = vst [vmem:[#allocation86_spill] sm:$0xff] %v14303_v57 }
 0x5da   : > { %v9639_v7 = vpack.c.bf16 %v2594_v38, %v2594_v38  ;;  %v14309_v54 = vpop.permute.xlu1 %5827  ;;  %v14311_v38 = vpop.f32.mrf.mxu1 }
 0x5db   : > { %10744 = vmatmul.mubr.msk.bf16.gmra.mxu0 %vm1830_vm0, %v17470_v35  ;;  %17478 = vst [vmem:[#allocation63_spill] sm:$0xff] %v14309_v54  ;;  %17479 = vst [vmem:[#allocation132_spill] sm:$0xff] %v14311_v38  ;;  %v17482_v35 = vld [vmem:[#allocation92_spill] sm:$0xff] }
 0x5dc   : > { %10792 = vmatpush3.bf16.msra.mxu0 %v17469_v11  ;;  %10747 = vmatprep.mubr.msk.bf16.mxu0 %vm1830_vm0, %v17472_v56  ;;  %2755 = vst.msk [vmem:[#allocation3 + $0x1c] sm:$0xf] %vm2747_vm2, %v9639_v7  ;;  %v17480_v11 = vld [vmem:[#allocation71_spill] sm:$0xff]  ;;  %v14315_v7 = vpop.f32.mrf.mxu1 }
 0x5dd   : > { %10793 = vmatprep.subr.bf16.mxu0 %v17473_v12  ;;  %17481 = vst [vmem:[#allocation45_spill] sm:$0xff] %v14315_v7 }
 0x5de   : > { %v14320_v56 = vpop.permute.xlu1 %5825 }
 0x5df   : > { %17483 = vst [vmem:[#allocation133_spill] sm:$0xff] %v14320_v56 }
 0x5e0   : > { %10794 = vmatpush3.bf16.msra.mxu0 %v17473_v12  ;;  %v14322_v12 = vpop.f32.mrf.mxu1 }
 0x5e1   : > { %10795 = vmatprep.subr.bf16.mxu0 %v17476_v33  ;;  %17484 = vst [vmem:[#allocation77_spill] sm:$0xff] %v14322_v12 }
 0x5e2   : > { %v14324_v60 = vpop.f32.mrf.mxu1 }
 0x5e3   : > { %10748 = vmatmul.mubr.msk.bf16.gmra.mxu0 %vm1830_vm0, %v17477_v13  ;;  %17485 = vst [vmem:[#allocation135_spill] sm:$0xff] %v14324_v60 }
 0x5e4   : > { %10796 = vmatpush3.bf16.msra.mxu0 %v17476_v33  ;;  %v14326_v36 = vpop.f32.mrf.mxu1 }
 0x5e5   : > { %10797 = vmatprep.subr.bf16.mxu0 %v17480_v11  ;;  %17486 = vst [vmem:[#allocation134_spill] sm:$0xff] %v14326_v36 }
 0x5e6   : > { %v14328_v7 = vpop.f32.mrf.mxu1 }
 0x5e7   : > { %17487 = vst [vmem:[#allocation70_spill] sm:$0xff] %v14328_v7 }
 0x5e8   : > { %10798 = vmatpush3.bf16.msra.mxu0 %v17480_v11  ;;  %v14330_v38 = vpop.f32.mrf.mxu1 }
 0x5e9   : > { %11087 = vmatprep.subr.msk.bf16.mxu0 %vm1830_vm0, %v17482_v35  ;;  %17488 = vst [vmem:[#allocation138_spill] sm:$0xff] %v14330_v38 }
 0x5ea   : > { %v14333_v58 = vpop.f32.mrf.mxu1 }
 0x5eb   : > { %17489 = vst [vmem:[#allocation13_spill] sm:$0xff] %v14333_v58  ;;  %v17492_v58 = vld [vmem:[#allocation85_spill] sm:$0xff] }
 0x5ee   : > { %v2282_v13 = vpop.xlane.xlu1 %2281 }
 0x5ef   : > { %11453 = vrcp.f32 %v2282_v13 }
 0x5f2   : > { %v2286_v57 = vpop.xlane.xlu1 %2285 }
 0x5f3   : > { %11455 = vrcp.f32 %v2286_v57 }
 0x5f6   : > { %v2290_v33 = vpop.xlane.xlu1 %2289 }
 0x5f7   : > { %11457 = vrcp.f32 %v2290_v33  ;;  %v14337_v33 = vpop.f32.mrf.mxu1 }
 0x5f8   : > { %17490 = vst [vmem:[#allocation68_spill] sm:$0xff] %v14337_v33 }
 0x5fa   : > { %v2294_v11 = vpop.xlane.xlu1 %2293 }
 0x5fb   : > { %11459 = vrcp.f32 %v2294_v11 }
 0x5fc   : > { %v11454_v55 = vpop.eup %11453 }
 0x5fd   : > { %v2587_v12 = vmul.f32 %v11454_v55, %v14210_v44 }
 0x5fe   : > { %v2298_v63 = vpop.xlane.xlu1 %2297 }
 0x5ff   : > { %11461 = vrcp.f32 %v2298_v63  ;;  %v9632_v13 = vpack.c.bf16 %v2587_v12, %v2587_v12 }
 0x600   : > { %v11456_v60 = vpop.eup %11455 }
 0x601   : > { %v2589_v36 = vmul.f32 %v11456_v60, %v14202_v52  ;;  %2748 = vst.msk [vmem:[#allocation3] sm:$0xf] %vm2747_vm2, %v9632_v13 }
 0x602   : > { %v3331_v56 = vpop.xlane.xlu1 %3330 }
 0x603   : > { %v9634_v7 = vpack.c.bf16 %v2589_v36, %v2589_v36  ;;  %11463 = vrcp.f32 %v3331_v56 }
 0x604   : > { %v11458_v57 = vpop.eup %11457 }
 0x605   : > { %v2591_v11 = vmul.f32 %v11458_v57, %v14225_v20  ;;  %2750 = vst.msk [vmem:[#allocation3 + $0x8] sm:$0xf] %vm2747_vm2, %v9634_v7  ;;  %v17494_v57 = vld [vmem:[#allocation24_spill] sm:$0xff] }
 0x606   : > { %v10641_v38 = vpop.f32.mrf.mxu1  ;;  %v3327_v48 = vpop.xlane.xlu1 %3326 }
 0x607   : > { %v14342_v44 = vadd.f32 %v10641_v38, %v17491_v61  ;;  %v9636_v55 = vpack.c.bf16 %v2591_v11, %v2591_v11  ;;  %v17493_v38 = vld [vmem:[#allocation22_spill] sm:$0xff]  ;;  %11465 = vrcp.f32 %v3327_v48 }
 0x608   : > { %v11460_v63 = vpop.eup %11459  ;;  %v3103_v12 = vpop.f32.mrf.mxu1 }
 0x609   : > { %v14345_v47 = vadd.f32 %v3103_v12, %v17492_v58  ;;  %3202 = vmax.xlane.f32.xlu1 %v14342_v44  ;;  %2752 = vst.msk [vmem:[#allocation3 + $0x10] sm:$0xf] %vm2747_vm2, %v9636_v55  ;;  %v2593_v52 = vmul.f32 %v11460_v63, %v14221_v1  ;;  %v17495_v63 = vld [vmem:[#allocation25_spill] sm:$0xff] }
 0x60a   : > { %v10642_v60 = vpop.f32.mrf.mxu1 }
 0x60b   : > { %3198 = vmax.xlane.f32.xlu0 %v14345_v47  ;;  %v9638_v20 = vpack.c.bf16 %v2593_v52, %v2593_v52  ;;  %v14352_v13 = vadd.f32 %v10642_v60, %v17493_v38 }
 0x60c   : > { %v11462_v36 = vpop.eup %11461  ;;  %v3106_v7 = vpop.f32.mrf.mxu1 }
 0x60d   : > { %v14355_v11 = vadd.f32 %v3106_v7, %v17494_v57  ;;  %2754 = vst.msk [vmem:[#allocation3 + $0x18] sm:$0xf] %vm2747_vm2, %v9638_v20  ;;  %v2595_v12 = vmul.f32 %v11462_v36, %v14240_v8  ;;  %v17497_v20 = vld [vmem:[#allocation30_spill] sm:$0xff] }
 0x60e   : > { %v10645_v33 = vpop.f32.mrf.mxu1 }
 0x60f   : > { %3200 = vmax.xlane.f32.xlu1 %v14355_v11  ;;  %3204 = vmax.xlane.f32.xlu0 %v14352_v13  ;;  %v9640_v1 = vpack.c.bf16 %v2595_v12, %v2595_v12  ;;  %v14362_v52 = vadd.f32 %v10645_v33, %v17495_v63 }
 0x610   : > { %v3119_v55 = vpop.f32.mrf.mxu1  ;;  %v11464_v56 = vpop.eup %11463 }
 0x611   : > { %v14365_v60 = vadd.f32 %v3119_v55, %v17496_v27  ;;  %2756 = vst.msk [vmem:[#allocation3 + $0x20] sm:$0xf] %vm2747_vm2, %v9640_v1  ;;  %v17499_v55 = vld [vmem:[#allocation33_spill] sm:$0xff] }
 0x612   : > { %v10646_v7 = vpop.f32.mrf.mxu1 }
 0x613   : > { %3206 = vmax.xlane.f32.xlu1 %v14365_v60  ;;  %3210 = vmax.xlane.f32.xlu0 %v14362_v52  ;;  %v14371_v36 = vadd.f32 %v10646_v7, %v17497_v20 }
 0x614   : > { %v3122_v8 = vpop.f32.mrf.mxu1  ;;  %v11466_v21 = vpop.eup %11465 }
 0x615   : > { %v14374_v12 = vadd.f32 %v3122_v8, %v17498_v24  ;;  %v17501_v8 = vld [vmem:[#allocation39_spill] sm:$0xff] }
 0x616   : > { %v10649_v22 = vpop.f32.mrf.mxu1 }
 0x617   : > { %3212 = vmax.xlane.f32.xlu1 %v14371_v36  ;;  %3208 = vmax.xlane.f32.xlu0 %v14374_v12  ;;  %v14379_v1 = vadd.f32 %v10649_v22, %v17499_v55  ;;  %v14393_v22 = vpop.xlane.xlu0 %3332 }
 0x618   : > { %v3135_v33 = vpop.f32.mrf.mxu1 }
 0x619   : > { %v14383_v43 = vadd.f32 %v3135_v33, %v17500_v62 }
 0x61a   : > { %v10650_v59 = vpop.f32.mrf.mxu1 }
 0x61b   : > { %3218 = vmax.xlane.f32.xlu1 %v14379_v1  ;;  %v14390_v50 = vadd.f32 %v10650_v59, %v17502_v29  ;;  %v3329_v40 = vpop.xlane.xlu0 %3328 }
 0x61c   : > { %v3138_v42 = vpop.f32.mrf.mxu1  ;;  %11467 = vrcp.f32 %v3329_v40 }
 0x61e   : > { %v10653_v7 = vpop.f32.mrf.mxu1 }
 0x61f   : > { %v14386_v46 = vadd.f32 %v10653_v7, %v17501_v8  ;;  %3214 = vmax.xlane.f32.xlu1 %v14383_v43  ;;  %v17504_v7 = vld [vmem:[#allocation37_spill] sm:$0xff]  ;;  %v14408_v53 = vpop.xlane.xlu0 %3340 }
 0x620   : > { %v3151_v54 = vpop.f32.mrf.mxu1  ;;  %v14400_v2 = vadd.f32 %v3138_v42, %v17504_v7  ;;  %17505 = vst [vmem:[#allocation56_spill] sm:$0xff] %v14408_v53 }
 0x621   : > { %3226 = vmax.xlane.f32.xlu0 %v14386_v46  ;;  %v14396_v6 = vadd.f32 %v3151_v54, %v17503_v14 }
 0x622   : > { %v10654_v33 = vpop.f32.mrf.mxu1  ;;  %v10673_v54 = vpop.f32.mrf.mxu0 }
 0x623   : > { %3220 = vmax.xlane.f32.xlu1 %v14390_v50  ;;  %v14404_v59 = vadd.f32 %v10654_v33, %v17284_v19  ;;  %v3698_v15 = vmul.f32 %v11464_v56, %v10673_v54  ;;  %v14412_v45 = vpop.xlane.xlu0 %3336 }
 0x624   : > { %v3504_v32 = vpop.f32.mrf.mxu0  ;;  %17506 = vst [vmem:[#allocation49_spill] sm:$0xff] %v14412_v45  ;;  %v3154_v53 = vpop.f32.mrf.mxu1 }
 0x625   : > { %3222 = vmax.xlane.f32.xlu0 %v14396_v6  ;;  %v9666_v10 = vpack.c.bf16 %v3698_v15, %v3698_v15  ;;  %v3696_v41 = vmul.f32 %v11466_v21, %v3504_v32 }
 0x626   : > { %v14410_v42 = vpop.f32.mrf.mxu0 }
 0x627   : > { %3216 = vmax.xlane.f32.xlu1 %v14400_v2  ;;  %v9664_v23 = vpack.c.bf16 %v3696_v41, %v3696_v41  ;;  %v14415_v51 = vpop.xlane.xlu0 %3348  ;;  %v14427_v41 = vadd.f32 %v3154_v53, %v13146_v30 }
 0x628   : > { %v3507_v33 = vpop.f32.mrf.mxu0  ;;  %17507 = vst [vmem:[#allocation46_spill] sm:$0xff] %v14415_v51 }
 0x629   : > { %3228 = vmax.xlane.f32.xlu0 %v14404_v59  ;;  %v11468_v28 = vpop.eup %11467 }
 0x62a   : > { %v3697_v48 = vmul.f32 %v11468_v28, %v3507_v33 }
 0x62b   : > { %v14419_v54 = vpop.xlane.xlu0 %3344 }
 0x62c   : > { %v9665_v40 = vpack.c.bf16 %v3697_v48, %v3697_v48  ;;  %17508 = vst [vmem:[#allocation84_spill] sm:$0xff] %v14419_v54 }
 0x62f   : > { %v14421_v56 = vpop.xlane.xlu0 %3356 }
 0x630   : > { %17509 = vst [vmem:[#allocation137_spill] sm:$0xff] %v14421_v56 }
 0x638   : > { %3828 = vrot.lane.b32.xlu1 %v9666_v10, %s12065_s26 }
 0x63c   : > { %3824 = vrot.lane.b32.xlu1 %v9664_v23, %s12065_s26  ;;  %v14431_v23 = vpop.f32.mrf.mxu0 }
 0x63d   : > { %17511 = vst [vmem:[#allocation55_spill] sm:$0xff] %v14431_v23 }
 0x63e   : > { %v14433_v33 = vpop.f32.mrf.mxu0 }
 0x63f   : > { %3826 = vrot.lane.b32.xlu0 %v9665_v40, %s12065_s26  ;;  %17512 = vst [vmem:[#allocation51_spill] sm:$0xff] %v14433_v33  ;;  %v14437_v40 = vpop.xlane.xlu1 %3338 }
 0x640   : > { %v14435_v48 = vpop.f32.mrf.mxu0  ;;  %17514 = vst [vmem:[#allocation76_spill] sm:$0xff] %v14437_v40 }
 0x641   : > { %17513 = vst [vmem:[#allocation91_spill] sm:$0xff] %v14435_v48 }
 0x649   : > { %v14423_v32 = vpop.xlane.xlu0 %3352 }
 0x64a   : > { %17510 = vst [vmem:[#allocation34_spill] sm:$0xff] %v14423_v32 }
 0x64d   : > { %v2300_v21 = vpop.xlane.xlu0 %2299 }
 0x64e   : > { %11469 = vrcp.f32 %v2300_v21  ;;  %v14439_v21 = vpop.f32.mrf.mxu0 }
 0x64f   : > { %17515 = vst [vmem:[#allocation60_spill] sm:$0xff] %v14439_v21 }
 0x650   : > { %v14441_v56 = vpop.f32.mrf.mxu0 }
 0x651   : > { %17516 = vst [vmem:[#allocation67_spill] sm:$0xff] %v14441_v56 }
 0x652   : > { %v14445_v53 = vpop.f32.mrf.mxu0 }
 0x653   : > { %17518 = vst [vmem:[#allocation74_spill] sm:$0xff] %v14445_v53 }
 0x65b   : > { %v11470_v15 = vpop.eup %11469 }
 0x65c   : > { %v2596_v10 = vmul.f32 %v11470_v15, %v14246_v25  ;;  %v14443_v25 = vpop.xlane.xlu1 %3334 }
 0x65d   : > { %17517 = vst [vmem:[#allocation78_spill] sm:$0xff] %v14443_v25 }
 0x65e   : > { %v9641_v28 = vpack.c.bf16 %v2596_v10, %v2596_v10  ;;  %v14449_v10 = vpop.f32.mrf.mxu0 }
 0x65f   : > { %17520 = vst [vmem:[#allocation83_spill] sm:$0xff] %v14449_v10 }
 0x660   : > { %3224 = vmax.xlane.f32.xlu1 %v14427_v41  ;;  %2757 = vst.msk [vmem:[#allocation3 + $0x24] sm:$0xf] %vm2747_vm2, %v9641_v28  ;;  %v14447_v15 = vpop.xlane.xlu1 %3346  ;;  %v14451_v28 = vpop.f32.mrf.mxu0 }
 0x661   : > { %17519 = vst [vmem:[#allocation75_spill] sm:$0xff] %v14447_v15  ;;  %17521 = vst [vmem:[#allocation79_spill] sm:$0xff] %v14451_v28 }
 0x664   : > { %v14453_v32 = vpop.xlane.xlu1 %3342 }
 0x665   : > { %17522 = vst [vmem:[#allocation69_spill] sm:$0xff] %v14453_v32 }
 0x668   : > { %v14461_v23 = vpop.xlane.xlu1 %3354 }
 0x669   : > { %17526 = vst [vmem:[#allocation73_spill] sm:$0xff] %v14461_v23 }
 0x66c   : > { %v14468_v10 = vpop.xlane.xlu1 %3350 }
 0x66d   : > { %17528 = vst [vmem:[#allocation22_spill] sm:$0xff] %v14468_v10 }
 0x683   : > { %v14455_v51 = vpop.f32.mrf.mxu0 }
 0x684   : > { %17523 = vst [vmem:[#allocation82_spill] sm:$0xff] %v14455_v51 }
 0x685   : > { %v14457_v54 = vpop.f32.mrf.mxu0 }
 0x686   : > { %17524 = vst [vmem:[#allocation71_spill] sm:$0xff] %v14457_v54 }
 0x687   : > { %v14459_v48 = vpop.f32.mrf.mxu0 }
 0x688   : > { %17525 = vst [vmem:[#allocation92_spill] sm:$0xff] %v14459_v48 }
 0x689   : > { %v14463_v56 = vpop.f32.mrf.mxu0 }
 0x68a   : > { %17527 = vst [vmem:[#allocation85_spill] sm:$0xff] %v14463_v56 }
 0x68b   : > { %v10737_v40 = vpop.f32.mrf.mxu0 }
 0x68c   : > { %v14466_v53 = vadd.f32 %v10737_v40, %v17491_v61 }
 0x68d   : > { %v4067_v15 = vpop.f32.mrf.mxu0 }
 0x68e   : > { %v14471_v28 = vadd.f32 %v4067_v15, %v17492_v58  ;;  %4311 = vmax.xlane.f32.xlu1 %v14466_v53 }
 0x68f   : > { %v10738_v51 = vpop.f32.mrf.mxu0 }
 0x690   : > { %v14475_v54 = vadd.f32 %v10738_v51, %v17493_v38  ;;  %4307 = vmax.xlane.f32.xlu0 %v14471_v28 }
 0x691   : > { %v4070_v23 = vpop.f32.mrf.mxu0 }
 0x692   : > { %v3203_v48 = vpop.xlane.xlu1 %3202  ;;  %4313 = vmax.xlane.f32.xlu1 %v14475_v54  ;;  %v14481_v10 = vadd.f32 %v4070_v23, %v17494_v57 }
 0x693   : > { %v3248_v40 = vsub.f32 %v14342_v44, %v3203_v48  ;;  %v10741_v56 = vpop.f32.mrf.mxu0 }
 0x694   : > { %v14484_v15 = vadd.f32 %v10741_v56, %v17495_v63  ;;  %v3199_v32 = vpop.xlane.xlu0 %3198 }
 0x695   : > { %v3246_v49 = vsub.f32 %v14345_v47, %v3199_v32  ;;  %v4083_v51 = vpop.f32.mrf.mxu0  ;;  %v3298_v5 = vmul.f32 1.442695, %v3248_v40 }
 0x696   : > { %4309 = vmax.xlane.f32.xlu1 %v14481_v10  ;;  %4319 = vmax.xlane.f32.xlu0 %v14484_v15  ;;  %v14490_v44 = vadd.f32 %v4083_v51, %v17496_v27 }
 0x697   : > { %v10742_v21 = vpop.f32.mrf.mxu0  ;;  %v3294_v33 = vmul.f32 1.442695, %v3246_v49  ;;  %11471 = vpow2.f32 %v3298_v5 }
 0x698   : > { %v3201_v48 = vpop.xlane.xlu1 %3200  ;;  %v3205_v23 = vpop.xlane.xlu0 %3204  ;;  %v14499_v49 = vadd.f32 %v10742_v21, %v17497_v20 }
 0x699   : > { %v3247_v45 = vsub.f32 %v14355_v11, %v3201_v48  ;;  %v3249_v56 = vsub.f32 %v14352_v13, %v3205_v23  ;;  %v4086_v25 = vpop.f32.mrf.mxu0  ;;  %11473 = vpow2.f32 %v3294_v33 }
 0x69a   : > { %v14495_v47 = vadd.f32 %v4086_v25, %v17498_v24  ;;  %4315 = vmax.xlane.f32.xlu1 %v14490_v44 }
 0x69b   : > { %v3296_v32 = vmul.f32 1.442695, %v3247_v45  ;;  %v3300_v40 = vmul.f32 1.442695, %v3249_v56  ;;  %v10745_v57 = vpop.f32.mrf.mxu0 }
 0x69c   : > { %v3207_v51 = vpop.xlane.xlu1 %3206  ;;  %v3211_v27 = vpop.xlane.xlu0 %3210  ;;  %4317 = vmax.xlane.f32.xlu0 %v14495_v47  ;;  %v14506_v33 = vadd.f32 %v10745_v57, %v17499_v55 }
 0x69d   : > { %11475 = vpow2.f32 %v3296_v32  ;;  %v3250_v13 = vsub.f32 %v14365_v60, %v3207_v51  ;;  %v3252_v11 = vsub.f32 %v14362_v52, %v3211_v27  ;;  %v4099_v25 = vpop.f32.mrf.mxu0 }
 0x69e   : > { %11477 = vpow2.f32 %v3300_v40  ;;  %4321 = vmax.xlane.f32.xlu1 %v14499_v49  ;;  %v14512_v40 = vadd.f32 %v4099_v25, %v17500_v62 }
 0x69f   : > { %v3302_v45 = vmul.f32 1.442695, %v3250_v13  ;;  %v10746_v5 = vpop.f32.mrf.mxu0  ;;  %v3306_v21 = vmul.f32 1.442695, %v3252_v11 }
 0x6a0   : > { %v3213_v48 = vpop.xlane.xlu1 %3212  ;;  %v3209_v23 = vpop.xlane.xlu0 %3208 }
 0x6a1   : > { %v3253_v56 = vsub.f32 %v14371_v36, %v3213_v48  ;;  %v3251_v32 = vsub.f32 %v14374_v12, %v3209_v23  ;;  %v4102_v20 = vpop.f32.mrf.mxu0  ;;  %11479 = vpow2.f32 %v3302_v45  ;;  %v14520_v12 = vadd.f32 %v10746_v5, %v17502_v29 }
 0x6a2   : > { %4327 = vmax.xlane.f32.xlu1 %v14506_v33  ;;  %11481 = vpow2.f32 %v3306_v21 }
 0x6a3   : > { %v3308_v27 = vmul.f32 1.442695, %v3253_v56  ;;  %v3304_v52 = vmul.f32 1.442695, %v3251_v32  ;;  %v10749_v60 = vpop.f32.mrf.mxu0 }
 0x6a4   : > { %v3219_v57 = vpop.xlane.xlu1 %3218  ;;  %v14515_v51 = vadd.f32 %v10749_v60, %v17501_v8  ;;  %v11472_v36 = vpop.eup %11471 }
 0x6a5   : > { %11483 = vpow2.f32 %v3308_v27  ;;  %v4115_v13 = vpop.f32.mrf.mxu0  ;;  %v3256_v29 = vsub.f32 %v14379_v1, %v3219_v57 }
 0x6a6   : > { %11485 = vpow2.f32 %v3304_v52  ;;  %4323 = vmax.xlane.f32.xlu1 %v14512_v40  ;;  %4335 = vmax.xlane.f32.xlu0 %v14515_v51  ;;  %v14523_v11 = vadd.f32 %v4115_v13, %v17503_v14  ;;  %v11474_v45 = vpop.eup %11473  ;;  %v14537_v52 = vadd.f32 %v4102_v20, %v17504_v7 }
 0x6a7   : > { %v10750_v21 = vpop.f32.mrf.mxu0  ;;  %11487 = vrcp.f32 %v14393_v22 }
 0x6a8   : > { %v3215_v25 = vpop.xlane.xlu1 %3214  ;;  %v14540_v13 = vadd.f32 %v10750_v21, %v17284_v19 }
 0x6a9   : > { %v3254_v32 = vsub.f32 %v14383_v43, %v3215_v25  ;;  %v4118_v14 = vpop.f32.mrf.mxu0  ;;  %v4208_v43 = vsel %vm1830_vm0, %v17425_v9, 0 }
 0x6aa   : > { %v14525_v48 = vpop.eup %11475  ;;  %v14527_v23 = vpop.xlane.xlu0 %3226  ;;  %4329 = vmax.xlane.f32.xlu1 %v14520_v12  ;;  %4331 = vmax.xlane.f32.xlu0 %v14523_v11  ;;  %v14551_v19 = vadd.f32 %v4118_v14, %v13146_v30 }
 0x6ab   : > { %v14531_v56 = vpop.eup %11477  ;;  %v3430_v5 = vpack.c.bf16 %v14525_v48, %v11474_v45  ;;  %v3310_v20 = vmul.f32 1.442695, %v3254_v32  ;;  %v3314_v32 = vmul.f32 1.442695, %v3256_v29 }
 0x6ac   : > { %v3431_v27 = vpack.c.bf16 %v14531_v56, %v11472_v36  ;;  %v3221_v60 = vpop.xlane.xlu1 %3220 }
 0x6ad   : > { %v3257_v8 = vsub.f32 %v14390_v50, %v3221_v60  ;;  %10703 = vmatprep.mubr.bf16.mxu1 %v3430_v5  ;;  %v17529_v5 = vld [vmem:[#allocation57_spill] sm:$0xff]  ;;  %11489 = vpow2.f32 %v3310_v20 }
 0x6ae   : > { %10704 = vmatmul.mubr.bf16.vlgmr.msra.gmra.mxu1 %v3431_v27  ;;  %v14546_v25 = vpop.xlane.xlu0 %3222  ;;  %4325 = vmax.xlane.f32.xlu1 %v14537_v52  ;;  %v11480_v21 = vpop.eup %11479 }
 0x6af   : > { %10752 = vmatpush3.bf16.xpose.msra.mxu1 %v4208_v43  ;;  %4337 = vmax.xlane.f32.xlu0 %v14540_v13  ;;  %v3316_v50 = vmul.f32 1.442695, %v3257_v8  ;;  %v11482_v57 = vpop.eup %11481 }
 0x6b0   : > { %11080 = vmatprep.subr.msk.bf16.mxu1 %vm1830_vm0, %v17529_v5  ;;  %v3217_v1 = vpop.xlane.xlu1 %3216 }
 0x6b1   : > { %v3255_v9 = vsub.f32 %v14400_v2, %v3217_v1  ;;  %11491 = vpow2.f32 %v3316_v50  ;;  %v4205_v2 = vsel %vm1830_vm0, %v17529_v5, 0  ;;  %v17530_v1 = vld [vmem:[#allocation62_spill] sm:$0xff] }
 0x6b2   : > { %v14557_v27 = vpop.eup %11483  ;;  %v14559_v60 = vpop.xlane.xlu0 %3228  ;;  %4333 = vmax.xlane.f32.xlu1 %v14551_v19 }
 0x6b3   : > { %v14562_v14 = vpop.eup %11485  ;;  %v3312_v8 = vmul.f32 1.442695, %v3255_v9  ;;  %v3433_v43 = vpack.c.bf16 %v14557_v27, %v11482_v57 }
 0x6b4   : > { %v3829_v30 = vpop.permute.xlu1 %3828  ;;  %v3432_v22 = vpack.c.bf16 %v14562_v14, %v11480_v21  ;;  %v11488_v50 = vpop.eup %11487 }
 0x6b5   : > { %11493 = vpow2.f32 %v3312_v8  ;;  %3923 = vst.msk [vmem:[#allocation3 + $0x8] sm:$0xf] %vm3920_vm3, %v3829_v30  ;;  %v3699_v30 = vmul.f32 %v11488_v50, %v14410_v42  ;;  %v17532_v42 = vld [vmem:[#allocation139_spill] sm:$0xff]  ;;  %v17535_v50 = vld [vmem:[#allocation108_spill] sm:$0xff] }
 0x6b6   : > { %11495 = vpow2.f32 %v3314_v32  ;;  %10707 = vmatprep.mubr.bf16.mxu1 %v3432_v22  ;;  %v3827_v29 = vpop.permute.xlu0 %3826  ;;  %3362 = vadd.xlane.f32.xlu1 %v11472_v36  ;;  %v4202_v36 = vsel %vm1830_vm0, %v17530_v1, 0  ;;  %v17531_v32 = vld [vmem:[#allocation48_spill] sm:$0xff] }
 0x6b7   : > { %10708 = vmatmul.mubr.bf16.gmra.mxu1 %v3433_v43  ;;  %3922 = vst.msk [vmem:[#allocation3 + $0x4] sm:$0xf] %vm3920_vm3, %v3827_v29  ;;  %v9667_v22 = vpack.c.bf16 %v3699_v30, %v3699_v30  ;;  %v4190_v30 = vsel %vm1830_vm0, %v17535_v50, 0 }
 0x6b8   : > { %10754 = vmatpush3.bf16.xpose.msra.mxu1 %v4205_v2  ;;  %v3825_v20 = vpop.permute.xlu1 %3824 }
 0x6b9   : > { %11081 = vmatprep.subr.msk.bf16.mxu1 %vm1830_vm0, %v17530_v1  ;;  %3921 = vst.msk [vmem:[#allocation3] sm:$0xf] %vm3920_vm3, %v3825_v20  ;;  %v17534_v20 = vld [vmem:[#allocation109_spill] sm:$0xff] }
 0x6ba   : > { %3358 = vadd.xlane.f32.xlu1 %v11474_v45  ;;  %v11490_v9 = vpop.eup %11489  ;;  %v4199_v45 = vsel %vm1830_vm0, %v17531_v32, 0  ;;  %v4193_v1 = vsel %vm1830_vm0, %v17534_v20, 0 }
 0x6be   : > { %3370 = vadd.xlane.f32.xlu1 %v11482_v57  ;;  %v11492_v5 = vpop.eup %11491  ;;  %v17533_v57 = vld [vmem:[#allocation10_spill] sm:$0xff] }
 0x6c0   : > { %10756 = vmatpush3.bf16.xpose.msra.mxu1 %v4202_v36  ;;  %v17536_v36 = vld [vmem:[#allocation101_spill] sm:$0xff] }
 0x6c1   : > { %11082 = vmatprep.subr.msk.bf16.mxu1 %vm1830_vm0, %v17531_v32  ;;  %v3258_v32 = vsub.f32 %v14396_v6, %v14546_v25 }
 0x6c2   : > { %v11494_v8 = vpop.eup %11493  ;;  %3366 = vadd.xlane.f32.xlu1 %v11480_v21  ;;  %v4196_v21 = vsel %vm1830_vm0, %v17533_v57, 0 }
 0x6c3   : > { %v11496_v43 = vpop.eup %11495  ;;  %v3434_v29 = vpack.c.bf16 %v11494_v8, %v11490_v9 }
 0x6c4   : > { %v3435_v2 = vpack.c.bf16 %v11492_v5, %v11496_v43 }
 0x6c5   : > { %3830 = vrot.lane.b32.xlu0 %v9667_v22, %s12065_s26  ;;  %10711 = vmatprep.mubr.bf16.mxu1 %v3434_v29  ;;  %v3260_v22 = vsub.f32 %v14386_v46, %v14527_v23  ;;  %v4187_v29 = vsel %vm1830_vm0, %v17536_v36, 0  ;;  %v17538_v46 = vld [vmem:[#allocation61_spill] sm:$0xff] }
 0x6c6   : > { %10712 = vmatmul.mubr.bf16.gmra.mxu1 %v3435_v2  ;;  %2303 = vadd.xlane.f32.xlu1 %v17532_v42  ;;  %v3318_v2 = vmul.f32 1.442695, %v3258_v32 }
 0x6c8   : > { %10758 = vmatpush3.bf16.xpose.msra.mxu1 %v4199_v45  ;;  %v17537_v45 = vld [vmem:[#allocation11_spill] sm:$0xff]  ;;  %11497 = vpow2.f32 %v3318_v2 }
 0x6c9   : > { %11083 = vmatprep.subr.msk.bf16.mxu1 %vm1830_vm0, %v17533_v57 }
 0x6ca   : > { %3376 = vadd.xlane.f32.xlu1 %v11494_v8  ;;  %v3261_v8 = vsub.f32 %v14404_v59, %v14559_v60 }
 0x6cc   : > { %v3324_v42 = vmul.f32 1.442695, %v3261_v8 }
 0x6ce   : > { %11499 = vpow2.f32 %v3324_v42 }
 0x6d0   : > { %10760 = vmatpush3.bf16.xpose.msra.mxu1 %v4196_v21  ;;  %v17541_v21 = vld [vmem:[#allocation14_spill] sm:$0xff] }
 0x6d1   : > { %11084 = vmatprep.subr.msk.bf16.mxu1 %vm1830_vm0, %v17534_v20  ;;  %v17543_v20 = vld [vmem:[#allocation118_spill] sm:$0xff] }
 0x6d5   : > { %v14611_v59 = vpop.eup %11497 }
 0x6d8   : > { %10762 = vmatpush3.bf16.xpose.msra.mxu1 %v4193_v1  ;;  %v17544_v1 = vld [vmem:[#allocation114_spill] sm:$0xff] }
 0x6d9   : > { %11085 = vmatprep.subr.msk.bf16.mxu1 %vm1830_vm0, %v17535_v50  ;;  %v17546_v50 = vld [vmem:[#allocation117_spill] sm:$0xff] }
 0x6e0   : > { %10764 = vmatpush3.bf16.xpose.msra.mxu1 %v4190_v30  ;;  %v17547_v30 = vld [vmem:[#allocation119_spill] sm:$0xff] }
 0x6e1   : > { %11086 = vmatprep.subr.msk.bf16.mxu1 %vm1830_vm0, %v17536_v36  ;;  %v17548_v36 = vld [vmem:[#allocation58_spill] sm:$0xff] }
 0x6e4   : > { %3364 = vadd.xlane.f32.xlu0 %v14531_v56  ;;  %v3322_v56 = vmul.f32 1.442695, %v3260_v22  ;;  %v17549_v22 = vld [vmem:[#allocation52_spill] sm:$0xff] }
 0x6e8   : > { %10766 = vmatpush3.bf16.xpose.msra.mxu1 %v4187_v29  ;;  %3360 = vadd.xlane.f32.xlu0 %v14525_v48  ;;  %v14613_v48 = vpop.eup %11499  ;;  %v17550_v29 = vld [vmem:[#allocation121_spill] sm:$0xff] }
 0x6e9   : > { %10815 = vmatprep.subr.bf16.mxu1 %v17537_v45  ;;  %v3225_v57 = vpop.xlane.xlu1 %3224 }
 0x6ea   : > { %v3259_v6 = vsub.f32 %v14427_v41, %v3225_v57 }
 0x6ec   : > { %v3320_v25 = vmul.f32 1.442695, %v3259_v6  ;;  %3372 = vadd.xlane.f32.xlu0 %v14557_v27 }
 0x6ee   : > { %11501 = vpow2.f32 %v3320_v25  ;;  %v17551_v25 = vld [vmem:[#allocation122_spill] sm:$0xff] }
 0x6ef   : > { %11503 = vpow2.f32 %v3322_v56 }
 0x6f0   : > { %3368 = vadd.xlane.f32.xlu0 %v14562_v14  ;;  %v17539_v14 = vld [vmem:[#allocation102_spill] sm:$0xff] }
 0x6f4   : > { %2301 = vadd.xlane.f32.xlu0 %v17538_v46 }
 0x6f8   : > { %3374 = vadd.xlane.f32.xlu0 %v11490_v9  ;;  %v17540_v9 = vld [vmem:[#allocation105_spill] sm:$0xff] }
 0x6fb   : > { %v14615_v23 = vpop.eup %11501 }
 0x6fc   : > { %v14617_v41 = vpop.eup %11503  ;;  %3378 = vadd.xlane.f32.xlu0 %v11496_v43  ;;  %v3436_v27 = vpack.c.bf16 %v14615_v23, %v14611_v59  ;;  %v17542_v43 = vld [vmem:[#allocation116_spill] sm:$0xff] }
 0x6fd   : > { %v3437_v60 = vpack.c.bf16 %v14613_v48, %v14617_v41 }
 0x6fe   : > { %10715 = vmatprep.mubr.bf16.mxu1 %v3436_v27 }
 0x6ff   : > { %10716 = vmatmul.mubr.bf16.gmra.mxu1 %v3437_v60 }
 0x700   : > { %3380 = vadd.xlane.f32.xlu0 %v11492_v5  ;;  %10767 = vmatprep.mubr.msk.bf16.mxu1 %vm1830_vm0, %v17539_v14  ;;  %v17545_v5 = vld [vmem:[#allocation38_spill] sm:$0xff] }
 0x707   : > { %10768 = vmatmul.mubr.msk.bf16.vlgmr.msra.gmra.mxu1 %vm1830_vm0, %v17540_v9  ;;  %v17553_v9 = vld [vmem:[#allocation124_spill] sm:$0xff] }
 0x708   : > { %10816 = vmatpush3.bf16.msra.mxu1 %v17537_v45  ;;  %10771 = vmatprep.mubr.msk.bf16.mxu1 %vm1830_vm0, %v17541_v21 }
 0x709   : > { %10817 = vmatprep.subr.bf16.mxu1 %v17542_v43 }
 0x70c   : > { %10818 = vmatpush3.bf16.msra.mxu1 %v17542_v43 }
 0x70d   : > { %10819 = vmatprep.subr.bf16.mxu1 %v17543_v20 }
 0x70f   : > { %10772 = vmatmul.mubr.msk.bf16.gmra.mxu1 %vm1830_vm0, %v17544_v1  ;;  %v17554_v1 = vld [vmem:[#allocation127_spill] sm:$0xff] }
 0x710   : > { %10820 = vmatpush3.bf16.msra.mxu1 %v17543_v20  ;;  %10775 = vmatprep.mubr.msk.bf16.mxu1 %vm1830_vm0, %v17545_v5 }
 0x711   : > { %10821 = vmatprep.subr.bf16.mxu1 %v17546_v50 }
 0x714   : > { %10822 = vmatpush3.bf16.msra.mxu1 %v17546_v50 }
 0x715   : > { %10823 = vmatprep.subr.bf16.mxu1 %v17547_v30 }
 0x717   : > { %10776 = vmatmul.mubr.msk.bf16.gmra.mxu1 %vm1830_vm0, %v17548_v36  ;;  %v4312_v32 = vpop.xlane.xlu1 %4311 }
 0x718   : > { %10824 = vmatpush3.bf16.msra.mxu1 %v17547_v30  ;;  %v4373_v8 = vsub.f32 %v14466_v53, %v4312_v32  ;;  %10779 = vmatprep.mubr.msk.bf16.mxu1 %vm1830_vm0, %v17549_v22  ;;  %v17552_v53 = vld [vmem:[#allocation66_spill] sm:$0xff] }
 0x719   : > { %10825 = vmatprep.subr.bf16.mxu1 %v17550_v29  ;;  %v4308_v2 = vpop.xlane.xlu0 %4307 }
 0x71a   : > { %v4407_v42 = vmul.f32 1.442695, %v4373_v8  ;;  %v4371_v45 = vsub.f32 %v14471_v28, %v4308_v2 }
 0x71b   : > { %v4314_v57 = vpop.xlane.xlu1 %4313 }
 0x71c   : > { %11505 = vpow2.f32 %v4407_v42  ;;  %v4403_v6 = vmul.f32 1.442695, %v4371_v45  ;;  %10826 = vmatpush3.bf16.msra.mxu1 %v17550_v29  ;;  %v4374_v56 = vsub.f32 %v14475_v54, %v4314_v57 }
 0x71d   : > { %10827 = vmatprep.subr.bf16.mxu1 %v17551_v25 }
 0x71e   : > { %v4409_v46 = vmul.f32 1.442695, %v4374_v56  ;;  %11507 = vpow2.f32 %v4403_v6 }
 0x71f   : > { %10780 = vmatmul.mubr.msk.bf16.gmra.mxu1 %vm1830_vm0, %v17552_v53  ;;  %v4310_v27 = vpop.xlane.xlu1 %4309  ;;  %v4320_v60 = vpop.xlane.xlu0 %4319 }
 0x720   : > { %11509 = vpow2.f32 %v4409_v46  ;;  %10828 = vmatpush3.bf16.msra.mxu1 %v17551_v25  ;;  %v4372_v28 = vsub.f32 %v14481_v10, %v4310_v27  ;;  %v4377_v14 = vsub.f32 %v14484_v15, %v4320_v60 }
 0x721   : > { %10829 = vmatprep.subr.bf16.mxu1 %v17553_v9 }
 0x722   : > { %v4405_v21 = vmul.f32 1.442695, %v4372_v28  ;;  %v4415_v54 = vmul.f32 1.442695, %v4377_v14 }
 0x723   : > { %v4316_v43 = vpop.xlane.xlu1 %4315 }
 0x724   : > { %11511 = vpow2.f32 %v4405_v21  ;;  %10830 = vmatpush3.bf16.msra.mxu1 %v17553_v9  ;;  %v4375_v20 = vsub.f32 %v14490_v44, %v4316_v43 }
 0x725   : > { %11513 = vpow2.f32 %v4415_v54  ;;  %11095 = vmatprep.subr.msk.bf16.mxu1 %vm1830_vm0, %v17554_v1  ;;  %v4318_v5 = vpop.xlane.xlu0 %4317  ;;  %v17555_v54 = vld [vmem:[#allocation80_spill] sm:$0xff] }
 0x726   : > { %v4411_v50 = vmul.f32 1.442695, %v4375_v20  ;;  %v4376_v10 = vsub.f32 %v14495_v47, %v4318_v5 }
 0x727   : > { %v4322_v30 = vpop.xlane.xlu1 %4321 }
 0x728   : > { %11515 = vpow2.f32 %v4411_v50  ;;  %v4413_v15 = vmul.f32 1.442695, %v4376_v10  ;;  %v4378_v36 = vsub.f32 %v14499_v49, %v4322_v30 }
 0x729   : > { %v11506_v32 = vpop.eup %11505 }
 0x72a   : > { %11517 = vpow2.f32 %v4413_v15  ;;  %v4417_v8 = vmul.f32 1.442695, %v4378_v36  ;;  %4471 = vadd.xlane.f32.xlu1 %v11506_v32 }
 0x72b   : > { %v4328_v22 = vpop.xlane.xlu1 %4327  ;;  %v11508_v29 = vpop.eup %11507 }
 0x72c   : > { %11519 = vpow2.f32 %v4417_v8  ;;  %v4381_v44 = vsub.f32 %v14506_v33, %v4328_v22 }
 0x72d   : > { %v11510_v2 = vpop.eup %11509 }
 0x72e   : > { %v4423_v42 = vmul.f32 1.442695, %v4381_v44  ;;  %4473 = vadd.xlane.f32.xlu0 %v11510_v2  ;;  %4467 = vadd.xlane.f32.xlu1 %v11508_v29  ;;  %v4564_v53 = vpack.c.bf16 %v11510_v2, %v11506_v32 }
 0x72f   : > { %v4324_v45 = vpop.xlane.xlu1 %4323  ;;  %v4336_v47 = vpop.xlane.xlu0 %4335 }
 0x730   : > { %11521 = vpow2.f32 %v4423_v42  ;;  %v4379_v57 = vsub.f32 %v14512_v40, %v4324_v45  ;;  %v4385_v49 = vsub.f32 %v14515_v51, %v4336_v47  ;;  %v5156_v40 = vsel %vm1830_vm0, %v17482_v35, 0 }
 0x731   : > { %v11512_v6 = vpop.eup %11511 }
 0x732   : > { %v11514_v56 = vpop.eup %11513  ;;  %v4419_v25 = vmul.f32 1.442695, %v4379_v57  ;;  %4469 = vadd.xlane.f32.xlu0 %v11512_v6  ;;  %v4563_v46 = vpack.c.bf16 %v11512_v6, %v11508_v29  ;;  %v4431_v14 = vmul.f32 1.442695, %v4385_v49  ;;  %v17559_v57 = vld [vmem:[#allocation72_spill] sm:$0xff] }
 0x733   : > { %4479 = vadd.xlane.f32.xlu1 %v11514_v56  ;;  %v4330_v27 = vpop.xlane.xlu1 %4329  ;;  %v4332_v33 = vpop.xlane.xlu0 %4331 }
 0x734   : > { %11523 = vpow2.f32 %v4419_v25  ;;  %v4382_v60 = vsub.f32 %v14520_v12, %v4330_v27  ;;  %10799 = vmatprep.mubr.bf16.mxu0 %v4563_v46  ;;  %v4383_v9 = vsub.f32 %v14523_v11, %v4332_v33 }
 0x735   : > { %v11516_v28 = vpop.eup %11515  ;;  %10800 = vmatmul.mubr.bf16.vlgmr.msra.gmra.mxu0 %v4564_v53 }
 0x736   : > { %v4425_v51 = vmul.f32 1.442695, %v4382_v60  ;;  %10848 = vmatpush3.bf16.xpose.msra.mxu0 %v5156_v40  ;;  %v4427_v11 = vmul.f32 1.442695, %v4383_v9  ;;  %v5147_v60 = vsel %vm1830_vm0, %v17559_v57, 0 }
 0x737   : > { %v11518_v21 = vpop.eup %11517  ;;  %11088 = vmatprep.subr.msk.bf16.mxu0 %vm1830_vm0, %v17555_v54  ;;  %4475 = vadd.xlane.f32.xlu1 %v11516_v28  ;;  %v4326_v43 = vpop.xlane.xlu1 %4325 }
 0x738   : > { %11525 = vpow2.f32 %v4425_v51  ;;  %v4380_v12 = vsub.f32 %v14537_v52, %v4326_v43  ;;  %v4338_v20 = vpop.xlane.xlu0 %4337  ;;  %v4565_v5 = vpack.c.bf16 %v11518_v21, %v11516_v28  ;;  %v5153_v52 = vsel %vm1830_vm0, %v17555_v54, 0  ;;  %v17564_v54 = vld [vmem:[#allocation9_spill] sm:$0xff] }
 0x739   : > { %v11520_v50 = vpop.eup %11519  ;;  %11527 = vpow2.f32 %v4431_v14  ;;  %v4386_v10 = vsub.f32 %v14540_v13, %v4338_v20  ;;  %v17556_v13 = vld [vmem:[#allocation81_spill] sm:$0xff] }
 0x73a   : > { %v4421_v30 = vmul.f32 1.442695, %v4380_v12  ;;  %4481 = vadd.xlane.f32.xlu0 %v11520_v50  ;;  %10803 = vmatprep.mubr.bf16.mxu0 %v4565_v5  ;;  %v4566_v35 = vpack.c.bf16 %v11520_v50, %v11514_v56  ;;  %v5150_v45 = vsel %vm1830_vm0, %v17556_v13, 0  ;;  %v17562_v14 = vld [vmem:[#allocation65_spill] sm:$0xff]  ;;  %v5141_v12 = vsel %vm1830_vm0, %v17564_v54, 0  ;;  %v17565_v5 = vld [vmem:[#allocation120_spill] sm:$0xff] }
 0x73b   : > { %v4433_v15 = vmul.f32 1.442695, %v4386_v10  ;;  %v4334_v36 = vpop.xlane.xlu1 %4333  ;;  %v5144_v51 = vsel %vm1830_vm0, %v17562_v14, 0  ;;  %v17566_v10 = vld [vmem:[#allocation123_spill] sm:$0xff] }
 0x73c   : > { %11529 = vpow2.f32 %v4421_v30  ;;  %v4384_v32 = vsub.f32 %v14551_v19, %v4334_v36  ;;  %v3831_v8 = vpop.permute.xlu0 %3830 }
 0x73d   : > { %v11522_v22 = vpop.eup %11521  ;;  %11531 = vpow2.f32 %v4427_v11  ;;  %3924 = vst.msk [vmem:[#allocation3 + $0xc] sm:$0xf] %vm3920_vm3, %v3831_v8  ;;  %10804 = vmatmul.mubr.bf16.gmra.mxu0 %v4566_v35  ;;  %v5138_v11 = vsel %vm1830_vm0, %v17565_v5, 0  ;;  %v5135_v35 = vsel %vm1830_vm0, %v17566_v10, 0 }
 0x73e   : > { %v4429_v29 = vmul.f32 1.442695, %v4384_v32  ;;  %10850 = vmatpush3.bf16.xpose.msra.mxu0 %v5153_v52  ;;  %4487 = vadd.xlane.f32.xlu1 %v11522_v22  ;;  %11533 = vpow2.f32 %v4433_v15  ;;  %v17569_v15 = vld [vmem:[#allocation126_spill] sm:$0xff]  ;;  %v17571_v32 = vld [vmem:[#allocation128_spill] sm:$0xff] }
 0x73f   : > { %11089 = vmatprep.subr.msk.bf16.mxu0 %vm1830_vm0, %v17556_v13  ;;  %4477 = vadd.xlane.f32.xlu0 %v11518_v21  ;;  %v14681_v44 = vpop.xlane.xlu1 %3362  ;;  %v17563_v21 = vld [vmem:[#allocation125_spill] sm:$0xff] }
 0x740   : > { %17557 = vst [vmem:[#allocation25_spill] sm:$0xff] %v14681_v44  ;;  %11535 = vpow2.f32 %v4429_v29  ;;  %v17574_v29 = vld [vmem:[#allocation143_spill] sm:$0xff] }
 0x741   : > { %v11524_v19 = vpop.eup %11523 }
 0x742   : > { %4483 = vadd.xlane.f32.xlu1 %v11524_v19 }
 0x743   : > { %v14683_v2 = vpop.xlane.xlu1 %3358 }
 0x744   : > { %17558 = vst [vmem:[#allocation57_spill] sm:$0xff] %v14683_v2 }
 0x745   : > { %v11526_v42 = vpop.eup %11525 }
 0x746   : > { %v11528_v47 = vpop.eup %11527  ;;  %10852 = vmatpush3.bf16.xpose.msra.mxu0 %v5150_v45  ;;  %4489 = vadd.xlane.f32.xlu0 %v11526_v42  ;;  %v4568_v53 = vpack.c.bf16 %v11526_v42, %v11522_v22  ;;  %v17573_v22 = vld [vmem:[#allocation131_spill] sm:$0xff] }
 0x747   : > { %11090 = vmatprep.subr.msk.bf16.mxu0 %vm1830_vm0, %v17559_v57  ;;  %4495 = vadd.xlane.f32.xlu1 %v11528_v47  ;;  %v14689_v6 = vpop.xlane.xlu1 %3370 }
 0x748   : > { %17560 = vst [vmem:[#allocation62_spill] sm:$0xff] %v14689_v6 }
 0x749   : > { %v11530_v49 = vpop.eup %11529 }
 0x74a   : > { %v11532_v56 = vpop.eup %11531  ;;  %4485 = vadd.xlane.f32.xlu0 %v11530_v49  ;;  %v4567_v25 = vpack.c.bf16 %v11530_v49, %v11524_v19 }
 0x74b   : > { %4491 = vadd.xlane.f32.xlu1 %v11532_v56  ;;  %v14691_v46 = vpop.xlane.xlu1 %3366  ;;  %v11534_v27 = vpop.eup %11533 }
 0x74c   : > { %17561 = vst [vmem:[#allocation48_spill] sm:$0xff] %v14691_v46  ;;  %10807 = vmatprep.mubr.bf16.mxu0 %v4567_v25  ;;  %v4570_v40 = vpack.c.bf16 %v11534_v27, %v11528_v47 }
 0x74d   : > { %v11536_v33 = vpop.eup %11535  ;;  %10808 = vmatmul.mubr.bf16.gmra.mxu0 %v4568_v53 }
 0x74e   : > { %10854 = vmatpush3.bf16.xpose.msra.mxu0 %v5147_v60  ;;  %4497 = vadd.xlane.f32.xlu0 %v11534_v27  ;;  %v4569_v28 = vpack.c.bf16 %v11536_v33, %v11532_v56 }
 0x74f   : > { %11091 = vmatprep.subr.msk.bf16.mxu0 %vm1830_vm0, %v17562_v14  ;;  %v2304_v9 = vpop.xlane.xlu1 %2303 }
 0x750   : > { %11537 = vrcp.f32 %v2304_v9  ;;  %10811 = vmatprep.mubr.bf16.mxu0 %v4569_v28 }
 0x752   : > { %4493 = vadd.xlane.f32.xlu0 %v11536_v33 }
 0x755   : > { %10812 = vmatmul.mubr.bf16.gmra.mxu0 %v4570_v40 }
 0x756   : > { %10856 = vmatpush3.bf16.xpose.msra.mxu0 %v5144_v51  ;;  %10863 = vmatprep.mubr.msk.bf16.mxu0 %vm1830_vm0, %v17563_v21 }
 0x757   : > { %11092 = vmatprep.subr.msk.bf16.mxu0 %vm1830_vm0, %v17564_v54 }
 0x75d   : > { %v11538_v43 = vpop.eup %11537 }
 0x75e   : > { %10858 = vmatpush3.bf16.xpose.msra.mxu0 %v5141_v12  ;;  %v2598_v20 = vmul.f32 %v11538_v43, %v14242_v39  ;;  %v17593_v12 = vld [vmem:[#allocation24_spill] sm:$0xff] }
 0x75f   : > { %11093 = vmatprep.subr.msk.bf16.mxu0 %vm1830_vm0, %v17565_v5 }
 0x760   : > { %v9643_v50 = vpack.c.bf16 %v2598_v20, %v2598_v20 }
 0x762   : > { %2759 = vst.msk [vmem:[#allocation3 + $0x2c] sm:$0xf] %vm2747_vm2, %v9643_v50 }
 0x766   : > { %10860 = vmatpush3.bf16.xpose.msra.mxu0 %v5138_v11  ;;  %v17594_v11 = vld [vmem:[#allocation28_spill] sm:$0xff] }
 0x767   : > { %11094 = vmatprep.subr.msk.bf16.mxu0 %vm1830_vm0, %v17566_v10 }
 0x76d   : > { %v14713_v30 = vpop.xlane.xlu0 %3364 }
 0x76e   : > { %17567 = vst [vmem:[#allocation139_spill] sm:$0xff] %v14713_v30  ;;  %10862 = vmatpush3.bf16.xpose.msra.mxu0 %v5135_v35 }
 0x76f   : > { %10911 = vmatprep.subr.bf16.mxu0 %v14179_v16 }
 0x771   : > { %v14718_v39 = vpop.xlane.xlu0 %3360 }
 0x772   : > { %17568 = vst [vmem:[#allocation10_spill] sm:$0xff] %v14718_v39 }
 0x775   : > { %10864 = vmatmul.mubr.msk.bf16.vlgmr.msra.gmra.mxu0 %vm1830_vm0, %v17569_v15  ;;  %v14722_v36 = vpop.xlane.xlu0 %3372 }
 0x776   : > { %17570 = vst [vmem:[#allocation109_spill] sm:$0xff] %v14722_v36  ;;  %10867 = vmatprep.mubr.msk.bf16.mxu0 %vm1830_vm0, %v17571_v32  ;;  %10912 = vmatpush3.bf16.msra.mxu0 %v14179_v16  ;;  %v17575_v16 = vld [vmem:[#allocation144_spill] sm:$0xff] }
 0x777   : > { %10913 = vmatprep.subr.bf16.mxu0 %v14227_v4 }
 0x779   : > { %v14728_v8 = vpop.xlane.xlu0 %3368 }
 0x77a   : > { %17572 = vst [vmem:[#allocation108_spill] sm:$0xff] %v14728_v8  ;;  %10914 = vmatpush3.bf16.msra.mxu0 %v14227_v4 }
 0x77b   : > { %10915 = vmatprep.subr.bf16.mxu0 %v14187_v17 }
 0x77d   : > { %10868 = vmatmul.mubr.msk.bf16.gmra.mxu0 %vm1830_vm0, %v17573_v22  ;;  %v2302_v52 = vpop.xlane.xlu0 %2301  ;;  %v17596_v22 = vld [vmem:[#allocation30_spill] sm:$0xff] }
 0x77e   : > { %11539 = vrcp.f32 %v2302_v52  ;;  %10871 = vmatprep.mubr.msk.bf16.mxu0 %vm1830_vm0, %v17574_v29  ;;  %10916 = vmatpush3.bf16.msra.mxu0 %v14187_v17 }
 0x77f   : > { %10917 = vmatprep.subr.bf16.mxu0 %v14192_v31 }
 0x781   : > { %v14813_v15 = vpop.xlane.xlu0 %3374 }
 0x782   : > { %10918 = vmatpush3.bf16.msra.mxu0 %v14192_v31  ;;  %v17576_v31 = vld [vmem:[#allocation148_spill] sm:$0xff]  ;;  %17595 = vst [vmem:[#allocation66_spill] sm:$0xff] %v14813_v15 }
 0x783   : > { %10919 = vmatprep.subr.bf16.mxu0 %v14198_v26 }
 0x785   : > { %10872 = vmatmul.mubr.msk.bf16.gmra.mxu0 %vm1830_vm0, %v17575_v16 }
 0x786   : > { %10875 = vmatprep.mubr.msk.bf16.mxu0 %vm1830_vm0, %v14074_v18  ;;  %10920 = vmatpush3.bf16.msra.mxu0 %v14198_v26  ;;  %v14755_v18 = vpop.f32.mrf.mxu1 }
 0x787   : > { %10921 = vmatprep.subr.bf16.mxu0 %v14233_v0  ;;  %17577 = vst [vmem:[#allocation101_spill] sm:$0xff] %v14755_v18 }
 0x788   : > { %v14757_v26 = vpop.f32.mrf.mxu1 }
 0x789   : > { %17578 = vst [vmem:[#allocation11_spill] sm:$0xff] %v14757_v26 }
 0x78a   : > { %10922 = vmatpush3.bf16.msra.mxu0 %v14233_v0  ;;  %v14759_v0 = vpop.f32.mrf.mxu1 }
 0x78b   : > { %v11540_v4 = vpop.eup %11539  ;;  %10923 = vmatprep.subr.bf16.mxu0 %v14208_v34  ;;  %17579 = vst [vmem:[#allocation61_spill] sm:$0xff] %v14759_v0 }
 0x78c   : > { %v2597_v17 = vmul.f32 %v11540_v4, %v14236_v37  ;;  %v14761_v19 = vpop.f32.mrf.mxu1  ;;  %v14825_v4 = vpop.xlane.xlu1 %3376 }
 0x78d   : > { %10876 = vmatmul.mubr.msk.bf16.gmra.mxu0 %vm1830_vm0, %v17576_v31  ;;  %17580 = vst [vmem:[#allocation102_spill] sm:$0xff] %v14761_v19  ;;  %17597 = vst [vmem:[#allocation124_spill] sm:$0xff] %v14825_v4 }
 0x78e   : > { %10924 = vmatpush3.bf16.msra.mxu0 %v14208_v34  ;;  %v9642_v13 = vpack.c.bf16 %v2597_v17, %v2597_v17  ;;  %v14763_v37 = vpop.f32.mrf.mxu1  ;;  %v14827_v17 = vpop.xlane.xlu0 %3378 }
 0x78f   : > { %10925 = vmatprep.subr.bf16.mxu0 %v14216_v3  ;;  %17581 = vst [vmem:[#allocation105_spill] sm:$0xff] %v14763_v37  ;;  %17598 = vst [vmem:[#allocation127_spill] sm:$0xff] %v14827_v17 }
 0x790   : > { %2758 = vst.msk [vmem:[#allocation3 + $0x28] sm:$0xf] %vm2747_vm2, %v9642_v13  ;;  %v14765_v42 = vpop.f32.mrf.mxu1 }
 0x791   : > { %17582 = vst [vmem:[#allocation14_spill] sm:$0xff] %v14765_v42 }
 0x792   : > { %10926 = vmatpush3.bf16.msra.mxu0 %v14216_v3  ;;  %v14767_v34 = vpop.f32.mrf.mxu1 }
 0x793   : > { %17583 = vst [vmem:[#allocation116_spill] sm:$0xff] %v14767_v34 }
 0x794   : > { %v14769_v45 = vpop.f32.mrf.mxu1 }
 0x795   : > { %17584 = vst [vmem:[#allocation118_spill] sm:$0xff] %v14769_v45 }
 0x796   : > { %v14771_v47 = vpop.f32.mrf.mxu1 }
 0x797   : > { %17585 = vst [vmem:[#allocation114_spill] sm:$0xff] %v14771_v47 }
 0x798   : > { %v14773_v57 = vpop.f32.mrf.mxu1 }
 0x799   : > { %17586 = vst [vmem:[#allocation38_spill] sm:$0xff] %v14773_v57 }
 0x79a   : > { %v14775_v3 = vpop.f32.mrf.mxu1 }
 0x79b   : > { %17587 = vst [vmem:[#allocation117_spill] sm:$0xff] %v14775_v3 }
 0x79c   : > { %v14777_v49 = vpop.f32.mrf.mxu1 }
 0x79d   : > { %17588 = vst [vmem:[#allocation119_spill] sm:$0xff] %v14777_v49 }
 0x7bf   : > { %v14779_v56 = vpop.f32.mrf.mxu1 }
 0x7c0   : > { %17589 = vst [vmem:[#allocation58_spill] sm:$0xff] %v14779_v56 }
 0x7c1   : > { %v14781_v25 = vpop.f32.mrf.mxu1 }
 0x7c2   : > { %17590 = vst [vmem:[#allocation52_spill] sm:$0xff] %v14781_v25 }
 0x7c3   : > { %v14783_v53 = vpop.f32.mrf.mxu1 }
 0x7c4   : > { %17591 = vst [vmem:[#allocation121_spill] sm:$0xff] %v14783_v53 }
 0x7c5   : > { %v14785_v27 = vpop.f32.mrf.mxu1 }
 0x7c6   : > { %17592 = vst [vmem:[#allocation122_spill] sm:$0xff] %v14785_v27 }
 0x7c7   : > { %v10769_v33 = vpop.f32.mrf.mxu1 }
 0x7c8   : > { %v14788_v60 = vadd.f32 %v10769_v33, %v17491_v61  ;;  %v4472_v33 = vpop.xlane.xlu1 %4471 }
 0x7c9   : > { %v4244_v28 = vpop.f32.mrf.mxu1  ;;  %11541 = vrcp.f32 %v4472_v33 }
 0x7ca   : > { %v14791_v14 = vadd.f32 %v4244_v28, %v17492_v58  ;;  %4343 = vmax.xlane.f32.xlu0 %v14788_v60  ;;  %v17599_v28 = vld [vmem:[#allocation36_spill] sm:$0xff] }
 0x7cb   : > { %v10770_v9 = vpop.f32.mrf.mxu1 }
 0x7cc   : > { %4339 = vmax.xlane.f32.xlu1 %v14791_v14  ;;  %v14796_v51 = vadd.f32 %v10770_v9, %v17493_v38 }
 0x7cd   : > { %v4247_v40 = vpop.f32.mrf.mxu1 }
 0x7ce   : > { %v14803_v20 = vadd.f32 %v4247_v40, %v17593_v12  ;;  %v14836_v40 = vpop.xlane.xlu0 %3380 }
 0x7cf   : > { %v10773_v21 = vpop.f32.mrf.mxu1  ;;  %17600 = vst [vmem:[#allocation80_spill] sm:$0xff] %v14836_v40  ;;  %v17608_v40 = vld [vmem:[#allocation42_spill] sm:$0xff] }
 0x7d0   : > { %v14799_v54 = vadd.f32 %v10773_v21, %v17495_v63  ;;  %4345 = vmax.xlane.f32.xlu1 %v14796_v51 }
 0x7d1   : > { %v4260_v43 = vpop.f32.mrf.mxu1 }
 0x7d2   : > { %4351 = vmax.xlane.f32.xlu0 %v14799_v54  ;;  %v14808_v10 = vadd.f32 %v4260_v43, %v17594_v11 }
 0x7d3   : > { %v10774_v5 = vpop.f32.mrf.mxu1 }
 0x7d4   : > { %4341 = vmax.xlane.f32.xlu1 %v14803_v20  ;;  %v14818_v52 = vadd.f32 %v10774_v5, %v17596_v22  ;;  %v4468_v5 = vpop.xlane.xlu1 %4467 }
 0x7d5   : > { %v4263_v50 = vpop.f32.mrf.mxu1  ;;  %11543 = vrcp.f32 %v4468_v5 }
 0x7d6   : > { %v14811_v35 = vadd.f32 %v4263_v50, %v17498_v24  ;;  %v4474_v50 = vpop.xlane.xlu0 %4473 }
 0x7d7   : > { %v10777_v32 = vpop.f32.mrf.mxu1  ;;  %11545 = vrcp.f32 %v4474_v50 }
 0x7d8   : > { %4347 = vmax.xlane.f32.xlu1 %v14808_v10  ;;  %4349 = vmax.xlane.f32.xlu0 %v14811_v35  ;;  %v14821_v29 = vadd.f32 %v10777_v32, %v17499_v55  ;;  %v14887_v42 = vpop.xlane.xlu1 %4479 }
 0x7d9   : > { %v4276_v16 = vpop.f32.mrf.mxu1 }
 0x7da   : > { %v14830_v31 = vadd.f32 %v4276_v16, %v17500_v62  ;;  %v4470_v32 = vpop.xlane.xlu0 %4469  ;;  %v11542_v16 = vpop.eup %11541 }
 0x7db   : > { %v10778_v13 = vpop.f32.mrf.mxu1  ;;  %11547 = vrcp.f32 %v4470_v32 }
 0x7dc   : > { %4353 = vmax.xlane.f32.xlu1 %v14818_v52  ;;  %4359 = vmax.xlane.f32.xlu0 %v14821_v29  ;;  %v14834_v9 = vadd.f32 %v10778_v13, %v17599_v28  ;;  %v14898_v8 = vpop.xlane.xlu1 %4475 }
 0x7dd   : > { %v4279_v21 = vpop.f32.mrf.mxu1 }
 0x7de   : > { %v14840_v43 = vadd.f32 %v4279_v21, %v17504_v7  ;;  %v14892_v45 = vpop.xlane.xlu0 %4481 }
 0x7e0   : > { %4355 = vmax.xlane.f32.xlu1 %v14830_v31  ;;  %v14910_v2 = vpop.xlane.xlu1 %4487 }
 0x7e1   : > { %17613 = vst [vmem:[#allocation128_spill] sm:$0xff] %v14910_v2 }
 0x7e2   : > { %v11544_v25 = vpop.eup %11543 }
 0x7e4   : > { %4361 = vmax.xlane.f32.xlu1 %v14834_v9  ;;  %v11546_v15 = vpop.eup %11545 }
 0x7e8   : > { %4357 = vmax.xlane.f32.xlu1 %v14840_v43  ;;  %v11548_v5 = vpop.eup %11547 }
 0x7f5   : > { %v10801_v13 = vpop.f32.mrf.mxu0 }
 0x7f6   : > { %v4823_v56 = vmul.f32 %v11542_v16, %v10801_v13 }
 0x7f7   : > { %v4637_v47 = vpop.f32.mrf.mxu0 }
 0x7f8   : > { %v9698_v57 = vpack.c.bf16 %v4823_v56, %v4823_v56  ;;  %v4821_v17 = vmul.f32 %v11544_v25, %v4637_v47  ;;  %v10781_v25 = vpop.f32.mrf.mxu1 }
 0x7f9   : > { %v10802_v53 = vpop.f32.mrf.mxu0 }
 0x7fa   : > { %v9696_v21 = vpack.c.bf16 %v4821_v17, %v4821_v17  ;;  %v4824_v27 = vmul.f32 %v11546_v15, %v10802_v53  ;;  %4953 = vrot.lane.b32.xlu0 %v9698_v57, %s12063_s23  ;;  %v17601_v57 = vld [vmem:[#allocation39_spill] sm:$0xff] }
 0x7fb   : > { %v4640_v33 = vpop.f32.mrf.mxu0  ;;  %v14856_v15 = vadd.f32 %v10781_v25, %v17601_v57 }
 0x7fc   : > { %4949 = vrot.lane.b32.xlu1 %v9696_v21, %s12063_s23  ;;  %v9699_v50 = vpack.c.bf16 %v4824_v27, %v4824_v27  ;;  %v4822_v3 = vmul.f32 %v11548_v5, %v4640_v33  ;;  %v4292_v27 = vpop.f32.mrf.mxu1  ;;  %v17605_v5 = vld [vmem:[#allocation41_spill] sm:$0xff] }
 0x7fd   : > { %v14847_v16 = vpop.f32.mrf.mxu0 }
 0x7fe   : > { %v9697_v32 = vpack.c.bf16 %v4822_v3, %v4822_v3  ;;  %v17603_v3 = vld [vmem:[#allocation40_spill] sm:$0xff]  ;;  %v10782_v33 = vpop.f32.mrf.mxu1 }
 0x7ff   : > { %v14849_v47 = vpop.f32.mrf.mxu0  ;;  %v14862_v13 = vadd.f32 %v4292_v27, %v17603_v3 }
 0x800   : > { %4955 = vrot.lane.b32.xlu1 %v9699_v50, %s12063_s23  ;;  %v14868_v50 = vadd.f32 %v10782_v33, %v17605_v5  ;;  %v4295_v25 = vpop.f32.mrf.mxu1 }
 0x801   : > { %v14851_v56 = vpop.f32.mrf.mxu0  ;;  %v14876_v37 = vadd.f32 %v4295_v25, %v17608_v40 }
 0x803   : > { %v14853_v53 = vpop.f32.mrf.mxu0 }
 0x804   : > { %4951 = vrot.lane.b32.xlu1 %v9697_v32, %s12063_s23 }
 0x80d   : > { %v14858_v17 = vpop.f32.mrf.mxu0 }
 0x80e   : > { %17602 = vst [vmem:[#allocation81_spill] sm:$0xff] %v14858_v17 }
 0x80f   : > { %v14864_v21 = vpop.f32.mrf.mxu0 }
 0x810   : > { %17604 = vst [vmem:[#allocation72_spill] sm:$0xff] %v14864_v21 }
 0x811   : > { %v14870_v32 = vpop.f32.mrf.mxu0 }
 0x812   : > { %17606 = vst [vmem:[#allocation65_spill] sm:$0xff] %v14870_v32 }
 0x813   : > { %v14873_v49 = vpop.f32.mrf.mxu0 }
 0x814   : > { %17607 = vst [vmem:[#allocation125_spill] sm:$0xff] %v14873_v49 }
 0x815   : > { %v14878_v27 = vpop.f32.mrf.mxu0 }
 0x816   : > { %17609 = vst [vmem:[#allocation9_spill] sm:$0xff] %v14878_v27 }
 0x817   : > { %v14881_v4 = vpop.f32.mrf.mxu0 }
 0x818   : > { %17610 = vst [vmem:[#allocation120_spill] sm:$0xff] %v14881_v4 }
 0x819   : > { %4367 = vmax.xlane.f32.xlu0 %v14856_v15  ;;  %v14883_v6 = vpop.f32.mrf.mxu0 }
 0x81a   : > { %17611 = vst [vmem:[#allocation123_spill] sm:$0xff] %v14883_v6 }
 0x81b   : > { %v14885_v33 = vpop.f32.mrf.mxu0 }
 0x81c   : > { %17612 = vst [vmem:[#allocation126_spill] sm:$0xff] %v14885_v33 }
 0x81d   : > { %4363 = vmax.xlane.f32.xlu0 %v14862_v13 }
 0x821   : > { %4369 = vmax.xlane.f32.xlu0 %v14868_v50 }
 0x828   : > { %4365 = vmax.xlane.f32.xlu1 %v14876_v37 }
 0x835   : > { %v10865_v34 = vpop.f32.mrf.mxu0 }
 0x836   : > { %v14890_v46 = vadd.f32 %v10865_v34, %v17491_v61  ;;  %v14904_v34 = vpop.xlane.xlu0 %4477 }
 0x837   : > { %v5192_v36 = vpop.f32.mrf.mxu0 }
 0x838   : > { %5436 = vmax.xlane.f32.xlu0 %v14890_v46  ;;  %v14896_v18 = vadd.f32 %v5192_v36, %v17492_v58 }
 0x839   : > { %v10866_v25 = vpop.f32.mrf.mxu0 }
 0x83a   : > { %v14907_v27 = vadd.f32 %v10866_v25, %v17493_v38  ;;  %v14913_v19 = vpop.xlane.xlu0 %4489  ;;  %v14922_v25 = vpop.xlane.xlu1 %4483 }
 0x83b   : > { %v5195_v44 = vpop.f32.mrf.mxu0  ;;  %17614 = vst [vmem:[#allocation131_spill] sm:$0xff] %v14913_v19  ;;  %17615 = vst [vmem:[#allocation143_spill] sm:$0xff] %v14922_v25 }
 0x83c   : > { %v14901_v26 = vadd.f32 %v5195_v44, %v17593_v12  ;;  %5432 = vmax.xlane.f32.xlu0 %v14896_v18 }
 0x83d   : > { %v10869_v0 = vpop.f32.mrf.mxu0 }
 0x83e   : > { %5434 = vmax.xlane.f32.xlu1 %v14901_v26  ;;  %v14916_v44 = vadd.f32 %v10869_v0, %v17495_v63  ;;  %v14928_v2 = vpop.xlane.xlu0 %4485 }
 0x83f   : > { %v5208_v36 = vpop.f32.mrf.mxu0  ;;  %17616 = vst [vmem:[#allocation144_spill] sm:$0xff] %v14928_v2 }
 0x840   : > { %5438 = vmax.xlane.f32.xlu0 %v14907_v27  ;;  %v14925_v33 = vadd.f32 %v5208_v36, %v17594_v11 }
 0x841   : > { %v10870_v30 = vpop.f32.mrf.mxu0 }
 0x842   : > { %v14932_v32 = vadd.f32 %v10870_v30, %v17596_v22  ;;  %v14940_v21 = vpop.xlane.xlu0 %4497 }
 0x843   : > { %v5211_v4 = vpop.f32.mrf.mxu0  ;;  %17618 = vst [vmem:[#allocation24_spill] sm:$0xff] %v14940_v21 }
 0x844   : > { %v14919_v6 = vadd.f32 %v5211_v4, %v17498_v24  ;;  %5444 = vmax.xlane.f32.xlu0 %v14916_v44  ;;  %v14934_v4 = vpop.xlane.xlu1 %4495 }
 0x845   : > { %v10873_v39 = vpop.f32.mrf.mxu0  ;;  %17617 = vst [vmem:[#allocation148_spill] sm:$0xff] %v14934_v4 }
 0x846   : > { %5442 = vmax.xlane.f32.xlu1 %v14919_v6  ;;  %v14943_v25 = vadd.f32 %v10873_v39, %v17499_v55  ;;  %v14957_v21 = vpop.xlane.xlu0 %4493 }
 0x847   : > { %v5224_v17 = vpop.f32.mrf.mxu0 }
 0x848   : > { %5440 = vmax.xlane.f32.xlu0 %v14925_v33  ;;  %v14950_v30 = vpop.xlane.xlu1 %4491 }
 0x849   : > { %v10874_v0 = vpop.f32.mrf.mxu0  ;;  %17619 = vst [vmem:[#allocation150_spill] sm:$0xff] %v14950_v30 }
 0x84b   : > { %v5227_v19 = vpop.f32.mrf.mxu0 }
 0x84c   : > { %v14937_v49 = vadd.f32 %v5227_v19, %v17504_v7  ;;  %5446 = vmax.xlane.f32.xlu0 %v14932_v32  ;;  %v14953_v19 = vadd.f32 %v5224_v17, %v17500_v62  ;;  %v17620_v7 = vld [vmem:[#allocation78_spill] sm:$0xff] }
 0x84d   : > { %v10877_v36 = vpop.f32.mrf.mxu0  ;;  %11549 = vrcp.f32 %v17620_v7  ;;  %17621 = vst [vmem:[#allocation78_spill] sm:$0xff] %v14957_v21 }
 0x84e   : > { %5450 = vmax.xlane.f32.xlu1 %v14937_v49  ;;  %v14947_v2 = vadd.f32 %v10877_v36, %v17601_v57  ;;  %v14964_v57 = vadd.f32 %v10874_v0, %v17599_v28 }
 0x84f   : > { %v5240_v4 = vpop.f32.mrf.mxu0 }
 0x850   : > { %5452 = vmax.xlane.f32.xlu0 %v14943_v25  ;;  %v14960_v39 = vadd.f32 %v5240_v4, %v17603_v3 }
 0x851   : > { %v10878_v30 = vpop.f32.mrf.mxu0 }
 0x852   : > { %5460 = vmax.xlane.f32.xlu1 %v14947_v2  ;;  %v14970_v21 = vadd.f32 %v10878_v30, %v17605_v5 }
 0x853   : > { %v4344_v17 = vpop.xlane.xlu0 %4343  ;;  %v5243_v3 = vpop.f32.mrf.mxu0 }
 0x854   : > { %5448 = vmax.xlane.f32.xlu0 %v14953_v19  ;;  %v4389_v55 = vsub.f32 %v14788_v60, %v4344_v17  ;;  %v14976_v24 = vadd.f32 %v5243_v3, %v17608_v40  ;;  %v17623_v60 = vld [vmem:[#allocation51_spill] sm:$0xff] }
 0x855   : > { %v4340_v36 = vpop.xlane.xlu1 %4339 }
 0x856   : > { %5456 = vmax.xlane.f32.xlu1 %v14960_v39  ;;  %v4387_v62 = vsub.f32 %v14791_v14, %v4340_v36  ;;  %v17622_v36 = vld [vmem:[#allocation49_spill] sm:$0xff]  ;;  %v4439_v30 = vmul.f32 1.442695, %v4389_v55 }
 0x857   : > { %11551 = vrcp.f32 %v17622_v36 }
 0x858   : > { %5454 = vmax.xlane.f32.xlu0 %v14964_v57  ;;  %v4435_v22 = vmul.f32 1.442695, %v4387_v62 }
 0x859   : > { %v4346_v7 = vpop.xlane.xlu1 %4345 }
 0x85a   : > { %v4390_v4 = vsub.f32 %v14796_v51, %v4346_v7  ;;  %v11550_v5 = vpop.eup %11549  ;;  %11553 = vpow2.f32 %v4435_v22 }
 0x85b   : > { %v4352_v28 = vpop.xlane.xlu0 %4351  ;;  %v3700_v62 = vmul.f32 %v11550_v5, %v17623_v60 }
 0x85c   : > { %5462 = vmax.xlane.f32.xlu0 %v14970_v21  ;;  %v4441_v0 = vmul.f32 1.442695, %v4390_v4  ;;  %v4393_v17 = vsub.f32 %v14799_v54, %v4352_v28 }
 0x85d   : > { %v4342_v11 = vpop.xlane.xlu1 %4341  ;;  %v9668_v36 = vpack.c.bf16 %v3700_v62, %v3700_v62 }
 0x85e   : > { %v4388_v14 = vsub.f32 %v14803_v20, %v4342_v11  ;;  %11555 = vpow2.f32 %v4441_v0  ;;  %v4447_v22 = vmul.f32 1.442695, %v4393_v17 }
 0x860   : > { %v4437_v51 = vmul.f32 1.442695, %v4388_v14  ;;  %5458 = vmax.xlane.f32.xlu0 %v14976_v24 }
 0x861   : > { %v4348_v7 = vpop.xlane.xlu1 %4347  ;;  %v4350_v4 = vpop.xlane.xlu0 %4349 }
 0x862   : > { %11557 = vpow2.f32 %v4437_v51  ;;  %v4391_v3 = vsub.f32 %v14808_v10, %v4348_v7  ;;  %v4392_v20 = vsub.f32 %v14811_v35, %v4350_v4  ;;  %v17624_v7 = vld [vmem:[#allocation60_spill] sm:$0xff] }
 0x863   : > { %11559 = vpow2.f32 %v4439_v30 }
 0x864   : > { %v4443_v11 = vmul.f32 1.442695, %v4391_v3  ;;  %v4445_v55 = vmul.f32 1.442695, %v4392_v20  ;;  %v11552_v10 = vpop.eup %11551 }
 0x865   : > { %v4354_v14 = vpop.xlane.xlu1 %4353  ;;  %v4360_v28 = vpop.xlane.xlu0 %4359  ;;  %v3701_v4 = vmul.f32 %v11552_v10, %v17624_v7 }
 0x866   : > { %11561 = vpow2.f32 %v4443_v11  ;;  %v4394_v40 = vsub.f32 %v14818_v52, %v4354_v14  ;;  %v4397_v17 = vsub.f32 %v14821_v29, %v4360_v28  ;;  %v17625_v28 = vld [vmem:[#allocation129_spill] sm:$0xff] }
 0x867   : > { %11563 = vpow2.f32 %v4445_v55  ;;  %3832 = vrot.lane.b32.xlu1 %v9668_v36, %s12065_s26  ;;  %v11554_v30 = vpop.eup %11553 }
 0x868   : > { %v4449_v54 = vmul.f32 1.442695, %v4394_v40  ;;  %11565 = vpow2.f32 %v4447_v22  ;;  %v4455_v14 = vmul.f32 1.442695, %v4397_v17  ;;  %v17626_v17 = vld [vmem:[#allocation130_spill] sm:$0xff] }
 0x869   : > { %v4356_v5 = vpop.xlane.xlu1 %4355 }
 0x86a   : > { %11567 = vpow2.f32 %v4449_v54  ;;  %v4395_v35 = vsub.f32 %v14830_v31, %v4356_v5  ;;  %v9669_v5 = vpack.c.bf16 %v3701_v4, %v3701_v4 }
 0x86b   : > { %v11556_v60 = vpop.eup %11555 }
 0x86c   : > { %v4954_v0 = vpop.permute.xlu0 %4953  ;;  %v4451_v3 = vmul.f32 1.442695, %v4395_v35 }
 0x86d   : > { %v4362_v51 = vpop.xlane.xlu1 %4361  ;;  %5048 = vst.msk [vmem:[#allocation3 + $0x8] sm:$0xf] %vm5045_vm4, %v4954_v0 }
 0x86e   : > { %v4398_v52 = vsub.f32 %v14834_v9, %v4362_v51  ;;  %v5333_v9 = vsel %vm1830_vm0, %v17554_v1, 0  ;;  %11569 = vpow2.f32 %v4451_v3 }
 0x86f   : > { %v11558_v62 = vpop.eup %11557 }
 0x870   : > { %v11560_v40 = vpop.eup %11559  ;;  %v4571_v20 = vpack.c.bf16 %v11558_v62, %v11554_v30  ;;  %v4457_v55 = vmul.f32 1.442695, %v4398_v52  ;;  %v5330_v52 = vsel %vm1830_vm0, %v17625_v28, 0 }
 0x871   : > { %v4572_v11 = vpack.c.bf16 %v11556_v60, %v11560_v40  ;;  %v4358_v36 = vpop.xlane.xlu1 %4357 }
 0x872   : > { %v4396_v31 = vsub.f32 %v14840_v43, %v4358_v36  ;;  %10831 = vmatprep.mubr.bf16.mxu1 %v4571_v20  ;;  %11571 = vpow2.f32 %v4457_v55 }
 0x873   : > { %v11562_v22 = vpop.eup %11561  ;;  %10832 = vmatmul.mubr.bf16.vlgmr.msra.gmra.mxu1 %v4572_v11  ;;  %v5327_v11 = vsel %vm1830_vm0, %v17626_v17, 0 }
 0x874   : > { %v11564_v54 = vpop.eup %11563  ;;  %v4453_v29 = vmul.f32 1.442695, %v4396_v31  ;;  %10880 = vmatpush3.bf16.xpose.msra.mxu1 %v5333_v9  ;;  %v17627_v31 = vld [vmem:[#allocation44_spill] sm:$0xff] }
 0x875   : > { %11096 = vmatprep.subr.msk.bf16.mxu1 %vm1830_vm0, %v17625_v28  ;;  %v4950_v10 = vpop.permute.xlu1 %4949  ;;  %v4573_v35 = vpack.c.bf16 %v11564_v54, %v11562_v22  ;;  %v11566_v0 = vpop.eup %11565  ;;  %v5324_v9 = vsel %vm1830_vm0, %v17627_v31, 0  ;;  %v17629_v28 = vld [vmem:[#allocation146_spill] sm:$0xff] }
 0x876   : > { %11573 = vpow2.f32 %v4453_v29  ;;  %5046 = vst.msk [vmem:[#allocation3] sm:$0xf] %vm5045_vm4, %v4950_v10  ;;  %3834 = vrot.lane.b32.xlu0 %v9669_v5, %s12065_s26  ;;  %v17628_v5 = vld [vmem:[#allocation95_spill] sm:$0xff]  ;;  %v17630_v10 = vld [vmem:[#allocation93_spill] sm:$0xff] }
 0x877   : > { %v11568_v43 = vpop.eup %11567  ;;  %11575 = vpow2.f32 %v4455_v14  ;;  %10835 = vmatprep.mubr.bf16.mxu1 %v4573_v35  ;;  %v5321_v29 = vsel %vm1830_vm0, %v17628_v5, 0 }
 0x878   : > { %v4574_v1 = vpack.c.bf16 %v11568_v43, %v11566_v0 }
 0x879   : > { %v4956_v51 = vpop.permute.xlu1 %4955 }
 0x87a   : > { %5049 = vst.msk [vmem:[#allocation3 + $0xc] sm:$0xf] %vm5045_vm4, %v4956_v51 }
 0x87b   : > { %10836 = vmatmul.mubr.bf16.gmra.mxu1 %v4574_v1  ;;  %v11570_v4 = vpop.eup %11569 }
 0x87c   : > { %10882 = vmatpush3.bf16.xpose.msra.mxu1 %v5330_v52 }
 0x87d   : > { %11097 = vmatprep.subr.msk.bf16.mxu1 %vm1830_vm0, %v17626_v17  ;;  %v4952_v7 = vpop.permute.xlu1 %4951  ;;  %v17635_v17 = vld [vmem:[#allocation23_spill] sm:$0xff] }
 0x87e   : > { %5047 = vst.msk [vmem:[#allocation3 + $0x4] sm:$0xf] %vm5045_vm4, %v4952_v7  ;;  %v17636_v7 = vld [vmem:[#allocation55_spill] sm:$0xff] }
 0x87f   : > { %v11572_v3 = vpop.eup %11571 }
 0x883   : > { %v11574_v20 = vpop.eup %11573 }
 0x884   : > { %v11576_v55 = vpop.eup %11575  ;;  %10884 = vmatpush3.bf16.xpose.msra.mxu1 %v5327_v11  ;;  %v4575_v36 = vpack.c.bf16 %v11574_v20, %v11570_v4 }
 0x885   : > { %11098 = vmatprep.subr.msk.bf16.mxu1 %vm1830_vm0, %v17627_v31  ;;  %v4576_v14 = vpack.c.bf16 %v11572_v3, %v11576_v55 }
 0x886   : > { %10839 = vmatprep.mubr.bf16.mxu1 %v4575_v36 }
 0x887   : > { %10840 = vmatmul.mubr.bf16.gmra.mxu1 %v4576_v14 }
 0x88b   : > { %4503 = vadd.xlane.f32.xlu1 %v11560_v40  ;;  %v5318_v40 = vsel %vm1830_vm0, %v17629_v28, 0 }
 0x88c   : > { %10886 = vmatpush3.bf16.xpose.msra.mxu1 %v5324_v9 }
 0x88d   : > { %11099 = vmatprep.subr.msk.bf16.mxu1 %vm1830_vm0, %v17628_v5 }
 0x88f   : > { %4499 = vadd.xlane.f32.xlu1 %v11554_v30  ;;  %v17631_v30 = vld [vmem:[#allocation76_spill] sm:$0xff] }
 0x890   : > { %11577 = vrcp.f32 %v17631_v30 }
 0x891   : > { %11579 = vrcp.f32 %v14898_v8  ;;  %v17634_v8 = vld [vmem:[#allocation142_spill] sm:$0xff] }
 0x892   : > { %11581 = vrcp.f32 %v14904_v34 }
 0x893   : > { %4511 = vadd.xlane.f32.xlu1 %v11566_v0  ;;  %v5315_v0 = vsel %vm1830_vm0, %v17630_v10, 0 }
 0x894   : > { %10888 = vmatpush3.bf16.xpose.msra.mxu1 %v5321_v29 }
 0x895   : > { %11100 = vmatprep.subr.msk.bf16.mxu1 %vm1830_vm0, %v17629_v28  ;;  %4505 = vadd.xlane.f32.xlu0 %v11556_v60  ;;  %v17632_v60 = vld [vmem:[#allocation89_spill] sm:$0xff] }
 0x897   : > { %4507 = vadd.xlane.f32.xlu1 %v11562_v22 }
 0x899   : > { %4501 = vadd.xlane.f32.xlu0 %v11558_v62  ;;  %v17633_v62 = vld [vmem:[#allocation149_spill] sm:$0xff] }
 0x89b   : > { %4519 = vadd.xlane.f32.xlu1 %v11576_v55 }
 0x89c   : > { %10890 = vmatpush3.bf16.xpose.msra.mxu1 %v5318_v40 }
 0x89d   : > { %11101 = vmatprep.subr.msk.bf16.mxu1 %vm1830_vm0, %v17630_v10  ;;  %4513 = vadd.xlane.f32.xlu0 %v11568_v43  ;;  %v11578_v51 = vpop.eup %11577 }
 0x89e   : > { %v11580_v11 = vpop.eup %11579 }
 0x89f   : > { %4515 = vadd.xlane.f32.xlu1 %v11570_v4  ;;  %v3702_v4 = vmul.f32 %v11578_v51, %v17636_v7  ;;  %v11582_v5 = vpop.eup %11581  ;;  %v17639_v7 = vld [vmem:[#allocation113_spill] sm:$0xff] }
 0x8a0   : > { %v4826_v28 = vmul.f32 %v11582_v5, %v14853_v53 }
 0x8a1   : > { %4509 = vadd.xlane.f32.xlu0 %v11564_v54  ;;  %v5312_v54 = vsel %vm1830_vm0, %v17633_v62, 0  ;;  %v9670_v31 = vpack.c.bf16 %v3702_v4, %v3702_v4 }
 0x8a2   : > { %v4368_v35 = vpop.xlane.xlu0 %4367 }
 0x8a3   : > { %2305 = vadd.xlane.f32.xlu1 %v17632_v60  ;;  %v4401_v34 = vsub.f32 %v14856_v15, %v4368_v35  ;;  %v9701_v15 = vpack.c.bf16 %v4826_v28, %v4826_v28 }
 0x8a4   : > { %10892 = vmatpush3.bf16.xpose.msra.mxu1 %v5315_v0 }
 0x8a5   : > { %11102 = vmatprep.subr.msk.bf16.mxu1 %vm1830_vm0, %v17633_v62  ;;  %4521 = vadd.xlane.f32.xlu0 %v11572_v3  ;;  %v17637_v3 = vld [vmem:[#allocation56_spill] sm:$0xff] }
 0x8a6   : > { %v4364_v22 = vpop.xlane.xlu0 %4363  ;;  %11583 = vrcp.f32 %v17637_v3 }
 0x8a7   : > { %v4399_v1 = vsub.f32 %v14862_v13, %v4364_v22  ;;  %v4825_v13 = vmul.f32 %v11580_v11, %v14849_v47  ;;  %v17638_v47 = vld [vmem:[#allocation91_spill] sm:$0xff] }
 0x8a9   : > { %4517 = vadd.xlane.f32.xlu0 %v11574_v20  ;;  %v4459_v20 = vmul.f32 1.442695, %v4399_v1  ;;  %v9700_v29 = vpack.c.bf16 %v4825_v13, %v4825_v13 }
 0x8aa   : > { %v4370_v43 = vpop.xlane.xlu0 %4369 }
 0x8ab   : > { %v4402_v52 = vsub.f32 %v14868_v50, %v4370_v43  ;;  %v4463_v50 = vmul.f32 1.442695, %v4401_v34  ;;  %11585 = vpow2.f32 %v4459_v20 }
 0x8ac   : > { %10894 = vmatpush3.bf16.xpose.msra.mxu1 %v5312_v54 }
 0x8ad   : > { %10943 = vmatprep.subr.bf16.mxu1 %v17634_v8  ;;  %2307 = vadd.xlane.f32.xlu0 %v17635_v17  ;;  %v4465_v55 = vmul.f32 1.442695, %v4402_v52 }
 0x8af   : > { %11587 = vpow2.f32 %v4465_v55  ;;  %v17640_v55 = vld [vmem:[#allocation16_spill] sm:$0xff] }
 0x8b1   : > { %v4366_v36 = vpop.xlane.xlu1 %4365 }
 0x8b2   : > { %v4400_v14 = vsub.f32 %v14876_v37, %v4366_v36  ;;  %v17641_v36 = vld [vmem:[#allocation110_spill] sm:$0xff] }
 0x8b3   : > { %v11584_v40 = vpop.eup %11583 }
 0x8b4   : > { %v4461_v9 = vmul.f32 1.442695, %v4400_v14  ;;  %3836 = vrot.lane.b32.xlu1 %v9670_v31, %s12065_s26  ;;  %v3703_v37 = vmul.f32 %v11584_v40, %v17638_v47 }
 0x8b6   : > { %11589 = vpow2.f32 %v4461_v9  ;;  %v9671_v30 = vpack.c.bf16 %v3703_v37, %v3703_v37 }
 0x8b7   : > { %11591 = vpow2.f32 %v4463_v50 }
 0x8b8   : > { %4957 = vrot.lane.b32.xlu1 %v9700_v29, %s12063_s23  ;;  %v15045_v10 = vpop.eup %11585  ;;  %v17643_v29 = vld [vmem:[#allocation140_spill] sm:$0xff] }
 0x8bc   : > { %4959 = vrot.lane.b32.xlu1 %v9701_v15, %s12063_s23  ;;  %v15047_v0 = vpop.eup %11587  ;;  %v17644_v15 = vld [vmem:[#allocation136_spill] sm:$0xff] }
 0x8c1   : > { %v5437_v35 = vpop.xlane.xlu0 %5436 }
 0x8c2   : > { %v5498_v22 = vsub.f32 %v14890_v46, %v5437_v35 }
 0x8c3   : > { %v15049_v60 = vpop.eup %11589  ;;  %3838 = vrot.lane.b32.xlu0 %v9671_v30, %s12065_s26  ;;  %v17646_v30 = vld [vmem:[#allocation98_spill] sm:$0xff] }
 0x8c4   : > { %v15052_v53 = vpop.eup %11591  ;;  %v4577_v62 = vpack.c.bf16 %v15049_v60, %v15045_v10  ;;  %v5532_v4 = vmul.f32 1.442695, %v5498_v22 }
 0x8c5   : > { %v5433_v43 = vpop.xlane.xlu0 %5432  ;;  %v4578_v54 = vpack.c.bf16 %v15047_v0, %v15052_v53 }
 0x8c6   : > { %v5496_v1 = vsub.f32 %v14896_v18, %v5433_v43  ;;  %10843 = vmatprep.mubr.bf16.mxu1 %v4577_v62 }
 0x8c7   : > { %v5435_v51 = vpop.xlane.xlu1 %5434  ;;  %10844 = vmatmul.mubr.bf16.gmra.mxu1 %v4578_v54 }
 0x8c8   : > { %v5528_v52 = vmul.f32 1.442695, %v5496_v1  ;;  %v5497_v17 = vsub.f32 %v14901_v26, %v5435_v51  ;;  %10895 = vmatprep.mubr.msk.bf16.mxu1 %vm1830_vm0, %v17639_v7 }
 0x8c9   : > { %v5439_v3 = vpop.xlane.xlu0 %5438 }
 0x8ca   : > { %v5530_v34 = vmul.f32 1.442695, %v5497_v17  ;;  %v5499_v46 = vsub.f32 %v14907_v27, %v5439_v3  ;;  %11593 = vpow2.f32 %v5528_v52  ;;  %v17642_v27 = vld [vmem:[#allocation112_spill] sm:$0xff]  ;;  %v17647_v52 = vld [vmem:[#allocation145_spill] sm:$0xff]  ;;  %v17648_v3 = vld [vmem:[#allocation47_spill] sm:$0xff] }
 0x8cc   : > { %11595 = vpow2.f32 %v5530_v34  ;;  %v5534_v20 = vmul.f32 1.442695, %v5499_v46  ;;  %v17649_v34 = vld [vmem:[#allocation115_spill] sm:$0xff] }
 0x8cd   : > { %11597 = vpow2.f32 %v5532_v4  ;;  %v5445_v11 = vpop.xlane.xlu0 %5444  ;;  %v17650_v46 = vld [vmem:[#allocation111_spill] sm:$0xff] }
 0x8ce   : > { %11599 = vpow2.f32 %v5534_v20  ;;  %v5502_v31 = vsub.f32 %v14916_v44, %v5445_v11 }
 0x8cf   : > { %v5443_v18 = vpop.xlane.xlu1 %5442  ;;  %10896 = vmatmul.mubr.msk.bf16.vlgmr.msra.gmra.mxu1 %vm1830_vm0, %v17640_v55  ;;  %v17651_v55 = vld [vmem:[#allocation20_spill] sm:$0xff] }
 0x8d0   : > { %v5501_v26 = vsub.f32 %v14919_v6, %v5443_v18  ;;  %10944 = vmatpush3.bf16.msra.mxu1 %v17634_v8  ;;  %10899 = vmatprep.mubr.msk.bf16.mxu1 %vm1830_vm0, %v17641_v36  ;;  %v5540_v5 = vmul.f32 1.442695, %v5502_v31 }
 0x8d1   : > { %10945 = vmatprep.subr.bf16.mxu1 %v17642_v27  ;;  %v5441_v13 = vpop.xlane.xlu0 %5440 }
 0x8d2   : > { %v5538_v14 = vmul.f32 1.442695, %v5501_v26  ;;  %v5500_v50 = vsub.f32 %v14925_v33, %v5441_v13  ;;  %v17645_v33 = vld [vmem:[#allocation141_spill] sm:$0xff] }
 0x8d4   : > { %v5536_v9 = vmul.f32 1.442695, %v5500_v50  ;;  %10946 = vmatpush3.bf16.msra.mxu1 %v17642_v27  ;;  %11601 = vpow2.f32 %v5538_v14  ;;  %v17652_v14 = vld [vmem:[#allocation63_spill] sm:$0xff] }
 0x8d5   : > { %10947 = vmatprep.subr.bf16.mxu1 %v17643_v29  ;;  %v5447_v6 = vpop.xlane.xlu0 %5446 }
 0x8d6   : > { %11603 = vpow2.f32 %v5536_v9  ;;  %v5503_v8 = vsub.f32 %v14932_v32, %v5447_v6 }
 0x8d7   : > { %v5451_v28 = vpop.xlane.xlu1 %5450  ;;  %10900 = vmatmul.mubr.msk.bf16.gmra.mxu1 %vm1830_vm0, %v17644_v15  ;;  %v11594_v44 = vpop.eup %11593  ;;  %11605 = vpow2.f32 %v5540_v5 }
 0x8d8   : > { %v5542_v40 = vmul.f32 1.442695, %v5503_v8  ;;  %v5505_v47 = vsub.f32 %v14937_v49, %v5451_v28  ;;  %10948 = vmatpush3.bf16.msra.mxu1 %v17643_v29  ;;  %10903 = vmatprep.mubr.msk.bf16.mxu1 %vm1830_vm0, %v17645_v33  ;;  %v17653_v29 = vld [vmem:[#allocation103_spill] sm:$0xff]  ;;  %v17654_v28 = vld [vmem:[#allocation133_spill] sm:$0xff] }
 0x8d9   : > { %v11596_v37 = vpop.eup %11595  ;;  %10949 = vmatprep.subr.bf16.mxu1 %v17646_v30  ;;  %v5453_v35 = vpop.xlane.xlu0 %5452 }
 0x8da   : > { %v11598_v62 = vpop.eup %11597  ;;  %11607 = vpow2.f32 %v5542_v40  ;;  %v5506_v32 = vsub.f32 %v14943_v25, %v5453_v35  ;;  %v5688_v22 = vpack.c.bf16 %v11596_v37, %v11594_v44  ;;  %v5546_v51 = vmul.f32 1.442695, %v5505_v47 }
 0x8db   : > { %v11600_v43 = vpop.eup %11599  ;;  %v5461_v54 = vpop.xlane.xlu1 %5460 }
 0x8dc   : > { %v5689_v1 = vpack.c.bf16 %v11600_v43, %v11598_v62  ;;  %10927 = vmatprep.mubr.bf16.mxu0 %v5688_v22  ;;  %10950 = vmatpush3.bf16.msra.mxu1 %v17646_v30  ;;  %v5548_v49 = vmul.f32 1.442695, %v5506_v32  ;;  %11609 = vpow2.f32 %v5546_v51  ;;  %v17655_v51 = vld [vmem:[#allocation90_spill] sm:$0xff] }
 0x8dd   : > { %10951 = vmatprep.subr.bf16.mxu1 %v17647_v52  ;;  %v5449_v17 = vpop.xlane.xlu0 %5448 }
 0x8de   : > { %v5504_v7 = vsub.f32 %v14953_v19, %v5449_v17  ;;  %10928 = vmatmul.mubr.bf16.vlgmr.msra.gmra.mxu0 %v5689_v1  ;;  %11611 = vpow2.f32 %v5548_v49  ;;  %v5510_v19 = vsub.f32 %v14947_v2, %v5461_v54 }
 0x8df   : > { %v5457_v4 = vpop.xlane.xlu1 %5456  ;;  %10904 = vmatmul.mubr.msk.bf16.gmra.mxu1 %vm1830_vm0, %v17648_v3 }
 0x8e0   : > { %v5544_v25 = vmul.f32 1.442695, %v5504_v7  ;;  %10952 = vmatpush3.bf16.msra.mxu1 %v17647_v52  ;;  %5596 = vadd.xlane.f32.xlu1 %v11598_v62  ;;  %v5508_v31 = vsub.f32 %v14960_v39, %v5457_v4  ;;  %v5556_v9 = vmul.f32 1.442695, %v5510_v19 }
 0x8e1   : > { %10907 = vmatprep.mubr.msk.bf16.mxu1 %vm1830_vm0, %v17649_v34  ;;  %10953 = vmatprep.subr.bf16.mxu1 %v17650_v46  ;;  %v5455_v20 = vpop.xlane.xlu0 %5454  ;;  %v11602_v11 = vpop.eup %11601 }
 0x8e2   : > { %11613 = vpow2.f32 %v5544_v25  ;;  %v5507_v18 = vsub.f32 %v14964_v57, %v5455_v20  ;;  %2309 = vadd.xlane.f32.xlu0 %v17651_v55  ;;  %v5552_v39 = vmul.f32 1.442695, %v5508_v31 }
 0x8e3   : > { %v11604_v26 = vpop.eup %11603  ;;  %v3833_v36 = vpop.permute.xlu1 %3832 }
 0x8e4   : > { %v5550_v27 = vmul.f32 1.442695, %v5507_v18  ;;  %3925 = vst.msk [vmem:[#allocation3 + $0x10] sm:$0xf] %vm3920_vm3, %v3833_v36  ;;  %10954 = vmatpush3.bf16.msra.mxu1 %v17650_v46  ;;  %5592 = vadd.xlane.f32.xlu1 %v11594_v44  ;;  %v5690_v13 = vpack.c.bf16 %v11602_v11, %v11604_v26  ;;  %v11606_v2 = vpop.eup %11605 }
 0x8e5   : > { %10955 = vmatprep.subr.bf16.mxu1 %v17652_v14  ;;  %v5463_v50 = vpop.xlane.xlu0 %5462 }
 0x8e6   : > { %11615 = vpow2.f32 %v5550_v27  ;;  %v5511_v57 = vsub.f32 %v14970_v21, %v5463_v50  ;;  %5598 = vadd.xlane.f32.xlu0 %v11600_v43  ;;  %10931 = vmatprep.mubr.bf16.mxu0 %v5690_v13  ;;  %v17659_v50 = vld [vmem:[#allocation69_spill] sm:$0xff] }
 0x8e7   : > { %v11608_v5 = vpop.eup %11607  ;;  %10908 = vmatmul.mubr.msk.bf16.gmra.mxu1 %vm1830_vm0, %v17653_v29  ;;  %11617 = vpow2.f32 %v5556_v9  ;;  %v17660_v9 = vld [vmem:[#allocation107_spill] sm:$0xff]  ;;  %vm6170_vm0 = vcmask 1044224  }
 0x8e8   : > { %10956 = vmatpush3.bf16.msra.mxu1 %v17652_v14  ;;  %5604 = vadd.xlane.f32.xlu1 %v11606_v2  ;;  %v5691_v6 = vpack.c.bf16 %v11608_v5, %v11606_v2  ;;  %v5558_v8 = vmul.f32 1.442695, %v5511_v57  ;;  %11619 = vpow2.f32 %v5552_v39 }
 0x8e9   : > { %10957 = vmatprep.subr.bf16.mxu1 %v17654_v28  ;;  %v5459_v15 = vpop.xlane.xlu0 %5458  ;;  %v11610_v40 = vpop.eup %11609 }
 0x8ea   : > { %v5509_v44 = vsub.f32 %v14976_v24, %v5459_v15  ;;  %5594 = vadd.xlane.f32.xlu0 %v11596_v37  ;;  %10932 = vmatmul.mubr.bf16.gmra.mxu0 %v5691_v6  ;;  %11621 = vpow2.f32 %v5558_v8  ;;  %v17662_v6 = vld [vmem:[#allocation74_spill] sm:$0xff] }
 0x8eb   : > { %v11612_v33 = vpop.eup %11611 }
 0x8ec   : > { %v5554_v21 = vmul.f32 1.442695, %v5509_v44  ;;  %10958 = vmatpush3.bf16.msra.mxu1 %v17654_v28  ;;  %5600 = vadd.xlane.f32.xlu1 %v11604_v26 }
 0x8ed   : > { %v3835_v47 = vpop.permute.xlu0 %3834 }
 0x8ee   : > { %11623 = vpow2.f32 %v5554_v21  ;;  %3926 = vst.msk [vmem:[#allocation3 + $0x14] sm:$0xf] %vm3920_vm3, %v3835_v47  ;;  %5606 = vadd.xlane.f32.xlu0 %v11608_v5 }
 0x8ef   : > { %v11614_v30 = vpop.eup %11613  ;;  %11625 = vrcp.f32 %v14892_v45 }
 0x8f0   : > { %5612 = vadd.xlane.f32.xlu1 %v11612_v33  ;;  %v5692_v35 = vpack.c.bf16 %v11610_v40, %v11614_v30  ;;  %11627 = vrcp.f32 %v14887_v42 }
 0x8f2   : > { %5602 = vadd.xlane.f32.xlu0 %v11602_v11  ;;  %10935 = vmatprep.mubr.bf16.mxu0 %v5692_v35 }
 0x8f3   : > { %v11616_v24 = vpop.eup %11615 }
 0x8f4   : > { %5608 = vadd.xlane.f32.xlu1 %v11614_v30  ;;  %v5693_v37 = vpack.c.bf16 %v11616_v24, %v11612_v33  ;;  %v11618_v62 = vpop.eup %11617 }
 0x8f5   : > { %v11620_v32 = vpop.eup %11619 }
 0x8f6   : > { %5614 = vadd.xlane.f32.xlu0 %v11616_v24  ;;  %10936 = vmatmul.mubr.bf16.gmra.mxu0 %v5693_v37 }
 0x8f7   : > { %v11622_v22 = vpop.eup %11621 }
 0x8f8   : > { %5620 = vadd.xlane.f32.xlu1 %v11618_v62  ;;  %v5695_v1 = vpack.c.bf16 %v11622_v22, %v11618_v62 }
 0x8fa   : > { %5610 = vadd.xlane.f32.xlu0 %v11610_v40 }
 0x8fb   : > { %v11624_v43 = vpop.eup %11623 }
 0x8fc   : > { %5616 = vadd.xlane.f32.xlu1 %v11620_v32  ;;  %v5694_v54 = vpack.c.bf16 %v11624_v43, %v11620_v32  ;;  %v11626_v49 = vpop.eup %11625 }
 0x8fd   : > { %v4828_v52 = vmul.f32 %v11626_v49, %v14851_v56  ;;  %v11628_v7 = vpop.eup %11627 }
 0x8fe   : > { %5622 = vadd.xlane.f32.xlu0 %v11622_v22  ;;  %10939 = vmatprep.mubr.bf16.mxu0 %v5694_v54  ;;  %v4827_v4 = vmul.f32 %v11628_v7, %v14847_v16  ;;  %v17665_v54 = vld [vmem:[#allocation29_spill] sm:$0xff] }
 0x8ff   : > { %10940 = vmatmul.mubr.bf16.gmra.mxu0 %v5695_v1  ;;  %v9703_v17 = vpack.c.bf16 %v4828_v52, %v4828_v52 }
 0x900   : > { %2311 = vadd.xlane.f32.xlu1 %v17655_v51  ;;  %v9702_v45 = vpack.c.bf16 %v4827_v4, %v4827_v4 }
 0x902   : > { %5618 = vadd.xlane.f32.xlu0 %v11624_v43 }
 0x911   : > { %4963 = vrot.lane.b32.xlu1 %v9703_v17, %s12063_s23 }
 0x914   : > { %v15114_v3 = vpop.xlane.xlu1 %4503 }
 0x918   : > { %v15116_v25 = vpop.xlane.xlu1 %4499  ;;  %4961 = vrot.lane.b32.xlu0 %v9702_v45, %s12063_s23 }
 0x91c   : > { %v15119_v34 = vpop.xlane.xlu1 %4511 }
 0x91d   : > { %17656 = vst [vmem:[#allocation49_spill] sm:$0xff] %v15119_v34  ;;  %v11187_v34 = vld [vmem:[%s12200_s24 + $0x8] sm:$0xff]  }
 0x91e   : > { %v15121_v46 = vpop.xlane.xlu0 %4505 }
 0x920   : > { %v15123_v42 = vpop.xlane.xlu1 %4507 }
 0x922   : > { %v15125_v56 = vpop.xlane.xlu0 %4501 }
 0x924   : > { %v15127_v20 = vpop.xlane.xlu1 %4519 }
 0x925   : > { %17657 = vst [vmem:[#allocation51_spill] sm:$0xff] %v15127_v20 }
 0x926   : > { %v15129_v11 = vpop.xlane.xlu0 %4513 }
 0x928   : > { %v15131_v16 = vpop.xlane.xlu1 %4515 }
 0x929   : > { %17658 = vst [vmem:[#allocation60_spill] sm:$0xff] %v15131_v16 }
 0x92a   : > { %v15133_v19 = vpop.xlane.xlu0 %4509 }
 0x92c   : > { %v2306_v18 = vpop.xlane.xlu1 %2305 }
 0x92d   : > { %11629 = vrcp.f32 %v2306_v18 }
 0x92e   : > { %v15135_v55 = vpop.xlane.xlu0 %4521 }
 0x930   : > { %v3837_v26 = vpop.permute.xlu1 %3836 }
 0x931   : > { %3927 = vst.msk [vmem:[#allocation3 + $0x18] sm:$0xf] %vm3920_vm3, %v3837_v26 }
 0x932   : > { %v15138_v36 = vpop.xlane.xlu0 %4517 }
 0x934   : > { %v4958_v31 = vpop.permute.xlu1 %4957 }
 0x935   : > { %5050 = vst.msk [vmem:[#allocation3 + $0x10] sm:$0xf] %vm5045_vm4, %v4958_v31  ;;  %3384 = vadd.xlane.f32.xlu1 %v14615_v23 }
 0x936   : > { %v2308_v27 = vpop.xlane.xlu0 %2307 }
 0x937   : > { %11631 = vrcp.f32 %v2308_v27  ;;  %3382 = vadd.xlane.f32.xlu0 %v14611_v59 }
 0x938   : > { %v4960_v13 = vpop.permute.xlu1 %4959  ;;  %11633 = vrcp.f32 %v17659_v50 }
 0x939   : > { %5051 = vst.msk [vmem:[#allocation3 + $0x14] sm:$0xf] %vm5045_vm4, %v4960_v13  ;;  %4523 = vadd.xlane.f32.xlu1 %v15045_v10  ;;  %v17661_v10 = vld [vmem:[#allocation53_spill] sm:$0xff] }
 0x93a   : > { %v11630_v14 = vpop.eup %11629  ;;  %v3839_v2 = vpop.permute.xlu0 %3838 }
 0x93b   : > { %3928 = vst.msk [vmem:[#allocation3 + $0x1c] sm:$0xf] %vm3920_vm3, %v3839_v2  ;;  %3386 = vadd.xlane.f32.xlu0 %v14617_v41  ;;  %v2599_v57 = vmul.f32 %v11630_v14, %v17660_v9 }
 0x93d   : > { %4527 = vadd.xlane.f32.xlu1 %v15052_v53  ;;  %v9644_v23 = vpack.c.bf16 %v2599_v57, %v2599_v57  ;;  %v15158_v53 = vpop.f32.mrf.mxu1 }
 0x93f   : > { %3388 = vadd.xlane.f32.xlu0 %v14613_v48  ;;  %2760 = vst.msk [vmem:[#allocation3 + $0x30] sm:$0xf] %vm2747_vm2, %v9644_v23  ;;  %v15160_v48 = vpop.f32.mrf.mxu1 }
 0x941   : > { %v15162_v28 = vpop.f32.mrf.mxu1 }
 0x943   : > { %4525 = vadd.xlane.f32.xlu0 %v15049_v60  ;;  %v15164_v60 = vpop.f32.mrf.mxu1 }
 0x944   : > { %v11632_v59 = vpop.eup %11631 }
 0x945   : > { %v2600_v5 = vmul.f32 %v11632_v59, %v17661_v10  ;;  %v11634_v29 = vpop.eup %11633  ;;  %v15168_v44 = vpop.f32.mrf.mxu1 }
 0x946   : > { %v3704_v41 = vmul.f32 %v11634_v29, %v17662_v6  ;;  %17663 = vst [vmem:[#allocation129_spill] sm:$0xff] %v15168_v44 }
 0x947   : > { %4529 = vadd.xlane.f32.xlu0 %v15047_v0  ;;  %v9645_v39 = vpack.c.bf16 %v2600_v5, %v2600_v5  ;;  %v15172_v40 = vpop.f32.mrf.mxu1 }
 0x948   : > { %v9672_v8 = vpack.c.bf16 %v3704_v41, %v3704_v41 }
 0x949   : > { %2761 = vst.msk [vmem:[#allocation3 + $0x34] sm:$0xf] %vm2747_vm2, %v9645_v39  ;;  %v15178_v30 = vpop.f32.mrf.mxu1 }
 0x94b   : > { %v15184_v37 = vpop.f32.mrf.mxu1 }
 0x94d   : > { %v15188_v22 = vpop.f32.mrf.mxu1 }
 0x94e   : > { %3840 = vrot.lane.b32.xlu1 %v9672_v8, %s12065_s26  ;;  %17664 = vst [vmem:[#allocation130_spill] sm:$0xff] %v15188_v22 }
 0x94f   : > { %v15195_v52 = vpop.f32.mrf.mxu1 }
 0x950   : > { %17666 = vst [vmem:[#allocation44_spill] sm:$0xff] %v15195_v52 }
 0x951   : > { %v15202_v4 = vpop.f32.mrf.mxu1 }
 0x953   : > { %v15208_v26 = vpop.f32.mrf.mxu1 }
 0x969   : > { %v15166_v15 = vpop.xlane.xlu1 %5596 }
 0x96b   : > { %v2310_v0 = vpop.xlane.xlu0 %2309 }
 0x96c   : > { %11635 = vrcp.f32 %v2310_v0 }
 0x96d   : > { %v15170_v21 = vpop.xlane.xlu1 %5592 }
 0x96f   : > { %v15174_v47 = vpop.xlane.xlu0 %5598 }
 0x971   : > { %v15176_v33 = vpop.xlane.xlu1 %5604 }
 0x973   : > { %v15180_v35 = vpop.xlane.xlu0 %5594 }
 0x975   : > { %v15182_v24 = vpop.xlane.xlu1 %5600 }
 0x977   : > { %v15186_v62 = vpop.xlane.xlu0 %5606 }
 0x979   : > { %v11636_v32 = vpop.eup %11635  ;;  %v15190_v43 = vpop.xlane.xlu1 %5612 }
 0x97a   : > { %v2601_v1 = vmul.f32 %v11636_v32, %v17665_v54  ;;  %v17671_v54 = vld [vmem:[#allocation104_spill] sm:$0xff] }
 0x97b   : > { %v15193_v51 = vpop.xlane.xlu0 %5602 }
 0x97c   : > { %v9646_v49 = vpack.c.bf16 %v2601_v1, %v2601_v1 }
 0x97d   : > { %v15197_v17 = vpop.xlane.xlu1 %5608 }
 0x97e   : > { %2762 = vst.msk [vmem:[#allocation3 + $0x38] sm:$0xf] %vm2747_vm2, %v9646_v49 }
 0x97f   : > { %v15200_v7 = vpop.xlane.xlu0 %5614 }
 0x981   : > { %v15204_v45 = vpop.xlane.xlu1 %5620 }
 0x983   : > { %v15206_v18 = vpop.xlane.xlu0 %5610 }
 0x985   : > { %v15210_v31 = vpop.xlane.xlu1 %5616 }
 0x987   : > { %v15212_v27 = vpop.xlane.xlu0 %5622  ;;  %v15214_v13 = vpop.f32.mrf.mxu1 }
 0x988   : > { %17667 = vst [vmem:[#allocation95_spill] sm:$0xff] %v15214_v13  ;;  %v17677_v13 = vld [vmem:[#allocation39_spill] sm:$0xff] }
 0x989   : > { %v2312_v14 = vpop.xlane.xlu1 %2311  ;;  %v15216_v50 = vpop.f32.mrf.mxu1 }
 0x98a   : > { %17668 = vst [vmem:[#allocation146_spill] sm:$0xff] %v15216_v50  ;;  %11637 = vrcp.f32 %v2312_v14 }
 0x98b   : > { %v15218_v2 = vpop.xlane.xlu0 %5618  ;;  %v15220_v9 = vpop.f32.mrf.mxu1  ;;  %11639 = vrcp.f32 %v15174_v47  ;;  %v11182_v47 = vld [vmem:[%s12200_s24 + $0x30] sm:$0xff]  }
 0x98c   : > { %17669 = vst [vmem:[#allocation93_spill] sm:$0xff] %v15220_v9  ;;  %11641 = vrcp.f32 %v15180_v35 }
 0x98d   : > { %v4964_v57 = vpop.permute.xlu1 %4963  ;;  %v15222_v23 = vpop.f32.mrf.mxu1  ;;  %11643 = vrcp.f32 %v15166_v15 }
 0x98e   : > { %17670 = vst [vmem:[#allocation76_spill] sm:$0xff] %v15222_v23  ;;  %5053 = vst.msk [vmem:[#allocation3 + $0x1c] sm:$0xf] %vm5045_vm4, %v4964_v57  ;;  %11645 = vrcp.f32 %v15186_v62 }
 0x98f   : > { %v4962_v59 = vpop.permute.xlu0 %4961  ;;  %v10897_v10 = vpop.f32.mrf.mxu1  ;;  %11647 = vrcp.f32 %v15170_v21  ;;  %v11185_v21 = vld [vmem:[%s12200_s24 + $0x18] sm:$0xff]  }
 0x990   : > { %5052 = vst.msk [vmem:[#allocation3 + $0x18] sm:$0xf] %vm5045_vm4, %v4962_v59  ;;  %v15227_v5 = vadd.f32 %v10897_v10, %v17491_v61  ;;  %v17672_v59 = vld [vmem:[#allocation32_spill] sm:$0xff]  ;;  %11649 = vrcp.f32 %v15193_v51 }
 0x991   : > { %v5369_v29 = vpop.f32.mrf.mxu1 }
 0x992   : > { %5468 = vmax.xlane.f32.xlu1 %v15227_v5  ;;  %v15231_v6 = vadd.f32 %v5369_v29, %v17492_v58  ;;  %v17673_v29 = vld [vmem:[#allocation28_spill] sm:$0xff] }
 0x993   : > { %v10898_v39 = vpop.f32.mrf.mxu1 }
 0x994   : > { %v15234_v41 = vadd.f32 %v10898_v39, %v17493_v38 }
 0x995   : > { %v5372_v8 = vpop.f32.mrf.mxu1 }
 0x996   : > { %5464 = vmax.xlane.f32.xlu1 %v15231_v6  ;;  %5470 = vmax.xlane.f32.xlu0 %v15234_v41  ;;  %v15239_v61 = vadd.f32 %v5372_v8, %v17593_v12 }
 0x997   : > { %v11638_v0 = vpop.eup %11637  ;;  %v10901_v32 = vpop.f32.mrf.mxu1 }
 0x998   : > { %v2602_v1 = vmul.f32 %v11638_v0, %v17671_v54  ;;  %v15244_v38 = vadd.f32 %v10901_v32, %v17495_v63  ;;  %v17674_v63 = vld [vmem:[#allocation30_spill] sm:$0xff]  ;;  %v11640_v35 = vpop.eup %11639 }
 0x999   : > { %v5385_v49 = vpop.f32.mrf.mxu1  ;;  %v11642_v15 = vpop.eup %11641 }
 0x99a   : > { %5466 = vmax.xlane.f32.xlu0 %v15239_v61  ;;  %v9647_v58 = vpack.c.bf16 %v2602_v1, %v2602_v1  ;;  %v15252_v39 = vadd.f32 %v5385_v49, %v17673_v29  ;;  %v17675_v1 = vld [vmem:[#allocation37_spill] sm:$0xff]  ;;  %v11644_v16 = vpop.eup %11643 }
 0x99b   : > { %v10902_v14 = vpop.f32.mrf.mxu1  ;;  %v11646_v51 = vpop.eup %11645 }
 0x99c   : > { %2763 = vst.msk [vmem:[#allocation3 + $0x3c] sm:$0xf] %vm2747_vm2, %v9647_v58  ;;  %v15257_v32 = vadd.f32 %v10902_v14, %v17674_v63  ;;  %v17678_v63 = vld [vmem:[#allocation35_spill] sm:$0xff] }
 0x99d   : > { %v5388_v57 = vpop.f32.mrf.mxu1 }
 0x99e   : > { %v15248_v10 = vadd.f32 %v5388_v57, %v17672_v59  ;;  %5476 = vmax.xlane.f32.xlu0 %v15244_v38  ;;  %v17676_v59 = vld [vmem:[#allocation33_spill] sm:$0xff]  ;;  %v10929_v29 = vpop.f32.mrf.mxu0 }
 0x99f   : > { %v10905_v12 = vpop.f32.mrf.mxu1 }
 0x9a0   : > { %5474 = vmax.xlane.f32.xlu1 %v15248_v10  ;;  %v15264_v49 = vadd.f32 %v10905_v12, %v17676_v59  ;;  %v17679_v12 = vld [vmem:[#allocation40_spill] sm:$0xff] }
 0x9a1   : > { %v5401_v8 = vpop.f32.mrf.mxu1 }
 0x9a2   : > { %5472 = vmax.xlane.f32.xlu0 %v15252_v39  ;;  %v15272_v22 = vadd.f32 %v5401_v8, %v17678_v63 }
 0x9a3   : > { %v10906_v0 = vpop.f32.mrf.mxu1 }
 0x9a5   : > { %v5404_v54 = vpop.f32.mrf.mxu1 }
 0x9a6   : > { %v15260_v58 = vadd.f32 %v5404_v54, %v17675_v1  ;;  %5478 = vmax.xlane.f32.xlu0 %v15257_v32  ;;  %v5762_v54 = vpop.f32.mrf.mxu0 }
 0x9a7   : > { %v10909_v57 = vpop.f32.mrf.mxu1 }
 0x9a8   : > { %5482 = vmax.xlane.f32.xlu1 %v15260_v58  ;;  %v15268_v50 = vadd.f32 %v10909_v57, %v17677_v13  ;;  %v11181_v13 = vld [vmem:[%s12200_s24 + $0x38] sm:$0xff]   ;;  %v10930_v8 = vpop.f32.mrf.mxu0 }
 0x9a9   : > { %v5417_v14 = vpop.f32.mrf.mxu1  ;;  %v17680_v57 = vld [vmem:[#allocation36_spill] sm:$0xff]  ;;  %10975 = vmatprep.subr.bf16.mxu0 %v11181_v13 }
 0x9aa   : > { %5484 = vmax.xlane.f32.xlu0 %v15264_v49  ;;  %v15277_v1 = vadd.f32 %v5417_v14, %v17679_v12  ;;  %v15282_v59 = vadd.f32 %v10906_v0, %v17680_v57  ;;  %10976 = vmatpush3.bf16.msra.mxu0 %v11181_v13  ;;  %v5765_v14 = vpop.f32.mrf.mxu0  ;;  %v11183_v0 = vld [vmem:[%s12200_s24 + $0x28] sm:$0xff]   ;;  %v5949_v12 = vmul.f32 %v11640_v35, %v10930_v8  ;;  %v11184_v13 = vld [vmem:[%s12200_s24 + $0x20] sm:$0xff]   ;;  %v11186_v35 = vld [vmem:[%s12200_s24 + $0x10] sm:$0xff]  }
 0x9ab   : > { %10977 = vmatprep.subr.bf16.mxu0 %v11182_v47  ;;  %v5947_v52 = vmul.f32 %v11642_v15, %v5765_v14  ;;  %v5948_v8 = vmul.f32 %v11644_v16, %v10929_v29 }
 0x9ac   : > { %5492 = vmax.xlane.f32.xlu1 %v15268_v50  ;;  %v15292_v63 = vpop.f32.mrf.mxu0 }
 0x9ad   : > { %v9729_v44 = vpack.c.bf16 %v5947_v52, %v5947_v52 }
 0x9ae   : > { %5480 = vmax.xlane.f32.xlu0 %v15272_v22  ;;  %10978 = vmatpush3.bf16.msra.mxu0 %v11182_v47  ;;  %v15296_v57 = vpop.f32.mrf.mxu0  ;;  %v9731_v47 = vpack.c.bf16 %v5949_v12, %v5949_v12  ;;  %v9730_v12 = vpack.c.bf16 %v5948_v8, %v5948_v8  ;;  %v17683_v8 = vld [vmem:[#allocation42_spill] sm:$0xff] }
 0x9af   : > { %10979 = vmatprep.subr.bf16.mxu0 %v11183_v0 }
 0x9b0   : > { %5488 = vmax.xlane.f32.xlu1 %v15277_v1  ;;  %v10934_v20 = vpop.f32.mrf.mxu0 }
 0x9b1   : > { %v5953_v9 = vmul.f32 %v11646_v51, %v10934_v20 }
 0x9b2   : > { %5486 = vmax.xlane.f32.xlu0 %v15282_v59  ;;  %10980 = vmatpush3.bf16.msra.mxu0 %v11183_v0  ;;  %v5781_v23 = vpop.f32.mrf.mxu0 }
 0x9b3   : > { %10981 = vmatprep.subr.bf16.mxu0 %v11184_v13  ;;  %v9735_v16 = vpack.c.bf16 %v5953_v9, %v5953_v9  ;;  %v17682_v9 = vld [vmem:[#allocation41_spill] sm:$0xff] }
 0x9b6   : > { %10982 = vmatpush3.bf16.msra.mxu0 %v11184_v13  ;;  %v11648_v13 = vpop.eup %11647 }
 0x9b7   : > { %10983 = vmatprep.subr.bf16.mxu0 %v11185_v21  ;;  %v11650_v14 = vpop.eup %11649  ;;  %v5946_v15 = vmul.f32 %v11648_v13, %v5762_v54  ;;  %v17685_v13 = vld [vmem:[#allocation27_spill] sm:$0xff] }
 0x9b8   : > { %v5951_v29 = vmul.f32 %v11650_v14, %v5781_v23  ;;  %v17686_v14 = vld [vmem:[#allocation143_spill] sm:$0xff] }
 0x9b9   : > { %v9728_v20 = vpack.c.bf16 %v5946_v15, %v5946_v15  ;;  %v17688_v15 = vld [vmem:[#allocation84_spill] sm:$0xff] }
 0x9ba   : > { %10984 = vmatpush3.bf16.msra.mxu0 %v11185_v21  ;;  %v11188_v21 = vld [vmem:[%s12200_s24] sm:$0xff]   ;;  %v9733_v51 = vpack.c.bf16 %v5951_v29, %v5951_v29  ;;  %v17689_v29 = vld [vmem:[#allocation67_spill] sm:$0xff] }
 0x9bb   : > { %10985 = vmatprep.subr.bf16.mxu0 %v11186_v35 }
 0x9be   : > { %v15298_v62 = vpop.xlane.xlu1 %3384  ;;  %10986 = vmatpush3.bf16.msra.mxu0 %v11186_v35 }
 0x9bf   : > { %10987 = vmatprep.subr.bf16.mxu0 %v11187_v34 }
 0x9c1   : > { %6080 = vrot.lane.b32.xlu1 %v9731_v47, %s12062_s12 }
 0x9c2   : > { %v15302_v0 = vpop.xlane.xlu1 %4523  ;;  %10988 = vmatpush3.bf16.msra.mxu0 %v11187_v34  ;;  %v17684_v34 = vld [vmem:[#allocation75_spill] sm:$0xff] }
 0x9c3   : > { %10989 = vmatprep.subr.bf16.mxu0 %v11188_v21  ;;  %11651 = vrcp.f32 %v17684_v34 }
 0x9c4   : > { %11653 = vrcp.f32 %v15176_v33 }
 0x9c5   : > { %6076 = vrot.lane.b32.xlu1 %v9729_v44, %s12062_s12  ;;  %v10910_v44 = vpop.f32.mrf.mxu1  ;;  %11655 = vrcp.f32 %v17686_v14 }
 0x9c6   : > { %v15306_v47 = vpop.xlane.xlu1 %4527  ;;  %10990 = vmatpush3.bf16.msra.mxu0 %v11188_v21  ;;  %v15316_v23 = vadd.f32 %v10910_v44, %v17682_v9  ;;  %11657 = vrcp.f32 %v15182_v24  ;;  %v17690_v9 = vld [vmem:[#allocation72_spill] sm:$0xff] }
 0x9c7   : > { %17681 = vst [vmem:[#allocation89_spill] sm:$0xff] %v15306_v47  ;;  %v5420_v54 = vpop.f32.mrf.mxu1 }
 0x9c8   : > { %6078 = vrot.lane.b32.xlu0 %v9730_v12, %s12062_s12  ;;  %v15320_v35 = vadd.f32 %v5420_v54, %v17683_v8  ;;  %v17687_v12 = vld [vmem:[#allocation144_spill] sm:$0xff] }
 0x9c9   : > { %6088 = vrot.lane.b32.xlu1 %v9735_v16, %s12062_s12  ;;  %11659 = vrcp.f32 %v17687_v12  ;;  %v17691_v12 = vld [vmem:[#allocation125_spill] sm:$0xff] }
 0x9ca   : > { %v3841_v52 = vpop.permute.xlu1 %3840  ;;  %11661 = vrcp.f32 %v17688_v15 }
 0x9cb   : > { %3929 = vst.msk [vmem:[#allocation3 + $0x20] sm:$0xf] %vm3920_vm3, %v3841_v52 }
 0x9cc   : > { %6074 = vrot.lane.b32.xlu0 %v9728_v20, %s12062_s12 }
 0x9cd   : > { %6084 = vrot.lane.b32.xlu1 %v9733_v51, %s12062_s12 }
 0x9d0   : > { %v11652_v16 = vpop.eup %11651 }
 0x9d1   : > { %v3706_v20 = vmul.f32 %v11652_v16, %v17689_v29  ;;  %v11654_v52 = vpop.eup %11653 }
 0x9d2   : > { %v11656_v21 = vpop.eup %11655  ;;  %v5952_v51 = vmul.f32 %v11654_v52, %v15292_v63  ;;  %v17692_v63 = vld [vmem:[#allocation79_spill] sm:$0xff] }
 0x9d3   : > { %v9674_v44 = vpack.c.bf16 %v3706_v20, %v3706_v20  ;;  %v4829_v33 = vmul.f32 %v11656_v21, %v17690_v9  ;;  %v11658_v54 = vpop.eup %11657 }
 0x9d4   : > { %v9734_v34 = vpack.c.bf16 %v5952_v51, %v5952_v51  ;;  %v5950_v24 = vmul.f32 %v11658_v54, %v15296_v57 }
 0x9d5   : > { %v9704_v14 = vpack.c.bf16 %v4829_v33, %v4829_v33 }
 0x9d6   : > { %v11660_v8 = vpop.eup %11659  ;;  %v9732_v20 = vpack.c.bf16 %v5950_v24, %v5950_v24 }
 0x9d7   : > { %v4830_v15 = vmul.f32 %v11660_v8, %v17691_v12  ;;  %v11662_v16 = vpop.eup %11661 }
 0x9d8   : > { %v3705_v29 = vmul.f32 %v11662_v16, %v17692_v63 }
 0x9d9   : > { %v9705_v52 = vpack.c.bf16 %v4830_v15, %v4830_v15 }
 0x9da   : > { %v9673_v57 = vpack.c.bf16 %v3705_v29, %v3705_v29 }
 0x9eb   : > { %5494 = vmax.xlane.f32.xlu0 %v15316_v23 }
 0x9ef   : > { %5490 = vmax.xlane.f32.xlu0 %v15320_v35 }
 0x9f1   : > { %2313 = vadd.xlane.f32.xlu1 %v17685_v13  ;;  %v15335_v13 = vpop.xlane.xlu0 %3382 }
 0x9f5   : > { %v15341_v21 = vpop.xlane.xlu0 %3386 }
 0x9f9   : > { %v15346_v51 = vpop.xlane.xlu0 %3388 }
 0xa02   : > { %3844 = vrot.lane.b32.xlu1 %v9674_v44, %s12065_s26  ;;  %v15348_v44 = vpop.xlane.xlu0 %4525 }
 0xa05   : > { %6086 = vrot.lane.b32.xlu0 %v9734_v34, %s12062_s12 }
 0xa06   : > { %4965 = vrot.lane.b32.xlu1 %v9704_v14, %s12063_s23  ;;  %v15350_v9 = vpop.xlane.xlu0 %4529 }
 0xa09   : > { %6082 = vrot.lane.b32.xlu0 %v9732_v20, %s12062_s12 }
 0xa0a   : > { %4967 = vrot.lane.b32.xlu1 %v9705_v52, %s12063_s23 }
 0xa0d   : > { %3842 = vrot.lane.b32.xlu0 %v9673_v57, %s12065_s26 }
 0xa1b   : > { %v5469_v33 = vpop.xlane.xlu1 %5468 }
 0xa1c   : > { %v5514_v14 = vsub.f32 %v15227_v5, %v5469_v33 }
 0xa1e   : > { %v5564_v29 = vmul.f32 1.442695, %v5514_v14 }
 0xa1f   : > { %v5465_v54 = vpop.xlane.xlu1 %5464  ;;  %v5471_v8 = vpop.xlane.xlu0 %5470 }
 0xa20   : > { %v5512_v34 = vsub.f32 %v15231_v6, %v5465_v54  ;;  %v5515_v24 = vsub.f32 %v15234_v41, %v5471_v8  ;;  %v17693_v6 = vld [vmem:[#allocation131_spill] sm:$0xff]  ;;  %v17694_v8 = vld [vmem:[#allocation96_spill] sm:$0xff] }
 0xa22   : > { %v5560_v12 = vmul.f32 1.442695, %v5512_v34  ;;  %v5566_v15 = vmul.f32 1.442695, %v5515_v24  ;;  %v17696_v24 = vld [vmem:[#allocation87_spill] sm:$0xff] }
 0xa23   : > { %v5467_v16 = vpop.xlane.xlu0 %5466 }
 0xa24   : > { %v5513_v63 = vsub.f32 %v15239_v61, %v5467_v16  ;;  %11663 = vpow2.f32 %v5560_v12  ;;  %v17695_v61 = vld [vmem:[#allocation46_spill] sm:$0xff] }
 0xa25   : > { %11665 = vpow2.f32 %v5566_v15 }
 0xa26   : > { %v5562_v20 = vmul.f32 1.442695, %v5513_v63 }
 0xa27   : > { %v5477_v52 = vpop.xlane.xlu0 %5476 }
 0xa28   : > { %11667 = vpow2.f32 %v5562_v20  ;;  %v5518_v41 = vsub.f32 %v15244_v38, %v5477_v52 }
 0xa29   : > { %11669 = vpow2.f32 %v5564_v29  ;;  %v5475_v57 = vpop.xlane.xlu1 %5474 }
 0xa2a   : > { %v5517_v47 = vsub.f32 %v15248_v10, %v5475_v57  ;;  %11671 = vrcp.f32 %v17693_v6  ;;  %v5572_v14 = vmul.f32 1.442695, %v5518_v41 }
 0xa2b   : > { %v5473_v5 = vpop.xlane.xlu0 %5472  ;;  %11673 = vrcp.f32 %v17695_v61 }
 0xa2c   : > { %v5570_v33 = vmul.f32 1.442695, %v5517_v47  ;;  %v5516_v54 = vsub.f32 %v15252_v39, %v5473_v5  ;;  %2315 = vadd.xlane.f32.xlu0 %v17694_v8 }
 0xa2e   : > { %v5568_v34 = vmul.f32 1.442695, %v5516_v54  ;;  %2319 = vadd.xlane.f32.xlu1 %v17696_v24  ;;  %11675 = vpow2.f32 %v5570_v33  ;;  %v17697_v54 = vld [vmem:[#allocation65_spill] sm:$0xff] }
 0xa2f   : > { %v5479_v12 = vpop.xlane.xlu0 %5478 }
 0xa30   : > { %11677 = vpow2.f32 %v5568_v34  ;;  %v5519_v10 = vsub.f32 %v15257_v32, %v5479_v12 }
 0xa31   : > { %v5483_v15 = vpop.xlane.xlu1 %5482  ;;  %v15364_v38 = vpop.eup %11663  ;;  %11679 = vpow2.f32 %v5572_v14 }
 0xa32   : > { %v5574_v16 = vmul.f32 1.442695, %v5519_v10  ;;  %v5521_v39 = vsub.f32 %v15260_v58, %v5483_v15  ;;  %v15367_v63 = vpop.eup %11665  ;;  %v17698_v15 = vld [vmem:[#allocation83_spill] sm:$0xff] }
 0xa33   : > { %v5485_v47 = vpop.xlane.xlu0 %5484 }
 0xa34   : > { %11681 = vpow2.f32 %v5574_v16  ;;  %v5578_v6 = vmul.f32 1.442695, %v5521_v39  ;;  %v5522_v41 = vsub.f32 %v15264_v49, %v5485_v47 }
 0xa35   : > { %v15369_v29 = vpop.eup %11667  ;;  %v15371_v20 = vpop.xlane.xlu1 %5492 }
 0xa36   : > { %v11670_v52 = vpop.eup %11669  ;;  %v5696_v57 = vpack.c.bf16 %v15369_v29, %v15364_v38  ;;  %11683 = vpow2.f32 %v5578_v6  ;;  %v5580_v14 = vmul.f32 1.442695, %v5522_v41 }
 0xa37   : > { %v5697_v32 = vpack.c.bf16 %v15367_v63, %v11670_v52  ;;  %v5481_v5 = vpop.xlane.xlu0 %5480  ;;  %v11672_v33 = vpop.eup %11671 }
 0xa38   : > { %v5520_v58 = vsub.f32 %v15272_v22, %v5481_v5  ;;  %10959 = vmatprep.mubr.bf16.mxu1 %v5696_v57  ;;  %v4832_v8 = vmul.f32 %v11672_v33, %v17697_v54  ;;  %v11674_v24 = vpop.eup %11673 }
 0xa39   : > { %v5489_v61 = vpop.xlane.xlu1 %5488  ;;  %10960 = vmatmul.mubr.bf16.vlgmr.msra.gmra.mxu1 %v5697_v32  ;;  %v3707_v16 = vmul.f32 %v11674_v24, %v17698_v15 }
 0xa3a   : > { %v5576_v34 = vmul.f32 1.442695, %v5520_v58  ;;  %v9707_v22 = vpack.c.bf16 %v4832_v8, %v4832_v8 }
 0xa3b   : > { %v5487_v12 = vpop.xlane.xlu0 %5486  ;;  %v15379_v10 = vpop.eup %11675  ;;  %v9675_v5 = vpack.c.bf16 %v3707_v16, %v3707_v16 }
 0xa3c   : > { %11685 = vpow2.f32 %v5576_v34  ;;  %v5523_v49 = vsub.f32 %v15282_v59, %v5487_v12 }
 0xa3d   : > { %v11678_v39 = vpop.eup %11677  ;;  %v6081_v47 = vpop.permute.xlu1 %6080  ;;  %11687 = vpow2.f32 %v5580_v14 }
 0xa3e   : > { %v5582_v57 = vmul.f32 1.442695, %v5523_v49  ;;  %6174 = vst.msk [vmem:[#allocation3 + $0xc] sm:$0xf] %vm6170_vm0, %v6081_v47  ;;  %v5698_v32 = vpack.c.bf16 %v15379_v10, %v11678_v39  ;;  %v11680_v41 = vpop.eup %11679 }
 0xa3f   : > { %4971 = vrot.lane.b32.xlu1 %v9707_v22, %s12063_s23  ;;  %v6079_v6 = vpop.permute.xlu0 %6078 }
 0xa40   : > { %11689 = vpow2.f32 %v5582_v57  ;;  %6173 = vst.msk [vmem:[#allocation3 + $0x8] sm:$0xf] %vm6170_vm0, %v6079_v6  ;;  %10963 = vmatprep.mubr.bf16.mxu1 %v5698_v32  ;;  %v17699_v57 = vld [vmem:[#allocation31_spill] sm:$0xff]  ;;  %v17700_v32 = vld [vmem:[#allocation128_spill] sm:$0xff]  ;;  %v5526_v6 = vsub.f32 %v15268_v50, %v15371_v20 }
 0xa41   : > { %v15387_v33 = vpop.eup %11681  ;;  %v6077_v59 = vpop.permute.xlu1 %6076  ;;  %11691 = vrcp.f32 %v17700_v32 }
 0xa42   : > { %6172 = vst.msk [vmem:[#allocation3 + $0x4] sm:$0xf] %vm6170_vm0, %v6077_v59  ;;  %3846 = vrot.lane.b32.xlu0 %v9675_v5, %s12065_s26  ;;  %v5699_v58 = vpack.c.bf16 %v15387_v33, %v11680_v41  ;;  %11693 = vrcp.f32 %v15197_v17  ;;  %v5588_v5 = vmul.f32 1.442695, %v5526_v6  ;;  %v5524_v59 = vsub.f32 %v15277_v1, %v5489_v61  ;;  %v17702_v6 = vld [vmem:[#allocation34_spill] sm:$0xff] }
 0xa43   : > { %v6075_v54 = vpop.permute.xlu0 %6074  ;;  %v15394_v34 = vpop.eup %11683 }
 0xa44   : > { %6171 = vst.msk [vmem:[#allocation3] sm:$0xf] %vm6170_vm0, %v6075_v54  ;;  %10964 = vmatmul.mubr.bf16.gmra.mxu1 %v5699_v58  ;;  %11695 = vpow2.f32 %v5588_v5  ;;  %v5584_v58 = vmul.f32 1.442695, %v5524_v59  ;;  %v15408_v54 = vpop.f32.mrf.mxu0 }
 0xa45   : > { %v6089_v8 = vpop.permute.xlu1 %6088 }
 0xa46   : > { %6178 = vst.msk [vmem:[#allocation3 + $0x1c] sm:$0xf] %vm6170_vm0, %v6089_v8  ;;  %11697 = vpow2.f32 %v5584_v58 }
 0xa47   : > { %v11190_v49 = vld [vmem:[#allocation3 + $0x8] sm:$0xff]   ;;  %11699 = vrcp.f32 %v15206_v18 }
 0xa49   : > { %v11686_v24 = vpop.eup %11685  ;;  %v6085_v14 = vpop.permute.xlu1 %6084 }
 0xa4a   : > { %6176 = vst.msk [vmem:[#allocation3 + $0x14] sm:$0xf] %vm6170_vm0, %v6085_v14  ;;  %v5700_v12 = vpack.c.bf16 %v15394_v34, %v11686_v24  ;;  %v11688_v16 = vpop.eup %11687  ;;  %v17701_v14 = vld [vmem:[#allocation81_spill] sm:$0xff] }
 0xa4b   : > { %v11189_v15 = vld [vmem:[#allocation3] sm:$0xff]  }
 0xa4c   : > { %10967 = vmatprep.mubr.bf16.mxu1 %v5700_v12  ;;  %10991 = vmatprep.mubr.bf16.mxu0 %v11189_v15 }
 0xa4d   : > { %v15398_v22 = vpop.eup %11689  ;;  %10992 = vmatmul.mubr.bf16.vlgmr.msra.gmra.mxu0 %v11190_v49 }
 0xa4e   : > { %v5701_v47 = vpack.c.bf16 %v15398_v22, %v11688_v16  ;;  %v11692_v8 = vpop.eup %11691 }
 0xa4f   : > { %v4831_v12 = vmul.f32 %v11692_v8, %v17701_v14  ;;  %v11694_v50 = vpop.eup %11693 }
 0xa50   : > { %10968 = vmatmul.mubr.bf16.gmra.mxu1 %v5701_v47 }
 0xa51   : > { %v9706_v17 = vpack.c.bf16 %v4831_v12, %v4831_v12  ;;  %v11696_v49 = vpop.eup %11695 }
 0xa61   : > { %2317 = vadd.xlane.f32.xlu0 %v17699_v57 }
 0xa63   : > { %5628 = vadd.xlane.f32.xlu1 %v11670_v52  ;;  %v5794_v52 = vpop.f32.mrf.mxu0 }
 0xa64   : > { %v5954_v15 = vmul.f32 %v11694_v50, %v5794_v52  ;;  %v17703_v50 = vld [vmem:[#allocation106_spill] sm:$0xff] }
 0xa65   : > { %v10938_v32 = vpop.f32.mrf.mxu0 }
 0xa67   : > { %5624 = vadd.xlane.f32.xlu1 %v15364_v38  ;;  %v5797_v8 = vpop.f32.mrf.mxu0 }
 0xa6b   : > { %5636 = vadd.xlane.f32.xlu1 %v11680_v41  ;;  %v9736_v41 = vpack.c.bf16 %v5954_v15, %v5954_v15 }
 0xa6f   : > { %5632 = vadd.xlane.f32.xlu1 %v11678_v39 }
 0xa73   : > { %5644 = vadd.xlane.f32.xlu1 %v11688_v16 }
 0xa74   : > { %v5495_v20 = vpop.xlane.xlu0 %5494 }
 0xa75   : > { %v5527_v38 = vsub.f32 %v15316_v23, %v5495_v20  ;;  %v11698_v23 = vpop.eup %11697 }
 0xa76   : > { %v11700_v58 = vpop.eup %11699 }
 0xa77   : > { %4969 = vrot.lane.b32.xlu0 %v9706_v17, %s12063_s23  ;;  %5640 = vadd.xlane.f32.xlu1 %v11686_v24  ;;  %v5590_v1 = vmul.f32 1.442695, %v5527_v38  ;;  %v5955_v15 = vmul.f32 %v11700_v58, %v5797_v8 }
 0xa78   : > { %v5491_v61 = vpop.xlane.xlu0 %5490 }
 0xa79   : > { %v5525_v39 = vsub.f32 %v15320_v35, %v5491_v61 }
 0xa7a   : > { %v2314_v47 = vpop.xlane.xlu1 %2313 }
 0xa7b   : > { %v5586_v57 = vmul.f32 1.442695, %v5525_v39  ;;  %11701 = vrcp.f32 %v2314_v47  ;;  %6090 = vrot.lane.b32.xlu0 %v9736_v41, %s12062_s12  ;;  %5652 = vadd.xlane.f32.xlu1 %v11696_v49  ;;  %v9737_v47 = vpack.c.bf16 %v5955_v15, %v5955_v15 }
 0xa7c   : > { %11703 = vpow2.f32 %v5590_v1  ;;  %v6087_v16 = vpop.permute.xlu0 %6086 }
 0xa7d   : > { %11705 = vpow2.f32 %v5586_v57  ;;  %6177 = vst.msk [vmem:[#allocation3 + $0x18] sm:$0xf] %vm6170_vm0, %v6087_v16  ;;  %v17704_v57 = vmov 0  }
 0xa7e   : > { %v3845_v24 = vpop.permute.xlu1 %3844  ;;  %11707 = vrcp.f32 %v15200_v7 }
 0xa7f   : > { %3931 = vst.msk [vmem:[#allocation3 + $0x28] sm:$0xf] %vm3920_vm3, %v3845_v24  ;;  %5648 = vadd.xlane.f32.xlu1 %v11698_v23  ;;  %11709 = vrcp.f32 %v17702_v6  ;;  %v17705_v24 = vld [vmem:[#allocation85_spill] sm:$0xff] }
 0xa80   : > { %v6083_v35 = vpop.permute.xlu0 %6082  ;;  %v17706_v6 = vld [vmem:[#allocation137_spill] sm:$0xff] }
 0xa81   : > { %6175 = vst.msk [vmem:[#allocation3 + $0x10] sm:$0xf] %vm6170_vm0, %v6083_v35 }
 0xa82   : > { %v4966_v18 = vpop.permute.xlu1 %4965 }
 0xa83   : > { %5054 = vst.msk [vmem:[#allocation3 + $0x20] sm:$0xf] %vm5045_vm4, %v4966_v18 }
 0xa84   : > { %v3843_v5 = vpop.permute.xlu0 %3842  ;;  %v11192_v52 = vld [vmem:[#allocation3 + $0x18] sm:$0xff]  }
 0xa85   : > { %3930 = vst.msk [vmem:[#allocation3 + $0x24] sm:$0xf] %vm3920_vm3, %v3843_v5 }
 0xa86   : > { %v4968_v59 = vpop.permute.xlu1 %4967 }
 0xa87   : > { %5055 = vst.msk [vmem:[#allocation3 + $0x24] sm:$0xf] %vm5045_vm4, %v4968_v59  ;;  %v17710_v59 = vld [vmem:[#allocation64_spill] sm:$0xff] }
 0xa88   : > { %v11702_v14 = vpop.eup %11701  ;;  %v11191_v12 = vld [vmem:[#allocation3 + $0x10] sm:$0xff]  }
 0xa89   : > { %v11704_v7 = vpop.eup %11703  ;;  %v2603_v20 = vmul.f32 %v11702_v14, %v17703_v50  ;;  %10995 = vmatprep.mubr.bf16.mxu0 %v11191_v12  ;;  %v17712_v50 = vld [vmem:[#allocation92_spill] sm:$0xff] }
 0xa8a   : > { %v11706_v17 = vpop.eup %11705  ;;  %10996 = vmatmul.mubr.bf16.gmra.mxu0 %v11192_v52  ;;  %v5703_v61 = vpack.c.bf16 %v11704_v7, %v11696_v49 }
 0xa8b   : > { %v5702_v38 = vpack.c.bf16 %v11706_v17, %v11698_v23  ;;  %v9648_v1 = vpack.c.bf16 %v2603_v20, %v2603_v20  ;;  %v11708_v41 = vpop.eup %11707 }
 0xa8c   : > { %v5957_v39 = vmul.f32 %v11708_v41, %v10938_v32  ;;  %v11710_v16 = vpop.eup %11709 }
 0xa8d   : > { %10971 = vmatprep.mubr.bf16.mxu1 %v5702_v38  ;;  %2764 = vst.msk [vmem:[#allocation3 + $0x40] sm:$0xf] %vm2747_vm2, %v9648_v1  ;;  %v3709_v35 = vmul.f32 %v11710_v16, %v17705_v24  ;;  %v17713_v1 = vld [vmem:[#allocation71_spill] sm:$0xff] }
 0xa8e   : > { %10972 = vmatmul.mubr.bf16.gmra.mxu1 %v5703_v61  ;;  %v9739_v18 = vpack.c.bf16 %v5957_v39, %v5957_v39 }
 0xa8f   : > { %7287 = vmatprep.mubr.bf16.mxu1 %v17704_v57  ;;  %v9677_v23 = vpack.c.bf16 %v3709_v35, %v3709_v35 }
 0xa90   : > { %6092 = vrot.lane.b32.xlu1 %v9737_v47, %s12062_s12  ;;  %v17714_v47 = vld [vmem:[#allocation126_spill] sm:$0xff] }
 0xa94   : > { %6096 = vrot.lane.b32.xlu1 %v9739_v18, %s12062_s12 }
 0xa98   : > { %3850 = vrot.lane.b32.xlu1 %v9677_v23, %s12065_s26 }
 0xa9a   : > { %5630 = vadd.xlane.f32.xlu0 %v15367_v63 }
 0xa9e   : > { %5626 = vadd.xlane.f32.xlu0 %v15369_v29 }
 0xaa2   : > { %5638 = vadd.xlane.f32.xlu0 %v15387_v33  ;;  %v17707_v33 = vld [vmem:[#allocation22_spill] sm:$0xff] }
 0xaa6   : > { %5634 = vadd.xlane.f32.xlu0 %v15379_v10  ;;  %v17708_v10 = vld [vmem:[#allocation97_spill] sm:$0xff] }
 0xaaa   : > { %5646 = vadd.xlane.f32.xlu0 %v15398_v22 }
 0xaae   : > { %5642 = vadd.xlane.f32.xlu0 %v15394_v34  ;;  %v17709_v34 = vld [vmem:[#allocation78_spill] sm:$0xff] }
 0xab2   : > { %5654 = vadd.xlane.f32.xlu0 %v11704_v7  ;;  %v17711_v7 = vld [vmem:[#allocation100_spill] sm:$0xff] }
 0xab5   : > { %v2316_v49 = vpop.xlane.xlu0 %2315 }
 0xab6   : > { %11711 = vrcp.f32 %v2316_v49  ;;  %5650 = vadd.xlane.f32.xlu0 %v11706_v17  ;;  %v17715_v49 = vld [vmem:[#allocation99_spill] sm:$0xff] }
 0xab7   : > { %11713 = vrcp.f32 %v15190_v43  ;;  %v2320_v32 = vpop.xlane.xlu1 %2319 }
 0xab8   : > { %11715 = vrcp.f32 %v2320_v32 }
 0xab9   : > { %11717 = vrcp.f32 %v17706_v6  ;;  %v3847_v63 = vpop.permute.xlu0 %3846  ;;  %v17716_v6 = vld [vmem:[#allocation73_spill] sm:$0xff] }
 0xaba   : > { %3932 = vst.msk [vmem:[#allocation3 + $0x2c] sm:$0xf] %vm3920_vm3, %v3847_v63  ;;  %11719 = vrcp.f32 %v17707_v33  ;;  %v17717_v63 = vld [vmem:[#allocation24_spill] sm:$0xff] }
 0xabb   : > { %v4972_v29 = vpop.permute.xlu1 %4971  ;;  %11721 = vrcp.f32 %v17709_v34  ;;  %v15468_v34 = vpop.f32.mrf.mxu0 }
 0xabc   : > { %5057 = vst.msk [vmem:[#allocation3 + $0x2c] sm:$0xf] %vm5045_vm4, %v4972_v29  ;;  %2323 = vadd.xlane.f32.xlu1 %v17708_v10  ;;  %v17718_v10 = vld [vmem:[#allocation150_spill] sm:$0xff] }
 0xac3   : > { %v11712_v22 = vpop.eup %11711 }
 0xac4   : > { %v11714_v5 = vpop.eup %11713  ;;  %v2604_v43 = vmul.f32 %v11712_v22, %v17710_v59  ;;  %v17719_v22 = vld [vmem:[#allocation26_spill] sm:$0xff] }
 0xac5   : > { %v11716_v58 = vpop.eup %11715  ;;  %v5956_v14 = vmul.f32 %v11714_v5, %v15408_v54 }
 0xac6   : > { %v11718_v8 = vpop.eup %11717  ;;  %v9649_v12 = vpack.c.bf16 %v2604_v43, %v2604_v43  ;;  %v2606_v52 = vmul.f32 %v11716_v58, %v17711_v7  ;;  %v15474_v43 = vpop.f32.mrf.mxu0  ;;  %v17720_v58 = vld [vmem:[#allocation50_spill] sm:$0xff] }
 0xac7   : > { %v3711_v20 = vmul.f32 %v11718_v8, %v17712_v50  ;;  %v11720_v15 = vpop.eup %11719  ;;  %v9738_v41 = vpack.c.bf16 %v5956_v14, %v5956_v14 }
 0xac8   : > { %2765 = vst.msk [vmem:[#allocation3 + $0x44] sm:$0xf] %vm2747_vm2, %v9649_v12  ;;  %v9651_v17 = vpack.c.bf16 %v2606_v52, %v2606_v52  ;;  %v11722_v38 = vpop.eup %11721  ;;  %v3708_v61 = vmul.f32 %v11720_v15, %v17713_v1  ;;  %v17721_v12 = vld [vmem:[#allocation10_spill] sm:$0xff]  ;;  %v10942_v52 = vpop.f32.mrf.mxu0  ;;  %v17723_v15 = vld [vmem:[#allocation123_spill] sm:$0xff] }
 0xac9   : > { %v9679_v39 = vpack.c.bf16 %v3711_v20, %v3711_v20  ;;  %v4834_v16 = vmul.f32 %v11722_v38, %v17714_v47  ;;  %v17724_v47 = vld [vmem:[#allocation120_spill] sm:$0xff] }
 0xaca   : > { %2767 = vst.msk [vmem:[#allocation3 + $0x4c] sm:$0xf] %vm2747_vm2, %v9651_v17  ;;  %v9676_v54 = vpack.c.bf16 %v3708_v61, %v3708_v61  ;;  %v5813_v61 = vpop.f32.mrf.mxu0 }
 0xacb   : > { %v9709_v24 = vpack.c.bf16 %v4834_v16, %v4834_v16 }
 0xacc   : > { %6094 = vrot.lane.b32.xlu0 %v9738_v41, %s12062_s12 }
 0xacd   : > { %3854 = vrot.lane.b32.xlu1 %v9679_v39, %s12065_s26 }
 0xad0   : > { %3848 = vrot.lane.b32.xlu0 %v9676_v54, %s12065_s26 }
 0xad1   : > { %4975 = vrot.lane.b32.xlu1 %v9709_v24, %s12063_s23 }
 0xaea   : > { %v2318_v35 = vpop.xlane.xlu0 %2317 }
 0xaeb   : > { %11723 = vrcp.f32 %v2318_v35 }
 0xaec   : > { %v15456_v18 = vpop.xlane.xlu1 %5628  ;;  %11725 = vrcp.f32 %v17716_v6 }
 0xaed   : > { %11727 = vrcp.f32 %v17717_v63 }
 0xaee   : > { %v4970_v23 = vpop.permute.xlu0 %4969  ;;  %11729 = vrcp.f32 %v17718_v10 }
 0xaef   : > { %5056 = vst.msk [vmem:[#allocation3 + $0x28] sm:$0xf] %vm5045_vm4, %v4970_v23  ;;  %2321 = vadd.xlane.f32.xlu0 %v17715_v49  ;;  %11731 = vrcp.f32 %v15218_v2  ;;  %v17722_v2 = vld [vmem:[#allocation82_spill] sm:$0xff] }
 0xaf0   : > { %v15460_v32 = vpop.xlane.xlu1 %5624  ;;  %11733 = vrcp.f32 %v15212_v27 }
 0xaf1   : > { %11735 = vrcp.f32 %v17721_v12 }
 0xaf2   : > { %v6091_v29 = vpop.permute.xlu0 %6090 }
 0xaf3   : > { %6179 = vst.msk [vmem:[#allocation3 + $0x20] sm:$0xf] %vm6170_vm0, %v6091_v29 }
 0xaf4   : > { %v15465_v33 = vpop.xlane.xlu1 %5636 }
 0xaf5   : > { %2327 = vadd.xlane.f32.xlu1 %v17719_v22  ;;  %v17725_v22 = vld [vmem:[#allocation102_spill] sm:$0xff] }
 0xaf8   : > { %v11724_v5 = vpop.eup %11723  ;;  %v15472_v59 = vpop.xlane.xlu1 %5632 }
 0xaf9   : > { %v2605_v8 = vmul.f32 %v11724_v5, %v17720_v58  ;;  %v11726_v50 = vpop.eup %11725 }
 0xafa   : > { %v11728_v20 = vpop.eup %11727  ;;  %v3710_v17 = vmul.f32 %v11726_v50, %v17722_v2 }
 0xafb   : > { %v9650_v14 = vpack.c.bf16 %v2605_v8, %v2605_v8  ;;  %v4836_v38 = vmul.f32 %v11728_v20, %v17723_v15  ;;  %v11730_v41 = vpop.eup %11729  ;;  %v17727_v15 = vld [vmem:[#allocation148_spill] sm:$0xff] }
 0xafc   : > { %v15479_v7 = vpop.xlane.xlu1 %5644  ;;  %v11732_v39 = vpop.eup %11731  ;;  %v9678_v27 = vpack.c.bf16 %v3710_v17, %v3710_v17  ;;  %v4833_v16 = vmul.f32 %v11730_v41, %v17724_v47  ;;  %v17726_v17 = vld [vmem:[#allocation17_spill] sm:$0xff]  ;;  %11737 = vrcp.f32 %v17727_v15  ;;  %v17728_v41 = vld [vmem:[#allocation139_spill] sm:$0xff]  ;;  %v17730_v47 = vld [vmem:[#allocation94_spill] sm:$0xff] }
 0xafd   : > { %2766 = vst.msk [vmem:[#allocation3 + $0x48] sm:$0xf] %vm2747_vm2, %v9650_v14  ;;  %v9711_v54 = vpack.c.bf16 %v4836_v38, %v4836_v38  ;;  %v5959_v24 = vmul.f32 %v11732_v39, %v5813_v61  ;;  %v11734_v23 = vpop.eup %11733  ;;  %11739 = vrcp.f32 %v15210_v31 }
 0xafe   : > { %v9708_v49 = vpack.c.bf16 %v4833_v16, %v4833_v16  ;;  %v5961_v6 = vmul.f32 %v11734_v23, %v10942_v52  ;;  %v11736_v10 = vpop.eup %11735  ;;  %11741 = vrcp.f32 %v17728_v41 }
 0xaff   : > { %v9741_v63 = vpack.c.bf16 %v5959_v24, %v5959_v24  ;;  %v3713_v5 = vmul.f32 %v11736_v10, %v17725_v22  ;;  %11743 = vrcp.f32 %v15204_v45  ;;  %v17731_v24 = vld [vmem:[#allocation9_spill] sm:$0xff] }
 0xb00   : > { %v15484_v1 = vpop.xlane.xlu1 %5640  ;;  %v9743_v58 = vpack.c.bf16 %v5961_v6, %v5961_v6 }
 0xb01   : > { %v9681_v14 = vpack.c.bf16 %v3713_v5, %v3713_v5 }
 0xb04   : > { %v15487_v35 = vpop.xlane.xlu1 %5652 }
 0xb05   : > { %3852 = vrot.lane.b32.xlu0 %v9678_v27, %s12065_s26  ;;  %v17729_v27 = vld [vmem:[#allocation57_spill] sm:$0xff] }
 0xb06   : > { %4979 = vrot.lane.b32.xlu1 %v9711_v54, %s12063_s23  ;;  %11745 = vrcp.f32 %v17729_v27 }
 0xb07   : > { %11747 = vrcp.f32 %v15125_v56  ;;  %v17732_v56 = vld [vmem:[#allocation61_spill] sm:$0xff] }
 0xb08   : > { %v15491_v29 = vpop.xlane.xlu1 %5648 }
 0xb09   : > { %4973 = vrot.lane.b32.xlu0 %v9708_v49, %s12063_s23  ;;  %v11738_v16 = vpop.eup %11737 }
 0xb0a   : > { %6100 = vrot.lane.b32.xlu1 %v9741_v63, %s12062_s12  ;;  %v4835_v23 = vmul.f32 %v11738_v16, %v17731_v24  ;;  %v11740_v31 = vpop.eup %11739 }
 0xb0b   : > { %v5958_v63 = vmul.f32 %v11740_v31, %v15474_v43  ;;  %v11742_v45 = vpop.eup %11741 }
 0xb0c   : > { %v6093_v8 = vpop.permute.xlu1 %6092  ;;  %v9710_v6 = vpack.c.bf16 %v4835_v23, %v4835_v23  ;;  %v11744_v10 = vpop.eup %11743 }
 0xb0d   : > { %6180 = vst.msk [vmem:[#allocation3 + $0x24] sm:$0xf] %vm6170_vm0, %v6093_v8  ;;  %v5960_v5 = vmul.f32 %v11744_v10, %v15468_v34  ;;  %v3715_v8 = vmul.f32 %v11742_v45, %v17732_v56  ;;  %v17735_v10 = vld [vmem:[#allocation43_spill] sm:$0xff]  ;;  %v15544_v56 = vpop.f32.mrf.mxu1 }
 0xb0e   : > { %6104 = vrot.lane.b32.xlu1 %v9743_v58, %s12062_s12  ;;  %v9740_v58 = vpack.c.bf16 %v5958_v63, %v5958_v63 }
 0xb0f   : > { %v9742_v15 = vpack.c.bf16 %v5960_v5, %v5960_v5  ;;  %v9683_v43 = vpack.c.bf16 %v3715_v8, %v3715_v8  ;;  %v17736_v5 = vld [vmem:[#allocation25_spill] sm:$0xff]  ;;  %v15546_v8 = vpop.f32.mrf.mxu1 }
 0xb10   : > { %v6097_v12 = vpop.permute.xlu1 %6096 }
 0xb11   : > { %6182 = vst.msk [vmem:[#allocation3 + $0x2c] sm:$0xf] %vm6170_vm0, %v6097_v12 }
 0xb12   : > { %3858 = vrot.lane.b32.xlu1 %v9681_v14, %s12065_s26 }
 0xb13   : > { %v11746_v14 = vpop.eup %11745 }
 0xb14   : > { %v3851_v52 = vpop.permute.xlu1 %3850  ;;  %v11193_v50 = vld [vmem:[#allocation3 + $0x20] sm:$0xff]  }
 0xb15   : > { %3934 = vst.msk [vmem:[#allocation3 + $0x34] sm:$0xf] %vm3920_vm3, %v3851_v52  ;;  %10999 = vmatprep.mubr.bf16.mxu0 %v11193_v50  ;;  %v11748_v52 = vpop.eup %11747  ;;  %v17733_v50 = vld [vmem:[#allocation11_spill] sm:$0xff] }
 0xb16   : > { %v4838_v41 = vmul.f32 %v11748_v52, %v15164_v60 }
 0xb18   : > { %v9713_v16 = vpack.c.bf16 %v4838_v41, %v4838_v41 }
 0xb23   : > { %v5631_v20 = vpop.xlane.xlu0 %5630 }
 0xb27   : > { %v5627_v2 = vpop.xlane.xlu0 %5626 }
 0xb28   : > { %2325 = vadd.xlane.f32.xlu0 %v17726_v17  ;;  %v3712_v17 = vmul.f32 %v11746_v14, %v17733_v50  ;;  %v17738_v14 = vld [vmem:[#allocation108_spill] sm:$0xff] }
 0xb2b   : > { %v15503_v38 = vpop.xlane.xlu0 %5638 }
 0xb2f   : > { %v15506_v61 = vpop.xlane.xlu0 %5634 }
 0xb33   : > { %v15510_v39 = vpop.xlane.xlu0 %5646 }
 0xb36   : > { %2331 = vadd.xlane.f32.xlu1 %v17730_v47  ;;  %v9680_v47 = vpack.c.bf16 %v3712_v17, %v3712_v17  ;;  %v17739_v17 = vld [vmem:[#allocation101_spill] sm:$0xff] }
 0xb37   : > { %v15515_v54 = vpop.xlane.xlu0 %5642 }
 0xb3b   : > { %v15518_v49 = vpop.xlane.xlu0 %5654 }
 0xb3e   : > { %4977 = vrot.lane.b32.xlu0 %v9710_v6, %s12063_s23  ;;  %v17734_v6 = vld [vmem:[#allocation132_spill] sm:$0xff] }
 0xb3f   : > { %v15522_v22 = vpop.xlane.xlu0 %5650 }
 0xb42   : > { %6098 = vrot.lane.b32.xlu0 %v9740_v58, %s12062_s12  ;;  %v17737_v58 = vld [vmem:[#allocation12_spill] sm:$0xff] }
 0xb43   : > { %v6095_v12 = vpop.permute.xlu0 %6094 }
 0xb44   : > { %6181 = vst.msk [vmem:[#allocation3 + $0x28] sm:$0xf] %vm6170_vm0, %v6095_v12 }
 0xb45   : > { %v2324_v27 = vpop.xlane.xlu1 %2323 }
 0xb46   : > { %11749 = vrcp.f32 %v2324_v27  ;;  %6102 = vrot.lane.b32.xlu0 %v9742_v15, %s12062_s12 }
 0xb47   : > { %3862 = vrot.lane.b32.xlu1 %v9683_v43, %s12065_s26  ;;  %v3849_v34 = vpop.permute.xlu0 %3848  ;;  %11751 = vrcp.f32 %v17736_v5  ;;  %v10962_v43 = vpop.f32.mrf.mxu1 }
 0xb48   : > { %3933 = vst.msk [vmem:[#allocation3 + $0x30] sm:$0xf] %vm3920_vm3, %v3849_v34  ;;  %11753 = vrcp.f32 %v15121_v46 }
 0xb49   : > { %v3855_v24 = vpop.permute.xlu1 %3854  ;;  %11755 = vrcp.f32 %v5627_v2 }
 0xb4a   : > { %3936 = vst.msk [vmem:[#allocation3 + $0x3c] sm:$0xf] %vm3920_vm3, %v3855_v24  ;;  %3856 = vrot.lane.b32.xlu0 %v9680_v47, %s12065_s26  ;;  %11757 = vrcp.f32 %v15116_v25 }
 0xb4b   : > { %4983 = vrot.lane.b32.xlu1 %v9713_v16, %s12063_s23  ;;  %v11194_v23 = vld [vmem:[#allocation3 + $0x28] sm:$0xff]   ;;  %11759 = vrcp.f32 %v5631_v20  ;;  %v5886_v20 = vpop.f32.mrf.mxu1 }
 0xb4c   : > { %11000 = vmatmul.mubr.bf16.gmra.mxu0 %v11194_v23  ;;  %11761 = vrcp.f32 %v17738_v14 }
 0xb4d   : > { %v4976_v60 = vpop.permute.xlu1 %4975 }
 0xb4e   : > { %5059 = vst.msk [vmem:[#allocation3 + $0x34] sm:$0xf] %vm5045_vm4, %v4976_v60 }
 0xb53   : > { %v11750_v31 = vpop.eup %11749 }
 0xb54   : > { %v2608_v63 = vmul.f32 %v11750_v31, %v17734_v6  ;;  %v11752_v12 = vpop.eup %11751 }
 0xb55   : > { %v11754_v50 = vpop.eup %11753  ;;  %v3714_v15 = vmul.f32 %v11752_v12, %v17739_v17  ;;  %v17741_v12 = vld [vmem:[#allocation88_spill] sm:$0xff] }
 0xb56   : > { %v9653_v45 = vpack.c.bf16 %v2608_v63, %v2608_v63  ;;  %v4840_v46 = vmul.f32 %v11754_v50, %v15162_v28  ;;  %v11756_v2 = vpop.eup %11755 }
 0xb57   : > { %v11758_v25 = vpop.eup %11757  ;;  %v9682_v27 = vpack.c.bf16 %v3714_v15, %v3714_v15  ;;  %v5963_v24 = vmul.f32 %v11756_v2, %v5886_v20  ;;  %v17745_v20 = vld [vmem:[#allocation48_spill] sm:$0xff] }
 0xb58   : > { %2769 = vst.msk [vmem:[#allocation3 + $0x54] sm:$0xf] %vm2747_vm2, %v9653_v45  ;;  %v4837_v34 = vmul.f32 %v11758_v25, %v15160_v48  ;;  %v9715_v47 = vpack.c.bf16 %v4840_v46, %v4840_v46  ;;  %v11760_v23 = vpop.eup %11759  ;;  %v17742_v46 = vld [vmem:[#allocation86_spill] sm:$0xff] }
 0xb59   : > { %v9745_v6 = vpack.c.bf16 %v5963_v24, %v5963_v24  ;;  %v5965_v63 = vmul.f32 %v11760_v23, %v10962_v43  ;;  %v11762_v48 = vpop.eup %11761 }
 0xb5a   : > { %v9712_v28 = vpack.c.bf16 %v4837_v34, %v4837_v34  ;;  %v17744_v34 = vld [vmem:[#allocation109_spill] sm:$0xff] }
 0xb5b   : > { %v9747_v14 = vpack.c.bf16 %v5965_v63, %v5965_v63 }
 0xb69   : > { %2329 = vadd.xlane.f32.xlu0 %v17735_v10  ;;  %v17740_v10 = vld [vmem:[#allocation118_spill] sm:$0xff] }
 0xb6a   : > { %v3717_v5 = vmul.f32 %v11762_v48, %v17740_v10 }
 0xb6c   : > { %v9685_v17 = vpack.c.bf16 %v3717_v5, %v3717_v5 }
 0xb6f   : > { %2335 = vadd.xlane.f32.xlu1 %v17737_v58 }
 0xb78   : > { %v2322_v52 = vpop.xlane.xlu0 %2321 }
 0xb79   : > { %11763 = vrcp.f32 %v2322_v52 }
 0xb7c   : > { %v3853_v41 = vpop.permute.xlu0 %3852 }
 0xb7d   : > { %3935 = vst.msk [vmem:[#allocation3 + $0x38] sm:$0xf] %vm3920_vm3, %v3853_v41 }
 0xb7e   : > { %v2328_v16 = vpop.xlane.xlu1 %2327 }
 0xb7f   : > { %11765 = vrcp.f32 %v2328_v16  ;;  %3860 = vrot.lane.b32.xlu0 %v9682_v27, %s12065_s26  ;;  %v17743_v27 = vld [vmem:[#allocation54_spill] sm:$0xff] }
 0xb80   : > { %4987 = vrot.lane.b32.xlu1 %v9715_v47, %s12063_s23  ;;  %v4974_v60 = vpop.permute.xlu0 %4973  ;;  %11767 = vrcp.f32 %v15114_v3  ;;  %v17746_v47 = vld [vmem:[#allocation15_spill] sm:$0xff] }
 0xb81   : > { %5058 = vst.msk [vmem:[#allocation3 + $0x30] sm:$0xf] %vm5045_vm4, %v4974_v60  ;;  %11769 = vrcp.f32 %v15460_v32 }
 0xb82   : > { %v4980_v31 = vpop.permute.xlu1 %4979  ;;  %11771 = vrcp.f32 %v15456_v18 }
 0xb83   : > { %5061 = vst.msk [vmem:[#allocation3 + $0x3c] sm:$0xf] %vm5045_vm4, %v4980_v31  ;;  %4981 = vrot.lane.b32.xlu0 %v9712_v28, %s12063_s23  ;;  %11773 = vrcp.f32 %v17744_v34 }
 0xb84   : > { %6108 = vrot.lane.b32.xlu1 %v9745_v6, %s12062_s12  ;;  %11775 = vrcp.f32 %v17745_v20 }
 0xb85   : > { %11777 = vrcp.f32 %v15133_v19  ;;  %v17747_v19 = vld [vmem:[#allocation116_spill] sm:$0xff] }
 0xb86   : > { %v11764_v45 = vpop.eup %11763  ;;  %v6101_v58 = vpop.permute.xlu1 %6100 }
 0xb87   : > { %6184 = vst.msk [vmem:[#allocation3 + $0x34] sm:$0xf] %vm6170_vm0, %v6101_v58  ;;  %v2607_v52 = vmul.f32 %v11764_v45, %v17741_v12 }
 0xb88   : > { %6112 = vrot.lane.b32.xlu1 %v9747_v14, %s12062_s12 }
 0xb89   : > { %v9652_v50 = vpack.c.bf16 %v2607_v52, %v2607_v52 }
 0xb8a   : > { %v6105_v15 = vpop.permute.xlu1 %6104 }
 0xb8b   : > { %6186 = vst.msk [vmem:[#allocation3 + $0x3c] sm:$0xf] %vm6170_vm0, %v6105_v15 }
 0xb8c   : > { %2768 = vst.msk [vmem:[#allocation3 + $0x50] sm:$0xf] %vm2747_vm2, %v9652_v50  ;;  %v11766_v43 = vpop.eup %11765  ;;  %3866 = vrot.lane.b32.xlu1 %v9685_v17, %s12065_s26  ;;  %v17749_v17 = vld [vmem:[#allocation147_spill] sm:$0xff] }
 0xb8d   : > { %v2610_v2 = vmul.f32 %v11766_v43, %v17742_v46  ;;  %v11768_v16 = vpop.eup %11767 }
 0xb8e   : > { %v3859_v25 = vpop.permute.xlu1 %3858  ;;  %v4839_v23 = vmul.f32 %v11768_v16, %v15158_v53  ;;  %v11770_v60 = vpop.eup %11769 }
 0xb8f   : > { %3938 = vst.msk [vmem:[#allocation3 + $0x44] sm:$0xf] %vm3920_vm3, %v3859_v25  ;;  %v9655_v41 = vpack.c.bf16 %v2610_v2, %v2610_v2  ;;  %v5962_v32 = vmul.f32 %v11770_v60, %v15546_v8  ;;  %v11772_v18 = vpop.eup %11771  ;;  %v17748_v8 = vld [vmem:[#allocation14_spill] sm:$0xff] }
 0xb90   : > { %v9714_v3 = vpack.c.bf16 %v4839_v23, %v4839_v23  ;;  %v11774_v31 = vpop.eup %11773  ;;  %v5964_v63 = vmul.f32 %v11772_v18, %v15544_v56  ;;  %v17751_v23 = vld [vmem:[#allocation21_spill] sm:$0xff]  ;;  %v17752_v60 = vld [vmem:[#allocation62_spill] sm:$0xff] }
 0xb91   : > { %2771 = vst.msk [vmem:[#allocation3 + $0x5c] sm:$0xf] %vm2747_vm2, %v9655_v41  ;;  %v9744_v48 = vpack.c.bf16 %v5962_v32, %v5962_v32  ;;  %v3719_v53 = vmul.f32 %v11774_v31, %v17747_v19  ;;  %v11776_v45 = vpop.eup %11775  ;;  %v17754_v31 = vld [vmem:[#allocation124_spill] sm:$0xff] }
 0xb92   : > { %v11778_v5 = vpop.eup %11777  ;;  %v3716_v58 = vmul.f32 %v11776_v45, %v17748_v8  ;;  %v9746_v14 = vpack.c.bf16 %v5964_v63, %v5964_v63 }
 0xb93   : > { %v9687_v52 = vpack.c.bf16 %v3719_v53, %v3719_v53  ;;  %v4842_v50 = vmul.f32 %v11778_v5, %v15184_v37 }
 0xb94   : > { %v9684_v2 = vpack.c.bf16 %v3716_v58, %v3716_v58 }
 0xb95   : > { %v9717_v41 = vpack.c.bf16 %v4842_v50, %v4842_v50 }
 0xba2   : > { %2333 = vadd.xlane.f32.xlu0 %v17743_v27 }
 0xbb0   : > { %2339 = vadd.xlane.f32.xlu1 %v17746_v47  ;;  %v17750_v47 = vld [vmem:[#allocation134_spill] sm:$0xff] }
 0xbb1   : > { %v2326_v24 = vpop.xlane.xlu0 %2325 }
 0xbb2   : > { %11779 = vrcp.f32 %v2326_v24 }
 0xbb5   : > { %v4978_v28 = vpop.permute.xlu0 %4977 }
 0xbb6   : > { %5060 = vst.msk [vmem:[#allocation3 + $0x38] sm:$0xf] %vm5045_vm4, %v4978_v28  ;;  %v17753_v28 = vld [vmem:[#allocation19_spill] sm:$0xff] }
 0xbb8   : > { %4985 = vrot.lane.b32.xlu0 %v9714_v3, %s12063_s23  ;;  %v15605_v3 = vpop.f32.mrf.mxu1 }
 0xbb9   : > { %v6099_v6 = vpop.permute.xlu0 %6098 }
 0xbba   : > { %6183 = vst.msk [vmem:[#allocation3 + $0x30] sm:$0xf] %vm6170_vm0, %v6099_v6  ;;  %v15608_v32 = vpop.f32.mrf.mxu1 }
 0xbbc   : > { %6106 = vrot.lane.b32.xlu0 %v9744_v48, %s12062_s12  ;;  %v17755_v48 = vld [vmem:[#allocation105_spill] sm:$0xff] }
 0xbbd   : > { %v6103_v10 = vpop.permute.xlu0 %6102 }
 0xbbe   : > { %6185 = vst.msk [vmem:[#allocation3 + $0x38] sm:$0xf] %vm6170_vm0, %v6103_v10 }
 0xbbf   : > { %v11780_v12 = vpop.eup %11779  ;;  %v2332_v56 = vpop.xlane.xlu1 %2331 }
 0xbc0   : > { %11781 = vrcp.f32 %v2332_v56  ;;  %6110 = vrot.lane.b32.xlu0 %v9746_v14, %s12062_s12  ;;  %v2609_v15 = vmul.f32 %v11780_v12, %v17749_v17 }
 0xbc1   : > { %3870 = vrot.lane.b32.xlu1 %v9687_v52, %s12065_s26  ;;  %v3857_v43 = vpop.permute.xlu0 %3856  ;;  %v11195_v46 = vld [vmem:[#allocation3 + $0x30] sm:$0xff]   ;;  %11783 = vrcp.f32 %v17752_v60 }
 0xbc2   : > { %3937 = vst.msk [vmem:[#allocation3 + $0x40] sm:$0xf] %vm3920_vm3, %v3857_v43  ;;  %v9654_v25 = vpack.c.bf16 %v2609_v15, %v2609_v15  ;;  %11003 = vmatprep.mubr.bf16.mxu0 %v11195_v46  ;;  %11785 = vrcp.f32 %v15129_v11  ;;  %v10966_v11 = vpop.f32.mrf.mxu1 }
 0xbc3   : > { %v3863_v27 = vpop.permute.xlu1 %3862  ;;  %11787 = vrcp.f32 %v15506_v61  ;;  %v17756_v61 = vld [vmem:[#allocation80_spill] sm:$0xff] }
 0xbc4   : > { %3940 = vst.msk [vmem:[#allocation3 + $0x4c] sm:$0xf] %vm3920_vm3, %v3863_v27  ;;  %3864 = vrot.lane.b32.xlu0 %v9684_v2, %s12065_s26  ;;  %11789 = vrcp.f32 %v15123_v42  ;;  %v5902_v8 = vpop.f32.mrf.mxu1  ;;  %v17758_v27 = vld [vmem:[#allocation77_spill] sm:$0xff] }
 0xbc5   : > { %2770 = vst.msk [vmem:[#allocation3 + $0x58] sm:$0xf] %vm2747_vm2, %v9654_v25  ;;  %4991 = vrot.lane.b32.xlu1 %v9717_v41, %s12063_s23  ;;  %v11196_v37 = vld [vmem:[#allocation3 + $0x38] sm:$0xff]   ;;  %11791 = vrcp.f32 %v15503_v38 }
 0xbc6   : > { %11004 = vmatmul.mubr.bf16.gmra.mxu0 %v11196_v37  ;;  %11793 = vrcp.f32 %v17754_v31 }
 0xbc7   : > { %v4984_v34 = vpop.permute.xlu1 %4983 }
 0xbc8   : > { %5063 = vst.msk [vmem:[#allocation3 + $0x44] sm:$0xf] %vm5045_vm4, %v4984_v34  ;;  %v15629_v34 = vpop.f32.mrf.mxu1 }
 0xbca   : > { %v15636_v60 = vpop.f32.mrf.mxu1 }
 0xbcd   : > { %v11782_v20 = vpop.eup %11781 }
 0xbce   : > { %v2612_v16 = vmul.f32 %v11782_v20, %v17750_v47  ;;  %v11784_v18 = vpop.eup %11783  ;;  %v17759_v20 = vld [vmem:[#allocation117_spill] sm:$0xff] }
 0xbcf   : > { %v11786_v63 = vpop.eup %11785  ;;  %v3718_v19 = vmul.f32 %v11784_v18, %v17755_v48 }
 0xbd0   : > { %v9657_v24 = vpack.c.bf16 %v2612_v16, %v2612_v16  ;;  %v4844_v42 = vmul.f32 %v11786_v63, %v15178_v30  ;;  %v11788_v53 = vpop.eup %11787 }
 0xbd1   : > { %v11790_v45 = vpop.eup %11789  ;;  %v9686_v5 = vpack.c.bf16 %v3718_v19, %v3718_v19  ;;  %v5967_v12 = vmul.f32 %v11788_v53, %v5902_v8  ;;  %v10970_v19 = vpop.f32.mrf.mxu1 }
 0xbd2   : > { %2773 = vst.msk [vmem:[#allocation3 + $0x64] sm:$0xf] %vm2747_vm2, %v9657_v24  ;;  %v4841_v38 = vmul.f32 %v11790_v45, %v15172_v40  ;;  %v9719_v58 = vpack.c.bf16 %v4844_v42, %v4844_v42  ;;  %v11792_v52 = vpop.eup %11791 }
 0xbd3   : > { %v9749_v40 = vpack.c.bf16 %v5967_v12, %v5967_v12  ;;  %v5969_v17 = vmul.f32 %v11792_v52, %v10966_v11  ;;  %v11794_v15 = vpop.eup %11793  ;;  %v17763_v52 = vld [vmem:[#allocation121_spill] sm:$0xff] }
 0xbd4   : > { %v9716_v50 = vpack.c.bf16 %v4841_v38, %v4841_v38 }
 0xbd5   : > { %v9751_v25 = vpack.c.bf16 %v5969_v17, %v5969_v17 }
 0xbe3   : > { %2337 = vadd.xlane.f32.xlu0 %v17751_v23 }
 0xbe9   : > { %2343 = vadd.xlane.f32.xlu1 %v17753_v28  ;;  %v17760_v28 = vld [vmem:[#allocation135_spill] sm:$0xff] }
 0xbf2   : > { %v2330_v6 = vpop.xlane.xlu0 %2329 }
 0xbf3   : > { %11795 = vrcp.f32 %v2330_v6 }
 0xbf4   : > { %11797 = vrcp.f32 %v17756_v61 }
 0xbf6   : > { %v3861_v10 = vpop.permute.xlu0 %3860 }
 0xbf7   : > { %3939 = vst.msk [vmem:[#allocation3 + $0x48] sm:$0xf] %vm3920_vm3, %v3861_v10 }
 0xbf8   : > { %v2336_v14 = vpop.xlane.xlu1 %2335 }
 0xbf9   : > { %11799 = vrcp.f32 %v2336_v14  ;;  %3868 = vrot.lane.b32.xlu0 %v9686_v5, %s12065_s26 }
 0xbfa   : > { %11801 = vrcp.f32 %v15138_v36  ;;  %4995 = vrot.lane.b32.xlu1 %v9719_v58, %s12063_s23  ;;  %v4982_v30 = vpop.permute.xlu0 %4981  ;;  %v17757_v36 = vld [vmem:[#allocation119_spill] sm:$0xff] }
 0xbfb   : > { %5062 = vst.msk [vmem:[#allocation3 + $0x40] sm:$0xf] %vm5045_vm4, %v4982_v30  ;;  %11803 = vrcp.f32 %v15135_v55  ;;  %v3721_v46 = vmul.f32 %v11794_v15, %v17757_v36 }
 0xbfc   : > { %v4988_v56 = vpop.permute.xlu1 %4987  ;;  %11805 = vrcp.f32 %v15515_v54 }
 0xbfd   : > { %5065 = vst.msk [vmem:[#allocation3 + $0x4c] sm:$0xf] %vm5045_vm4, %v4988_v56  ;;  %4989 = vrot.lane.b32.xlu0 %v9716_v50, %s12063_s23  ;;  %v9689_v16 = vpack.c.bf16 %v3721_v46, %v3721_v46  ;;  %11807 = vrcp.f32 %v15510_v39  ;;  %v17764_v50 = vld [vmem:[#allocation49_spill] sm:$0xff] }
 0xbfe   : > { %6116 = vrot.lane.b32.xlu1 %v9749_v40, %s12062_s12  ;;  %11809 = vrcp.f32 %v15298_v62  ;;  %v17766_v46 = vld [vmem:[#allocation93_spill] sm:$0xff] }
 0xbff   : > { %11811 = vrcp.f32 %v15346_v51  ;;  %v17761_v51 = vld [vmem:[#allocation122_spill] sm:$0xff] }
 0xc00   : > { %v11796_v43 = vpop.eup %11795  ;;  %v6109_v2 = vpop.permute.xlu1 %6108  ;;  %11813 = vrcp.f32 %v15348_v44  ;;  %v17762_v44 = vld [vmem:[#allocation59_spill] sm:$0xff] }
 0xc01   : > { %v11798_v41 = vpop.eup %11797  ;;  %6188 = vst.msk [vmem:[#allocation3 + $0x44] sm:$0xf] %vm6170_vm0, %v6109_v2  ;;  %v2611_v37 = vmul.f32 %v11796_v43, %v17758_v27  ;;  %11815 = vrcp.f32 %v15350_v9 }
 0xc02   : > { %6120 = vrot.lane.b32.xlu1 %v9751_v25, %s12062_s12  ;;  %v3723_v47 = vmul.f32 %v11798_v41, %v17759_v20  ;;  %11817 = vrcp.f32 %v15522_v22  ;;  %v17765_v22 = vld [vmem:[#allocation76_spill] sm:$0xff]  ;;  %v17767_v41 = vld [vmem:[#allocation66_spill] sm:$0xff]  ;;  %v17768_v20 = vld [vmem:[#allocation127_spill] sm:$0xff] }
 0xc03   : > { %v9656_v55 = vpack.c.bf16 %v2611_v37, %v2611_v37  ;;  %11819 = vrcp.f32 %v17764_v50 }
 0xc04   : > { %v6113_v24 = vpop.permute.xlu1 %6112  ;;  %v9691_v31 = vpack.c.bf16 %v3723_v47, %v3723_v47  ;;  %11821 = vrcp.f32 %v15518_v49 }
 0xc05   : > { %6190 = vst.msk [vmem:[#allocation3 + $0x4c] sm:$0xf] %vm6170_vm0, %v6113_v24  ;;  %11823 = vrcp.f32 %v15472_v59 }
 0xc06   : > { %2772 = vst.msk [vmem:[#allocation3 + $0x60] sm:$0xf] %vm2747_vm2, %v9656_v55  ;;  %v11800_v54 = vpop.eup %11799  ;;  %3874 = vrot.lane.b32.xlu1 %v9689_v16, %s12065_s26  ;;  %11825 = vrcp.f32 %v15465_v33  ;;  %v17769_v16 = vld [vmem:[#allocation129_spill] sm:$0xff] }
 0xc07   : > { %v11802_v23 = vpop.eup %11801  ;;  %v2614_v18 = vmul.f32 %v11800_v54, %v17760_v28  ;;  %11827 = vrcp.f32 %v17767_v41 }
 0xc08   : > { %v4846_v6 = vmul.f32 %v11802_v23, %v15208_v26  ;;  %v3867_v63 = vpop.permute.xlu1 %3866  ;;  %v11804_v48 = vpop.eup %11803  ;;  %11829 = vrcp.f32 %v17768_v20 }
 0xc09   : > { %3942 = vst.msk [vmem:[#allocation3 + $0x54] sm:$0xf] %vm3920_vm3, %v3867_v63  ;;  %v9659_v39 = vpack.c.bf16 %v2614_v18, %v2614_v18  ;;  %v4848_v11 = vmul.f32 %v11804_v48, %v15202_v4  ;;  %v11806_v42 = vpop.eup %11805  ;;  %v5918_v26 = vpop.f32.mrf.mxu1  ;;  %v17770_v63 = vld [vmem:[#allocation60_spill] sm:$0xff] }
 0xc0a   : > { %3878 = vrot.lane.b32.xlu1 %v9691_v31, %s12065_s26  ;;  %v9721_v61 = vpack.c.bf16 %v4846_v6, %v4846_v6  ;;  %v5971_v53 = vmul.f32 %v11806_v42, %v5918_v26  ;;  %v11808_v45 = vpop.eup %11807  ;;  %v17771_v42 = vld [vmem:[#allocation51_spill] sm:$0xff] }
 0xc0b   : > { %2775 = vst.msk [vmem:[#allocation3 + $0x6c] sm:$0xf] %vm2747_vm2, %v9659_v39  ;;  %v9723_v62 = vpack.c.bf16 %v4848_v11, %v4848_v11  ;;  %v5973_v5 = vmul.f32 %v11808_v45, %v10970_v19  ;;  %v11810_v38 = vpop.eup %11809  ;;  %v15652_v14 = vpop.f32.mrf.mxu1 }
 0xc0c   : > { %v9753_v10 = vpack.c.bf16 %v5971_v53, %v5971_v53  ;;  %v3725_v8 = vmul.f32 %v11810_v38, %v17761_v51  ;;  %v11812_v58 = vpop.eup %11811  ;;  %v17773_v38 = vld [vmem:[#allocation45_spill] sm:$0xff] }
 0xc0d   : > { %v9755_v4 = vpack.c.bf16 %v5973_v5, %v5973_v5  ;;  %v3727_v9 = vmul.f32 %v11812_v58, %v17763_v52  ;;  %v11814_v30 = vpop.eup %11813  ;;  %v15659_v56 = vpop.f32.mrf.mxu1  ;;  %v17774_v58 = vld [vmem:[#allocation114_spill] sm:$0xff] }
 0xc0e   : > { %4999 = vrot.lane.b32.xlu1 %v9721_v61, %s12063_s23  ;;  %v9693_v12 = vpack.c.bf16 %v3725_v8, %v3725_v8  ;;  %v4850_v17 = vmul.f32 %v11814_v30, %v17765_v22  ;;  %v11816_v15 = vpop.eup %11815  ;;  %v15686_v5 = vpop.f32.mrf.mxu0  ;;  %v17775_v22 = vld [vmem:[#allocation44_spill] sm:$0xff] }
 0xc0f   : > { %v9695_v40 = vpack.c.bf16 %v3727_v9, %v3727_v9  ;;  %v10974_v43 = vpop.f32.mrf.mxu1  ;;  %v4852_v2 = vmul.f32 %v11816_v15, %v17766_v46  ;;  %v11818_v49 = vpop.eup %11817 }
 0xc10   : > { %v9725_v36 = vpack.c.bf16 %v4850_v17, %v4850_v17  ;;  %v11820_v37 = vpop.eup %11819  ;;  %v15692_v9 = vpop.f32.mrf.mxu0 }
 0xc11   : > { %v5934_v25 = vpop.f32.mrf.mxu1  ;;  %v9727_v59 = vpack.c.bf16 %v4852_v2, %v4852_v2  ;;  %v11822_v55 = vpop.eup %11821  ;;  %v4843_v24 = vmul.f32 %v11820_v37, %v17769_v16  ;;  %v17777_v37 = vld [vmem:[#allocation68_spill] sm:$0xff] }
 0xc12   : > { %5003 = vrot.lane.b32.xlu1 %v9723_v62, %s12063_s23  ;;  %v5975_v27 = vmul.f32 %v11818_v49, %v5934_v25  ;;  %v5977_v54 = vmul.f32 %v11822_v55, %v10974_v43  ;;  %v11824_v33 = vpop.eup %11823  ;;  %v17772_v62 = vld [vmem:[#allocation38_spill] sm:$0xff]  ;;  %v15700_v15 = vpop.f32.mrf.mxu0 }
 0xc13   : > { %v9718_v18 = vpack.c.bf16 %v4843_v24, %v4843_v24  ;;  %v5966_v31 = vmul.f32 %v11824_v33, %v15608_v32  ;;  %v11826_v39 = vpop.eup %11825 }
 0xc14   : > { %v9757_v23 = vpack.c.bf16 %v5975_v27, %v5975_v27  ;;  %v9759_v6 = vpack.c.bf16 %v5977_v54, %v5977_v54  ;;  %v5968_v19 = vmul.f32 %v11826_v39, %v15605_v3  ;;  %v11828_v61 = vpop.eup %11827  ;;  %v6439_v25 = vpop.f32.mrf.mxu0 }
 0xc15   : > { %v9748_v11 = vpack.c.bf16 %v5966_v31, %v5966_v31  ;;  %v11830_v26 = vpop.eup %11829  ;;  %v3720_v53 = vmul.f32 %v11828_v61, %v17772_v62 }
 0xc16   : > { %6124 = vrot.lane.b32.xlu1 %v9753_v10, %s12062_s12  ;;  %v9750_v45 = vpack.c.bf16 %v5968_v19, %v5968_v19 }
 0xc1a   : > { %6128 = vrot.lane.b32.xlu1 %v9755_v4, %s12062_s12 }
 0xc1c   : > { %2341 = vadd.xlane.f32.xlu0 %v17762_v44  ;;  %v3722_v44 = vmul.f32 %v11830_v26, %v17774_v58  ;;  %v11926_v26 = vld [vmem:[#allocation2 + $0x50] sm:$0xff] }
 0xc1d   : > { %v17783_v58 = vld [vmem:[#allocation95_spill] sm:$0xff] }
 0xc1e   : > { %3882 = vrot.lane.b32.xlu1 %v9693_v12, %s12065_s26  ;;  %v9688_v12 = vpack.c.bf16 %v3720_v53, %v3720_v53 }
 0xc22   : > { %3886 = vrot.lane.b32.xlu1 %v9695_v40, %s12065_s26  ;;  %v9690_v40 = vpack.c.bf16 %v3722_v44, %v3722_v44 }
 0xc26   : > { %5007 = vrot.lane.b32.xlu1 %v9725_v36, %s12063_s23  ;;  %v17776_v36 = vld [vmem:[#allocation130_spill] sm:$0xff] }
 0xc2a   : > { %5011 = vrot.lane.b32.xlu1 %v9727_v59, %s12063_s23 }
 0xc2b   : > { %v2334_v47 = vpop.xlane.xlu0 %2333 }
 0xc2c   : > { %11831 = vrcp.f32 %v2334_v47 }
 0xc2d   : > { %11833 = vrcp.f32 %v17770_v63  ;;  %v11925_v63 = vld [vmem:[#allocation2] sm:$0xff] }
 0xc2e   : > { %6132 = vrot.lane.b32.xlu1 %v9757_v23, %s12062_s12  ;;  %11835 = vrcp.f32 %v17771_v42 }
 0xc2f   : > { %v4986_v28 = vpop.permute.xlu0 %4985  ;;  %11837 = vrcp.f32 %v15484_v1 }
 0xc30   : > { %5064 = vst.msk [vmem:[#allocation3 + $0x48] sm:$0xf] %vm5045_vm4, %v4986_v28 }
 0xc32   : > { %4993 = vrot.lane.b32.xlu0 %v9718_v18, %s12063_s23  ;;  %6136 = vrot.lane.b32.xlu1 %v9759_v6, %s12062_s12  ;;  %v17780_v18 = vld [vmem:[#allocation52_spill] sm:$0xff] }
 0xc33   : > { %v6107_v48 = vpop.permute.xlu0 %6106 }
 0xc34   : > { %6187 = vst.msk [vmem:[#allocation3 + $0x40] sm:$0xf] %vm6170_vm0, %v6107_v48 }
 0xc36   : > { %6114 = vrot.lane.b32.xlu0 %v9748_v11, %s12062_s12  ;;  %v17781_v11 = vld [vmem:[#allocation58_spill] sm:$0xff] }
 0xc37   : > { %v6111_v32 = vpop.permute.xlu0 %6110 }
 0xc38   : > { %6189 = vst.msk [vmem:[#allocation3 + $0x48] sm:$0xf] %vm6170_vm0, %v6111_v32 }
 0xc39   : > { %v11832_v10 = vpop.eup %11831  ;;  %v2340_v3 = vpop.xlane.xlu1 %2339 }
 0xc3a   : > { %11839 = vrcp.f32 %v2340_v3  ;;  %6118 = vrot.lane.b32.xlu0 %v9750_v45, %s12062_s12  ;;  %v2613_v4 = vmul.f32 %v11832_v10, %v17773_v38  ;;  %v11834_v1 = vpop.eup %11833  ;;  %v17782_v45 = vld [vmem:[#allocation146_spill] sm:$0xff] }
 0xc3b   : > { %v3865_v51 = vpop.permute.xlu0 %3864  ;;  %v11197_v8 = vld [vmem:[#allocation3 + $0x40] sm:$0xff]   ;;  %11841 = vrcp.f32 %v15479_v7  ;;  %v4845_v17 = vmul.f32 %v11834_v1, %v17775_v22  ;;  %v11836_v7 = vpop.eup %11835 }
 0xc3c   : > { %3941 = vst.msk [vmem:[#allocation3 + $0x50] sm:$0xf] %vm3920_vm3, %v3865_v51  ;;  %v9658_v52 = vpack.c.bf16 %v2613_v4, %v2613_v4  ;;  %11007 = vmatprep.mubr.bf16.mxu0 %v11197_v8  ;;  %11843 = vrcp.f32 %v15335_v13  ;;  %v4847_v46 = vmul.f32 %v11836_v7, %v17776_v36  ;;  %v11838_v49 = vpop.eup %11837  ;;  %v10997_v13 = vpop.f32.mrf.mxu0  ;;  %v11927_v4 = vld [vmem:[#allocation2 + $0x30] sm:$0xff]  ;;  %v11928_v1 = vld [vmem:[#allocation2 + $0x80] sm:$0xff]  ;;  %v11929_v7 = vld [vmem:[#allocation2 + $0xe8] sm:$0xff] }
 0xc3d   : > { %v3871_v30 = vpop.permute.xlu1 %3870  ;;  %v9720_v2 = vpack.c.bf16 %v4845_v17, %v4845_v17  ;;  %11845 = vrcp.f32 %v15341_v21  ;;  %v5970_v59 = vmul.f32 %v11838_v49, %v15636_v60  ;;  %v17778_v21 = vld [vmem:[#allocation89_spill] sm:$0xff] }
 0xc3e   : > { %3944 = vst.msk [vmem:[#allocation3 + $0x5c] sm:$0xf] %vm3920_vm3, %v3871_v30  ;;  %3872 = vrot.lane.b32.xlu0 %v9688_v12, %s12065_s26  ;;  %v9722_v27 = vpack.c.bf16 %v4847_v46, %v4847_v46  ;;  %11847 = vrcp.f32 %v15302_v0  ;;  %v6452_v16 = vpop.f32.mrf.mxu0  ;;  %v15720_v0 = vld [vmem:[%s17779_s19] ss:$0 sm:$0xff] }
 0xc3f   : > { %2774 = vst.msk [vmem:[#allocation3 + $0x68] sm:$0xf] %vm2747_vm2, %v9658_v52  ;;  %v11198_v50 = vld [vmem:[#allocation3 + $0x48] sm:$0xff]   ;;  %11849 = vrcp.f32 %v17778_v21  ;;  %v9752_v54 = vpack.c.bf16 %v5970_v59, %v5970_v59  ;;  %v6440_v28 = vadd.f32 %v15720_v0, %v6439_v25  ;;  %v6453_v48 = vadd.f32 %v15720_v0, %v6452_v16  ;;  %v17786_v16 = vld [vmem:[#allocation13_spill] sm:$0xff] }
 0xc40   : > { %11008 = vmatmul.mubr.bf16.gmra.mxu0 %v11198_v50  ;;  %v15722_v60 = vpop.f32.mrf.mxu0  ;;  %11851 = vrcp.f32 %v15491_v29  ;;  %v6461_v29 = vadd.f32 %v10997_v13, %v15720_v0 }
 0xc41   : > { %v4992_v43 = vpop.permute.xlu1 %4991  ;;  %v15730_v39 = vadd.f32 %v11925_v63, %v6440_v28  ;;  %11853 = vrcp.f32 %v15487_v35  ;;  %v15738_v62 = vadd.f32 %v11926_v26, %v6453_v48 }
 0xc42   : > { %5067 = vst.msk [vmem:[#allocation3 + $0x54] sm:$0xf] %vm5045_vm4, %v4992_v43  ;;  %3876 = vrot.lane.b32.xlu0 %v9690_v40, %s12065_s26  ;;  %v15728_v6 = vpop.f32.mrf.mxu0  ;;  %v15743_v35 = vadd.f32 %v11927_v4, %v6461_v29  ;;  %v6464_v4 = vadd.f32 %v15722_v60, %v15720_v0 }
 0xc44   : > { %v11001_v32 = vpop.f32.mrf.mxu0 }
 0xc45   : > { %v6477_v30 = vadd.f32 %v11001_v32, %v15720_v0  ;;  %v11932_v32 = vld [vmem:[#allocation2 + $0x60] sm:$0xff] }
 0xc46   : > { %4997 = vrot.lane.b32.xlu0 %v9720_v2, %s12063_s23  ;;  %v6468_v38 = vpop.f32.mrf.mxu0 }
 0xc47   : > { %v11840_v41 = vpop.eup %11839  ;;  %v6469_v51 = vadd.f32 %v15720_v0, %v6468_v38  ;;  %v15756_v36 = vadd.f32 %v11929_v7, %v6477_v30 }
 0xc48   : > { %v2616_v55 = vmul.f32 %v11840_v41, %v17777_v37  ;;  %v11842_v47 = vpop.eup %11841 }
 0xc49   : > { %v5972_v24 = vmul.f32 %v11842_v47, %v15629_v34  ;;  %v11844_v23 = vpop.eup %11843  ;;  %v15751_v50 = vadd.f32 %v11928_v1, %v6469_v51  ;;  %17784 = vst [vmem:[#allocation149_spill] sm:$0xff] %v15756_v36  ;;  %v11002_v47 = vpop.f32.mrf.mxu0  ;;  %v11935_v51 = vld [vmem:[#allocation2 + $0x68] sm:$0xff] }
 0xc4a   : > { %5001 = vrot.lane.b32.xlu0 %v9722_v27, %s12063_s23  ;;  %v9661_v20 = vpack.c.bf16 %v2616_v55, %v2616_v55  ;;  %v3724_v31 = vmul.f32 %v11844_v23, %v17780_v18  ;;  %v11846_v34 = vpop.eup %11845  ;;  %v17785_v27 = vld [vmem:[#allocation138_spill] sm:$0xff]  ;;  %v6445_v18 = vadd.f32 %v15686_v5, %v15720_v0  ;;  %v6480_v60 = vadd.f32 %v11002_v47, %v15720_v0 }
 0xc4b   : > { %v9754_v33 = vpack.c.bf16 %v5972_v24, %v5972_v24  ;;  %v3726_v61 = vmul.f32 %v11846_v34, %v17781_v11  ;;  %v11848_v42 = vpop.eup %11847  ;;  %v11931_v11 = vld [vmem:[#allocation2 + $0xd8] sm:$0xff]  ;;  %v11937_v1 = vld [vmem:[#allocation2 + $0x88] sm:$0xff] }
 0xc4c   : > { %2777 = vst.msk [vmem:[#allocation3 + $0x74] sm:$0xf] %vm2747_vm2, %v9661_v20  ;;  %v9692_v19 = vpack.c.bf16 %v3724_v31, %v3724_v31  ;;  %v4849_v10 = vmul.f32 %v11848_v42, %v17782_v45  ;;  %v11850_v3 = vpop.eup %11849  ;;  %v11930_v31 = vld [vmem:[#allocation2 + $0xb0] sm:$0xff]  ;;  %v6448_v42 = vadd.f32 %v15700_v15, %v15720_v0  ;;  %v11934_v15 = vld [vmem:[#allocation2 + $0x8] sm:$0xff] }
 0xc4d   : > { %v9694_v53 = vpack.c.bf16 %v3726_v61, %v3726_v61  ;;  %v4851_v44 = vmul.f32 %v11850_v3, %v17783_v58  ;;  %v11852_v12 = vpop.eup %11851  ;;  %v15780_v61 = vadd.f32 %v11931_v11, %v6445_v18  ;;  %v11936_v58 = vld [vmem:[#allocation2 + $0x48] sm:$0xff] }
 0xc4e   : > { %6122 = vrot.lane.b32.xlu0 %v9752_v54, %s12062_s12  ;;  %v9724_v8 = vpack.c.bf16 %v4849_v10, %v4849_v10  ;;  %v5974_v52 = vmul.f32 %v11852_v12, %v15659_v56  ;;  %v11854_v22 = vpop.eup %11853  ;;  %v6437_v54 = vadd.f32 %v15720_v0, %v15692_v9  ;;  %v6456_v10 = vadd.f32 %v15720_v0, %v15728_v6 }
 0xc4f   : > { %v9726_v40 = vpack.c.bf16 %v4851_v44, %v4851_v44  ;;  %v5976_v17 = vmul.f32 %v11854_v22, %v15652_v14  ;;  %v15805_v44 = vadd.f32 %v11936_v58, %v6464_v4 }
 0xc50   : > { %v9756_v43 = vpack.c.bf16 %v5974_v52, %v5974_v52  ;;  %v15775_v34 = vadd.f32 %v11930_v31, %v6437_v54 }
 0xc51   : > { %v9758_v56 = vpack.c.bf16 %v5976_v17, %v5976_v17 }
 0xc52   : > { %6126 = vrot.lane.b32.xlu0 %v9754_v33, %s12062_s12  ;;  %v6471_v33 = vpop.f32.mrf.mxu0 }
 0xc53   : > { %v6472_v12 = vadd.f32 %v15720_v0, %v6471_v33 }
 0xc56   : > { %3880 = vrot.lane.b32.xlu0 %v9692_v19, %s12065_s26  ;;  %6599 = vadd.xlane.f32.xlu1 %v15730_v39 }
 0xc5a   : > { %3884 = vrot.lane.b32.xlu0 %v9694_v53, %s12065_s26  ;;  %6605 = vadd.xlane.f32.xlu1 %v15738_v62  ;;  %v11933_v53 = vld [vmem:[#allocation2 + $0x18] sm:$0xff] }
 0xc5b   : > { %v15790_v45 = vadd.f32 %v11933_v53, %v6448_v42 }
 0xc5e   : > { %5005 = vrot.lane.b32.xlu0 %v9724_v8, %s12063_s23  ;;  %6609 = vadd.xlane.f32.xlu1 %v15743_v35  ;;  %v15801_v8 = vadd.f32 %v11935_v51, %v6456_v10 }
 0xc62   : > { %5009 = vrot.lane.b32.xlu0 %v9726_v40, %s12063_s23  ;;  %6613 = vadd.xlane.f32.xlu1 %v15751_v50  ;;  %v15811_v40 = vadd.f32 %v11937_v1, %v6472_v12 }
 0xc66   : > { %6130 = vrot.lane.b32.xlu0 %v9756_v43, %s12062_s12  ;;  %6617 = vadd.xlane.f32.xlu1 %v15756_v36  ;;  %v11938_v43 = vld [vmem:[#allocation2 + $0xb8] sm:$0xff] }
 0xc67   : > { %v15815_v7 = vadd.f32 %v11938_v43, %v6480_v60  ;;  %v11942_v43 = vld [vmem:[#allocation2 + $0x40] sm:$0xff] }
 0xc69   : > { %17787 = vst [vmem:[#allocation142_spill] sm:$0xff] %v15815_v7 }
 0xc6a   : > { %6134 = vrot.lane.b32.xlu0 %v9758_v56, %s12062_s12 }
 0xc6c   : > { %v2338_v46 = vpop.xlane.xlu0 %2337 }
 0xc6d   : > { %11855 = vrcp.f32 %v2338_v46 }
 0xc70   : > { %v3869_v2 = vpop.permute.xlu0 %3868 }
 0xc71   : > { %3943 = vst.msk [vmem:[#allocation3 + $0x58] sm:$0xf] %vm3920_vm3, %v3869_v2 }
 0xc72   : > { %v2344_v25 = vpop.xlane.xlu1 %2343 }
 0xc73   : > { %11857 = vrcp.f32 %v2344_v25  ;;  %v11939_v25 = vld [vmem:[#allocation2 + $0xf0] sm:$0xff] }
 0xc74   : > { %v4990_v49 = vpop.permute.xlu0 %4989 }
 0xc75   : > { %5066 = vst.msk [vmem:[#allocation3 + $0x50] sm:$0xf] %vm5045_vm4, %v4990_v49 }
 0xc76   : > { %v4996_v14 = vpop.permute.xlu1 %4995 }
 0xc77   : > { %5069 = vst.msk [vmem:[#allocation3 + $0x5c] sm:$0xf] %vm5045_vm4, %v4996_v14 }
 0xc7a   : > { %v11856_v41 = vpop.eup %11855  ;;  %v6117_v13 = vpop.permute.xlu1 %6116 }
 0xc7b   : > { %6192 = vst.msk [vmem:[#allocation3 + $0x54] sm:$0xf] %vm6170_vm0, %v6117_v13  ;;  %v2615_v59 = vmul.f32 %v11856_v41, %v17785_v27  ;;  %v11940_v13 = vld [vmem:[#allocation2 + $0x78] sm:$0xff] }
 0xc7d   : > { %v9660_v37 = vpack.c.bf16 %v2615_v59, %v2615_v59 }
 0xc7e   : > { %v6121_v55 = vpop.permute.xlu1 %6120 }
 0xc7f   : > { %6194 = vst.msk [vmem:[#allocation3 + $0x5c] sm:$0xf] %vm6170_vm0, %v6121_v55 }
 0xc80   : > { %2776 = vst.msk [vmem:[#allocation3 + $0x70] sm:$0xf] %vm2747_vm2, %v9660_v37  ;;  %v11858_v20 = vpop.eup %11857 }
 0xc81   : > { %v2618_v21 = vmul.f32 %v11858_v20, %v17786_v16 }
 0xc82   : > { %v3875_v24 = vpop.permute.xlu1 %3874 }
 0xc83   : > { %3946 = vst.msk [vmem:[#allocation3 + $0x64] sm:$0xf] %vm3920_vm3, %v3875_v24  ;;  %v9663_v23 = vpack.c.bf16 %v2618_v21, %v2618_v21  ;;  %v17788_v21 = vld [vmem:[#allocation70_spill] sm:$0xff] }
 0xc85   : > { %2779 = vst.msk [vmem:[#allocation3 + $0x7c] sm:$0xf] %vm2747_vm2, %v9663_v23 }
 0xc86   : > { %v3879_v28 = vpop.permute.xlu1 %3878  ;;  %v11005_v63 = vpop.f32.mrf.mxu0 }
 0xc87   : > { %3948 = vst.msk [vmem:[#allocation3 + $0x6c] sm:$0xf] %vm3920_vm3, %v3879_v28  ;;  %v6493_v5 = vadd.f32 %v11005_v63, %v15720_v0 }
 0xc88   : > { %v6484_v48 = vpop.f32.mrf.mxu0 }
 0xc89   : > { %6597 = vadd.xlane.f32.xlu0 %v15775_v34  ;;  %v6485_v19 = vadd.f32 %v15720_v0, %v6484_v48  ;;  %v15795_v3 = vadd.f32 %v11934_v15, %v6493_v5 }
 0xc8a   : > { %v5000_v9 = vpop.permute.xlu1 %4999  ;;  %v11006_v52 = vpop.f32.mrf.mxu0 }
 0xc8b   : > { %5071 = vst.msk [vmem:[#allocation3 + $0x64] sm:$0xf] %vm5045_vm4, %v5000_v9  ;;  %v15786_v29 = vadd.f32 %v11932_v32, %v6485_v19  ;;  %v6496_v2 = vadd.f32 %v11006_v52, %v15720_v0  ;;  %v11941_v52 = vld [vmem:[#allocation2 + $0x38] sm:$0xff] }
 0xc8c   : > { %v6487_v22 = vpop.f32.mrf.mxu0 }
 0xc8d   : > { %6601 = vadd.xlane.f32.xlu0 %v15780_v61  ;;  %6621 = vadd.xlane.f32.xlu1 %v15786_v29  ;;  %v6488_v56 = vadd.f32 %v15720_v0, %v6487_v22  ;;  %v15825_v27 = vadd.f32 %v11940_v13, %v6496_v2  ;;  %v11943_v2 = vld [vmem:[#allocation2 + $0x58] sm:$0xff] }
 0xc8e   : > { %v5004_v26 = vpop.permute.xlu1 %5003 }
 0xc8f   : > { %5073 = vst.msk [vmem:[#allocation3 + $0x6c] sm:$0xf] %vm5045_vm4, %v5004_v26  ;;  %v15821_v49 = vadd.f32 %v11939_v25, %v6488_v56 }
 0xc91   : > { %6603 = vadd.xlane.f32.xlu0 %v15790_v45  ;;  %6625 = vadd.xlane.f32.xlu1 %v15795_v3 }
 0xc92   : > { %v6125_v38 = vpop.permute.xlu1 %6124 }
 0xc93   : > { %6196 = vst.msk [vmem:[#allocation3 + $0x64] sm:$0xf] %vm6170_vm0, %v6125_v38 }
 0xc95   : > { %6607 = vadd.xlane.f32.xlu0 %v15801_v8 }
 0xc96   : > { %v6129_v6 = vpop.permute.xlu1 %6128 }
 0xc97   : > { %6198 = vst.msk [vmem:[#allocation3 + $0x6c] sm:$0xf] %vm6170_vm0, %v6129_v6 }
 0xc99   : > { %6611 = vadd.xlane.f32.xlu0 %v15805_v44 }
 0xc9a   : > { %v3883_v30 = vpop.permute.xlu1 %3882 }
 0xc9b   : > { %3950 = vst.msk [vmem:[#allocation3 + $0x74] sm:$0xf] %vm3920_vm3, %v3883_v30 }
 0xc9d   : > { %6615 = vadd.xlane.f32.xlu0 %v15811_v40 }
 0xc9e   : > { %v3887_v17 = vpop.permute.xlu1 %3886 }
 0xc9f   : > { %3952 = vst.msk [vmem:[#allocation3 + $0x7c] sm:$0xf] %vm3920_vm3, %v3887_v17 }
 0xca1   : > { %6619 = vadd.xlane.f32.xlu0 %v15815_v7 }
 0xca2   : > { %v5008_v46 = vpop.permute.xlu1 %5007 }
 0xca3   : > { %5075 = vst.msk [vmem:[#allocation3 + $0x74] sm:$0xf] %vm5045_vm4, %v5008_v46 }
 0xca5   : > { %6623 = vadd.xlane.f32.xlu0 %v15821_v49  ;;  %v2342_v14 = vpop.xlane.xlu0 %2341 }
 0xca6   : > { %11859 = vrcp.f32 %v2342_v14  ;;  %v5012_v41 = vpop.permute.xlu1 %5011 }
 0xca7   : > { %5077 = vst.msk [vmem:[#allocation3 + $0x7c] sm:$0xf] %vm5045_vm4, %v5012_v41  ;;  %v11944_v41 = vld [vmem:[#allocation2 + $0xc8] sm:$0xff] }
 0xca9   : > { %6627 = vadd.xlane.f32.xlu0 %v15825_v27  ;;  %v4994_v59 = vpop.permute.xlu0 %4993 }
 0xcaa   : > { %5068 = vst.msk [vmem:[#allocation3 + $0x58] sm:$0xf] %vm5045_vm4, %v4994_v59  ;;  %v6133_v37 = vpop.permute.xlu1 %6132 }
 0xcab   : > { %6200 = vst.msk [vmem:[#allocation3 + $0x74] sm:$0xf] %vm6170_vm0, %v6133_v37 }
 0xcad   : > { %v6115_v55 = vpop.permute.xlu0 %6114 }
 0xcae   : > { %6191 = vst.msk [vmem:[#allocation3 + $0x50] sm:$0xf] %vm6170_vm0, %v6115_v55  ;;  %v6137_v20 = vpop.permute.xlu1 %6136 }
 0xcaf   : > { %6202 = vst.msk [vmem:[#allocation3 + $0x7c] sm:$0xf] %vm6170_vm0, %v6137_v20 }
 0xcb1   : > { %v6119_v47 = vpop.permute.xlu0 %6118 }
 0xcb2   : > { %6193 = vst.msk [vmem:[#allocation3 + $0x58] sm:$0xf] %vm6170_vm0, %v6119_v47 }
 0xcb3   : > { %v11860_v16 = vpop.eup %11859 }
 0xcb4   : > { %v2617_v24 = vmul.f32 %v11860_v16, %v17788_v21  ;;  %v11205_v16 = vld [vmem:[%s12218_s3 + $0xe0] ss:$16 sps:$4 sm:$0xff]   ;;  %v11207_v21 = vld [vmem:[%s12218_s3 + $0xe4] ss:$16 sps:$4 sm:$0xff]  }
 0xcb5   : > { %v3873_v54 = vpop.permute.xlu0 %3872  ;;  %v11199_v23 = vld [vmem:[#allocation3 + $0x50] sm:$0xff]   ;;  %7255 = vmatprep.subr.bf16.mxu1 %v11207_v21 }
 0xcb6   : > { %3945 = vst.msk [vmem:[#allocation3 + $0x60] sm:$0xf] %vm3920_vm3, %v3873_v54  ;;  %v9662_v33 = vpack.c.bf16 %v2617_v24, %v2617_v24  ;;  %11011 = vmatprep.mubr.bf16.mxu0 %v11199_v23  ;;  %v11208_v24 = vld [vmem:[%s12218_s3 + $0xe8] ss:$16 sps:$4 sm:$0xff]   ;;  %v11210_v54 = vld [vmem:[%s12218_s3 + $0xec] ss:$16 sps:$4 sm:$0xff]   ;;  %7256 = vmatpush1.bf16.msra.mxu1 %v11205_v16 }
 0xcb7   : > { %7448 = vmatprep.subr.bf16.mxu0 %v11210_v54  ;;  %v11213_v23 = vld [vmem:[%s12218_s3 + $0xc4] ss:$16 sps:$4 sm:$0xff]  }
 0xcb8   : > { %2778 = vst.msk [vmem:[#allocation3 + $0x78] sm:$0xf] %vm2747_vm2, %v9662_v33  ;;  %7449 = vmatpush1.bf16.msra.mxu0 %v11208_v24  ;;  %v11216_v33 = vld [vmem:[%s12218_s3 + $0xcc] ss:$16 sps:$4 sm:$0xff]   ;;  %7257 = vmatprep.subr.bf16.mxu1 %v11213_v23 }
 0xcb9   : > { %v3877_v28 = vpop.permute.xlu0 %3876  ;;  %v11200_v18 = vld [vmem:[#allocation3 + $0x58] sm:$0xff]   ;;  %7450 = vmatprep.subr.bf16.mxu0 %v11216_v33 }
 0xcba   : > { %3947 = vst.msk [vmem:[#allocation3 + $0x68] sm:$0xf] %vm3920_vm3, %v3877_v28  ;;  %11012 = vmatmul.mubr.bf16.gmra.mxu0 %v11200_v18  ;;  %v11211_v28 = vld [vmem:[%s12218_s3 + $0xc0] ss:$16 sps:$4 sm:$0xff]   ;;  %v11214_v18 = vld [vmem:[%s12218_s3 + $0xc8] ss:$16 sps:$4 sm:$0xff]  }
 0xcbb   : > { %7258 = vmatpush1.bf16.msra.mxu1 %v11211_v28  ;;  %v11945_v28 = vld [vmem:[#allocation2 + $0xe0] sm:$0xff] }
 0xcbc   : > { %7451 = vmatpush1.bf16.msra.mxu0 %v11214_v18 }
 0xcbd   : > { %v4998_v31 = vpop.permute.xlu0 %4997 }
 0xcbe   : > { %5070 = vst.msk [vmem:[#allocation3 + $0x60] sm:$0xf] %vm5045_vm4, %v4998_v31  ;;  %v11219_v31 = vld [vmem:[%s12218_s3 + $0xa4] ss:$16 sps:$4 sm:$0xff]  }
 0xcbf   : > { %7259 = vmatprep.subr.bf16.mxu1 %v11219_v31 }
 0xcc1   : > { %v5002_v63 = vpop.permute.xlu0 %5001 }
 0xcc2   : > { %5072 = vst.msk [vmem:[#allocation3 + $0x68] sm:$0xf] %vm5045_vm4, %v5002_v63  ;;  %v11222_v63 = vld [vmem:[%s12218_s3 + $0xac] ss:$16 sps:$4 sm:$0xff]  }
 0xcc3   : > { %7452 = vmatprep.subr.bf16.mxu0 %v11222_v63 }
 0xcc5   : > { %v6123_v48 = vpop.permute.xlu0 %6122 }
 0xcc6   : > { %6195 = vst.msk [vmem:[#allocation3 + $0x60] sm:$0xf] %vm6170_vm0, %v6123_v48  ;;  %v11217_v48 = vld [vmem:[%s12218_s3 + $0xa0] ss:$16 sps:$4 sm:$0xff]  }
 0xcc7   : > { %7260 = vmatpush1.bf16.msra.mxu1 %v11217_v48 }
 0xcc9   : > { %v6127_v9 = vpop.permute.xlu0 %6126 }
 0xcca   : > { %6197 = vst.msk [vmem:[#allocation3 + $0x68] sm:$0xf] %vm6170_vm0, %v6127_v9  ;;  %v11220_v9 = vld [vmem:[%s12218_s3 + $0xa8] ss:$16 sps:$4 sm:$0xff]  }
 0xccb   : > { %7453 = vmatpush1.bf16.msra.mxu0 %v11220_v9 }
 0xccd   : > { %v3881_v19 = vpop.permute.xlu0 %3880  ;;  %v11201_v11 = vld [vmem:[#allocation3 + $0x60] sm:$0xff]  }
 0xcce   : > { %3949 = vst.msk [vmem:[#allocation3 + $0x70] sm:$0xf] %vm3920_vm3, %v3881_v19  ;;  %11015 = vmatprep.mubr.bf16.mxu0 %v11201_v11  ;;  %v11225_v19 = vld [vmem:[%s12218_s3 + $0x84] ss:$16 sps:$4 sm:$0xff]   ;;  %v11228_v11 = vld [vmem:[%s12218_s3 + $0x8c] ss:$16 sps:$4 sm:$0xff]  }
 0xccf   : > { %7261 = vmatprep.subr.bf16.mxu1 %v11225_v19  ;;  %7454 = vmatprep.subr.bf16.mxu0 %v11228_v11 }
 0xcd1   : > { %v3885_v42 = vpop.permute.xlu0 %3884  ;;  %v11202_v5 = vld [vmem:[#allocation3 + $0x68] sm:$0xff]  }
 0xcd2   : > { %3951 = vst.msk [vmem:[#allocation3 + $0x78] sm:$0xf] %vm3920_vm3, %v3885_v42  ;;  %11016 = vmatmul.mubr.bf16.gmra.mxu0 %v11202_v5  ;;  %v11223_v42 = vld [vmem:[%s12218_s3 + $0x80] ss:$16 sps:$4 sm:$0xff]   ;;  %v11226_v5 = vld [vmem:[%s12218_s3 + $0x88] ss:$16 sps:$4 sm:$0xff]  }
 0xcd3   : > { %7262 = vmatpush1.bf16.msra.mxu1 %v11223_v42  ;;  %7455 = vmatpush1.bf16.msra.mxu0 %v11226_v5  ;;  %v11946_v42 = vld [vmem:[#allocation2 + $0x90] sm:$0xff] }
 0xcd5   : > { %v5006_v32 = vpop.permute.xlu0 %5005 }
 0xcd6   : > { %5074 = vst.msk [vmem:[#allocation3 + $0x70] sm:$0xf] %vm5045_vm4, %v5006_v32  ;;  %v11231_v32 = vld [vmem:[%s12218_s3 + $0x64] ss:$16 sps:$4 sm:$0xff]  }
 0xcd7   : > { %7263 = vmatprep.subr.bf16.mxu1 %v11231_v32 }
 0xcd9   : > { %v5010_v26 = vpop.permute.xlu0 %5009 }
 0xcda   : > { %5076 = vst.msk [vmem:[#allocation3 + $0x78] sm:$0xf] %vm5045_vm4, %v5010_v26  ;;  %v11234_v26 = vld [vmem:[%s12218_s3 + $0x6c] ss:$16 sps:$4 sm:$0xff]  }
 0xcdb   : > { %7456 = vmatprep.subr.bf16.mxu0 %v11234_v26 }
 0xcdd   : > { %v6131_v53 = vpop.permute.xlu0 %6130 }
 0xcde   : > { %6199 = vst.msk [vmem:[#allocation3 + $0x70] sm:$0xf] %vm6170_vm0, %v6131_v53  ;;  %v11229_v53 = vld [vmem:[%s12218_s3 + $0x60] ss:$16 sps:$4 sm:$0xff]  }
 0xcdf   : > { %v6600_v60 = vpop.xlane.xlu1 %6599  ;;  %7264 = vmatpush1.bf16.msra.mxu1 %v11229_v53 }
 0xce0   : > { %v6662_v17 = vmul.f32 0.0078125, %v6600_v60  ;;  %v11249_v60 = vld [vmem:[%s12218_s3 + $0x4] ss:$16 sps:$4 sm:$0xff]  }
 0xce1   : > { %v6135_v10 = vpop.permute.xlu0 %6134 }
 0xce2   : > { %6201 = vst.msk [vmem:[#allocation3 + $0x78] sm:$0xf] %vm6170_vm0, %v6135_v10  ;;  %v15863_v14 = vsub.f32 %v15730_v39, %v6662_v17  ;;  %v11232_v10 = vld [vmem:[%s12218_s3 + $0x68] ss:$16 sps:$4 sm:$0xff]  }
 0xce3   : > { %7457 = vmatpush1.bf16.msra.mxu0 %v11232_v10  ;;  %v11250_v17 = vld [vmem:[%s12218_s3 + $0x8] ss:$16 sps:$4 sm:$0xff]  }
 0xce4   : > { %v6726_v37 = vmul.f32 %v15863_v14, %v15863_v14 }
 0xce5   : > { %v11203_v15 = vld [vmem:[#allocation3 + $0x70] sm:$0xff]  }
 0xce6   : > { %11019 = vmatprep.mubr.bf16.mxu0 %v11203_v15  ;;  %v11237_v15 = vld [vmem:[%s12218_s3 + $0x44] ss:$16 sps:$4 sm:$0xff]  }
 0xce7   : > { %7265 = vmatprep.subr.bf16.mxu1 %v11237_v15  ;;  %v11947_v15 = vld [vmem:[#allocation2 + $0x70] sm:$0xff] }
 0xce9   : > { %v11204_v38 = vld [vmem:[#allocation3 + $0x78] sm:$0xff]  }
 0xcea   : > { %11020 = vmatmul.mubr.bf16.gmra.mxu0 %v11204_v38  ;;  %v11240_v38 = vld [vmem:[%s12218_s3 + $0x4c] ss:$16 sps:$4 sm:$0xff]  }
 0xceb   : > { %7480 = vmatprep.mubr.bf16.mxu0 %v17704_v57  ;;  %7458 = vmatprep.subr.bf16.mxu0 %v11240_v38 }
 0xd00   : > { %v11009_v4 = vpop.f32.mrf.mxu0 }
 0xd01   : > { %v6509_v12 = vadd.f32 %v11009_v4, %v15720_v0  ;;  %v11235_v4 = vld [vmem:[%s12218_s3 + $0x40] ss:$16 sps:$4 sm:$0xff]  }
 0xd02   : > { %v6500_v51 = vpop.f32.mrf.mxu0  ;;  %7266 = vmatpush1.bf16.msra.mxu1 %v11235_v4 }
 0xd03   : > { %v6501_v6 = vadd.f32 %v15720_v0, %v6500_v51  ;;  %v15855_v56 = vadd.f32 %v11942_v43, %v6509_v12  ;;  %v11238_v51 = vld [vmem:[%s12218_s3 + $0x48] ss:$16 sps:$4 sm:$0xff]   ;;  %v11241_v12 = vld [vmem:[%s12218_s3 + $0x20] ss:$16 sps:$4 sm:$0xff]  }
 0xd04   : > { %v11010_v58 = vpop.f32.mrf.mxu0  ;;  %7459 = vmatpush1.bf16.msra.mxu0 %v11238_v51 }
 0xd05   : > { %v15851_v30 = vadd.f32 %v11941_v52, %v6501_v6  ;;  %17789 = vst [vmem:[#allocation23_spill] sm:$0xff] %v15855_v56  ;;  %v6512_v46 = vadd.f32 %v11010_v58, %v15720_v0  ;;  %v11243_v6 = vld [vmem:[%s12218_s3 + $0x24] ss:$16 sps:$4 sm:$0xff]   ;;  %v11246_v58 = vld [vmem:[%s12218_s3 + $0x2c] ss:$16 sps:$4 sm:$0xff]  }
 0xd06   : > { %v6503_v1 = vpop.f32.mrf.mxu0  ;;  %v11244_v52 = vld [vmem:[%s12218_s3 + $0x28] ss:$16 sps:$4 sm:$0xff]   ;;  %7267 = vmatprep.subr.bf16.mxu1 %v11243_v6  ;;  %7460 = vmatprep.subr.bf16.mxu0 %v11246_v58 }
 0xd07   : > { %v6504_v22 = vadd.f32 %v15720_v0, %v6503_v1  ;;  %6629 = vadd.xlane.f32.xlu1 %v15851_v30  ;;  %v15865_v13 = vadd.f32 %v11944_v41, %v6512_v46  ;;  %v11252_v1 = vld [vmem:[%s12218_s3 + $0xc] ss:$16 sps:$4 sm:$0xff]   ;;  %7268 = vmatpush1.bf16.msra.mxu1 %v11241_v12  ;;  %v6606_v41 = vpop.xlane.xlu1 %6605 }
 0xd08   : > { %7461 = vmatpush1.bf16.msra.mxu0 %v11244_v52  ;;  %7269 = vmatprep.subr.bf16.mxu1 %v11249_v60  ;;  %v6665_v48 = vmul.f32 0.0078125, %v6606_v41  ;;  %v11948_v52 = vld [vmem:[#allocation2 + $0xc0] sm:$0xff] }
 0xd09   : > { %v15858_v25 = vadd.f32 %v11943_v2, %v6504_v22  ;;  %17791 = vst [vmem:[#allocation56_spill] sm:$0xff] %v15865_v13  ;;  %v11247_v22 = vld [vmem:[%s12218_s3] ss:$16 sps:$4 sm:$0xff]   ;;  %7462 = vmatprep.subr.bf16.mxu0 %v11252_v1 }
 0xd0a   : > { %v15929_v53 = vsub.f32 %v15738_v62, %v6665_v48 }
 0xd0b   : > { %17790 = vst [vmem:[#allocation55_spill] sm:$0xff] %v15858_v25  ;;  %6631 = vadd.xlane.f32.xlu0 %v15858_v25  ;;  %6633 = vadd.xlane.f32.xlu1 %v15855_v56  ;;  %v6610_v16 = vpop.xlane.xlu1 %6609 }
 0xd0c   : > { %7270 = vmatpush1.bf16.msra.mxu1 %v11247_v22  ;;  %7463 = vmatpush1.bf16.msra.mxu0 %v11250_v17  ;;  %v6729_v1 = vmul.f32 %v15929_v53, %v15929_v53 }
 0xd0f   : > { %6635 = vadd.xlane.f32.xlu0 %v15865_v13  ;;  %v6614_v9 = vpop.xlane.xlu1 %6613 }
 0xd12   : > { %v6598_v59 = vpop.xlane.xlu0 %6597 }
 0xd13   : > { %v6661_v55 = vmul.f32 0.0078125, %v6598_v59  ;;  %6759 = vadd.xlane.f32.xlu0 %v6726_v37  ;;  %v15936_v6 = vpop.xlane.xlu1 %6617 }
 0xd15   : > { %v15871_v20 = vsub.f32 %v15775_v34, %v6661_v55 }
 0xd16   : > { %v6602_v43 = vpop.xlane.xlu0 %6601 }
 0xd17   : > { %v6725_v47 = vmul.f32 %v15871_v20, %v15871_v20  ;;  %v6663_v55 = vmul.f32 0.0078125, %v6602_v43  ;;  %v15948_v22 = vpop.xlane.xlu1 %6621 }
 0xd19   : > { %6757 = vadd.xlane.f32.xlu1 %v6725_v47  ;;  %v15909_v54 = vsub.f32 %v15780_v61, %v6663_v55 }
 0xd1a   : > { %v6604_v46 = vpop.xlane.xlu0 %6603 }
 0xd1b   : > { %v6664_v23 = vmul.f32 0.0078125, %v6604_v46  ;;  %v6727_v32 = vmul.f32 %v15909_v54, %v15909_v54  ;;  %v15955_v41 = vpop.xlane.xlu1 %6625 }
 0xd1d   : > { %v15918_v19 = vsub.f32 %v15790_v45, %v6664_v23 }
 0xd1e   : > { %v6608_v2 = vpop.xlane.xlu0 %6607 }
 0xd1f   : > { %v6666_v10 = vmul.f32 0.0078125, %v6608_v2  ;;  %v6728_v51 = vmul.f32 %v15918_v19, %v15918_v19  ;;  %v6667_v2 = vmul.f32 0.0078125, %v6610_v16 }
 0xd21   : > { %v15940_v58 = vsub.f32 %v15801_v8, %v6666_v10 }
 0xd22   : > { %v6612_v59 = vpop.xlane.xlu0 %6611 }
 0xd23   : > { %v6730_v17 = vmul.f32 %v15940_v58, %v15940_v58  ;;  %v6668_v23 = vmul.f32 0.0078125, %v6612_v59 }
 0xd26   : > { %v15911_v33 = vpop.xlane.xlu0 %6615 }
 0xd2a   : > { %v15925_v26 = vpop.xlane.xlu0 %6619 }
 0xd2e   : > { %v15942_v12 = vpop.xlane.xlu0 %6623 }
 0xd32   : > { %v15953_v43 = vpop.xlane.xlu0 %6627 }
 0xd7a   : > { %v11013_v37 = vpop.f32.mrf.mxu0 }
 0xd7b   : > { %v6525_v11 = vadd.f32 %v11013_v37, %v15720_v0 }
 0xd7c   : > { %v6516_v47 = vpop.f32.mrf.mxu0 }
 0xd7d   : > { %v6517_v21 = vadd.f32 %v15720_v0, %v6516_v47  ;;  %v15931_v38 = vadd.f32 %v11947_v15, %v6525_v11  ;;  %v11950_v15 = vld [vmem:[#allocation2 + $0xd0] sm:$0xff] }
 0xd7e   : > { %v11014_v24 = vpop.f32.mrf.mxu0 }
 0xd7f   : > { %v15913_v18 = vadd.f32 %v11945_v28, %v6517_v21  ;;  %17794 = vst [vmem:[#allocation16_spill] sm:$0xff] %v15931_v38  ;;  %v6528_v4 = vadd.f32 %v11014_v24, %v15720_v0  ;;  %v15961_v24 = vsub.f32 %v15743_v35, %v6667_v2  ;;  %v11951_v2 = vld [vmem:[#allocation2 + $0x10] sm:$0xff] }
 0xd80   : > { %v6519_v31 = vpop.f32.mrf.mxu0 }
 0xd81   : > { %17792 = vst [vmem:[#allocation91_spill] sm:$0xff] %v15913_v18  ;;  %v6520_v63 = vadd.f32 %v15720_v0, %v6519_v31  ;;  %6637 = vadd.xlane.f32.xlu1 %v15913_v18  ;;  %v15944_v60 = vadd.f32 %v11948_v52, %v6528_v4  ;;  %v11949_v31 = vld [vmem:[#allocation2 + $0xa8] sm:$0xff]  ;;  %v6731_v4 = vmul.f32 %v15961_v24, %v15961_v24 }
 0xd83   : > { %v15921_v5 = vadd.f32 %v11946_v42, %v6520_v63  ;;  %17795 = vst [vmem:[#allocation110_spill] sm:$0xff] %v15944_v60  ;;  %v6669_v42 = vmul.f32 0.0078125, %v6614_v9 }
 0xd85   : > { %17793 = vst [vmem:[#allocation113_spill] sm:$0xff] %v15921_v5  ;;  %6639 = vadd.xlane.f32.xlu0 %v15921_v5  ;;  %6761 = vadd.xlane.f32.xlu1 %v6727_v32  ;;  %v15972_v32 = vsub.f32 %v15805_v44, %v6668_v23 }
 0xd89   : > { %6641 = vadd.xlane.f32.xlu1 %v15931_v38  ;;  %6763 = vadd.xlane.f32.xlu0 %v6728_v51 }
 0xd8d   : > { %6765 = vadd.xlane.f32.xlu1 %v6729_v1  ;;  %6643 = vadd.xlane.f32.xlu0 %v15944_v60  ;;  %v15983_v1 = vsub.f32 %v15751_v50, %v6669_v42  ;;  %v11952_v42 = vld [vmem:[#allocation2 + $0x28] sm:$0xff] }
 0xd90   : > { %v15963_v28 = vpop.xlane.xlu1 %6629 }
 0xd91   : > { %6767 = vadd.xlane.f32.xlu0 %v6730_v17  ;;  %v6670_v17 = vmul.f32 0.0078125, %v15911_v33 }
 0xd92   : > { %v11017_v46 = vpop.f32.mrf.mxu0 }
 0xd93   : > { %v6541_v10 = vadd.f32 %v11017_v46, %v15720_v0 }
 0xd94   : > { %v6532_v37 = vpop.f32.mrf.mxu0  ;;  %v15958_v47 = vpop.xlane.xlu0 %6631 }
 0xd95   : > { %v6533_v55 = vadd.f32 %v15720_v0, %v6532_v37  ;;  %v15979_v51 = vpop.xlane.xlu1 %6633  ;;  %v15986_v46 = vadd.f32 %v11951_v2, %v6541_v10  ;;  %v6733_v10 = vmul.f32 %v15983_v1, %v15983_v1 }
 0xd96   : > { %v11018_v21 = vpop.f32.mrf.mxu0 }
 0xd97   : > { %v15965_v63 = vadd.f32 %v11949_v31, %v6533_v55  ;;  %v6544_v37 = vadd.f32 %v11018_v21, %v15720_v0  ;;  %v6732_v55 = vmul.f32 %v15972_v32, %v15972_v32 }
 0xd98   : > { %v6535_v48 = vpop.f32.mrf.mxu0  ;;  %v15968_v11 = vpop.xlane.xlu0 %6635 }
 0xd99   : > { %17796 = vst [vmem:[#allocation112_spill] sm:$0xff] %v15965_v63  ;;  %v6536_v16 = vadd.f32 %v15720_v0, %v6535_v48  ;;  %6645 = vadd.xlane.f32.xlu1 %v15965_v63  ;;  %v15995_v33 = vadd.f32 %v11952_v42, %v6544_v37 }
 0xd9b   : > { %v15975_v59 = vadd.f32 %v11950_v15, %v6536_v16  ;;  %v15993_v16 = vsub.f32 %v15811_v40, %v6670_v17 }
 0xd9c   : > { %v6760_v52 = vpop.xlane.xlu0 %6759 }
 0xd9d   : > { %6769 = vadd.xlane.f32.xlu1 %v6731_v4  ;;  %6647 = vadd.xlane.f32.xlu0 %v15975_v59  ;;  %v6822_v9 = vmul.f32 0.0078125, %v6760_v52  ;;  %v6734_v15 = vmul.f32 %v15993_v16, %v15993_v16  ;;  %v6671_v52 = vmul.f32 0.0078125, %v15936_v6  ;;  %v16016_v6 = vld [vmem:[%s17797_s0] ss:$0 sm:$0xff] }
 0xd9f   : > { %v6854_v23 = vadd.f32 1e-05, %v6822_v9 }
 0xda1   : > { %6649 = vadd.xlane.f32.xlu1 %v15986_v46  ;;  %6771 = vadd.xlane.f32.xlu0 %v6732_v55  ;;  %11861 = vrsqrt.f32 %v6854_v23  ;;  %v16005_v55 = vsub.f32 %v15756_v36, %v6671_v52  ;;  %v6672_v23 = vmul.f32 0.0078125, %v15925_v26 }
 0xda2   : > { %v6758_v31 = vpop.xlane.xlu1 %6757 }
 0xda3   : > { %v6821_v48 = vmul.f32 0.0078125, %v6758_v31  ;;  %v11953_v31 = vld [vmem:[#allocation2 + $0xa0] sm:$0xff]  ;;  %v16022_v52 = vsub.f32 %v15815_v7, %v6672_v23  ;;  %v6675_v23 = vmul.f32 0.0078125, %v15955_v41 }
 0xda5   : > { %v6853_v21 = vadd.f32 1e-05, %v6821_v48  ;;  %6773 = vadd.xlane.f32.xlu1 %v6733_v10  ;;  %6651 = vadd.xlane.f32.xlu0 %v15995_v33  ;;  %v16054_v41 = vsub.f32 %v15795_v3, %v6675_v23 }
 0xda7   : > { %11863 = vrsqrt.f32 %v6853_v21 }
 0xda9   : > { %6775 = vadd.xlane.f32.xlu0 %v6734_v15  ;;  %v6673_v15 = vmul.f32 0.0078125, %v15948_v22  ;;  %v16037_v22 = vld [vmem:[%s17798_s27] ss:$0 sm:$0xff] }
 0xdaa   : > { %v11021_v4 = vpop.f32.mrf.mxu0 }
 0xdac   : > { %v6548_v9 = vpop.f32.mrf.mxu0 }
 0xdad   : > { %v6549_v17 = vadd.f32 %v15720_v0, %v6548_v9  ;;  %v11954_v9 = vld [vmem:[#allocation2 + $0xf8] sm:$0xff] }
 0xdae   : > { %v11022_v2 = vpop.f32.mrf.mxu0  ;;  %v11862_v37 = vpop.eup %11861 }
 0xdaf   : > { %v16008_v48 = vadd.f32 %v11953_v31, %v6549_v17  ;;  %v6918_v42 = vmul.f32 %v11862_v37, %v15863_v14  ;;  %v6557_v14 = vadd.f32 %v11021_v4, %v15720_v0  ;;  %v6735_v37 = vmul.f32 %v16005_v55, %v16005_v55 }
 0xdb0   : > { %v6551_v10 = vpop.f32.mrf.mxu0  ;;  %v16040_v4 = vsub.f32 %v15786_v29, %v6673_v15 }
 0xdb1   : > { %v6552_v21 = vadd.f32 %v15720_v0, %v6551_v10  ;;  %6653 = vadd.xlane.f32.xlu1 %v16008_v48  ;;  %v6956_v31 = vmul.f32 %v16016_v6, %v6918_v42  ;;  %v6674_v42 = vmul.f32 0.0078125, %v15942_v12  ;;  %v6676_v12 = vmul.f32 0.0078125, %v15953_v43 }
 0xdb2   : > { %v6679_v43 = vmul.f32 0.0078125, %v15979_v51 }
 0xdb3   : > { %v16025_v17 = vadd.f32 %v11954_v9, %v6552_v21  ;;  %v11955_v9 = vld [vmem:[#allocation2 + $0x20] sm:$0xff]  ;;  %v6994_v36 = vadd.f32 %v16037_v22, %v6956_v31  ;;  %v6737_v31 = vmul.f32 %v16040_v4, %v16040_v4  ;;  %v16067_v23 = vsub.f32 %v15825_v27, %v6676_v12 }
 0xdb4   : > { %v11864_v26 = vpop.eup %11863 }
 0xdb5   : > { %v6917_v10 = vmul.f32 %v11864_v26, %v15871_v20  ;;  %6777 = vadd.xlane.f32.xlu1 %v6735_v37  ;;  %6655 = vadd.xlane.f32.xlu0 %v16025_v17  ;;  %v16045_v20 = vadd.f32 %v11955_v9, %v6557_v14  ;;  %v6560_v26 = vadd.f32 %v11022_v2, %v15720_v0  ;;  %v6677_v0 = vmul.f32 0.0078125, %v15963_v28  ;;  %v11956_v2 = vld [vmem:[#allocation2 + $0x98] sm:$0xff] }
 0xdb6   : > { %v6736_v37 = vmul.f32 %v16022_v52, %v16022_v52  ;;  %v16058_v14 = vsub.f32 %v15821_v49, %v6674_v42  ;;  %v6678_v28 = vmul.f32 0.0078125, %v15958_v47  ;;  %v6740_v42 = vmul.f32 %v16067_v23, %v16067_v23 }
 0xdb7   : > { %v6955_v21 = vmul.f32 %v16016_v6, %v6917_v10  ;;  %v16061_v10 = vadd.f32 %v11956_v2, %v6560_v26  ;;  %v16083_v9 = vsub.f32 %v15855_v56, %v6679_v43 }
 0xdb8   : > { %v16086_v26 = vsub.f32 %v15858_v25, %v6678_v28 }
 0xdb9   : > { %v6993_v7 = vadd.f32 %v16037_v22, %v6955_v21  ;;  %6657 = vadd.xlane.f32.xlu1 %v16045_v20  ;;  %6779 = vadd.xlane.f32.xlu0 %v6736_v37  ;;  %v6738_v21 = vmul.f32 %v16058_v14, %v16058_v14  ;;  %v6680_v37 = vmul.f32 0.0078125, %v15968_v11  ;;  %v6743_v12 = vmul.f32 %v16083_v9, %v16083_v9 }
 0xdbb   : > { %v7025_v15 = vpack.c.bf16 %v6994_v36, %v6993_v7  ;;  %v6739_v36 = vmul.f32 %v16054_v41, %v16054_v41  ;;  %v16074_v7 = vsub.f32 %v15851_v30, %v6677_v0  ;;  %v16092_v47 = vsub.f32 %v15865_v13, %v6680_v37 }
 0xdbd   : > { %7288 = vmatmul.mubr.bf16.vlgmr.msra.gmra.mxu1 %v7025_v15  ;;  %7481 = vmatmul.mubr.bf16.vlgmr.msra.gmra.mxu0 %v7025_v15  ;;  %v6741_v51 = vmul.f32 %v16074_v7, %v16074_v7  ;;  %v6742_v15 = vmul.f32 %v16086_v26, %v16086_v26  ;;  %v6744_v0 = vmul.f32 %v16092_v47, %v16092_v47 }
 0xdbe   : > { %6781 = vadd.xlane.f32.xlu1 %v6737_v31  ;;  %6659 = vadd.xlane.f32.xlu0 %v16061_v10 }
 0xdbf   : > { %7297 = vmatprep.mubr.bf16.mxu1 %v17704_v57  ;;  %7490 = vmatprep.mubr.bf16.mxu0 %v17704_v57 }
 0xdc2   : > { %6785 = vadd.xlane.f32.xlu1 %v6739_v36  ;;  %6783 = vadd.xlane.f32.xlu0 %v6738_v21 }
 0xdc6   : > { %6789 = vadd.xlane.f32.xlu1 %v6741_v51  ;;  %6787 = vadd.xlane.f32.xlu0 %v6740_v42 }
 0xdca   : > { %6793 = vadd.xlane.f32.xlu1 %v6743_v12  ;;  %6791 = vadd.xlane.f32.xlu0 %v6742_v15 }
 0xdce   : > { %6795 = vadd.xlane.f32.xlu0 %v6744_v0 }
 0xe0a   : > { %v6638_v11 = vpop.xlane.xlu1 %6637 }
 0xe0b   : > { %v6681_v2 = vmul.f32 0.0078125, %v6638_v11 }
 0xe0d   : > { %v16101_v31 = vsub.f32 %v15913_v18, %v6681_v2 }
 0xe0e   : > { %v6762_v36 = vpop.xlane.xlu1 %6761  ;;  %v6640_v43 = vpop.xlane.xlu0 %6639 }
 0xe0f   : > { %v6823_v28 = vmul.f32 0.0078125, %v6762_v36  ;;  %v6682_v21 = vmul.f32 0.0078125, %v6640_v43  ;;  %v6745_v42 = vmul.f32 %v16101_v31, %v16101_v31 }
 0xe11   : > { %v6855_v37 = vadd.f32 1e-05, %v6823_v28  ;;  %v16106_v51 = vsub.f32 %v15921_v5, %v6682_v21  ;;  %6797 = vadd.xlane.f32.xlu1 %v6745_v42 }
 0xe12   : > { %v6642_v12 = vpop.xlane.xlu1 %6641  ;;  %v6764_v15 = vpop.xlane.xlu0 %6763 }
 0xe13   : > { %11865 = vrsqrt.f32 %v6855_v37  ;;  %v6683_v0 = vmul.f32 0.0078125, %v6642_v12  ;;  %v6824_v11 = vmul.f32 0.0078125, %v6764_v15  ;;  %v6746_v2 = vmul.f32 %v16106_v51, %v16106_v51 }
 0xe15   : > { %v16111_v18 = vsub.f32 %v15931_v38, %v6683_v0  ;;  %v6856_v36 = vadd.f32 1e-05, %v6824_v11  ;;  %6799 = vadd.xlane.f32.xlu0 %v6746_v2 }
 0xe16   : > { %v6766_v43 = vpop.xlane.xlu1 %6765  ;;  %v6644_v13 = vpop.xlane.xlu0 %6643 }
 0xe17   : > { %11867 = vrsqrt.f32 %v6856_v36  ;;  %v6825_v28 = vmul.f32 0.0078125, %v6766_v43  ;;  %v6684_v21 = vmul.f32 0.0078125, %v6644_v13  ;;  %v6747_v42 = vmul.f32 %v16111_v18, %v16111_v18 }
 0xe19   : > { %v6857_v5 = vadd.f32 1e-05, %v6825_v28  ;;  %v16116_v37 = vsub.f32 %v15944_v60, %v6684_v21  ;;  %6801 = vadd.xlane.f32.xlu1 %v6747_v42 }
 0xe1a   : > { %v6768_v12 = vpop.xlane.xlu0 %6767 }
 0xe1b   : > { %11869 = vrsqrt.f32 %v6857_v5  ;;  %v6826_v15 = vmul.f32 0.0078125, %v6768_v12  ;;  %v6748_v0 = vmul.f32 %v16116_v37, %v16116_v37 }
 0xe1d   : > { %v6858_v11 = vadd.f32 1e-05, %v6826_v15  ;;  %6803 = vadd.xlane.f32.xlu0 %v6748_v0 }
 0xe1f   : > { %11871 = vrsqrt.f32 %v6858_v11 }
 0xe20   : > { %v11866_v2 = vpop.eup %11865 }
 0xe21   : > { %v6919_v13 = vmul.f32 %v11866_v2, %v15909_v54 }
 0xe22   : > { %v6646_v36 = vpop.xlane.xlu1 %6645 }
 0xe23   : > { %v6685_v43 = vmul.f32 0.0078125, %v6646_v36  ;;  %v6957_v5 = vmul.f32 %v16016_v6, %v6919_v13 }
 0xe24   : > { %v11868_v38 = vpop.eup %11867 }
 0xe25   : > { %v16122_v28 = vsub.f32 %v15965_v63, %v6685_v43  ;;  %v6920_v21 = vmul.f32 %v11868_v38, %v15918_v19  ;;  %v6995_v36 = vadd.f32 %v16037_v22, %v6957_v5 }
 0xe26   : > { %v6770_v42 = vpop.xlane.xlu1 %6769  ;;  %v6648_v12 = vpop.xlane.xlu0 %6647 }
 0xe27   : > { %v6827_v60 = vmul.f32 0.0078125, %v6770_v42  ;;  %v6686_v56 = vmul.f32 0.0078125, %v6648_v12  ;;  %v6749_v15 = vmul.f32 %v16122_v28, %v16122_v28  ;;  %v6958_v0 = vmul.f32 %v16016_v6, %v6920_v21 }
 0xe28   : > { %v11870_v54 = vpop.eup %11869 }
 0xe29   : > { %v6859_v11 = vadd.f32 1e-05, %v6827_v60  ;;  %v16130_v2 = vsub.f32 %v15975_v59, %v6686_v56  ;;  %6805 = vadd.xlane.f32.xlu1 %v6749_v15  ;;  %v6996_v19 = vadd.f32 %v16037_v22, %v6958_v0  ;;  %v6921_v43 = vmul.f32 %v11870_v54, %v15929_v53 }
 0xe2a   : > { %v6650_v38 = vpop.xlane.xlu1 %6649  ;;  %v6772_v13 = vpop.xlane.xlu0 %6771 }
 0xe2b   : > { %11873 = vrsqrt.f32 %v6859_v11  ;;  %v6687_v42 = vmul.f32 0.0078125, %v6650_v38  ;;  %v6828_v12 = vmul.f32 0.0078125, %v6772_v13  ;;  %v7026_v63 = vpack.c.bf16 %v6996_v19, %v6995_v36 }
 0xe2c   : > { %v11872_v25 = vpop.eup %11871  ;;  %v6750_v60 = vmul.f32 %v16130_v2, %v16130_v2  ;;  %v6959_v53 = vmul.f32 %v16016_v6, %v6921_v43 }
 0xe2d   : > { %v16138_v56 = vsub.f32 %v15986_v46, %v6687_v42  ;;  %v6860_v21 = vadd.f32 1e-05, %v6828_v12  ;;  %7298 = vmatmul.mubr.bf16.gmra.mxu1 %v7026_v63  ;;  %7491 = vmatmul.mubr.bf16.gmra.mxu0 %v7026_v63  ;;  %v6922_v5 = vmul.f32 %v11872_v25, %v15940_v58 }
 0xe2e   : > { %6807 = vadd.xlane.f32.xlu0 %v6750_v60  ;;  %v6774_v15 = vpop.xlane.xlu1 %6773  ;;  %v6652_v0 = vpop.xlane.xlu0 %6651  ;;  %7307 = vmatprep.mubr.bf16.mxu1 %v17704_v57  ;;  %v6997_v38 = vadd.f32 %v16037_v22, %v6959_v53 }
 0xe2f   : > { %11875 = vrsqrt.f32 %v6860_v21  ;;  %v6829_v54 = vmul.f32 0.0078125, %v6774_v15  ;;  %v6688_v11 = vmul.f32 0.0078125, %v6652_v0  ;;  %v6751_v36 = vmul.f32 %v16138_v56, %v16138_v56  ;;  %7500 = vmatprep.mubr.bf16.mxu0 %v17704_v57 }
 0xe30   : > { %v6960_v19 = vmul.f32 %v16016_v6, %v6922_v5 }
 0xe31   : > { %v6861_v63 = vadd.f32 1e-05, %v6829_v54  ;;  %v16148_v25 = vsub.f32 %v15995_v33, %v6688_v11  ;;  %6809 = vadd.xlane.f32.xlu1 %v6751_v36 }
 0xe32   : > { %v6776_v58 = vpop.xlane.xlu0 %6775  ;;  %v6998_v13 = vadd.f32 %v16037_v22, %v6960_v19 }
 0xe33   : > { %11877 = vrsqrt.f32 %v6861_v63  ;;  %v6830_v43 = vmul.f32 0.0078125, %v6776_v58  ;;  %v6752_v42 = vmul.f32 %v16148_v25, %v16148_v25 }
 0xe34   : > { %v7027_v12 = vpack.c.bf16 %v6998_v13, %v6997_v38 }
 0xe35   : > { %v6862_v60 = vadd.f32 1e-05, %v6830_v43  ;;  %6811 = vadd.xlane.f32.xlu0 %v6752_v42 }
 0xe36   : > { %7308 = vmatmul.mubr.bf16.gmra.mxu1 %v7027_v12  ;;  %7501 = vmatmul.mubr.bf16.gmra.mxu0 %v7027_v12 }
 0xe37   : > { %11879 = vrsqrt.f32 %v6862_v60  ;;  %7317 = vmatprep.mubr.bf16.mxu1 %v17704_v57  ;;  %7510 = vmatprep.mubr.bf16.mxu0 %v17704_v57 }
 0xe38   : > { %v11874_v21 = vpop.eup %11873 }
 0xe39   : > { %v6923_v5 = vmul.f32 %v11874_v21, %v15961_v24 }
 0xe3a   : > { %v6654_v15 = vpop.xlane.xlu1 %6653 }
 0xe3b   : > { %v6689_v0 = vmul.f32 0.0078125, %v6654_v15  ;;  %v6961_v36 = vmul.f32 %v16016_v6, %v6923_v5 }
 0xe3c   : > { %v11876_v53 = vpop.eup %11875 }
 0xe3d   : > { %v16158_v54 = vsub.f32 %v16008_v48, %v6689_v0  ;;  %v6924_v11 = vmul.f32 %v11876_v53, %v15972_v32  ;;  %v6999_v60 = vadd.f32 %v16037_v22, %v6961_v36 }
 0xe3e   : > { %v6778_v19 = vpop.xlane.xlu1 %6777  ;;  %v6656_v63 = vpop.xlane.xlu0 %6655 }
 0xe3f   : > { %v6831_v58 = vmul.f32 0.0078125, %v6778_v19  ;;  %v6690_v38 = vmul.f32 0.0078125, %v6656_v63  ;;  %v6753_v13 = vmul.f32 %v16158_v54, %v16158_v54  ;;  %v6962_v43 = vmul.f32 %v16016_v6, %v6924_v11 }
 0xe40   : > { %v11878_v24 = vpop.eup %11877 }
 0xe41   : > { %v6863_v42 = vadd.f32 1e-05, %v6831_v58  ;;  %v16166_v12 = vsub.f32 %v16025_v17, %v6690_v38  ;;  %6813 = vadd.xlane.f32.xlu1 %v6753_v13  ;;  %v7000_v32 = vadd.f32 %v16037_v22, %v6962_v43  ;;  %v6925_v15 = vmul.f32 %v11878_v24, %v15983_v1 }
 0xe42   : > { %v6658_v21 = vpop.xlane.xlu1 %6657  ;;  %v6780_v5 = vpop.xlane.xlu0 %6779 }
 0xe43   : > { %11881 = vrsqrt.f32 %v6863_v42  ;;  %v6691_v0 = vmul.f32 0.0078125, %v6658_v21  ;;  %v6832_v53 = vmul.f32 0.0078125, %v6780_v5  ;;  %v7028_v19 = vpack.c.bf16 %v7000_v32, %v6999_v60 }
 0xe44   : > { %v11880_v63 = vpop.eup %11879  ;;  %v6754_v11 = vmul.f32 %v16166_v12, %v16166_v12  ;;  %v6963_v1 = vmul.f32 %v16016_v6, %v6925_v15 }
 0xe45   : > { %v16174_v58 = vsub.f32 %v16045_v20, %v6691_v0  ;;  %v6864_v38 = vadd.f32 1e-05, %v6832_v53  ;;  %7318 = vmatmul.mubr.bf16.gmra.mxu1 %v7028_v19  ;;  %7511 = vmatmul.mubr.bf16.gmra.mxu0 %v7028_v19  ;;  %v6926_v36 = vmul.f32 %v11880_v63, %v15993_v16 }
 0xe46   : > { %6815 = vadd.xlane.f32.xlu0 %v6754_v11  ;;  %7327 = vmatprep.mubr.bf16.mxu1 %v17704_v57  ;;  %v7001_v53 = vadd.f32 %v16037_v22, %v6963_v1 }
 0xe47   : > { %v6782_v13 = vpop.xlane.xlu1 %6781  ;;  %v6660_v43 = vpop.xlane.xlu0 %6659  ;;  %11883 = vrsqrt.f32 %v6864_v38  ;;  %v6755_v60 = vmul.f32 %v16174_v58, %v16174_v58  ;;  %7520 = vmatprep.mubr.bf16.mxu0 %v17704_v57  ;;  %v6964_v32 = vmul.f32 %v16016_v6, %v6926_v36 }
 0xe48   : > { %v6833_v24 = vmul.f32 0.0078125, %v6782_v13  ;;  %v6692_v42 = vmul.f32 0.0078125, %v6660_v43 }
 0xe49   : > { %6817 = vadd.xlane.f32.xlu1 %v6755_v60  ;;  %v7002_v15 = vadd.f32 %v16037_v22, %v6964_v32 }
 0xe4a   : > { %v6865_v21 = vadd.f32 1e-05, %v6833_v24  ;;  %v16184_v16 = vsub.f32 %v16061_v10, %v6692_v42 }
 0xe4b   : > { %v6786_v5 = vpop.xlane.xlu1 %6785  ;;  %v6784_v0 = vpop.xlane.xlu0 %6783  ;;  %v7029_v38 = vpack.c.bf16 %v7002_v15, %v7001_v53 }
 0xe4c   : > { %11885 = vrsqrt.f32 %v6865_v21  ;;  %v6835_v19 = vmul.f32 0.0078125, %v6786_v5  ;;  %v6834_v63 = vmul.f32 0.0078125, %v6784_v0  ;;  %v6756_v11 = vmul.f32 %v16184_v16, %v16184_v16 }
 0xe4d   : > { %7328 = vmatmul.mubr.bf16.gmra.mxu1 %v7029_v38  ;;  %7521 = vmatmul.mubr.bf16.gmra.mxu0 %v7029_v38 }
 0xe4e   : > { %v6866_v13 = vadd.f32 1e-05, %v6834_v63  ;;  %6819 = vadd.xlane.f32.xlu0 %v6756_v11  ;;  %v6867_v36 = vadd.f32 1e-05, %v6835_v19  ;;  %7337 = vmatprep.mubr.bf16.mxu1 %v17704_v57 }
 0xe4f   : > { %v6788_v43 = vpop.xlane.xlu0 %6787  ;;  %v6790_v24 = vpop.xlane.xlu1 %6789  ;;  %7530 = vmatprep.mubr.bf16.mxu0 %v17704_v57 }
 0xe50   : > { %v6836_v42 = vmul.f32 0.0078125, %v6788_v43  ;;  %v11882_v1 = vpop.eup %11881  ;;  %11887 = vrsqrt.f32 %v6866_v13  ;;  %v6837_v21 = vmul.f32 0.0078125, %v6790_v24 }
 0xe51   : > { %v6927_v32 = vmul.f32 %v11882_v1, %v16005_v55  ;;  %11889 = vrsqrt.f32 %v6867_v36 }
 0xe52   : > { %v6868_v60 = vadd.f32 1e-05, %v6836_v42  ;;  %v6869_v11 = vadd.f32 1e-05, %v6837_v21 }
 0xe53   : > { %v6792_v5 = vpop.xlane.xlu0 %6791  ;;  %v6965_v63 = vmul.f32 %v16016_v6, %v6927_v32  ;;  %v6794_v38 = vpop.xlane.xlu1 %6793  ;;  %v11254_v32 = vld [vmem:[%s12229_s1 + $0xf8] sm:$0xff]  }
 0xe54   : > { %v6838_v0 = vmul.f32 0.0078125, %v6792_v5  ;;  %v11884_v53 = vpop.eup %11883  ;;  %11891 = vrsqrt.f32 %v6868_v60  ;;  %v6839_v24 = vmul.f32 0.0078125, %v6794_v38  ;;  %v11253_v60 = vld [vmem:[%s12229_s1 + $0x78] sm:$0xff]   ;;  %10303 = vmatprep.subr.bf16.mxu0 %v11254_v32 }
 0xe55   : > { %v6928_v19 = vmul.f32 %v11884_v53, %v16022_v52  ;;  %v7003_v42 = vadd.f32 %v16037_v22, %v6965_v63  ;;  %v11255_v5 = vld [vmem:[%s12229_s1 + $0x38] sm:$0xff]   ;;  %10191 = vmatprep.subr.bf16.mxu1 %v11253_v60 }
 0xe56   : > { %v6870_v15 = vadd.f32 1e-05, %v6838_v0  ;;  %v11256_v0 = vld [vmem:[%s12229_s1 + $0xb8] sm:$0xff]   ;;  %10192 = vmatpush3.bf16.msra.mxu1 %v11255_v5 }
 0xe57   : > { %v6796_v13 = vpop.xlane.xlu0 %6795  ;;  %v6966_v55 = vmul.f32 %v16016_v6, %v6928_v19  ;;  %v11258_v19 = vld [vmem:[%s12229_s1 + $0xf0] sm:$0xff]   ;;  %10304 = vmatpush3.bf16.msra.mxu0 %v11256_v0  ;;  %v11263_v0 = vld [vmem:[%s12229_s1 + $0x28] sm:$0xff]  }
 0xe58   : > { %11893 = vrsqrt.f32 %v6870_v15  ;;  %v6840_v43 = vmul.f32 0.0078125, %v6796_v13  ;;  %v11257_v15 = vld [vmem:[%s12229_s1 + $0x70] sm:$0xff]   ;;  %v6871_v13 = vadd.f32 1e-05, %v6839_v24  ;;  %10305 = vmatprep.subr.bf16.mxu0 %v11258_v19  ;;  %v11261_v24 = vld [vmem:[%s12229_s1 + $0x68] sm:$0xff]   ;;  %v11265_v19 = vld [vmem:[%s12229_s1 + $0x60] sm:$0xff]  }
 0xe59   : > { %v11886_v36 = vpop.eup %11885  ;;  %v7004_v1 = vadd.f32 %v16037_v22, %v6966_v55  ;;  %11895 = vrsqrt.f32 %v6869_v11  ;;  %v11259_v55 = vld [vmem:[%s12229_s1 + $0x30] sm:$0xff]   ;;  %10193 = vmatprep.subr.bf16.mxu1 %v11257_v15 }
 0xe5a   : > { %v6929_v52 = vmul.f32 %v11886_v36, %v16040_v4  ;;  %v6872_v53 = vadd.f32 1e-05, %v6840_v43  ;;  %v11260_v36 = vld [vmem:[%s12229_s1 + $0xb0] sm:$0xff]   ;;  %10194 = vmatpush3.bf16.msra.mxu1 %v11259_v55 }
 0xe5b   : > { %v7030_v21 = vpack.c.bf16 %v7004_v1, %v7003_v42  ;;  %v11262_v42 = vld [vmem:[%s12229_s1 + $0xe8] sm:$0xff]   ;;  %10306 = vmatpush3.bf16.msra.mxu0 %v11260_v36  ;;  %10195 = vmatprep.subr.bf16.mxu1 %v11261_v24  ;;  %v11270_v24 = vld [vmem:[%s12229_s1 + $0xd8] sm:$0xff]  }
 0xe5c   : > { %v6967_v63 = vmul.f32 %v16016_v6, %v6929_v52  ;;  %11897 = vrsqrt.f32 %v6872_v53  ;;  %10307 = vmatprep.subr.bf16.mxu0 %v11262_v42  ;;  %v11264_v53 = vld [vmem:[%s12229_s1 + $0xa8] sm:$0xff]  }
 0xe5d   : > { %v11888_v38 = vpop.eup %11887  ;;  %7338 = vmatmul.mubr.bf16.gmra.mxu1 %v7030_v21  ;;  %7531 = vmatmul.mubr.bf16.gmra.mxu0 %v7030_v21  ;;  %11899 = vrsqrt.f32 %v6871_v13 }
 0xe5e   : > { %7347 = vmatprep.mubr.bf16.mxu1 %v17704_v57  ;;  %7540 = vmatprep.mubr.bf16.mxu0 %v17704_v57  ;;  %v6930_v4 = vmul.f32 %v11888_v38, %v16058_v14  ;;  %v11890_v11 = vpop.eup %11889  ;;  %v7005_v14 = vadd.f32 %v16037_v22, %v6967_v63  ;;  %v11266_v38 = vld [vmem:[%s12229_s1 + $0xe0] sm:$0xff]  }
 0xe5f   : > { %v6931_v60 = vmul.f32 %v11890_v11, %v16054_v41  ;;  %10196 = vmatpush3.bf16.msra.mxu1 %v11263_v0  ;;  %10308 = vmatpush3.bf16.msra.mxu0 %v11264_v53  ;;  %v11267_v63 = vld [vmem:[%s12229_s1 + $0x20] sm:$0xff]   ;;  %v11275_v53 = vld [vmem:[%s12229_s1 + $0x10] sm:$0xff]  }
 0xe60   : > { %v6968_v43 = vmul.f32 %v16016_v6, %v6930_v4  ;;  %v11268_v11 = vld [vmem:[%s12229_s1 + $0xa0] sm:$0xff]   ;;  %10197 = vmatprep.subr.bf16.mxu1 %v11265_v19  ;;  %10309 = vmatprep.subr.bf16.mxu0 %v11266_v38 }
 0xe61   : > { %v11892_v1 = vpop.eup %11891  ;;  %v6969_v41 = vmul.f32 %v16016_v6, %v6931_v60 }
 0xe62   : > { %v7006_v52 = vadd.f32 %v16037_v22, %v6968_v43  ;;  %v6932_v32 = vmul.f32 %v11892_v1, %v16067_v23  ;;  %v11269_v43 = vld [vmem:[%s12229_s1 + $0x58] sm:$0xff]  }
 0xe63   : > { %v7007_v55 = vadd.f32 %v16037_v22, %v6969_v41  ;;  %10198 = vmatpush3.bf16.msra.mxu1 %v11267_v63  ;;  %10310 = vmatpush3.bf16.msra.mxu0 %v11268_v11  ;;  %v11277_v41 = vld [vmem:[%s12229_s1 + $0x48] sm:$0xff]  }
 0xe64   : > { %v7031_v21 = vpack.c.bf16 %v7006_v52, %v7005_v14  ;;  %v6970_v5 = vmul.f32 %v16016_v6, %v6932_v32  ;;  %v11272_v14 = vld [vmem:[%s12229_s1 + $0x98] sm:$0xff]   ;;  %10199 = vmatprep.subr.bf16.mxu1 %v11269_v43  ;;  %10311 = vmatprep.subr.bf16.mxu0 %v11270_v24  ;;  %v11273_v32 = vld [vmem:[%s12229_s1 + $0x50] sm:$0xff]   ;;  %v11280_v63 = vld [vmem:[%s12229_s1 + $0x88] sm:$0xff]  }
 0xe65   : > { %v11894_v15 = vpop.eup %11893  ;;  %v11283_v43 = vld [vmem:[%s12229_s1] sm:$0xff]  }
 0xe66   : > { %7348 = vmatmul.mubr.bf16.gmra.mxu1 %v7031_v21  ;;  %7541 = vmatmul.mubr.bf16.gmra.mxu0 %v7031_v21  ;;  %v11896_v23 = vpop.eup %11895  ;;  %v7008_v13 = vadd.f32 %v16037_v22, %v6970_v5  ;;  %v6934_v4 = vmul.f32 %v11894_v15, %v16086_v26  ;;  %v11271_v26 = vld [vmem:[%s12229_s1 + $0x18] sm:$0xff]   ;;  %v11274_v21 = vld [vmem:[%s12229_s1 + $0xd0] sm:$0xff]   ;;  %v11284_v24 = vld [vmem:[%s12229_s1 + $0x80] sm:$0xff]  }
 0xe67   : > { %7357 = vmatprep.mubr.bf16.mxu1 %v17704_v57  ;;  %7550 = vmatprep.mubr.bf16.mxu0 %v17704_v57  ;;  %v6933_v36 = vmul.f32 %v11896_v23, %v16074_v7  ;;  %v11276_v15 = vld [vmem:[%s12229_s1 + $0x90] sm:$0xff]   ;;  %v11278_v23 = vld [vmem:[%s12229_s1 + $0xc8] sm:$0xff]  }
 0xe68   : > { %v7032_v42 = vpack.c.bf16 %v7008_v13, %v7007_v55  ;;  %v6972_v1 = vmul.f32 %v16016_v6, %v6934_v4  ;;  %10200 = vmatpush3.bf16.msra.mxu1 %v11271_v26  ;;  %10312 = vmatpush3.bf16.msra.mxu0 %v11272_v14  ;;  %v11281_v55 = vld [vmem:[%s12229_s1 + $0x40] sm:$0xff]  }
 0xe69   : > { %v11898_v52 = vpop.eup %11897  ;;  %v6971_v7 = vmul.f32 %v16016_v6, %v6933_v36  ;;  %10201 = vmatprep.subr.bf16.mxu1 %v11273_v32  ;;  %10313 = vmatprep.subr.bf16.mxu0 %v11274_v21  ;;  %v11282_v36 = vld [vmem:[%s12229_s1 + $0xc0] sm:$0xff]  }
 0xe6a   : > { %v11900_v60 = vpop.eup %11899  ;;  %v7010_v5 = vadd.f32 %v16037_v22, %v6972_v1  ;;  %v6936_v0 = vmul.f32 %v11898_v52, %v16092_v47  ;;  %v11279_v47 = vld [vmem:[%s12229_s1 + $0x8] sm:$0xff]  }
 0xe6b   : > { %v7009_v19 = vadd.f32 %v16037_v22, %v6971_v7  ;;  %v6935_v38 = vmul.f32 %v11900_v60, %v16083_v9 }
 0xe6c   : > { %v6974_v4 = vmul.f32 %v16016_v6, %v6936_v0  ;;  %10202 = vmatpush3.bf16.msra.mxu1 %v11275_v53  ;;  %10314 = vmatpush3.bf16.msra.mxu0 %v11276_v15 }
 0xe6d   : > { %v7033_v13 = vpack.c.bf16 %v7010_v5, %v7009_v19  ;;  %10203 = vmatprep.subr.bf16.mxu1 %v11277_v41  ;;  %10315 = vmatprep.subr.bf16.mxu0 %v11278_v23  ;;  %v6973_v11 = vmul.f32 %v16016_v6, %v6935_v38 }
 0xe6e   : > { %7358 = vmatmul.mubr.bf16.gmra.mxu1 %v7032_v42  ;;  %7551 = vmatmul.mubr.bf16.gmra.mxu0 %v7032_v42  ;;  %v7012_v9 = vadd.f32 %v16037_v22, %v6974_v4 }
 0xe6f   : > { %7367 = vmatprep.mubr.bf16.mxu1 %v17704_v57  ;;  %7560 = vmatprep.mubr.bf16.mxu0 %v17704_v57  ;;  %v7011_v42 = vadd.f32 %v16037_v22, %v6973_v11 }
 0xe70   : > { %10204 = vmatpush3.bf16.msra.mxu1 %v11279_v47  ;;  %10316 = vmatpush3.bf16.msra.mxu0 %v11280_v63 }
 0xe71   : > { %10205 = vmatprep.subr.bf16.mxu1 %v11281_v55  ;;  %10317 = vmatprep.subr.bf16.mxu0 %v11282_v36  ;;  %v7034_v1 = vpack.c.bf16 %v7012_v9, %v7011_v42 }
 0xe74   : > { %10206 = vmatpush3.bf16.msra.mxu1 %v11283_v43  ;;  %10318 = vmatpush3.bf16.msra.mxu0 %v11284_v24 }
 0xe76   : > { %7368 = vmatmul.mubr.bf16.gmra.mxu1 %v7033_v13  ;;  %7561 = vmatmul.mubr.bf16.gmra.mxu0 %v7033_v13 }
 0xe77   : > { %7377 = vmatprep.mubr.bf16.mxu1 %v17704_v57  ;;  %7570 = vmatprep.mubr.bf16.mxu0 %v17704_v57 }
 0xe7e   : > { %7378 = vmatmul.mubr.bf16.gmra.mxu1 %v7034_v1  ;;  %7571 = vmatmul.mubr.bf16.gmra.mxu0 %v7034_v1 }
 0xe7f   : > { %7387 = vmatprep.mubr.bf16.mxu1 %v17704_v57  ;;  %7580 = vmatprep.mubr.bf16.mxu0 %v17704_v57 }
 0xe9a   : > { %v6798_v26 = vpop.xlane.xlu1 %6797 }
 0xe9b   : > { %v6841_v14 = vmul.f32 0.0078125, %v6798_v26 }
 0xe9d   : > { %v6873_v52 = vadd.f32 1e-05, %v6841_v14 }
 0xe9e   : > { %v6800_v60 = vpop.xlane.xlu0 %6799 }
 0xe9f   : > { %11901 = vrsqrt.f32 %v6873_v52  ;;  %v6842_v7 = vmul.f32 0.0078125, %v6800_v60 }
 0xea1   : > { %v6874_v32 = vadd.f32 1e-05, %v6842_v7 }
 0xea2   : > { %v6802_v21 = vpop.xlane.xlu1 %6801 }
 0xea3   : > { %11903 = vrsqrt.f32 %v6874_v32  ;;  %v6843_v5 = vmul.f32 0.0078125, %v6802_v21 }
 0xea5   : > { %v6875_v0 = vadd.f32 1e-05, %v6843_v5 }
 0xea6   : > { %v6804_v53 = vpop.xlane.xlu0 %6803 }
 0xea7   : > { %11905 = vrsqrt.f32 %v6875_v0  ;;  %v6844_v15 = vmul.f32 0.0078125, %v6804_v53 }
 0xea9   : > { %v6876_v19 = vadd.f32 1e-05, %v6844_v15 }
 0xeab   : > { %11907 = vrsqrt.f32 %v6876_v19 }
 0xeac   : > { %v11902_v38 = vpop.eup %11901 }
 0xead   : > { %v6937_v41 = vmul.f32 %v11902_v38, %v16101_v31 }
 0xeaf   : > { %v6975_v4 = vmul.f32 %v16016_v6, %v6937_v41 }
 0xeb0   : > { %v11904_v23 = vpop.eup %11903 }
 0xeb1   : > { %v6938_v13 = vmul.f32 %v11904_v23, %v16106_v51  ;;  %v7013_v9 = vadd.f32 %v16037_v22, %v6975_v4 }
 0xeb2   : > { %v6806_v47 = vpop.xlane.xlu1 %6805 }
 0xeb3   : > { %v6845_v63 = vmul.f32 0.0078125, %v6806_v47  ;;  %v6976_v11 = vmul.f32 %v16016_v6, %v6938_v13 }
 0xeb4   : > { %v11906_v55 = vpop.eup %11905 }
 0xeb5   : > { %v6877_v36 = vadd.f32 1e-05, %v6845_v63  ;;  %v7014_v43 = vadd.f32 %v16037_v22, %v6976_v11  ;;  %v6939_v24 = vmul.f32 %v11906_v55, %v16111_v18 }
 0xeb7   : > { %11909 = vrsqrt.f32 %v6877_v36  ;;  %v6808_v42 = vpop.xlane.xlu0 %6807  ;;  %v7035_v31 = vpack.c.bf16 %v7014_v43, %v7013_v9  ;;  %v6977_v14 = vmul.f32 %v16016_v6, %v6939_v24 }
 0xeb8   : > { %v11908_v1 = vpop.eup %11907  ;;  %v6846_v26 = vmul.f32 0.0078125, %v6808_v42 }
 0xeb9   : > { %7388 = vmatmul.mubr.bf16.gmra.mxu1 %v7035_v31  ;;  %7581 = vmatmul.mubr.bf16.gmra.mxu0 %v7035_v31  ;;  %v6940_v51 = vmul.f32 %v11908_v1, %v16116_v37  ;;  %v7015_v21 = vadd.f32 %v16037_v22, %v6977_v14 }
 0xeba   : > { %v6878_v52 = vadd.f32 1e-05, %v6846_v26  ;;  %v6810_v60 = vpop.xlane.xlu1 %6809  ;;  %7397 = vmatprep.mubr.bf16.mxu1 %v17704_v57  ;;  %7590 = vmatprep.mubr.bf16.mxu0 %v17704_v57 }
 0xebb   : > { %v6847_v7 = vmul.f32 0.0078125, %v6810_v60  ;;  %v6978_v18 = vmul.f32 %v16016_v6, %v6940_v51 }
 0xebc   : > { %11911 = vrsqrt.f32 %v6878_v52 }
 0xebd   : > { %v6879_v32 = vadd.f32 1e-05, %v6847_v7  ;;  %v7016_v5 = vadd.f32 %v16037_v22, %v6978_v18 }
 0xebe   : > { %v6812_v0 = vpop.xlane.xlu0 %6811 }
 0xebf   : > { %11913 = vrsqrt.f32 %v6879_v32  ;;  %v6848_v37 = vmul.f32 0.0078125, %v6812_v0  ;;  %v7036_v53 = vpack.c.bf16 %v7016_v5, %v7015_v21  ;;  %v7289_v5 = vpop.f32.mrf.mxu1  ;;  %v7482_v0 = vpop.f32.mrf.mxu0 }
 0xec1   : > { %v6880_v15 = vadd.f32 1e-05, %v6848_v37  ;;  %7398 = vmatmul.mubr.bf16.gmra.mxu1 %v7036_v53  ;;  %7591 = vmatmul.mubr.bf16.gmra.mxu0 %v7036_v53  ;;  %v7291_v53 = vpop.f32.mrf.mxu1 }
 0xec2   : > { %7407 = vmatprep.mubr.bf16.mxu1 %v17704_v57  ;;  %7600 = vmatprep.mubr.bf16.mxu0 %v17704_v57 }
 0xec3   : > { %11915 = vrsqrt.f32 %v6880_v15  ;;  %v7484_v15 = vpop.f32.mrf.mxu0 }
 0xec4   : > { %v11910_v19 = vpop.eup %11909 }
 0xec5   : > { %v6941_v38 = vmul.f32 %v11910_v19, %v16122_v28 }
 0xec7   : > { %v6979_v4 = vmul.f32 %v16016_v6, %v6941_v38 }
 0xec9   : > { %v11912_v41 = vpop.eup %11911  ;;  %v7017_v9 = vadd.f32 %v16037_v22, %v6979_v4  ;;  %v7486_v4 = vpop.f32.mrf.mxu0 }
 0xeca   : > { %v6814_v23 = vpop.xlane.xlu1 %6813  ;;  %v6942_v13 = vmul.f32 %v11912_v41, %v16130_v2  ;;  %v17799_v41 = vld [vmem:[#allocation18_spill] sm:$0xff] }
 0xecb   : > { %v6849_v47 = vmul.f32 0.0078125, %v6814_v23  ;;  %v7081_v23 = vsub.s32 1, %v17799_v41 }
 0xecc   : > { %v11914_v63 = vpop.eup %11913  ;;  %v6980_v11 = vmul.f32 %v16016_v6, %v6942_v13  ;;  %v7293_v13 = vpop.f32.mrf.mxu1 }
 0xecd   : > { %v6881_v55 = vadd.f32 1e-05, %v6849_v47  ;;  %v6943_v36 = vmul.f32 %v11914_v63, %v16138_v56 }
 0xece   : > { %v7018_v43 = vadd.f32 %v16037_v22, %v6980_v11  ;;  %v7089_v11 = vsub.s32 3, %v17799_v41 }
 0xecf   : > { %11917 = vrsqrt.f32 %v6881_v55  ;;  %v6816_v24 = vpop.xlane.xlu0 %6815  ;;  %v6981_v1 = vmul.f32 %v16016_v6, %v6943_v36 }
 0xed0   : > { %v11916_v28 = vpop.eup %11915  ;;  %v6850_v42 = vmul.f32 0.0078125, %v6816_v24  ;;  %v7037_v31 = vpack.c.bf16 %v7018_v43, %v7017_v9  ;;  %v7073_v9 = vld [vmem:[%s12224_s25] sm:$0xf] }
 0xed1   : > { %v6944_v2 = vmul.f32 %v11916_v28, %v16148_v25  ;;  %v7019_v60 = vadd.f32 %v16037_v22, %v6981_v1  ;;  %v16304_v24 = vrot.slane %v7073_v9, %v7081_v23  ;;  %v7488_v28 = vpop.f32.mrf.mxu0  ;;  %v7077_v1 = vsub.s32 0, %v17799_v41 }
 0xed2   : > { %v6882_v26 = vadd.f32 1e-05, %v6850_v42  ;;  %7408 = vmatmul.mubr.bf16.gmra.mxu1 %v7037_v31  ;;  %7601 = vmatmul.mubr.bf16.gmra.mxu0 %v7037_v31  ;;  %v6818_v51 = vpop.xlane.xlu1 %6817 }
 0xed3   : > { %v6851_v14 = vmul.f32 0.0078125, %v6818_v51  ;;  %7417 = vmatprep.mubr.bf16.mxu1 %v17704_v57  ;;  %7610 = vmatprep.mubr.bf16.mxu0 %v17704_v57  ;;  %v6982_v56 = vmul.f32 %v16016_v6, %v6944_v2  ;;  %v16308_v2 = vrot.slane %v7073_v9, %v7089_v11 }
 0xed4   : > { %11919 = vrsqrt.f32 %v6882_v26  ;;  %v7085_v26 = vsub.s32 2, %v17799_v41 }
 0xed5   : > { %v6883_v52 = vadd.f32 1e-05, %v6851_v14  ;;  %v7020_v7 = vadd.f32 %v16037_v22, %v6982_v56 }
 0xed7   : > { %v6820_v25 = vpop.xlane.xlu0 %6819  ;;  %11921 = vrsqrt.f32 %v6883_v52  ;;  %v7038_v32 = vpack.c.bf16 %v7020_v7, %v7019_v60  ;;  %v7292_v60 = vadd.f32 %v7291_v53, %v16304_v24  ;;  %v7485_v7 = vadd.f32 %v7484_v15, %v16308_v2 }
 0xed8   : > { %v6852_v18 = vmul.f32 0.0078125, %v6820_v25 }
 0xed9   : > { %v7642_v41 = vmax.f32 %v7292_v60, 0.0  ;;  %v7644_v15 = vmax.f32 %v7485_v7, 0.0 }
 0xeda   : > { %v6884_v21 = vadd.f32 1e-05, %v6852_v18  ;;  %7418 = vmatmul.mubr.bf16.gmra.mxu1 %v7038_v32  ;;  %7611 = vmatmul.mubr.bf16.gmra.mxu0 %v7038_v32  ;;  %v16321_v18 = vrot.slane %v7073_v9, %v7077_v1  ;;  %v16323_v32 = vrot.slane %v7073_v9, %v7085_v26 }
 0xedb   : > { %7427 = vmatprep.mubr.bf16.mxu1 %v17704_v57  ;;  %7620 = vmatprep.mubr.bf16.mxu0 %v17704_v57 }
 0xedc   : > { %11923 = vrsqrt.f32 %v6884_v21  ;;  %v11918_v37 = vpop.eup %11917  ;;  %v7294_v23 = vadd.f32 %v7293_v13, %v16321_v18  ;;  %v7290_v11 = vadd.f32 %v7289_v5, %v16321_v18 }
 0xedd   : > { %v6945_v19 = vmul.f32 %v11918_v37, %v16158_v54  ;;  %v7295_v54 = vpop.f32.mrf.mxu1 }
 0xede   : > { %v7296_v14 = vadd.f32 %v7295_v54, %v16304_v24  ;;  %v7645_v13 = vmax.f32 %v7294_v23, 0.0 }
 0xedf   : > { %v6983_v63 = vmul.f32 %v16016_v6, %v6945_v19 }
 0xee0   : > { %v7646_v21 = vmax.f32 %v7296_v14, 0.0 }
 0xee1   : > { %v11920_v38 = vpop.eup %11919  ;;  %v7021_v42 = vadd.f32 %v16037_v22, %v6983_v63 }
 0xee2   : > { %v6946_v47 = vmul.f32 %v11920_v38, %v16166_v12 }
 0xee4   : > { %v11922_v55 = vpop.eup %11921  ;;  %v6984_v36 = vmul.f32 %v16016_v6, %v6946_v47 }
 0xee5   : > { %v6947_v43 = vmul.f32 %v11922_v55, %v16174_v58  ;;  %v7489_v58 = vadd.f32 %v7488_v28, %v16308_v2  ;;  %v7483_v55 = vadd.f32 %v7482_v0, %v16323_v32 }
 0xee6   : > { %v7022_v31 = vadd.f32 %v16037_v22, %v6984_v36 }
 0xee7   : > { %v6985_v52 = vmul.f32 %v16016_v6, %v6947_v43  ;;  %v7770_v43 = vpack.c.bf16 %v7646_v21, %v7642_v41  ;;  %v7643_v1 = vmax.f32 %v7483_v55, 0.0 }
 0xee8   : > { %v7039_v51 = vpack.c.bf16 %v7022_v31, %v7021_v42 }
 0xee9   : > { %v11924_v12 = vpop.eup %11923  ;;  %v7023_v53 = vadd.f32 %v16037_v22, %v6985_v52 }
 0xeea   : > { %v6948_v56 = vmul.f32 %v11924_v12, %v16184_v16  ;;  %7428 = vmatmul.mubr.bf16.gmra.mxu1 %v7039_v51  ;;  %7621 = vmatmul.mubr.bf16.gmra.mxu0 %v7039_v51  ;;  %v7648_v16 = vmax.f32 %v7489_v58, 0.0  ;;  %v7641_v12 = vmax.f32 %v7290_v11, 0.0 }
 0xeeb   : > { %7437 = vmatprep.mubr.bf16.mxu1 %v17704_v57  ;;  %7630 = vmatprep.mubr.bf16.mxu0 %v17704_v57  ;;  %v7487_v57 = vadd.f32 %v7486_v4, %v16323_v32 }
 0xeec   : > { %v6986_v25 = vmul.f32 %v16016_v6, %v6948_v56  ;;  %v7772_v54 = vpack.c.bf16 %v7648_v16, %v7644_v15  ;;  %v7769_v60 = vpack.c.bf16 %v7645_v13, %v7641_v12 }
 0xeed   : > { %v7299_v37 = vpop.f32.mrf.mxu1  ;;  %v7492_v19 = vpop.f32.mrf.mxu0  ;;  %v7647_v42 = vmax.f32 %v7487_v57, 0.0 }
 0xeee   : > { %v7024_v38 = vadd.f32 %v16037_v22, %v6986_v25  ;;  %v7300_v15 = vadd.f32 %v7299_v37, %v16321_v18  ;;  %v7493_v23 = vadd.f32 %v7492_v19, %v16323_v32 }
 0xeef   : > { %v7301_v47 = vpop.f32.mrf.mxu1  ;;  %v7494_v6 = vpop.f32.mrf.mxu0  ;;  %v7771_v7 = vpack.c.bf16 %v7647_v42, %v7643_v1 }
 0xef0   : > { %v7040_v63 = vpack.c.bf16 %v7024_v38, %v7023_v53  ;;  %v7302_v28 = vadd.f32 %v7301_v47, %v16304_v24  ;;  %v7495_v22 = vadd.f32 %v7494_v6, %v16308_v2  ;;  %v7651_v19 = vmax.f32 %v7493_v23, 0.0 }
 0xef1   : > { %v7303_v36 = vpop.f32.mrf.mxu1  ;;  %v7496_v9 = vpop.f32.mrf.mxu0 }
 0xef2   : > { %7438 = vmatmul.mubr.bf16.gmra.mxu1 %v7040_v63  ;;  %7631 = vmatmul.mubr.bf16.gmra.mxu0 %v7040_v63  ;;  %v7650_v26 = vmax.f32 %v7302_v28, 0.0  ;;  %v7652_v51 = vmax.f32 %v7495_v22, 0.0  ;;  %v7304_v25 = vadd.f32 %v7303_v36, %v16321_v18  ;;  %v7497_v21 = vadd.f32 %v7496_v9, %v16323_v32 }
 0xef3   : > { %8128 = vmatprep.mubr.bf16.mxu1 %v7770_v43  ;;  %8289 = vmatprep.mubr.bf16.mxu0 %v7772_v54  ;;  %v7305_v4 = vpop.f32.mrf.mxu1  ;;  %v7498_v31 = vpop.f32.mrf.mxu0  ;;  %v7649_v54 = vmax.f32 %v7300_v15, 0.0 }
 0xef4   : > { %v7306_v5 = vadd.f32 %v7305_v4, %v16304_v24  ;;  %v7499_v0 = vadd.f32 %v7498_v31, %v16308_v2  ;;  %v7653_v11 = vmax.f32 %v7304_v25, 0.0  ;;  %v7655_v55 = vmax.f32 %v7497_v21, 0.0 }
 0xef6   : > { %v7654_v14 = vmax.f32 %v7306_v5, 0.0  ;;  %v7656_v58 = vmax.f32 %v7499_v0, 0.0  ;;  %v7309_v56 = vpop.f32.mrf.mxu1  ;;  %v7502_v52 = vpop.f32.mrf.mxu0  ;;  %v7773_v4 = vpack.c.bf16 %v7653_v11, %v7649_v54  ;;  %v7775_v31 = vpack.c.bf16 %v7655_v55, %v7651_v19 }
 0xef8   : > { %v7311_v16 = vpop.f32.mrf.mxu1  ;;  %v7504_v53 = vpop.f32.mrf.mxu0  ;;  %v7774_v38 = vpack.c.bf16 %v7654_v14, %v7650_v26  ;;  %v7776_v41 = vpack.c.bf16 %v7656_v58, %v7652_v51  ;;  %v7310_v26 = vadd.f32 %v7309_v56, %v16321_v18  ;;  %v7503_v51 = vadd.f32 %v7502_v52, %v16323_v32 }
 0xef9   : > { %v7312_v6 = vadd.f32 %v7311_v16, %v16304_v24  ;;  %v7505_v63 = vadd.f32 %v7504_v53, %v16308_v2 }
 0xefa   : > { %v7313_v57 = vpop.f32.mrf.mxu1  ;;  %v7506_v47 = vpop.f32.mrf.mxu0  ;;  %8129 = vmatmul.mubr.bf16.vlgmr.msra.gmra.mxu1 %v7769_v60  ;;  %8290 = vmatmul.mubr.bf16.vlgmr.msra.gmra.mxu0 %v7771_v7  ;;  %v7657_v25 = vmax.f32 %v7310_v26, 0.0  ;;  %v7659_v21 = vmax.f32 %v7503_v51, 0.0 }
 0xefb   : > { %8136 = vmatprep.mubr.bf16.mxu1 %v7774_v38  ;;  %8297 = vmatprep.mubr.bf16.mxu0 %v7776_v41  ;;  %v7658_v28 = vmax.f32 %v7312_v6, 0.0  ;;  %v7660_v22 = vmax.f32 %v7505_v63, 0.0  ;;  %v7314_v5 = vadd.f32 %v7313_v57, %v16321_v18  ;;  %v7507_v0 = vadd.f32 %v7506_v47, %v16323_v32 }
 0xefc   : > { %v7315_v36 = vpop.f32.mrf.mxu1  ;;  %v7508_v9 = vpop.f32.mrf.mxu0 }
 0xefd   : > { %v7316_v43 = vadd.f32 %v7315_v36, %v16304_v24  ;;  %v7509_v37 = vadd.f32 %v7508_v9, %v16308_v2  ;;  %v7661_v14 = vmax.f32 %v7314_v5, 0.0  ;;  %v7663_v58 = vmax.f32 %v7507_v0, 0.0 }
 0xeff   : > { %v7662_v13 = vmax.f32 %v7316_v43, 0.0  ;;  %v7664_v42 = vmax.f32 %v7509_v37, 0.0  ;;  %v7777_v38 = vpack.c.bf16 %v7661_v14, %v7657_v25  ;;  %v7779_v41 = vpack.c.bf16 %v7663_v58, %v7659_v21 }
 0xf01   : > { %v7778_v12 = vpack.c.bf16 %v7662_v13, %v7658_v28  ;;  %v7780_v1 = vpack.c.bf16 %v7664_v42, %v7660_v22 }
 0xf02   : > { %8137 = vmatmul.mubr.bf16.gmra.mxu1 %v7773_v4  ;;  %8298 = vmatmul.mubr.bf16.gmra.mxu0 %v7775_v31 }
 0xf03   : > { %8144 = vmatprep.mubr.bf16.mxu1 %v7778_v12  ;;  %8305 = vmatprep.mubr.bf16.mxu0 %v7780_v1 }
 0xf05   : > { %v7319_v60 = vpop.f32.mrf.mxu1  ;;  %v7512_v7 = vpop.f32.mrf.mxu0 }
 0xf06   : > { %v7320_v6 = vadd.f32 %v7319_v60, %v16321_v18  ;;  %v7513_v63 = vadd.f32 %v7512_v7, %v16323_v32 }
 0xf07   : > { %v7321_v16 = vpop.f32.mrf.mxu1  ;;  %v7514_v53 = vpop.f32.mrf.mxu0 }
 0xf08   : > { %v7322_v15 = vadd.f32 %v7321_v16, %v16304_v24  ;;  %v7515_v52 = vadd.f32 %v7514_v53, %v16308_v2  ;;  %v7665_v4 = vmax.f32 %v7320_v6, 0.0  ;;  %v7667_v31 = vmax.f32 %v7513_v63, 0.0 }
 0xf09   : > { %v7323_v23 = vpop.f32.mrf.mxu1  ;;  %v7516_v56 = vpop.f32.mrf.mxu0 }
 0xf0a   : > { %v7324_v57 = vadd.f32 %v7323_v23, %v16321_v18  ;;  %v7517_v47 = vadd.f32 %v7516_v56, %v16323_v32  ;;  %8145 = vmatmul.mubr.bf16.gmra.mxu1 %v7777_v38  ;;  %8306 = vmatmul.mubr.bf16.gmra.mxu0 %v7779_v41  ;;  %v7666_v54 = vmax.f32 %v7322_v15, 0.0  ;;  %v7668_v19 = vmax.f32 %v7515_v52, 0.0 }
 0xf0b   : > { %v7325_v11 = vpop.f32.mrf.mxu1  ;;  %v7518_v55 = vpop.f32.mrf.mxu0 }
 0xf0c   : > { %v7326_v36 = vadd.f32 %v7325_v11, %v16304_v24  ;;  %v7519_v9 = vadd.f32 %v7518_v55, %v16308_v2  ;;  %v7669_v43 = vmax.f32 %v7324_v57, 0.0  ;;  %v7671_v37 = vmax.f32 %v7517_v47, 0.0 }
 0xf0d   : > { %v7329_v13 = vpop.f32.mrf.mxu1  ;;  %v7522_v42 = vpop.f32.mrf.mxu0 }
 0xf0e   : > { %v7670_v28 = vmax.f32 %v7326_v36, 0.0  ;;  %v7672_v22 = vmax.f32 %v7519_v9, 0.0  ;;  %v7781_v26 = vpack.c.bf16 %v7669_v43, %v7665_v4  ;;  %v7783_v51 = vpack.c.bf16 %v7671_v37, %v7667_v31 }
 0xf0f   : > { %v7331_v5 = vpop.f32.mrf.mxu1  ;;  %v7524_v0 = vpop.f32.mrf.mxu0  ;;  %v7330_v16 = vadd.f32 %v7329_v13, %v16321_v18  ;;  %v7523_v53 = vadd.f32 %v7522_v42, %v16323_v32 }
 0xf10   : > { %v7782_v12 = vpack.c.bf16 %v7670_v28, %v7666_v54  ;;  %v7784_v1 = vpack.c.bf16 %v7672_v22, %v7668_v19  ;;  %v7332_v14 = vadd.f32 %v7331_v5, %v16304_v24  ;;  %v7525_v7 = vadd.f32 %v7524_v0, %v16308_v2 }
 0xf11   : > { %v7333_v58 = vpop.f32.mrf.mxu1  ;;  %v7526_v60 = vpop.f32.mrf.mxu0  ;;  %v7673_v11 = vmax.f32 %v7330_v16, 0.0  ;;  %v7675_v55 = vmax.f32 %v7523_v53, 0.0 }
 0xf12   : > { %8152 = vmatprep.mubr.bf16.mxu1 %v7782_v12  ;;  %8313 = vmatprep.mubr.bf16.mxu0 %v7784_v1  ;;  %v7334_v25 = vadd.f32 %v7333_v58, %v16321_v18  ;;  %v7527_v21 = vadd.f32 %v7526_v60, %v16323_v32  ;;  %v7674_v57 = vmax.f32 %v7332_v14, 0.0  ;;  %v7676_v47 = vmax.f32 %v7525_v7, 0.0 }
 0xf13   : > { %8153 = vmatmul.mubr.bf16.gmra.mxu1 %v7781_v26  ;;  %8314 = vmatmul.mubr.bf16.gmra.mxu0 %v7783_v51  ;;  %v7335_v38 = vpop.f32.mrf.mxu1  ;;  %v7528_v41 = vpop.f32.mrf.mxu0 }
 0xf14   : > { %v7336_v15 = vadd.f32 %v7335_v38, %v16304_v24  ;;  %v7529_v23 = vadd.f32 %v7528_v41, %v16308_v2  ;;  %v7677_v56 = vmax.f32 %v7334_v25, 0.0  ;;  %v7679_v52 = vmax.f32 %v7527_v21, 0.0 }
 0xf16   : > { %v7678_v6 = vmax.f32 %v7336_v15, 0.0  ;;  %v7680_v63 = vmax.f32 %v7529_v23, 0.0  ;;  %v7785_v43 = vpack.c.bf16 %v7677_v56, %v7673_v11  ;;  %v7787_v37 = vpack.c.bf16 %v7679_v52, %v7675_v55 }
 0xf18   : > { %v7786_v36 = vpack.c.bf16 %v7678_v6, %v7674_v57  ;;  %v7788_v9 = vpack.c.bf16 %v7680_v63, %v7676_v47 }
 0xf1a   : > { %8160 = vmatprep.mubr.bf16.mxu1 %v7786_v36  ;;  %8321 = vmatprep.mubr.bf16.mxu0 %v7788_v9 }
 0xf1b   : > { %8161 = vmatmul.mubr.bf16.gmra.mxu1 %v7785_v43  ;;  %8322 = vmatmul.mubr.bf16.gmra.mxu0 %v7787_v37 }
 0xf1d   : > { %v7339_v54 = vpop.f32.mrf.mxu1  ;;  %v7532_v19 = vpop.f32.mrf.mxu0 }
 0xf1e   : > { %v7340_v12 = vadd.f32 %v7339_v54, %v16321_v18  ;;  %v7533_v1 = vadd.f32 %v7532_v19, %v16323_v32 }
 0xf1f   : > { %v7341_v28 = vpop.f32.mrf.mxu1  ;;  %v7534_v22 = vpop.f32.mrf.mxu0 }
 0xf20   : > { %v7342_v4 = vadd.f32 %v7341_v28, %v16304_v24  ;;  %v7535_v31 = vadd.f32 %v7534_v22, %v16308_v2  ;;  %v7681_v15 = vmax.f32 %v7340_v12, 0.0  ;;  %v7683_v23 = vmax.f32 %v7533_v1, 0.0 }
 0xf21   : > { %v7343_v13 = vpop.f32.mrf.mxu1  ;;  %v7536_v42 = vpop.f32.mrf.mxu0 }
 0xf22   : > { %v7344_v5 = vadd.f32 %v7343_v13, %v16321_v18  ;;  %v7537_v0 = vadd.f32 %v7536_v42, %v16323_v32  ;;  %v7682_v25 = vmax.f32 %v7342_v4, 0.0  ;;  %v7684_v21 = vmax.f32 %v7535_v31, 0.0 }
 0xf23   : > { %v7345_v26 = vpop.f32.mrf.mxu1  ;;  %v7538_v51 = vpop.f32.mrf.mxu0 }
 0xf24   : > { %v7346_v14 = vadd.f32 %v7345_v26, %v16304_v24  ;;  %v7539_v58 = vadd.f32 %v7538_v51, %v16308_v2  ;;  %v7685_v60 = vmax.f32 %v7344_v5, 0.0  ;;  %v7687_v7 = vmax.f32 %v7537_v0, 0.0 }
 0xf26   : > { %v7686_v16 = vmax.f32 %v7346_v14, 0.0  ;;  %v7688_v53 = vmax.f32 %v7539_v58, 0.0  ;;  %v7349_v38 = vpop.f32.mrf.mxu1  ;;  %v7542_v41 = vpop.f32.mrf.mxu0  ;;  %v7789_v6 = vpack.c.bf16 %v7685_v60, %v7681_v15  ;;  %v7791_v63 = vpack.c.bf16 %v7687_v7, %v7683_v23 }
 0xf27   : > { %v7350_v54 = vadd.f32 %v7349_v38, %v16321_v18  ;;  %v7543_v19 = vadd.f32 %v7542_v41, %v16323_v32 }
 0xf28   : > { %v7790_v56 = vpack.c.bf16 %v7686_v16, %v7682_v25  ;;  %v7792_v52 = vpack.c.bf16 %v7688_v53, %v7684_v21  ;;  %v7351_v57 = vpop.f32.mrf.mxu1  ;;  %v7544_v47 = vpop.f32.mrf.mxu0 }
 0xf29   : > { %v7352_v11 = vadd.f32 %v7351_v57, %v16304_v24  ;;  %v7545_v9 = vadd.f32 %v7544_v47, %v16308_v2  ;;  %v7689_v14 = vmax.f32 %v7350_v54, 0.0  ;;  %v7691_v58 = vmax.f32 %v7543_v19, 0.0 }
 0xf2a   : > { %v7353_v55 = vpop.f32.mrf.mxu1  ;;  %v7546_v36 = vpop.f32.mrf.mxu0  ;;  %8168 = vmatprep.mubr.bf16.mxu1 %v7790_v56  ;;  %8329 = vmatprep.mubr.bf16.mxu0 %v7792_v52 }
 0xf2b   : > { %v7354_v43 = vadd.f32 %v7353_v55, %v16321_v18  ;;  %v7547_v37 = vadd.f32 %v7546_v36, %v16323_v32  ;;  %8169 = vmatmul.mubr.bf16.gmra.mxu1 %v7789_v6  ;;  %8330 = vmatmul.mubr.bf16.gmra.mxu0 %v7791_v63  ;;  %v7690_v12 = vmax.f32 %v7352_v11, 0.0  ;;  %v7692_v1 = vmax.f32 %v7545_v9, 0.0 }
 0xf2c   : > { %v7355_v28 = vpop.f32.mrf.mxu1  ;;  %v7548_v22 = vpop.f32.mrf.mxu0 }
 0xf2d   : > { %v7356_v13 = vadd.f32 %v7355_v28, %v16304_v24  ;;  %v7549_v42 = vadd.f32 %v7548_v22, %v16308_v2  ;;  %v7693_v4 = vmax.f32 %v7354_v43, 0.0  ;;  %v7695_v31 = vmax.f32 %v7547_v37, 0.0 }
 0xf2e   : > { %v7359_v5 = vpop.f32.mrf.mxu1  ;;  %v7552_v0 = vpop.f32.mrf.mxu0 }
 0xf2f   : > { %v7694_v26 = vmax.f32 %v7356_v13, 0.0  ;;  %v7696_v51 = vmax.f32 %v7549_v42, 0.0  ;;  %v7793_v16 = vpack.c.bf16 %v7693_v4, %v7689_v14  ;;  %v7795_v53 = vpack.c.bf16 %v7695_v31, %v7691_v58 }
 0xf30   : > { %v7361_v60 = vpop.f32.mrf.mxu1  ;;  %v7554_v7 = vpop.f32.mrf.mxu0  ;;  %v7360_v57 = vadd.f32 %v7359_v5, %v16321_v18  ;;  %v7553_v47 = vadd.f32 %v7552_v0, %v16323_v32 }
 0xf31   : > { %v7794_v25 = vpack.c.bf16 %v7694_v26, %v7690_v12  ;;  %v7796_v21 = vpack.c.bf16 %v7696_v51, %v7692_v1  ;;  %v7362_v38 = vadd.f32 %v7361_v60, %v16304_v24  ;;  %v7555_v23 = vadd.f32 %v7554_v7, %v16308_v2 }
 0xf32   : > { %v7363_v41 = vpop.f32.mrf.mxu1  ;;  %v7556_v15 = vpop.f32.mrf.mxu0  ;;  %v7697_v13 = vmax.f32 %v7360_v57, 0.0  ;;  %v7699_v42 = vmax.f32 %v7553_v47, 0.0 }
 0xf33   : > { %v7364_v56 = vadd.f32 %v7363_v41, %v16321_v18  ;;  %v7557_v52 = vadd.f32 %v7556_v15, %v16323_v32  ;;  %8176 = vmatprep.mubr.bf16.mxu1 %v7794_v25  ;;  %8337 = vmatprep.mubr.bf16.mxu0 %v7796_v21  ;;  %v7698_v54 = vmax.f32 %v7362_v38, 0.0  ;;  %v7700_v19 = vmax.f32 %v7555_v23, 0.0 }
 0xf34   : > { %v7365_v6 = vpop.f32.mrf.mxu1  ;;  %v7558_v63 = vpop.f32.mrf.mxu0  ;;  %8177 = vmatmul.mubr.bf16.gmra.mxu1 %v7793_v16  ;;  %8338 = vmatmul.mubr.bf16.gmra.mxu0 %v7795_v53 }
 0xf35   : > { %v7366_v11 = vadd.f32 %v7365_v6, %v16304_v24  ;;  %v7559_v55 = vadd.f32 %v7558_v63, %v16308_v2  ;;  %v7701_v36 = vmax.f32 %v7364_v56, 0.0  ;;  %v7703_v9 = vmax.f32 %v7557_v52, 0.0 }
 0xf36   : > { %v7369_v43 = vpop.f32.mrf.mxu1  ;;  %v7562_v37 = vpop.f32.mrf.mxu0 }
 0xf37   : > { %v7702_v28 = vmax.f32 %v7366_v11, 0.0  ;;  %v7704_v22 = vmax.f32 %v7559_v55, 0.0  ;;  %v7797_v12 = vpack.c.bf16 %v7701_v36, %v7697_v13  ;;  %v7799_v1 = vpack.c.bf16 %v7703_v9, %v7699_v42 }
 0xf38   : > { %v7371_v4 = vpop.f32.mrf.mxu1  ;;  %v7564_v31 = vpop.f32.mrf.mxu0  ;;  %v7370_v25 = vadd.f32 %v7369_v43, %v16321_v18  ;;  %v7563_v21 = vadd.f32 %v7562_v37, %v16323_v32 }
 0xf39   : > { %v7798_v5 = vpack.c.bf16 %v7702_v28, %v7698_v54  ;;  %v7800_v0 = vpack.c.bf16 %v7704_v22, %v7700_v19  ;;  %v7372_v26 = vadd.f32 %v7371_v4, %v16304_v24  ;;  %v7565_v58 = vadd.f32 %v7564_v31, %v16308_v2 }
 0xf3a   : > { %v7373_v51 = vpop.f32.mrf.mxu1  ;;  %v7566_v14 = vpop.f32.mrf.mxu0  ;;  %v7705_v11 = vmax.f32 %v7370_v25, 0.0  ;;  %v7707_v55 = vmax.f32 %v7563_v21, 0.0 }
 0xf3b   : > { %v7374_v60 = vadd.f32 %v7373_v51, %v16321_v18  ;;  %v7567_v7 = vadd.f32 %v7566_v14, %v16323_v32  ;;  %8184 = vmatprep.mubr.bf16.mxu1 %v7798_v5  ;;  %8345 = vmatprep.mubr.bf16.mxu0 %v7800_v0  ;;  %v7706_v57 = vmax.f32 %v7372_v26, 0.0  ;;  %v7708_v47 = vmax.f32 %v7565_v58, 0.0 }
 0xf3c   : > { %v7375_v16 = vpop.f32.mrf.mxu1  ;;  %v7568_v53 = vpop.f32.mrf.mxu0  ;;  %8185 = vmatmul.mubr.bf16.gmra.mxu1 %v7797_v12  ;;  %8346 = vmatmul.mubr.bf16.gmra.mxu0 %v7799_v1 }
 0xf3d   : > { %v7376_v38 = vadd.f32 %v7375_v16, %v16304_v24  ;;  %v7569_v41 = vadd.f32 %v7568_v53, %v16308_v2  ;;  %v7709_v15 = vmax.f32 %v7374_v60, 0.0  ;;  %v7711_v23 = vmax.f32 %v7567_v7, 0.0 }
 0xf3e   : > { %v7379_v56 = vpop.f32.mrf.mxu1  ;;  %v7572_v52 = vpop.f32.mrf.mxu0 }
 0xf3f   : > { %v7710_v6 = vmax.f32 %v7376_v38, 0.0  ;;  %v7712_v63 = vmax.f32 %v7569_v41, 0.0  ;;  %v7801_v54 = vpack.c.bf16 %v7709_v15, %v7705_v11  ;;  %v7803_v19 = vpack.c.bf16 %v7711_v23, %v7707_v55 }
 0xf40   : > { %v7381_v36 = vpop.f32.mrf.mxu1  ;;  %v7574_v9 = vpop.f32.mrf.mxu0  ;;  %v7380_v5 = vadd.f32 %v7379_v56, %v16321_v18  ;;  %v7573_v0 = vadd.f32 %v7572_v52, %v16323_v32 }
 0xf41   : > { %v7802_v43 = vpack.c.bf16 %v7710_v6, %v7706_v57  ;;  %v7804_v37 = vpack.c.bf16 %v7712_v63, %v7708_v47  ;;  %v7382_v28 = vadd.f32 %v7381_v36, %v16304_v24  ;;  %v7575_v42 = vadd.f32 %v7574_v9, %v16308_v2 }
 0xf42   : > { %v7383_v22 = vpop.f32.mrf.mxu1  ;;  %v7576_v13 = vpop.f32.mrf.mxu0  ;;  %v7713_v16 = vmax.f32 %v7380_v5, 0.0  ;;  %v7715_v53 = vmax.f32 %v7573_v0, 0.0 }
 0xf43   : > { %v7384_v4 = vadd.f32 %v7383_v22, %v16321_v18  ;;  %v7577_v31 = vadd.f32 %v7576_v13, %v16323_v32  ;;  %8192 = vmatprep.mubr.bf16.mxu1 %v7802_v43  ;;  %8353 = vmatprep.mubr.bf16.mxu0 %v7804_v37  ;;  %v7714_v60 = vmax.f32 %v7382_v28, 0.0  ;;  %v7716_v7 = vmax.f32 %v7575_v42, 0.0 }
 0xf44   : > { %v7385_v12 = vpop.f32.mrf.mxu1  ;;  %v7578_v1 = vpop.f32.mrf.mxu0  ;;  %8193 = vmatmul.mubr.bf16.gmra.mxu1 %v7801_v54  ;;  %8354 = vmatmul.mubr.bf16.gmra.mxu0 %v7803_v19 }
 0xf45   : > { %v7386_v26 = vadd.f32 %v7385_v12, %v16304_v24  ;;  %v7579_v51 = vadd.f32 %v7578_v1, %v16308_v2  ;;  %v7717_v14 = vmax.f32 %v7384_v4, 0.0  ;;  %v7719_v58 = vmax.f32 %v7577_v31, 0.0 }
 0xf47   : > { %v7718_v25 = vmax.f32 %v7386_v26, 0.0  ;;  %v7720_v21 = vmax.f32 %v7579_v51, 0.0  ;;  %v7805_v15 = vpack.c.bf16 %v7717_v14, %v7713_v16  ;;  %v7807_v23 = vpack.c.bf16 %v7719_v58, %v7715_v53 }
 0xf49   : > { %v7806_v38 = vpack.c.bf16 %v7718_v25, %v7714_v60  ;;  %v7808_v41 = vpack.c.bf16 %v7720_v21, %v7716_v7 }
 0xf4b   : > { %8200 = vmatprep.mubr.bf16.mxu1 %v7806_v38  ;;  %8361 = vmatprep.mubr.bf16.mxu0 %v7808_v41 }
 0xf4c   : > { %8201 = vmatmul.mubr.bf16.gmra.mxu1 %v7805_v15  ;;  %8362 = vmatmul.mubr.bf16.gmra.mxu0 %v7807_v23 }
 0xf79   : > { %v7389_v56 = vpop.f32.mrf.mxu1  ;;  %v7582_v52 = vpop.f32.mrf.mxu0 }
 0xf7a   : > { %v7390_v43 = vadd.f32 %v7389_v56, %v16321_v18  ;;  %v7583_v37 = vadd.f32 %v7582_v52, %v16323_v32 }
 0xf7b   : > { %v7391_v57 = vpop.f32.mrf.mxu1  ;;  %v7584_v47 = vpop.f32.mrf.mxu0 }
 0xf7c   : > { %v7392_v11 = vadd.f32 %v7391_v57, %v16304_v24  ;;  %v7585_v55 = vadd.f32 %v7584_v47, %v16308_v2  ;;  %v7721_v26 = vmax.f32 %v7390_v43, 0.0  ;;  %v7723_v51 = vmax.f32 %v7583_v37, 0.0 }
 0xf7d   : > { %v7393_v6 = vpop.f32.mrf.mxu1  ;;  %v7586_v63 = vpop.f32.mrf.mxu0 }
 0xf7e   : > { %v7394_v36 = vadd.f32 %v7393_v6, %v16321_v18  ;;  %v7587_v9 = vadd.f32 %v7586_v63, %v16323_v32  ;;  %v7722_v5 = vmax.f32 %v7392_v11, 0.0  ;;  %v7724_v0 = vmax.f32 %v7585_v55, 0.0 }
 0xf7f   : > { %v7395_v54 = vpop.f32.mrf.mxu1  ;;  %v7588_v19 = vpop.f32.mrf.mxu0 }
 0xf80   : > { %v7396_v28 = vadd.f32 %v7395_v54, %v16304_v24  ;;  %v7589_v22 = vadd.f32 %v7588_v19, %v16308_v2  ;;  %v7725_v13 = vmax.f32 %v7394_v36, 0.0  ;;  %v7727_v42 = vmax.f32 %v7587_v9, 0.0 }
 0xf81   : > { %v7399_v4 = vpop.f32.mrf.mxu1  ;;  %v7592_v31 = vpop.f32.mrf.mxu0 }
 0xf82   : > { %v7726_v12 = vmax.f32 %v7396_v28, 0.0  ;;  %v7728_v1 = vmax.f32 %v7589_v22, 0.0  ;;  %v7809_v25 = vpack.c.bf16 %v7725_v13, %v7721_v26  ;;  %v7811_v21 = vpack.c.bf16 %v7727_v42, %v7723_v51 }
 0xf83   : > { %v7401_v14 = vpop.f32.mrf.mxu1  ;;  %v7594_v58 = vpop.f32.mrf.mxu0  ;;  %v7400_v56 = vadd.f32 %v7399_v4, %v16321_v18  ;;  %v7593_v52 = vadd.f32 %v7592_v31, %v16323_v32 }
 0xf84   : > { %v7810_v60 = vpack.c.bf16 %v7726_v12, %v7722_v5  ;;  %v7812_v7 = vpack.c.bf16 %v7728_v1, %v7724_v0  ;;  %v7402_v16 = vadd.f32 %v7401_v14, %v16304_v24  ;;  %v7595_v41 = vadd.f32 %v7594_v58, %v16308_v2 }
 0xf85   : > { %v7403_v53 = vpop.f32.mrf.mxu1  ;;  %v7596_v38 = vpop.f32.mrf.mxu0  ;;  %v7729_v54 = vmax.f32 %v7400_v56, 0.0  ;;  %v7731_v19 = vmax.f32 %v7593_v52, 0.0 }
 0xf86   : > { %v7404_v15 = vadd.f32 %v7403_v53, %v16321_v18  ;;  %v7597_v23 = vadd.f32 %v7596_v38, %v16323_v32  ;;  %8208 = vmatprep.mubr.bf16.mxu1 %v7810_v60  ;;  %8369 = vmatprep.mubr.bf16.mxu0 %v7812_v7  ;;  %v7730_v36 = vmax.f32 %v7402_v16, 0.0  ;;  %v7732_v9 = vmax.f32 %v7595_v41, 0.0 }
 0xf87   : > { %v7405_v57 = vpop.f32.mrf.mxu1  ;;  %v7598_v47 = vpop.f32.mrf.mxu0  ;;  %8209 = vmatmul.mubr.bf16.gmra.mxu1 %v7809_v25  ;;  %8370 = vmatmul.mubr.bf16.gmra.mxu0 %v7811_v21 }
 0xf88   : > { %v7406_v6 = vadd.f32 %v7405_v57, %v16304_v24  ;;  %v7599_v63 = vadd.f32 %v7598_v47, %v16308_v2  ;;  %v7733_v11 = vmax.f32 %v7404_v15, 0.0  ;;  %v7735_v55 = vmax.f32 %v7597_v23, 0.0 }
 0xf8a   : > { %v7734_v43 = vmax.f32 %v7406_v6, 0.0  ;;  %v7736_v37 = vmax.f32 %v7599_v63, 0.0  ;;  %v7813_v13 = vpack.c.bf16 %v7733_v11, %v7729_v54  ;;  %v7815_v42 = vpack.c.bf16 %v7735_v55, %v7731_v19 }
 0xf8c   : > { %v7814_v28 = vpack.c.bf16 %v7734_v43, %v7730_v36  ;;  %v7816_v22 = vpack.c.bf16 %v7736_v37, %v7732_v9 }
 0xf8e   : > { %8216 = vmatprep.mubr.bf16.mxu1 %v7814_v28  ;;  %8377 = vmatprep.mubr.bf16.mxu0 %v7816_v22 }
 0xf8f   : > { %8217 = vmatmul.mubr.bf16.gmra.mxu1 %v7813_v13  ;;  %8378 = vmatmul.mubr.bf16.gmra.mxu0 %v7815_v42 }
 0xf92   : > { %v7409_v4 = vpop.f32.mrf.mxu1  ;;  %v7602_v31 = vpop.f32.mrf.mxu0 }
 0xf93   : > { %v7410_v60 = vadd.f32 %v7409_v4, %v16321_v18  ;;  %v7603_v7 = vadd.f32 %v7602_v31, %v16323_v32 }
 0xf94   : > { %v7411_v5 = vpop.f32.mrf.mxu1  ;;  %v7604_v0 = vpop.f32.mrf.mxu0 }
 0xf95   : > { %v7412_v26 = vadd.f32 %v7411_v5, %v16304_v24  ;;  %v7605_v51 = vadd.f32 %v7604_v0, %v16308_v2  ;;  %v7737_v6 = vmax.f32 %v7410_v60, 0.0  ;;  %v7739_v63 = vmax.f32 %v7603_v7, 0.0 }
 0xf96   : > { %v7413_v12 = vpop.f32.mrf.mxu1  ;;  %v7606_v1 = vpop.f32.mrf.mxu0 }
 0xf97   : > { %v7414_v14 = vadd.f32 %v7413_v12, %v16321_v18  ;;  %v7607_v58 = vadd.f32 %v7606_v1, %v16323_v32  ;;  %v7738_v56 = vmax.f32 %v7412_v26, 0.0  ;;  %v7740_v52 = vmax.f32 %v7605_v51, 0.0 }
 0xf98   : > { %v7415_v25 = vpop.f32.mrf.mxu1  ;;  %v7608_v21 = vpop.f32.mrf.mxu0 }
 0xf99   : > { %v7416_v16 = vadd.f32 %v7415_v25, %v16304_v24  ;;  %v7609_v53 = vadd.f32 %v7608_v21, %v16308_v2  ;;  %v7741_v38 = vmax.f32 %v7414_v14, 0.0  ;;  %v7743_v41 = vmax.f32 %v7607_v58, 0.0 }
 0xf9a   : > { %v7419_v15 = vpop.f32.mrf.mxu1  ;;  %v7612_v23 = vpop.f32.mrf.mxu0 }
 0xf9b   : > { %v7742_v57 = vmax.f32 %v7416_v16, 0.0  ;;  %v7744_v47 = vmax.f32 %v7609_v53, 0.0  ;;  %v7817_v43 = vpack.c.bf16 %v7741_v38, %v7737_v6  ;;  %v7819_v37 = vpack.c.bf16 %v7743_v41, %v7739_v63 }
 0xf9c   : > { %v7421_v11 = vpop.f32.mrf.mxu1  ;;  %v7614_v55 = vpop.f32.mrf.mxu0  ;;  %v7420_v4 = vadd.f32 %v7419_v15, %v16321_v18  ;;  %v7613_v31 = vadd.f32 %v7612_v23, %v16323_v32 }
 0xf9d   : > { %v7818_v36 = vpack.c.bf16 %v7742_v57, %v7738_v56  ;;  %v7820_v9 = vpack.c.bf16 %v7744_v47, %v7740_v52  ;;  %v7422_v54 = vadd.f32 %v7421_v11, %v16304_v24  ;;  %v7615_v22 = vadd.f32 %v7614_v55, %v16308_v2 }
 0xf9e   : > { %v7423_v19 = vpop.f32.mrf.mxu1  ;;  %v7616_v28 = vpop.f32.mrf.mxu0  ;;  %v7745_v25 = vmax.f32 %v7420_v4, 0.0  ;;  %v7747_v21 = vmax.f32 %v7613_v31, 0.0 }
 0xf9f   : > { %v7424_v13 = vadd.f32 %v7423_v19, %v16321_v18  ;;  %v7617_v42 = vadd.f32 %v7616_v28, %v16323_v32  ;;  %8224 = vmatprep.mubr.bf16.mxu1 %v7818_v36  ;;  %8385 = vmatprep.mubr.bf16.mxu0 %v7820_v9  ;;  %v7746_v14 = vmax.f32 %v7422_v54, 0.0  ;;  %v7748_v58 = vmax.f32 %v7615_v22, 0.0 }
 0xfa0   : > { %v7425_v5 = vpop.f32.mrf.mxu1  ;;  %v7618_v0 = vpop.f32.mrf.mxu0  ;;  %8225 = vmatmul.mubr.bf16.gmra.mxu1 %v7817_v43  ;;  %8386 = vmatmul.mubr.bf16.gmra.mxu0 %v7819_v37 }
 0xfa1   : > { %v7426_v12 = vadd.f32 %v7425_v5, %v16304_v24  ;;  %v7619_v1 = vadd.f32 %v7618_v0, %v16308_v2  ;;  %v7749_v26 = vmax.f32 %v7424_v13, 0.0  ;;  %v7751_v51 = vmax.f32 %v7617_v42, 0.0 }
 0xfa3   : > { %v7750_v60 = vmax.f32 %v7426_v12, 0.0  ;;  %v7752_v7 = vmax.f32 %v7619_v1, 0.0  ;;  %v7821_v38 = vpack.c.bf16 %v7749_v26, %v7745_v25  ;;  %v7823_v41 = vpack.c.bf16 %v7751_v51, %v7747_v21 }
 0xfa5   : > { %v7822_v16 = vpack.c.bf16 %v7750_v60, %v7746_v14  ;;  %v7824_v53 = vpack.c.bf16 %v7752_v7, %v7748_v58 }
 0xfa7   : > { %8232 = vmatprep.mubr.bf16.mxu1 %v7822_v16  ;;  %8393 = vmatprep.mubr.bf16.mxu0 %v7824_v53 }
 0xfa8   : > { %8233 = vmatmul.mubr.bf16.gmra.mxu1 %v7821_v38  ;;  %8394 = vmatmul.mubr.bf16.gmra.mxu0 %v7823_v41 }
 0xfaa   : > { %v7429_v15 = vpop.f32.mrf.mxu1  ;;  %v7622_v23 = vpop.f32.mrf.mxu0 }
 0xfab   : > { %v7430_v36 = vadd.f32 %v7429_v15, %v16321_v18  ;;  %v7623_v9 = vadd.f32 %v7622_v23, %v16323_v32 }
 0xfac   : > { %v7431_v56 = vpop.f32.mrf.mxu1  ;;  %v7624_v52 = vpop.f32.mrf.mxu0 }
 0xfad   : > { %v7432_v6 = vadd.f32 %v7431_v56, %v16304_v24  ;;  %v7625_v63 = vadd.f32 %v7624_v52, %v16308_v2  ;;  %v7753_v12 = vmax.f32 %v7430_v36, 0.0  ;;  %v7755_v1 = vmax.f32 %v7623_v9, 0.0 }
 0xfae   : > { %v7433_v57 = vpop.f32.mrf.mxu1  ;;  %v7626_v47 = vpop.f32.mrf.mxu0 }
 0xfaf   : > { %v7434_v11 = vadd.f32 %v7433_v57, %v16321_v18  ;;  %v7627_v55 = vadd.f32 %v7626_v47, %v16323_v32  ;;  %v7754_v4 = vmax.f32 %v7432_v6, 0.0  ;;  %v7756_v31 = vmax.f32 %v7625_v63, 0.0 }
 0xfb0   : > { %v7435_v43 = vpop.f32.mrf.mxu1  ;;  %v7628_v37 = vpop.f32.mrf.mxu0 }
 0xfb1   : > { %v7436_v54 = vadd.f32 %v7435_v43, %v16304_v24  ;;  %v7629_v19 = vadd.f32 %v7628_v37, %v16308_v2  ;;  %v7757_v28 = vmax.f32 %v7434_v11, 0.0  ;;  %v7759_v22 = vmax.f32 %v7627_v55, 0.0 }
 0xfb2   : > { %v7439_v13 = vpop.f32.mrf.mxu1  ;;  %v7632_v42 = vpop.f32.mrf.mxu0 }
 0xfb3   : > { %v7758_v5 = vmax.f32 %v7436_v54, 0.0  ;;  %v7760_v0 = vmax.f32 %v7629_v19, 0.0  ;;  %v7825_v60 = vpack.c.bf16 %v7757_v28, %v7753_v12  ;;  %v7827_v7 = vpack.c.bf16 %v7759_v22, %v7755_v1 }
 0xfb4   : > { %v7441_v26 = vpop.f32.mrf.mxu1  ;;  %v7634_v51 = vpop.f32.mrf.mxu0  ;;  %v7440_v15 = vadd.f32 %v7439_v13, %v16321_v18  ;;  %v7633_v23 = vadd.f32 %v7632_v42, %v16323_v32 }
 0xfb5   : > { %v7826_v14 = vpack.c.bf16 %v7758_v5, %v7754_v4  ;;  %v7828_v58 = vpack.c.bf16 %v7760_v0, %v7756_v31  ;;  %v7442_v25 = vadd.f32 %v7441_v26, %v16304_v24  ;;  %v7635_v53 = vadd.f32 %v7634_v51, %v16308_v2 }
 0xfb6   : > { %v7443_v21 = vpop.f32.mrf.mxu1  ;;  %v7636_v16 = vpop.f32.mrf.mxu0  ;;  %v7763_v54 = vmax.f32 %v7633_v23, 0.0 }
 0xfb7   : > { %v7444_v38 = vadd.f32 %v7443_v21, %v16321_v18  ;;  %v7637_v41 = vadd.f32 %v7636_v16, %v16323_v32  ;;  %8240 = vmatprep.mubr.bf16.mxu1 %v7826_v14  ;;  %8401 = vmatprep.mubr.bf16.mxu0 %v7828_v58  ;;  %v7762_v36 = vmax.f32 %v7442_v25, 0.0  ;;  %v7764_v9 = vmax.f32 %v7635_v53, 0.0  ;;  %v16456_v32 = vld [vmem:[%s661_s28] ss:$0 sm:$0xff]  ;;  %s17810_s28 = sld [smem:[#allocation155_spill]] (!%p9590_p8) }
 0xfb8   : > { %v7445_v56 = vpop.f32.mrf.mxu1  ;;  %v7638_v52 = vpop.f32.mrf.mxu0  ;;  %8241 = vmatmul.mubr.bf16.gmra.mxu1 %v7825_v60  ;;  %8402 = vmatmul.mubr.bf16.gmra.mxu0 %v7827_v7  ;;  %v7761_v18 = vmax.f32 %v7440_v15, 0.0 }
 0xfb9   : > { %v7446_v57 = vadd.f32 %v7445_v56, %v16304_v24  ;;  %v7639_v47 = vadd.f32 %v7638_v52, %v16308_v2  ;;  %v7765_v6 = vmax.f32 %v7444_v38, 0.0  ;;  %v7767_v63 = vmax.f32 %v7637_v41, 0.0 }
 0xfba   : > { %v10207_v11 = vpop.f32.mrf.mxu1  ;;  %v10319_v55 = vpop.f32.mrf.mxu0 }
 0xfbb   : > { %v7766_v43 = vmax.f32 %v7446_v57, 0.0  ;;  %v7768_v37 = vmax.f32 %v7639_v47, 0.0  ;;  %v7829_v13 = vpack.c.bf16 %v7765_v6, %v7761_v18  ;;  %v7831_v42 = vpack.c.bf16 %v7767_v63, %v7763_v54 }
 0xfbc   : > { %v10208_v19 = vpop.f32.mrf.mxu1  ;;  %v10320_v24 = vpop.f32.mrf.mxu0 }
 0xfbd   : > { %v7830_v28 = vpack.c.bf16 %v7766_v43, %v7762_v36  ;;  %v7832_v2 = vpack.c.bf16 %v7768_v37, %v7764_v9  ;;  %v10209_v22 = vadd.f32 %v10208_v19, %v10207_v11  ;;  %v10321_v0 = vadd.f32 %v10320_v24, %v10319_v55 }
 0xfbe   : > { %v10210_v4 = vpop.f32.mrf.mxu1  ;;  %v10322_v31 = vpop.f32.mrf.mxu0 }
 0xfbf   : > { %v8131_v5 = vadd.f32 %v10209_v22, %v16456_v32  ;;  %8248 = vmatprep.mubr.bf16.mxu1 %v7830_v28  ;;  %8409 = vmatprep.mubr.bf16.mxu0 %v7832_v2 }
 0xfc0   : > { %v10211_v12 = vpop.f32.mrf.mxu1  ;;  %8249 = vmatmul.mubr.bf16.gmra.mxu1 %v7829_v13  ;;  %v10323_v1 = vpop.f32.mrf.mxu0  ;;  %8410 = vmatmul.mubr.bf16.gmra.mxu0 %v7831_v42 }
 0xfc1   : > { %v8292_v26 = vadd.f32 %v10321_v0, %v8131_v5  ;;  %v10212_v51 = vadd.f32 %v10211_v12, %v10210_v4  ;;  %v10324_v25 = vadd.f32 %v10323_v1, %v10322_v31 }
 0xfc2   : > { %v10213_v14 = vpop.f32.mrf.mxu1  ;;  %v10325_v58 = vpop.f32.mrf.mxu0 }
 0xfc3   : > { %v16460_v60 = vadd.f32 %v8292_v26, %v15775_v34  ;;  %v8134_v7 = vadd.f32 %v10212_v51, %v16456_v32 }
 0xfc4   : > { %v10214_v21 = vpop.f32.mrf.mxu1  ;;  %v10326_v16 = vpop.f32.mrf.mxu0 }
 0xfc5   : > { %8450 = vst [vmem:[#allocation2 + $0xb0] sm:$0xff] %v16460_v60  ;;  %v8295_v53 = vadd.f32 %v10324_v25, %v8134_v7  ;;  %v10215_v38 = vadd.f32 %v10214_v21, %v10213_v14  ;;  %v10327_v52 = vadd.f32 %v10326_v16, %v10325_v58 }
 0xfc6   : > { %v10216_v41 = vpop.f32.mrf.mxu1  ;;  %v10328_v15 = vpop.f32.mrf.mxu0 }
 0xfc7   : > { %v16465_v23 = vadd.f32 %v8295_v53, %v15730_v39  ;;  %v8139_v56 = vadd.f32 %v10215_v38, %v16456_v32 }
 0xfc8   : > { %v10217_v57 = vpop.f32.mrf.mxu1  ;;  %v10329_v34 = vpop.f32.mrf.mxu0 }
 0xfc9   : > { %8451 = vst [vmem:[#allocation2] sm:$0xff] %v16465_v23  ;;  %v8300_v47 = vadd.f32 %v10327_v52, %v8139_v56  ;;  %v10218_v6 = vadd.f32 %v10217_v57, %v10216_v41  ;;  %v10330_v9 = vadd.f32 %v10329_v34, %v10328_v15 }
 0xfca   : > { %v10219_v63 = vpop.f32.mrf.mxu1  ;;  %v10331_v11 = vpop.f32.mrf.mxu0 }
 0xfcb   : > { %v16470_v55 = vadd.f32 %v8300_v47, %v15780_v61  ;;  %v8142_v36 = vadd.f32 %v10218_v6, %v16456_v32 }
 0xfcc   : > { %v10220_v43 = vpop.f32.mrf.mxu1  ;;  %v10332_v39 = vpop.f32.mrf.mxu0 }
 0xfcd   : > { %8452 = vst [vmem:[#allocation2 + $0xd8] sm:$0xff] %v16470_v55  ;;  %v8303_v37 = vadd.f32 %v10330_v9, %v8142_v36  ;;  %v10221_v18 = vadd.f32 %v10220_v43, %v10219_v63  ;;  %v10333_v2 = vadd.f32 %v10332_v39, %v10331_v11 }
 0xfce   : > { %v10222_v54 = vpop.f32.mrf.mxu1  ;;  %v10334_v19 = vpop.f32.mrf.mxu0 }
 0xfcf   : > { %v16475_v24 = vadd.f32 %v8303_v37, %v15790_v45  ;;  %v8147_v28 = vadd.f32 %v10221_v18, %v16456_v32 }
 0xfd0   : > { %v10223_v22 = vpop.f32.mrf.mxu1  ;;  %v10335_v61 = vpop.f32.mrf.mxu0 }
 0xfd1   : > { %8453 = vst [vmem:[#allocation2 + $0x18] sm:$0xff] %v16475_v24  ;;  %v8308_v13 = vadd.f32 %v10333_v2, %v8147_v28  ;;  %v10224_v42 = vadd.f32 %v10223_v22, %v10222_v54  ;;  %v10336_v5 = vadd.f32 %v10335_v61, %v10334_v19 }
 0xfd3   : > { %v16480_v4 = vadd.f32 %v8308_v13, %v15738_v62  ;;  %v8150_v31 = vadd.f32 %v10224_v42, %v16456_v32  ;;  %v10225_v0 = vpop.f32.mrf.mxu1  ;;  %v10337_v12 = vpop.f32.mrf.mxu0 }
 0xfd5   : > { %8454 = vst [vmem:[#allocation2 + $0x50] sm:$0xff] %v16480_v4  ;;  %v8311_v45 = vadd.f32 %v10336_v5, %v8150_v31  ;;  %v10226_v1 = vpop.f32.mrf.mxu1  ;;  %v10338_v26 = vpop.f32.mrf.mxu0 }
 0xfd6   : > { %v10227_v51 = vadd.f32 %v10226_v1, %v10225_v0  ;;  %v10339_v62 = vadd.f32 %v10338_v26, %v10337_v12 }
 0xfd7   : > { %v16485_v14 = vadd.f32 %v8311_v45, %v15801_v8  ;;  %v10228_v58 = vpop.f32.mrf.mxu1  ;;  %v10340_v7 = vpop.f32.mrf.mxu0 }
 0xfd8   : > { %v8155_v25 = vadd.f32 %v10227_v51, %v16456_v32 }
 0xfd9   : > { %8455 = vst [vmem:[#allocation2 + $0x68] sm:$0xff] %v16485_v14  ;;  %v10229_v21 = vpop.f32.mrf.mxu1  ;;  %v10341_v16 = vpop.f32.mrf.mxu0 }
 0xfda   : > { %v8316_v53 = vadd.f32 %v10339_v62, %v8155_v25  ;;  %v10230_v38 = vadd.f32 %v10229_v21, %v10228_v58  ;;  %v10342_v56 = vadd.f32 %v10341_v16, %v10340_v7  ;;  %v17800_v58 = vld [vmem:[#allocation149_spill] sm:$0xff] }
 0xfdb   : > { %v10231_v52 = vpop.f32.mrf.mxu1  ;;  %v10343_v8 = vpop.f32.mrf.mxu0 }
 0xfdc   : > { %v16490_v41 = vadd.f32 %v8316_v53, %v15743_v35  ;;  %v8158_v15 = vadd.f32 %v10230_v38, %v16456_v32 }
 0xfdd   : > { %v10232_v34 = vpop.f32.mrf.mxu1  ;;  %v10344_v47 = vpop.f32.mrf.mxu0 }
 0xfde   : > { %8456 = vst [vmem:[#allocation2 + $0x30] sm:$0xff] %v16490_v41  ;;  %v8319_v57 = vadd.f32 %v10342_v56, %v8158_v15  ;;  %v10233_v6 = vadd.f32 %v10232_v34, %v10231_v52  ;;  %v10345_v35 = vadd.f32 %v10344_v47, %v10343_v8  ;;  %v17801_v56 = vld [vmem:[#allocation142_spill] sm:$0xff] }
 0xfdf   : > { %v10234_v11 = vpop.f32.mrf.mxu1  ;;  %v10346_v36 = vpop.f32.mrf.mxu0 }
 0xfe0   : > { %v16495_v63 = vadd.f32 %v8319_v57, %v15805_v44  ;;  %v8163_v9 = vadd.f32 %v10233_v6, %v16456_v32 }
 0xfe1   : > { %v10235_v43 = vpop.f32.mrf.mxu1  ;;  %v10347_v39 = vpop.f32.mrf.mxu0 }
 0xfe2   : > { %8457 = vst [vmem:[#allocation2 + $0x48] sm:$0xff] %v16495_v63  ;;  %v8324_v37 = vadd.f32 %v10345_v35, %v8163_v9  ;;  %v10236_v18 = vadd.f32 %v10235_v43, %v10234_v11  ;;  %v10348_v28 = vadd.f32 %v10347_v39, %v10346_v36 }
 0xfe4   : > { %v16500_v54 = vadd.f32 %v8324_v37, %v15751_v50  ;;  %v8166_v19 = vadd.f32 %v10236_v18, %v16456_v32 }
 0xfe6   : > { %8458 = vst [vmem:[#allocation2 + $0x80] sm:$0xff] %v16500_v54  ;;  %v8327_v44 = vadd.f32 %v10348_v28, %v8166_v19 }
 0xfe8   : > { %v16505_v2 = vadd.f32 %v8327_v44, %v15811_v40 }
 0xfea   : > { %8459 = vst [vmem:[#allocation2 + $0x88] sm:$0xff] %v16505_v2 }
 0xfeb   : > { %v10237_v22 = vpop.f32.mrf.mxu1  ;;  %v10349_v61 = vpop.f32.mrf.mxu0 }
 0xfed   : > { %v10238_v13 = vpop.f32.mrf.mxu1  ;;  %v10350_v42 = vpop.f32.mrf.mxu0 }
 0xfee   : > { %v10239_v31 = vadd.f32 %v10238_v13, %v10237_v22  ;;  %v10351_v12 = vadd.f32 %v10350_v42, %v10349_v61 }
 0xfef   : > { %v10240_v5 = vpop.f32.mrf.mxu1  ;;  %v10352_v0 = vpop.f32.mrf.mxu0 }
 0xff0   : > { %v8171_v50 = vadd.f32 %v10239_v31, %v16456_v32 }
 0xff1   : > { %v10241_v45 = vpop.f32.mrf.mxu1  ;;  %v10353_v1 = vpop.f32.mrf.mxu0 }
 0xff2   : > { %v8332_v26 = vadd.f32 %v10351_v12, %v8171_v50  ;;  %v10242_v51 = vadd.f32 %v10241_v45, %v10240_v5  ;;  %v10354_v25 = vadd.f32 %v10353_v1, %v10352_v0 }
 0xff4   : > { %v16510_v7 = vadd.f32 %v8332_v26, %v17800_v58  ;;  %v8174_v40 = vadd.f32 %v10242_v51, %v16456_v32  ;;  %v10243_v62 = vpop.f32.mrf.mxu1  ;;  %v10355_v21 = vpop.f32.mrf.mxu0 }
 0xff6   : > { %8460 = vst [vmem:[#allocation2 + $0xe8] sm:$0xff] %v16510_v7  ;;  %v8335_v16 = vadd.f32 %v10354_v25, %v8174_v40  ;;  %v10244_v53 = vpop.f32.mrf.mxu1  ;;  %v10356_v38 = vpop.f32.mrf.mxu0 }
 0xff7   : > { %v10245_v15 = vadd.f32 %v10244_v53, %v10243_v62  ;;  %v10357_v47 = vadd.f32 %v10356_v38, %v10355_v21 }
 0xff8   : > { %v16515_v52 = vadd.f32 %v8335_v16, %v17801_v56  ;;  %v10246_v8 = vpop.f32.mrf.mxu1  ;;  %v10358_v57 = vpop.f32.mrf.mxu0 }
 0xff9   : > { %v8179_v34 = vadd.f32 %v10245_v15, %v16456_v32 }
 0xffa   : > { %8461 = vst [vmem:[#allocation2 + $0xb8] sm:$0xff] %v16515_v52  ;;  %v10247_v6 = vpop.f32.mrf.mxu1  ;;  %v10359_v11 = vpop.f32.mrf.mxu0 }
 0xffb   : > { %v8340_v36 = vadd.f32 %v10357_v47, %v8179_v34  ;;  %v10248_v9 = vadd.f32 %v10247_v6, %v10246_v8  ;;  %v10360_v18 = vadd.f32 %v10359_v11, %v10358_v57 }
 0xffc   : > { %v10249_v35 = vpop.f32.mrf.mxu1  ;;  %v10361_v43 = vpop.f32.mrf.mxu0 }
 0xffd   : > { %v16520_v39 = vadd.f32 %v8340_v36, %v15786_v29  ;;  %v8182_v37 = vadd.f32 %v10248_v9, %v16456_v32 }
 0xffe   : > { %v10250_v19 = vpop.f32.mrf.mxu1  ;;  %v10362_v28 = vpop.f32.mrf.mxu0 }
 0xfff   : > { %8462 = vst [vmem:[#allocation2 + $0x60] sm:$0xff] %v16520_v39  ;;  %v8343_v44 = vadd.f32 %v10360_v18, %v8182_v37  ;;  %v10251_v22 = vadd.f32 %v10250_v19, %v10249_v35  ;;  %v10363_v5 = vadd.f32 %v10362_v28, %v10361_v43  ;;  %v17802_v19 = vld [vmem:[#allocation55_spill] sm:$0xff] }
0x1000   : > { %v10252_v61 = vpop.f32.mrf.mxu1  ;;  %v10364_v13 = vpop.f32.mrf.mxu0 }
0x1001   : > { %v16525_v42 = vadd.f32 %v8343_v44, %v15821_v49  ;;  %v8187_v31 = vadd.f32 %v10251_v22, %v16456_v32 }
0x1002   : > { %v10253_v0 = vpop.f32.mrf.mxu1  ;;  %v10365_v29 = vpop.f32.mrf.mxu0 }
0x1003   : > { %8463 = vst [vmem:[#allocation2 + $0xf0] sm:$0xff] %v16525_v42  ;;  %v8348_v50 = vadd.f32 %v10363_v5, %v8187_v31  ;;  %v10254_v12 = vadd.f32 %v10253_v0, %v10252_v61  ;;  %v10366_v58 = vadd.f32 %v10365_v29, %v10364_v13  ;;  %v17803_v5 = vld [vmem:[#allocation23_spill] sm:$0xff] }
0x1004   : > { %v10255_v45 = vpop.f32.mrf.mxu1  ;;  %v10367_v1 = vpop.f32.mrf.mxu0 }
0x1005   : > { %v16530_v26 = vadd.f32 %v8348_v50, %v15795_v3  ;;  %v8190_v51 = vadd.f32 %v10254_v12, %v16456_v32 }
0x1006   : > { %v10256_v40 = vpop.f32.mrf.mxu1  ;;  %v10368_v49 = vpop.f32.mrf.mxu0 }
0x1007   : > { %8464 = vst [vmem:[#allocation2 + $0x8] sm:$0xff] %v16530_v26  ;;  %v8351_v25 = vadd.f32 %v10366_v58, %v8190_v51  ;;  %v10257_v62 = vadd.f32 %v10256_v40, %v10255_v45  ;;  %v10369_v15 = vadd.f32 %v10368_v49, %v10367_v1  ;;  %v17804_v45 = vld [vmem:[#allocation56_spill] sm:$0xff] }
0x1008   : > { %v10258_v21 = vpop.f32.mrf.mxu1  ;;  %v10370_v16 = vpop.f32.mrf.mxu0 }
0x1009   : > { %v16535_v53 = vadd.f32 %v8351_v25, %v15825_v27  ;;  %v8195_v38 = vadd.f32 %v10257_v62, %v16456_v32 }
0x100a   : > { %v10259_v56 = vpop.f32.mrf.mxu1  ;;  %v10371_v3 = vpop.f32.mrf.mxu0 }
0x100b   : > { %8465 = vst [vmem:[#allocation2 + $0x78] sm:$0xff] %v16535_v53  ;;  %v8356_v8 = vadd.f32 %v10369_v15, %v8195_v38  ;;  %v10260_v57 = vadd.f32 %v10259_v56, %v10258_v21  ;;  %v10372_v36 = vadd.f32 %v10371_v3, %v10370_v16 }
0x100c   : > { %v10261_v34 = vpop.f32.mrf.mxu1  ;;  %v10373_v47 = vpop.f32.mrf.mxu0 }
0x100d   : > { %v16540_v6 = vadd.f32 %v8356_v8, %v15851_v30  ;;  %v8198_v11 = vadd.f32 %v10260_v57, %v16456_v32 }
0x100e   : > { %v10262_v9 = vpop.f32.mrf.mxu1  ;;  %v10374_v27 = vpop.f32.mrf.mxu0 }
0x100f   : > { %8466 = vst [vmem:[#allocation2 + $0x38] sm:$0xff] %v16540_v6  ;;  %v8359_v35 = vadd.f32 %v10372_v36, %v8198_v11  ;;  %v10263_v43 = vadd.f32 %v10262_v9, %v10261_v34  ;;  %v10375_v22 = vadd.f32 %v10374_v27, %v10373_v47  ;;  %v17805_v47 = vld [vmem:[#allocation91_spill] sm:$0xff] }
0x1010   : > { %v10264_v37 = vpop.f32.mrf.mxu1  ;;  %v10376_v18 = vpop.f32.mrf.mxu0 }
0x1011   : > { %v16545_v28 = vadd.f32 %v8359_v35, %v17802_v19  ;;  %v8203_v44 = vadd.f32 %v10263_v43, %v16456_v32 }
0x1012   : > { %v10265_v61 = vpop.f32.mrf.mxu1  ;;  %v10377_v30 = vpop.f32.mrf.mxu0 }
0x1013   : > { %8467 = vst [vmem:[#allocation2 + $0x58] sm:$0xff] %v16545_v28  ;;  %v8364_v13 = vadd.f32 %v10375_v22, %v8203_v44  ;;  %v10266_v31 = vadd.f32 %v10265_v61, %v10264_v37  ;;  %v10378_v50 = vadd.f32 %v10377_v30, %v10376_v18  ;;  %v17806_v44 = vld [vmem:[#allocation113_spill] sm:$0xff] }
0x1015   : > { %v16550_v0 = vadd.f32 %v8364_v13, %v17803_v5  ;;  %v8206_v29 = vadd.f32 %v10266_v31, %v16456_v32 }
0x1017   : > { %8468 = vst [vmem:[#allocation2 + $0x40] sm:$0xff] %v16550_v0  ;;  %v8367_v12 = vadd.f32 %v10378_v50, %v8206_v29  ;;  %v17807_v50 = vld [vmem:[#allocation16_spill] sm:$0xff] }
0x1019   : > { %v16555_v1 = vadd.f32 %v8367_v12, %v17804_v45 }
0x101b   : > { %8469 = vst [vmem:[#allocation2 + $0xc8] sm:$0xff] %v16555_v1 }
0x1047   : > { %v10267_v51 = vpop.f32.mrf.mxu1  ;;  %v10379_v58 = vpop.f32.mrf.mxu0 }
0x1049   : > { %v10268_v40 = vpop.f32.mrf.mxu1  ;;  %v10380_v49 = vpop.f32.mrf.mxu0 }
0x104a   : > { %v10269_v25 = vadd.f32 %v10268_v40, %v10267_v51  ;;  %v10381_v38 = vadd.f32 %v10380_v49, %v10379_v58  ;;  %v17808_v40 = vld [vmem:[#allocation110_spill] sm:$0xff] }
0x104b   : > { %v10270_v62 = vpop.f32.mrf.mxu1  ;;  %v10382_v21 = vpop.f32.mrf.mxu0 }
0x104c   : > { %v8211_v16 = vadd.f32 %v10269_v25, %v16456_v32 }
0x104d   : > { %v10271_v15 = vpop.f32.mrf.mxu1  ;;  %v10383_v56 = vpop.f32.mrf.mxu0 }
0x104e   : > { %v8372_v3 = vadd.f32 %v10381_v38, %v8211_v16  ;;  %v10272_v8 = vadd.f32 %v10271_v15, %v10270_v62  ;;  %v10384_v9 = vadd.f32 %v10383_v56, %v10382_v21 }
0x104f   : > { %v10273_v57 = vpop.f32.mrf.mxu1  ;;  %v10385_v34 = vpop.f32.mrf.mxu0 }
0x1050   : > { %v16560_v11 = vadd.f32 %v8372_v3, %v17805_v47  ;;  %v8214_v36 = vadd.f32 %v10272_v8, %v16456_v32 }
0x1051   : > { %v10274_v27 = vpop.f32.mrf.mxu1  ;;  %v10386_v35 = vpop.f32.mrf.mxu0 }
0x1052   : > { %8470 = vst [vmem:[#allocation2 + $0xe0] sm:$0xff] %v16560_v11  ;;  %v8375_v43 = vadd.f32 %v10384_v9, %v8214_v36  ;;  %v10275_v37 = vadd.f32 %v10274_v27, %v10273_v57  ;;  %v10387_v30 = vadd.f32 %v10386_v35, %v10385_v34  ;;  %v17809_v35 = vld [vmem:[#allocation112_spill] sm:$0xff] }
0x1053   : > { %v10276_v18 = vpop.f32.mrf.mxu1  ;;  %v10388_v19 = vpop.f32.mrf.mxu0 }
0x1054   : > { %v16565_v22 = vadd.f32 %v8375_v43, %v17806_v44  ;;  %v8219_v61 = vadd.f32 %v10275_v37, %v16456_v32 }
0x1055   : > { %v10277_v13 = vpop.f32.mrf.mxu1  ;;  %v10389_v31 = vpop.f32.mrf.mxu0 }
0x1056   : > { %8471 = vst [vmem:[#allocation2 + $0x90] sm:$0xff] %v16565_v22  ;;  %v8380_v5 = vadd.f32 %v10387_v30, %v8219_v61  ;;  %v10278_v29 = vadd.f32 %v10277_v13, %v10276_v18  ;;  %v10390_v51 = vadd.f32 %v10389_v31, %v10388_v19 }
0x1058   : > { %v16570_v12 = vadd.f32 %v8380_v5, %v17807_v50  ;;  %v8222_v45 = vadd.f32 %v10278_v29, %v16456_v32 }
0x105a   : > { %8472 = vst [vmem:[#allocation2 + $0x70] sm:$0xff] %v16570_v12  ;;  %v8383_v58 = vadd.f32 %v10390_v51, %v8222_v45 }
0x105c   : > { %v16575_v49 = vadd.f32 %v8383_v58, %v17808_v40 }
0x105e   : > { %8473 = vst [vmem:[#allocation2 + $0xc0] sm:$0xff] %v16575_v49 }
0x1060   : > { %v10279_v25 = vpop.f32.mrf.mxu1  ;;  %v10391_v62 = vpop.f32.mrf.mxu0 }
0x1062   : > { %v10280_v21 = vpop.f32.mrf.mxu1  ;;  %v10392_v16 = vpop.f32.mrf.mxu0 }
0x1063   : > { %v10281_v38 = vadd.f32 %v10280_v21, %v10279_v25  ;;  %v10393_v8 = vadd.f32 %v10392_v16, %v10391_v62 }
0x1064   : > { %v10282_v15 = vpop.f32.mrf.mxu1  ;;  %v10394_v56 = vpop.f32.mrf.mxu0 }
0x1065   : > { %v8227_v3 = vadd.f32 %v10281_v38, %v16456_v32 }
0x1066   : > { %v10283_v57 = vpop.f32.mrf.mxu1  ;;  %v10395_v34 = vpop.f32.mrf.mxu0 }
0x1067   : > { %v8388_v47 = vadd.f32 %v10393_v8, %v8227_v3  ;;  %v10284_v36 = vadd.f32 %v10283_v57, %v10282_v15  ;;  %v10396_v18 = vadd.f32 %v10395_v34, %v10394_v56 }
0x1068   : > { %v10285_v9 = vpop.f32.mrf.mxu1  ;;  %v10397_v27 = vpop.f32.mrf.mxu0 }
0x1069   : > { %v16580_v43 = vadd.f32 %v8388_v47, %v17809_v35  ;;  %v8230_v37 = vadd.f32 %v10284_v36, %v16456_v32 }
0x106a   : > { %v10286_v19 = vpop.f32.mrf.mxu1  ;;  %v10398_v44 = vpop.f32.mrf.mxu0 }
0x106b   : > { %8474 = vst [vmem:[#allocation2 + $0xa8] sm:$0xff] %v16580_v43  ;;  %v8391_v61 = vadd.f32 %v10396_v18, %v8230_v37  ;;  %v10287_v30 = vadd.f32 %v10286_v19, %v10285_v9  ;;  %v10399_v50 = vadd.f32 %v10398_v44, %v10397_v27 }
0x106c   : > { %v10288_v13 = vpop.f32.mrf.mxu1  ;;  %v10400_v31 = vpop.f32.mrf.mxu0 }
0x106d   : > { %v16585_v5 = vadd.f32 %v8391_v61, %v15975_v59  ;;  %v8235_v29 = vadd.f32 %v10287_v30, %v16456_v32 }
0x106e   : > { %v10289_v45 = vpop.f32.mrf.mxu1  ;;  %v10401_v51 = vpop.f32.mrf.mxu0 }
0x106f   : > { %8475 = vst [vmem:[#allocation2 + $0xd0] sm:$0xff] %v16585_v5  ;;  %v8396_v58 = vadd.f32 %v10399_v50, %v8235_v29  ;;  %v10290_v40 = vadd.f32 %v10289_v45, %v10288_v13  ;;  %v10402_v21 = vadd.f32 %v10401_v51, %v10400_v31 }
0x1071   : > { %v16590_v25 = vadd.f32 %v8396_v58, %v15986_v46  ;;  %v8238_v62 = vadd.f32 %v10290_v40, %v16456_v32 }
0x1073   : > { %8476 = vst [vmem:[#allocation2 + $0x10] sm:$0xff] %v16590_v25  ;;  %v8399_v16 = vadd.f32 %v10402_v21, %v8238_v62 }
0x1075   : > { %v16595_v59 = vadd.f32 %v8399_v16, %v15995_v33 }
0x1077   : > { %8477 = vst [vmem:[#allocation2 + $0x28] sm:$0xff] %v16595_v59 }
0x1078   : > { %v10291_v38 = vpop.f32.mrf.mxu1  ;;  %v10403_v15 = vpop.f32.mrf.mxu0 }
0x107a   : > { %v10292_v56 = vpop.f32.mrf.mxu1  ;;  %v10404_v3 = vpop.f32.mrf.mxu0 }
0x107b   : > { %v10293_v8 = vadd.f32 %v10292_v56, %v10291_v38  ;;  %v10405_v47 = vadd.f32 %v10404_v3, %v10403_v15 }
0x107c   : > { %v10294_v57 = vpop.f32.mrf.mxu1  ;;  %v10406_v34 = vpop.f32.mrf.mxu0 }
0x107d   : > { %v8243_v46 = vadd.f32 %v10293_v8, %v16456_v32 }
0x107e   : > { %v10295_v36 = vpop.f32.mrf.mxu1  ;;  %v10407_v9 = vpop.f32.mrf.mxu0 }
0x107f   : > { %v8404_v27 = vadd.f32 %v10405_v47, %v8243_v46  ;;  %v10296_v35 = vadd.f32 %v10295_v36, %v10294_v57  ;;  %v10408_v44 = vadd.f32 %v10407_v9, %v10406_v34 }
0x1080   : > { %v10297_v37 = vpop.f32.mrf.mxu1  ;;  %v10409_v18 = vpop.f32.mrf.mxu0 }
0x1081   : > { %v16600_v33 = vadd.f32 %v8404_v27, %v16008_v48  ;;  %v8246_v19 = vadd.f32 %v10296_v35, %v16456_v32 }
0x1082   : > { %v10298_v61 = vpop.f32.mrf.mxu1  ;;  %v10410_v30 = vpop.f32.mrf.mxu0 }
0x1083   : > { %8478 = vst [vmem:[#allocation2 + $0xa0] sm:$0xff] %v16600_v33  ;;  %v8407_v13 = vadd.f32 %v10408_v44, %v8246_v19  ;;  %v10299_v31 = vadd.f32 %v10298_v61, %v10297_v37  ;;  %v10411_v58 = vadd.f32 %v10410_v30, %v10409_v18 }
0x1084   : > { %v10300_v29 = vpop.f32.mrf.mxu1  ;;  %v10412_v50 = vpop.f32.mrf.mxu0 }
0x1085   : > { %v16605_v45 = vadd.f32 %v8407_v13, %v16025_v17  ;;  %v8251_v51 = vadd.f32 %v10299_v31, %v16456_v32 }
0x1086   : > { %v10301_v40 = vpop.f32.mrf.mxu1  ;;  %v10413_v48 = vpop.f32.mrf.mxu0 }
0x1087   : > { %8479 = vst [vmem:[#allocation2 + $0xf8] sm:$0xff] %v16605_v45  ;;  %v8412_v62 = vadd.f32 %v10411_v58, %v8251_v51  ;;  %v10302_v21 = vadd.f32 %v10301_v40, %v10300_v29  ;;  %v10414_v15 = vadd.f32 %v10413_v48, %v10412_v50 }
0x1089   : > { %v16610_v16 = vadd.f32 %v8412_v62, %v16045_v20  ;;  %v8254_v38 = vadd.f32 %v10302_v21, %v16456_v32 }
0x108b   : > { %8480 = vst [vmem:[#allocation2 + $0x20] sm:$0xff] %v16610_v16  ;;  %v8415_v56 = vadd.f32 %v10414_v15, %v8254_v38  ;;  %8485 = sbr.rel (%p9590_p8) target bundleno = 4613 (0x1205), region = 84 }
0x108d   : > { %v16615_v17 = vadd.f32 %v8415_v56, %v16061_v10 }
0x108f   : > { %8481 = vst [vmem:[#allocation2 + $0x98] sm:$0xff] %v16615_v17 }
0x1090   : > { %8488 = vadd.xlane.f32.xlu0 %v16460_v60  ;;  %8492 = vadd.xlane.f32.xlu1 %v16470_v55 }
0x1094   : > { %8490 = vadd.xlane.f32.xlu0 %v16465_v23  ;;  %8494 = vadd.xlane.f32.xlu1 %v16475_v24 }
0x1098   : > { %8496 = vadd.xlane.f32.xlu0 %v16480_v4  ;;  %8498 = vadd.xlane.f32.xlu1 %v16485_v14 }
0x109c   : > { %8500 = vadd.xlane.f32.xlu0 %v16490_v41  ;;  %8502 = vadd.xlane.f32.xlu1 %v16495_v63 }
0x10a0   : > { %8504 = vadd.xlane.f32.xlu0 %v16500_v54  ;;  %8506 = vadd.xlane.f32.xlu1 %v16505_v2 }
0x10a4   : > { %8508 = vadd.xlane.f32.xlu0 %v16510_v7  ;;  %8510 = vadd.xlane.f32.xlu1 %v16515_v52 }
0x10a8   : > { %8512 = vadd.xlane.f32.xlu0 %v16520_v39  ;;  %8514 = vadd.xlane.f32.xlu1 %v16525_v42 }
0x10ac   : > { %8516 = vadd.xlane.f32.xlu0 %v16530_v26  ;;  %8518 = vadd.xlane.f32.xlu1 %v16535_v53 }
0x10b0   : > { %8520 = vadd.xlane.f32.xlu0 %v16540_v6  ;;  %8522 = vadd.xlane.f32.xlu1 %v16545_v28 }
0x10b4   : > { %8524 = vadd.xlane.f32.xlu0 %v16550_v0  ;;  %8526 = vadd.xlane.f32.xlu1 %v16555_v1 }
0x10b8   : > { %8528 = vadd.xlane.f32.xlu0 %v16560_v11  ;;  %8530 = vadd.xlane.f32.xlu1 %v16565_v22 }
0x10bc   : > { %8532 = vadd.xlane.f32.xlu0 %v16570_v12  ;;  %8534 = vadd.xlane.f32.xlu1 %v16575_v49 }
0x10c0   : > { %8536 = vadd.xlane.f32.xlu0 %v16580_v43  ;;  %8538 = vadd.xlane.f32.xlu1 %v16585_v5 }
0x10c4   : > { %8540 = vadd.xlane.f32.xlu0 %v16590_v25  ;;  %8542 = vadd.xlane.f32.xlu1 %v16595_v59 }
0x10c8   : > { %8544 = vadd.xlane.f32.xlu0 %v16600_v33  ;;  %8546 = vadd.xlane.f32.xlu1 %v16605_v45 }
0x10cc   : > { %8548 = vadd.xlane.f32.xlu0 %v16610_v16  ;;  %8550 = vadd.xlane.f32.xlu1 %v16615_v17 }
0x1119   : > { %v8489_v20 = vpop.xlane.xlu0 %8488  ;;  %v8493_v10 = vpop.xlane.xlu1 %8492 }
0x111a   : > { %v8552_v32 = vmul.f32 0.0078125, %v8489_v20  ;;  %v8554_v3 = vmul.f32 0.0078125, %v8493_v10 }
0x111c   : > { %v16652_v8 = vsub.f32 %v16460_v60, %v8552_v32  ;;  %v16655_v57 = vsub.f32 %v16470_v55, %v8554_v3 }
0x111d   : > { %v8491_v34 = vpop.xlane.xlu0 %8490  ;;  %v8495_v46 = vpop.xlane.xlu1 %8494 }
0x111e   : > { %v8553_v47 = vmul.f32 0.0078125, %v8491_v34  ;;  %v8616_v36 = vmul.f32 %v16652_v8, %v16652_v8  ;;  %v8555_v9 = vmul.f32 0.0078125, %v8495_v46  ;;  %v8618_v60 = vmul.f32 %v16655_v57, %v16655_v57 }
0x1120   : > { %v16660_v27 = vsub.f32 %v16465_v23, %v8553_v47  ;;  %8648 = vadd.xlane.f32.xlu0 %v8616_v36  ;;  %v16663_v35 = vsub.f32 %v16475_v24, %v8555_v9 }
0x1121   : > { %v8497_v37 = vpop.xlane.xlu0 %8496  ;;  %v8499_v55 = vpop.xlane.xlu1 %8498 }
0x1122   : > { %v8556_v18 = vmul.f32 0.0078125, %v8497_v37  ;;  %v8617_v19 = vmul.f32 %v16660_v27, %v16660_v27  ;;  %v8557_v44 = vmul.f32 0.0078125, %v8499_v55  ;;  %v8619_v24 = vmul.f32 %v16663_v35, %v16663_v35 }
0x1124   : > { %v16670_v61 = vsub.f32 %v16480_v4, %v8556_v18  ;;  %8652 = vadd.xlane.f32.xlu0 %v8618_v60  ;;  %8650 = vadd.xlane.f32.xlu1 %v8617_v19  ;;  %v16673_v23 = vsub.f32 %v16485_v14, %v8557_v44 }
0x1125   : > { %v8501_v30 = vpop.xlane.xlu0 %8500  ;;  %v8503_v13 = vpop.xlane.xlu1 %8502 }
0x1126   : > { %v8558_v31 = vmul.f32 0.0078125, %v8501_v30  ;;  %v8620_v29 = vmul.f32 %v16670_v61, %v16670_v61  ;;  %v8559_v50 = vmul.f32 0.0078125, %v8503_v13  ;;  %v8621_v14 = vmul.f32 %v16673_v23, %v16673_v23 }
0x1128   : > { %v16680_v51 = vsub.f32 %v16490_v41, %v8558_v31  ;;  %8654 = vadd.xlane.f32.xlu1 %v8619_v24  ;;  %8656 = vadd.xlane.f32.xlu0 %v8620_v29  ;;  %v16683_v4 = vsub.f32 %v16495_v63, %v8559_v50 }
0x1129   : > { %v8505_v58 = vpop.xlane.xlu0 %8504  ;;  %v8507_v40 = vpop.xlane.xlu1 %8506 }
0x112a   : > { %v8560_v48 = vmul.f32 0.0078125, %v8505_v58  ;;  %v8622_v62 = vmul.f32 %v16680_v51, %v16680_v51  ;;  %v8561_v21 = vmul.f32 0.0078125, %v8507_v40  ;;  %v8623_v63 = vmul.f32 %v16683_v4, %v16683_v4 }
0x112c   : > { %v16690_v38 = vsub.f32 %v16500_v54, %v8560_v48  ;;  %8658 = vadd.xlane.f32.xlu1 %v8621_v14  ;;  %8660 = vadd.xlane.f32.xlu0 %v8622_v62  ;;  %v16693_v41 = vsub.f32 %v16505_v2, %v8561_v21 }
0x112d   : > { %v8509_v15 = vpop.xlane.xlu0 %8508  ;;  %v8511_v56 = vpop.xlane.xlu1 %8510 }
0x112e   : > { %v8562_v20 = vmul.f32 0.0078125, %v8509_v15  ;;  %v8624_v10 = vmul.f32 %v16690_v38, %v16690_v38  ;;  %v8563_v32 = vmul.f32 0.0078125, %v8511_v56  ;;  %v8625_v2 = vmul.f32 %v16693_v41, %v16693_v41 }
0x1130   : > { %v16700_v3 = vsub.f32 %v16510_v7, %v8562_v20  ;;  %8662 = vadd.xlane.f32.xlu1 %v8623_v63  ;;  %8664 = vadd.xlane.f32.xlu0 %v8624_v10  ;;  %v16703_v54 = vsub.f32 %v16515_v52, %v8563_v32 }
0x1131   : > { %v8513_v34 = vpop.xlane.xlu0 %8512  ;;  %v8515_v46 = vpop.xlane.xlu1 %8514 }
0x1132   : > { %v8564_v47 = vmul.f32 0.0078125, %v8513_v34  ;;  %v8626_v36 = vmul.f32 %v16700_v3, %v16700_v3  ;;  %v8565_v9 = vmul.f32 0.0078125, %v8515_v46  ;;  %v8627_v52 = vmul.f32 %v16703_v54, %v16703_v54 }
0x1134   : > { %v16710_v60 = vsub.f32 %v16520_v39, %v8564_v47  ;;  %8666 = vadd.xlane.f32.xlu1 %v8625_v2  ;;  %8668 = vadd.xlane.f32.xlu0 %v8626_v36  ;;  %v16713_v7 = vsub.f32 %v16525_v42, %v8565_v9 }
0x1135   : > { %v8517_v37 = vpop.xlane.xlu0 %8516  ;;  %v8519_v55 = vpop.xlane.xlu1 %8518 }
0x1136   : > { %v8566_v18 = vmul.f32 0.0078125, %v8517_v37  ;;  %v8628_v19 = vmul.f32 %v16710_v60, %v16710_v60  ;;  %v8567_v44 = vmul.f32 0.0078125, %v8519_v55  ;;  %v8629_v42 = vmul.f32 %v16713_v7, %v16713_v7 }
0x1138   : > { %v16720_v24 = vsub.f32 %v16530_v26, %v8566_v18  ;;  %8670 = vadd.xlane.f32.xlu1 %v8627_v52  ;;  %8672 = vadd.xlane.f32.xlu0 %v8628_v19  ;;  %v16723_v39 = vsub.f32 %v16535_v53, %v8567_v44 }
0x1139   : > { %v8521_v30 = vpop.xlane.xlu0 %8520  ;;  %v8523_v13 = vpop.xlane.xlu1 %8522 }
0x113a   : > { %v8568_v31 = vmul.f32 0.0078125, %v8521_v30  ;;  %v8630_v29 = vmul.f32 %v16720_v24, %v16720_v24  ;;  %v8569_v50 = vmul.f32 0.0078125, %v8523_v13  ;;  %v8631_v53 = vmul.f32 %v16723_v39, %v16723_v39 }
0x113c   : > { %v16730_v14 = vsub.f32 %v16540_v6, %v8568_v31  ;;  %8674 = vadd.xlane.f32.xlu1 %v8629_v42  ;;  %8676 = vadd.xlane.f32.xlu0 %v8630_v29  ;;  %v16733_v26 = vsub.f32 %v16545_v28, %v8569_v50 }
0x113d   : > { %v8525_v58 = vpop.xlane.xlu0 %8524  ;;  %v8527_v40 = vpop.xlane.xlu1 %8526 }
0x113e   : > { %v8570_v48 = vmul.f32 0.0078125, %v8525_v58  ;;  %v8632_v62 = vmul.f32 %v16730_v14, %v16730_v14  ;;  %v8571_v21 = vmul.f32 0.0078125, %v8527_v40  ;;  %v8633_v28 = vmul.f32 %v16733_v26, %v16733_v26 }
0x1140   : > { %v16740_v63 = vsub.f32 %v16550_v0, %v8570_v48  ;;  %8678 = vadd.xlane.f32.xlu1 %v8631_v53  ;;  %8680 = vadd.xlane.f32.xlu0 %v8632_v62  ;;  %v16743_v6 = vsub.f32 %v16555_v1, %v8571_v21 }
0x1141   : > { %v8529_v15 = vpop.xlane.xlu0 %8528  ;;  %v8531_v56 = vpop.xlane.xlu1 %8530 }
0x1142   : > { %v8572_v20 = vmul.f32 0.0078125, %v8529_v15  ;;  %v8634_v10 = vmul.f32 %v16740_v63, %v16740_v63  ;;  %v8573_v32 = vmul.f32 0.0078125, %v8531_v56  ;;  %v8635_v1 = vmul.f32 %v16743_v6, %v16743_v6 }
0x1144   : > { %v16750_v2 = vsub.f32 %v16560_v11, %v8572_v20  ;;  %8682 = vadd.xlane.f32.xlu1 %v8633_v28  ;;  %8684 = vadd.xlane.f32.xlu0 %v8634_v10  ;;  %v16753_v0 = vsub.f32 %v16565_v22, %v8573_v32 }
0x1145   : > { %v8533_v34 = vpop.xlane.xlu0 %8532  ;;  %v8535_v46 = vpop.xlane.xlu1 %8534 }
0x1146   : > { %v8574_v47 = vmul.f32 0.0078125, %v8533_v34  ;;  %v8636_v36 = vmul.f32 %v16750_v2, %v16750_v2  ;;  %v8575_v9 = vmul.f32 0.0078125, %v8535_v46  ;;  %v8637_v22 = vmul.f32 %v16753_v0, %v16753_v0 }
0x1148   : > { %v16760_v52 = vsub.f32 %v16570_v12, %v8574_v47  ;;  %8686 = vadd.xlane.f32.xlu1 %v8635_v1  ;;  %8688 = vadd.xlane.f32.xlu0 %v8636_v36  ;;  %v16763_v11 = vsub.f32 %v16575_v49, %v8575_v9 }
0x1149   : > { %v8537_v37 = vpop.xlane.xlu0 %8536  ;;  %v8539_v55 = vpop.xlane.xlu1 %8538 }
0x114a   : > { %v8576_v18 = vmul.f32 0.0078125, %v8537_v37  ;;  %v8638_v19 = vmul.f32 %v16760_v52, %v16760_v52  ;;  %v8577_v44 = vmul.f32 0.0078125, %v8539_v55  ;;  %v8639_v49 = vmul.f32 %v16763_v11, %v16763_v11 }
0x114c   : > { %v16770_v42 = vsub.f32 %v16580_v43, %v8576_v18  ;;  %8690 = vadd.xlane.f32.xlu1 %v8637_v22  ;;  %8692 = vadd.xlane.f32.xlu0 %v8638_v19  ;;  %v16773_v12 = vsub.f32 %v16585_v5, %v8577_v44 }
0x114d   : > { %v8541_v30 = vpop.xlane.xlu0 %8540  ;;  %v8543_v13 = vpop.xlane.xlu1 %8542 }
0x114e   : > { %v8578_v31 = vmul.f32 0.0078125, %v8541_v30  ;;  %v8640_v29 = vmul.f32 %v16770_v42, %v16770_v42  ;;  %v8579_v50 = vmul.f32 0.0078125, %v8543_v13  ;;  %v8641_v5 = vmul.f32 %v16773_v12, %v16773_v12 }
0x1150   : > { %v16780_v53 = vsub.f32 %v16590_v25, %v8578_v31  ;;  %8694 = vadd.xlane.f32.xlu1 %v8639_v49  ;;  %8696 = vadd.xlane.f32.xlu0 %v8640_v29  ;;  %v16783_v43 = vsub.f32 %v16595_v59, %v8579_v50 }
0x1151   : > { %v8545_v58 = vpop.xlane.xlu0 %8544  ;;  %v8547_v40 = vpop.xlane.xlu1 %8546 }
0x1152   : > { %v8580_v48 = vmul.f32 0.0078125, %v8545_v58  ;;  %v8642_v62 = vmul.f32 %v16780_v53, %v16780_v53  ;;  %v8581_v21 = vmul.f32 0.0078125, %v8547_v40  ;;  %v8643_v59 = vmul.f32 %v16783_v43, %v16783_v43 }
0x1154   : > { %v16790_v28 = vsub.f32 %v16600_v33, %v8580_v48  ;;  %8698 = vadd.xlane.f32.xlu1 %v8641_v5  ;;  %8700 = vadd.xlane.f32.xlu0 %v8642_v62  ;;  %v16793_v25 = vsub.f32 %v16605_v45, %v8581_v21 }
0x1155   : > { %v8549_v15 = vpop.xlane.xlu0 %8548  ;;  %v8551_v56 = vpop.xlane.xlu1 %8550 }
0x1156   : > { %v8582_v20 = vmul.f32 0.0078125, %v8549_v15  ;;  %v8644_v10 = vmul.f32 %v16790_v28, %v16790_v28  ;;  %v8583_v32 = vmul.f32 0.0078125, %v8551_v56  ;;  %v8645_v45 = vmul.f32 %v16793_v25, %v16793_v25 }
0x1158   : > { %v16800_v1 = vsub.f32 %v16610_v16, %v8582_v20  ;;  %8702 = vadd.xlane.f32.xlu1 %v8643_v59  ;;  %8704 = vadd.xlane.f32.xlu0 %v8644_v10  ;;  %v16803_v33 = vsub.f32 %v16615_v17, %v8583_v32  ;;  %v16814_v20 = vld [vmem:[%s17810_s28] ss:$0 sm:$0xff] }
0x115a   : > { %v8646_v34 = vmul.f32 %v16800_v1, %v16800_v1  ;;  %v8647_v46 = vmul.f32 %v16803_v33, %v16803_v33 }
0x115c   : > { %8706 = vadd.xlane.f32.xlu1 %v8645_v45  ;;  %8708 = vadd.xlane.f32.xlu0 %v8646_v34 }
0x1160   : > { %8710 = vadd.xlane.f32.xlu1 %v8647_v46 }
0x11a9   : > { %v8649_v47 = vpop.xlane.xlu0 %8648 }
0x11aa   : > { %v8712_v16 = vmul.f32 0.0078125, %v8649_v47 }
0x11ac   : > { %v8744_v36 = vadd.f32 1e-05, %v8712_v16 }
0x11ad   : > { %v8651_v9 = vpop.xlane.xlu1 %8650  ;;  %v8653_v22 = vpop.xlane.xlu0 %8652 }
0x11ae   : > { %11957 = vrsqrt.f32 %v8744_v36  ;;  %v8713_v17 = vmul.f32 0.0078125, %v8651_v9  ;;  %v8714_v37 = vmul.f32 0.0078125, %v8653_v22 }
0x11b0   : > { %v8745_v55 = vadd.f32 1e-05, %v8713_v17  ;;  %v8746_v18 = vadd.f32 1e-05, %v8714_v37  ;;  %v16821_v17 = vld [vmem:[%s17811_s15] ss:$0 sm:$0xff] }
0x11b1   : > { %v8655_v19 = vpop.xlane.xlu1 %8654  ;;  %v8657_v44 = vpop.xlane.xlu0 %8656 }
0x11b2   : > { %11959 = vrsqrt.f32 %v8745_v55  ;;  %v8715_v49 = vmul.f32 0.0078125, %v8655_v19  ;;  %v8716_v30 = vmul.f32 0.0078125, %v8657_v44 }
0x11b3   : > { %11961 = vrsqrt.f32 %v8746_v18 }
0x11b4   : > { %v8747_v13 = vadd.f32 1e-05, %v8715_v49  ;;  %v8748_v31 = vadd.f32 1e-05, %v8716_v30 }
0x11b5   : > { %v8659_v29 = vpop.xlane.xlu1 %8658  ;;  %v8661_v50 = vpop.xlane.xlu0 %8660 }
0x11b6   : > { %11963 = vrsqrt.f32 %v8747_v13  ;;  %v8717_v5 = vmul.f32 0.0078125, %v8659_v29  ;;  %v8718_v58 = vmul.f32 0.0078125, %v8661_v50 }
0x11b7   : > { %11965 = vrsqrt.f32 %v8748_v31 }
0x11b8   : > { %v8749_v40 = vadd.f32 1e-05, %v8717_v5  ;;  %v8750_v48 = vadd.f32 1e-05, %v8718_v58 }
0x11b9   : > { %v8663_v62 = vpop.xlane.xlu1 %8662  ;;  %v8665_v21 = vpop.xlane.xlu0 %8664 }
0x11ba   : > { %11967 = vrsqrt.f32 %v8749_v40  ;;  %v8719_v59 = vmul.f32 0.0078125, %v8663_v62  ;;  %v8720_v15 = vmul.f32 0.0078125, %v8665_v21 }
0x11bb   : > { %v11958_v56 = vpop.eup %11957  ;;  %11969 = vrsqrt.f32 %v8750_v48 }
0x11bc   : > { %v8808_v10 = vmul.f32 %v11958_v56, %v16652_v8  ;;  %v8751_v32 = vadd.f32 1e-05, %v8719_v59  ;;  %v8752_v45 = vadd.f32 1e-05, %v8720_v15 }
0x11bd   : > { %v8667_v34 = vpop.xlane.xlu1 %8666  ;;  %v8669_v46 = vpop.xlane.xlu0 %8668 }
0x11be   : > { %11971 = vrsqrt.f32 %v8751_v32  ;;  %v8721_v47 = vmul.f32 0.0078125, %v8667_v34  ;;  %v8722_v16 = vmul.f32 0.0078125, %v8669_v46  ;;  %v8846_v9 = vmul.f32 %v16814_v20, %v8808_v10 }
0x11bf   : > { %v11960_v36 = vpop.eup %11959  ;;  %11973 = vrsqrt.f32 %v8752_v45 }
0x11c0   : > { %v11962_v22 = vpop.eup %11961  ;;  %v8809_v37 = vmul.f32 %v11960_v36, %v16660_v27  ;;  %v8753_v8 = vadd.f32 1e-05, %v8721_v47  ;;  %v8754_v55 = vadd.f32 1e-05, %v8722_v16  ;;  %v8884_v29 = vadd.f32 %v16821_v17, %v8846_v9 }
0x11c1   : > { %v8810_v18 = vmul.f32 %v11962_v22, %v16655_v57  ;;  %v8671_v19 = vpop.xlane.xlu1 %8670  ;;  %v8673_v44 = vpop.xlane.xlu0 %8672 }
0x11c2   : > { %v8847_v49 = vmul.f32 %v16814_v20, %v8809_v37  ;;  %11975 = vrsqrt.f32 %v8753_v8  ;;  %v8723_v30 = vmul.f32 0.0078125, %v8671_v19  ;;  %v8724_v13 = vmul.f32 0.0078125, %v8673_v44 }
0x11c3   : > { %v11964_v31 = vpop.eup %11963  ;;  %v8848_v50 = vmul.f32 %v16814_v20, %v8810_v18  ;;  %11977 = vrsqrt.f32 %v8754_v55 }
0x11c4   : > { %v11966_v5 = vpop.eup %11965  ;;  %v8885_v27 = vadd.f32 %v16821_v17, %v8847_v49  ;;  %v8811_v58 = vmul.f32 %v11964_v31, %v16663_v35  ;;  %v8755_v57 = vadd.f32 1e-05, %v8723_v30  ;;  %v8756_v40 = vadd.f32 1e-05, %v8724_v13 }
0x11c5   : > { %v8812_v48 = vmul.f32 %v11966_v5, %v16670_v61  ;;  %v8675_v62 = vpop.xlane.xlu1 %8674  ;;  %v8677_v21 = vpop.xlane.xlu0 %8676  ;;  %v8886_v35 = vadd.f32 %v16821_v17, %v8848_v50 }
0x11c6   : > { %v9795_v59 = vpack.c.bf16 %v8885_v27, %v8884_v29  ;;  %v8849_v15 = vmul.f32 %v16814_v20, %v8811_v58  ;;  %11979 = vrsqrt.f32 %v8755_v57  ;;  %v8725_v56 = vmul.f32 0.0078125, %v8675_v62 }
0x11c7   : > { %v11968_v10 = vpop.eup %11967  ;;  %v8850_v32 = vmul.f32 %v16814_v20, %v8812_v48  ;;  %11981 = vrsqrt.f32 %v8756_v40  ;;  %v8726_v45 = vmul.f32 0.0078125, %v8677_v21 }
0x11c8   : > { %v11970_v34 = vpop.eup %11969  ;;  %9796 = vst [vmem:[%s12238_s30] sm:$0xff] %v9795_v59   ;;  %v8887_v46 = vadd.f32 %v16821_v17, %v8849_v15  ;;  %v8813_v61 = vmul.f32 %v11968_v10, %v16673_v23  ;;  %v8757_v47 = vadd.f32 1e-05, %v8725_v56 }
0x11c9   : > { %v8814_v16 = vmul.f32 %v11970_v34, %v16680_v51  ;;  %v8758_v36 = vadd.f32 1e-05, %v8726_v45  ;;  %v8679_v9 = vpop.xlane.xlu1 %8678  ;;  %v8681_v22 = vpop.xlane.xlu0 %8680  ;;  %v8888_v19 = vadd.f32 %v16821_v17, %v8850_v32 }
0x11ca   : > { %v9800_v37 = vpack.c.bf16 %v8887_v46, %v8886_v35  ;;  %v8851_v8 = vmul.f32 %v16814_v20, %v8813_v61  ;;  %11983 = vrsqrt.f32 %v8757_v47  ;;  %v8727_v55 = vmul.f32 0.0078125, %v8679_v9 }
0x11cb   : > { %v11972_v18 = vpop.eup %11971  ;;  %11985 = vrsqrt.f32 %v8758_v36  ;;  %v8728_v44 = vmul.f32 0.0078125, %v8681_v22  ;;  %v8852_v30 = vmul.f32 %v16814_v20, %v8814_v16 }
0x11cc   : > { %v11974_v49 = vpop.eup %11973  ;;  %9872 = vst [vmem:[%s12238_s30 + $0x8] sm:$0xff] %v9800_v37   ;;  %v8889_v23 = vadd.f32 %v16821_v17, %v8851_v8  ;;  %v8815_v51 = vmul.f32 %v11972_v18, %v16683_v4  ;;  %v8759_v13 = vadd.f32 1e-05, %v8727_v55 }
0x11cd   : > { %v8816_v31 = vmul.f32 %v11974_v49, %v16690_v38  ;;  %v8760_v29 = vadd.f32 1e-05, %v8728_v44  ;;  %v8683_v50 = vpop.xlane.xlu1 %8682  ;;  %v8685_v5 = vpop.xlane.xlu0 %8684  ;;  %v8890_v4 = vadd.f32 %v16821_v17, %v8852_v30 }
0x11ce   : > { %v9805_v27 = vpack.c.bf16 %v8889_v23, %v8888_v19  ;;  %v8853_v58 = vmul.f32 %v16814_v20, %v8815_v51  ;;  %11987 = vrsqrt.f32 %v8759_v13  ;;  %v8729_v57 = vmul.f32 0.0078125, %v8683_v50 }
0x11cf   : > { %v11976_v40 = vpop.eup %11975  ;;  %v8854_v48 = vmul.f32 %v16814_v20, %v8816_v31  ;;  %11989 = vrsqrt.f32 %v8760_v29  ;;  %v8730_v62 = vmul.f32 0.0078125, %v8685_v5 }
0x11d0   : > { %v11978_v21 = vpop.eup %11977  ;;  %9873 = vst [vmem:[%s12238_s30 + $0x10] sm:$0xff] %v9805_v27   ;;  %v8891_v59 = vadd.f32 %v16821_v17, %v8853_v58  ;;  %v8817_v38 = vmul.f32 %v11976_v40, %v16693_v41  ;;  %v8761_v15 = vadd.f32 1e-05, %v8729_v57 }
0x11d1   : > { %v8818_v56 = vmul.f32 %v11978_v21, %v16700_v3  ;;  %v8762_v10 = vadd.f32 1e-05, %v8730_v62  ;;  %v8687_v32 = vpop.xlane.xlu1 %8686  ;;  %v8689_v45 = vpop.xlane.xlu0 %8688  ;;  %v8892_v47 = vadd.f32 %v16821_v17, %v8854_v48 }
0x11d2   : > { %v9810_v34 = vpack.c.bf16 %v8891_v59, %v8890_v4  ;;  %v8855_v35 = vmul.f32 %v16814_v20, %v8817_v38  ;;  %11991 = vrsqrt.f32 %v8761_v15  ;;  %v8731_v46 = vmul.f32 0.0078125, %v8687_v32 }
0x11d3   : > { %v11980_v61 = vpop.eup %11979  ;;  %11993 = vrsqrt.f32 %v8762_v10  ;;  %v8732_v16 = vmul.f32 0.0078125, %v8689_v45  ;;  %v8856_v9 = vmul.f32 %v16814_v20, %v8818_v56 }
0x11d4   : > { %v11982_v36 = vpop.eup %11981  ;;  %9874 = vst [vmem:[%s12238_s30 + $0x18] sm:$0xff] %v9810_v34   ;;  %v8893_v41 = vadd.f32 %v16821_v17, %v8855_v35  ;;  %v8819_v3 = vmul.f32 %v11980_v61, %v16703_v54  ;;  %v8763_v22 = vadd.f32 1e-05, %v8731_v46 }
0x11d5   : > { %v8820_v37 = vmul.f32 %v11982_v36, %v16710_v60  ;;  %v8764_v8 = vadd.f32 1e-05, %v8732_v16  ;;  %v8691_v55 = vpop.xlane.xlu1 %8690  ;;  %v8693_v18 = vpop.xlane.xlu0 %8692  ;;  %v8894_v54 = vadd.f32 %v16821_v17, %v8856_v9 }
0x11d6   : > { %v9815_v19 = vpack.c.bf16 %v8893_v41, %v8892_v47  ;;  %v8857_v44 = vmul.f32 %v16814_v20, %v8819_v3  ;;  %11995 = vrsqrt.f32 %v8763_v22  ;;  %v8733_v49 = vmul.f32 0.0078125, %v8691_v55 }
0x11d7   : > { %v11984_v23 = vpop.eup %11983  ;;  %v8858_v30 = vmul.f32 %v16814_v20, %v8820_v37  ;;  %11997 = vrsqrt.f32 %v8764_v8  ;;  %v8734_v51 = vmul.f32 0.0078125, %v8693_v18 }
0x11d8   : > { %v11986_v13 = vpop.eup %11985  ;;  %9875 = vst [vmem:[%s12238_s30 + $0x20] sm:$0xff] %v9815_v19   ;;  %v8895_v31 = vadd.f32 %v16821_v17, %v8857_v44  ;;  %v8821_v60 = vmul.f32 %v11984_v23, %v16713_v7  ;;  %v8765_v29 = vadd.f32 1e-05, %v8733_v49 }
0x11d9   : > { %v8822_v50 = vmul.f32 %v11986_v13, %v16720_v24  ;;  %v8766_v5 = vadd.f32 1e-05, %v8734_v51  ;;  %v8695_v27 = vpop.xlane.xlu1 %8694  ;;  %v8697_v58 = vpop.xlane.xlu0 %8696  ;;  %v8896_v21 = vadd.f32 %v16821_v17, %v8858_v30 }
0x11da   : > { %v9820_v57 = vpack.c.bf16 %v8895_v31, %v8894_v54  ;;  %v8859_v40 = vmul.f32 %v16814_v20, %v8821_v60  ;;  %11999 = vrsqrt.f32 %v8765_v29  ;;  %v8735_v48 = vmul.f32 0.0078125, %v8695_v27 }
0x11db   : > { %v11988_v62 = vpop.eup %11987  ;;  %12001 = vrsqrt.f32 %v8766_v5  ;;  %v8736_v4 = vmul.f32 0.0078125, %v8697_v58  ;;  %v8860_v38 = vmul.f32 %v16814_v20, %v8822_v50 }
0x11dc   : > { %v11990_v59 = vpop.eup %11989  ;;  %9876 = vst [vmem:[%s12238_s30 + $0x28] sm:$0xff] %v9820_v57   ;;  %v8897_v7 = vadd.f32 %v16821_v17, %v8859_v40  ;;  %v8823_v24 = vmul.f32 %v11988_v62, %v16723_v39  ;;  %v8767_v15 = vadd.f32 1e-05, %v8735_v48 }
0x11dd   : > { %v8824_v56 = vmul.f32 %v11990_v59, %v16730_v14  ;;  %v8768_v10 = vadd.f32 1e-05, %v8736_v4  ;;  %v8699_v32 = vpop.xlane.xlu1 %8698  ;;  %v8701_v45 = vpop.xlane.xlu0 %8700  ;;  %v8898_v39 = vadd.f32 %v16821_v17, %v8860_v38 }
0x11de   : > { %v9825_v34 = vpack.c.bf16 %v8897_v7, %v8896_v21  ;;  %v8861_v35 = vmul.f32 %v16814_v20, %v8823_v24  ;;  %12003 = vrsqrt.f32 %v8767_v15  ;;  %v8737_v46 = vmul.f32 0.0078125, %v8699_v32 }
0x11df   : > { %v11992_v61 = vpop.eup %11991  ;;  %v8862_v47 = vmul.f32 %v16814_v20, %v8824_v56  ;;  %12005 = vrsqrt.f32 %v8768_v10  ;;  %v8738_v16 = vmul.f32 0.0078125, %v8701_v45 }
0x11e0   : > { %v11994_v36 = vpop.eup %11993  ;;  %9877 = vst [vmem:[%s12238_s30 + $0x30] sm:$0xff] %v9825_v34   ;;  %v8899_v41 = vadd.f32 %v16821_v17, %v8861_v35  ;;  %v8825_v14 = vmul.f32 %v11992_v61, %v16733_v26  ;;  %v8769_v9 = vadd.f32 1e-05, %v8737_v46 }
0x11e1   : > { %v8826_v3 = vmul.f32 %v11994_v36, %v16740_v63  ;;  %v8770_v22 = vadd.f32 1e-05, %v8738_v16  ;;  %v8703_v37 = vpop.xlane.xlu1 %8702  ;;  %v8705_v8 = vpop.xlane.xlu0 %8704  ;;  %v8900_v49 = vadd.f32 %v16821_v17, %v8862_v47 }
0x11e2   : > { %v9830_v55 = vpack.c.bf16 %v8899_v41, %v8898_v39  ;;  %v8863_v18 = vmul.f32 %v16814_v20, %v8825_v14  ;;  %12007 = vrsqrt.f32 %v8769_v9  ;;  %v8739_v19 = vmul.f32 0.0078125, %v8703_v37 }
0x11e3   : > { %v11996_v44 = vpop.eup %11995  ;;  %12009 = vrsqrt.f32 %v8770_v22  ;;  %v8740_v23 = vmul.f32 0.0078125, %v8705_v8  ;;  %v8864_v51 = vmul.f32 %v16814_v20, %v8826_v3 }
0x11e4   : > { %v11998_v30 = vpop.eup %11997  ;;  %9878 = vst [vmem:[%s12238_s30 + $0x38] sm:$0xff] %v9830_v55   ;;  %v8901_v26 = vadd.f32 %v16821_v17, %v8863_v18  ;;  %v8827_v63 = vmul.f32 %v11996_v44, %v16743_v6  ;;  %v8771_v13 = vadd.f32 1e-05, %v8739_v19 }
0x11e5   : > { %v8828_v54 = vmul.f32 %v11998_v30, %v16750_v2  ;;  %v8772_v31 = vadd.f32 1e-05, %v8740_v23  ;;  %v8707_v60 = vpop.xlane.xlu1 %8706  ;;  %v8709_v29 = vpop.xlane.xlu0 %8708  ;;  %v8902_v6 = vadd.f32 %v16821_v17, %v8864_v51 }
0x11e6   : > { %v9835_v50 = vpack.c.bf16 %v8901_v26, %v8900_v49  ;;  %v8865_v5 = vmul.f32 %v16814_v20, %v8827_v63  ;;  %12011 = vrsqrt.f32 %v8771_v13  ;;  %v8741_v27 = vmul.f32 0.0078125, %v8707_v60 }
0x11e7   : > { %v12000_v58 = vpop.eup %11999  ;;  %v8866_v57 = vmul.f32 %v16814_v20, %v8828_v54  ;;  %12013 = vrsqrt.f32 %v8772_v31  ;;  %v8742_v40 = vmul.f32 0.0078125, %v8709_v29 }
0x11e8   : > { %v12002_v48 = vpop.eup %12001  ;;  %9879 = vst [vmem:[%s12238_s30 + $0x40] sm:$0xff] %v9835_v50   ;;  %v8903_v2 = vadd.f32 %v16821_v17, %v8865_v5  ;;  %v8829_v62 = vmul.f32 %v12000_v58, %v16753_v0  ;;  %v8773_v21 = vadd.f32 1e-05, %v8741_v27 }
0x11e9   : > { %v8830_v4 = vmul.f32 %v12002_v48, %v16760_v52  ;;  %v8774_v59 = vadd.f32 1e-05, %v8742_v40  ;;  %v8711_v7 = vpop.xlane.xlu1 %8710  ;;  %v8904_v10 = vadd.f32 %v16821_v17, %v8866_v57 }
0x11ea   : > { %v9840_v38 = vpack.c.bf16 %v8903_v2, %v8902_v6  ;;  %v8867_v24 = vmul.f32 %v16814_v20, %v8829_v62  ;;  %12015 = vrsqrt.f32 %v8773_v21  ;;  %v8743_v15 = vmul.f32 0.0078125, %v8711_v7 }
0x11eb   : > { %v12004_v56 = vpop.eup %12003  ;;  %12017 = vrsqrt.f32 %v8774_v59  ;;  %v8868_v0 = vmul.f32 %v16814_v20, %v8830_v4 }
0x11ec   : > { %v12006_v32 = vpop.eup %12005  ;;  %9880 = vst [vmem:[%s12238_s30 + $0x48] sm:$0xff] %v9840_v38   ;;  %v8905_v45 = vadd.f32 %v16821_v17, %v8867_v24  ;;  %v8831_v52 = vmul.f32 %v12004_v56, %v16763_v11  ;;  %v8775_v34 = vadd.f32 1e-05, %v8743_v15 }
0x11ed   : > { %v8832_v35 = vmul.f32 %v12006_v32, %v16770_v42  ;;  %v8906_v36 = vadd.f32 %v16821_v17, %v8868_v0 }
0x11ee   : > { %v9845_v46 = vpack.c.bf16 %v8905_v45, %v8904_v10  ;;  %v8869_v61 = vmul.f32 %v16814_v20, %v8831_v52  ;;  %12019 = vrsqrt.f32 %v8775_v34 }
0x11ef   : > { %v12008_v47 = vpop.eup %12007  ;;  %v8870_v41 = vmul.f32 %v16814_v20, %v8832_v35 }
0x11f0   : > { %v12010_v16 = vpop.eup %12009  ;;  %9881 = vst [vmem:[%s12238_s30 + $0x50] sm:$0xff] %v9845_v46   ;;  %v8907_v39 = vadd.f32 %v16821_v17, %v8869_v61  ;;  %v8833_v14 = vmul.f32 %v12008_v47, %v16773_v12 }
0x11f1   : > { %v8834_v11 = vmul.f32 %v12010_v16, %v16780_v53  ;;  %v8908_v37 = vadd.f32 %v16821_v17, %v8870_v41 }
0x11f2   : > { %v9850_v42 = vpack.c.bf16 %v8907_v39, %v8906_v36  ;;  %v8871_v9 = vmul.f32 %v16814_v20, %v8833_v14 }
0x11f3   : > { %v12012_v3 = vpop.eup %12011  ;;  %v8872_v55 = vmul.f32 %v16814_v20, %v8834_v11 }
0x11f4   : > { %v12014_v22 = vpop.eup %12013  ;;  %9882 = vst [vmem:[%s12238_s30 + $0x58] sm:$0xff] %v9850_v42   ;;  %v8909_v8 = vadd.f32 %v16821_v17, %v8871_v9  ;;  %v8835_v18 = vmul.f32 %v12012_v3, %v16783_v43 }
0x11f5   : > { %v8836_v12 = vmul.f32 %v12014_v22, %v16790_v28  ;;  %v8910_v23 = vadd.f32 %v16821_v17, %v8872_v55 }
0x11f6   : > { %v9855_v19 = vpack.c.bf16 %v8909_v8, %v8908_v37  ;;  %v8873_v53 = vmul.f32 %v16814_v20, %v8835_v18 }
0x11f7   : > { %v12016_v44 = vpop.eup %12015  ;;  %v8874_v26 = vmul.f32 %v16814_v20, %v8836_v12 }
0x11f8   : > { %v12018_v49 = vpop.eup %12017  ;;  %9883 = vst [vmem:[%s12238_s30 + $0x60] sm:$0xff] %v9855_v19   ;;  %v8911_v30 = vadd.f32 %v16821_v17, %v8873_v53  ;;  %v8837_v51 = vmul.f32 %v12016_v44, %v16793_v25 }
0x11f9   : > { %v8838_v43 = vmul.f32 %v12018_v49, %v16800_v1  ;;  %v8912_v54 = vadd.f32 %v16821_v17, %v8874_v26 }
0x11fa   : > { %v9860_v63 = vpack.c.bf16 %v8911_v30, %v8910_v23  ;;  %v8875_v28 = vmul.f32 %v16814_v20, %v8837_v51 }
0x11fb   : > { %v12020_v13 = vpop.eup %12019  ;;  %v8876_v60 = vmul.f32 %v16814_v20, %v8838_v43 }
0x11fc   : > { %9884 = vst [vmem:[%s12238_s30 + $0x68] sm:$0xff] %v9860_v63   ;;  %v8913_v31 = vadd.f32 %v16821_v17, %v8875_v28  ;;  %v8839_v29 = vmul.f32 %v12020_v13, %v16803_v33 }
0x11fd   : > { %v8914_v25 = vadd.f32 %v16821_v17, %v8876_v60 }
0x11fe   : > { %v9865_v50 = vpack.c.bf16 %v8913_v31, %v8912_v54  ;;  %v8877_v5 = vmul.f32 %v16814_v20, %v8839_v29 }
0x1200   : > { %9885 = vst [vmem:[%s12238_s30 + $0x70] sm:$0xff] %v9865_v50   ;;  %v8915_v1 = vadd.f32 %v16821_v17, %v8877_v5 }
0x1202   : > { %v9870_v27 = vpack.c.bf16 %v8915_v1, %v8914_v25 }
0x1204   : > { %9886 = vst [vmem:[%s12238_s30 + $0x78] sm:$0xff] %v9870_v27  }
0x1205 PF: > { %s17812_s22 = sld [smem:[#allocation6_spill]] }
0x1206   : > { %s17813_s29 = sld [smem:[#allocation4_spill]] }
0x1207   : > { %s17814_s30 = sld [smem:[#allocation5_spill]] }
0x1208   : > { %s17815_s15 = sld [smem:[#allocation7_spill]] }
0x1209   : > { %s17816_s16 = sld [smem:[#allocation8_spill]] }
0x120b   : > { %s24_s17 = sadd.s32 1, %s17812_s22  }
0x120c   : > { %p21_p9 = scmp.ge.s32.totalorder %s24_s17, 6  }
0x120e   :  { %23 = sbr.rel (!%p21_p9) target bundleno = 7 (0x7), region = 147 }

</bundles_post_ra>
